<compile_context>
chip_gen: v5e
topology: v5e:2x2
jax: 0.10.0
libtpu: 0.0.40
codegen_flags: <defaults>
</compile_context>

<pallas_src>
import math

import jax
import jax.numpy as jnp
from jax.experimental import pallas as pl
from jax.experimental.pallas import tpu as pltpu

IN_DIM = 784
HID = 400
LAT = 2                      # lat_space_size

XW = LAT + IN_DIM            # packed input width: [eps(2) | image(784)] = 786
HID_PAD = 512                # 400 -> 4*128
HEAD_PAD = 128               # packed [mu(2) | logvar(2) | zeros]
LAT_PAD = 8                  # fc4 weight rows, sublane aligned


def _round_up(x, m):
    return (x + m - 1) // m * m


def vae_kernel(x_ref,
               w1_ref, b1_ref, w2_ref, b2_ref,
               wh_ref, bh_ref, w4_ref, b4_ref, w5_ref, b5_ref,
               recon_ref, head_ref):
    x = x_ref[...]                                     # (TB, 786) bf16
    eps = x[:, 0:LAT].astype(jnp.float32)              # reparam noise, lanes 0:2

    # ---- encode: bf16 on the MXU, f32 accumulate, f32 elementwise ----
    h1 = jnp.maximum(
        jnp.dot(x, w1_ref[...], preferred_element_type=jnp.float32)
        + b1_ref[...], 0.0)
    h2 = jnp.maximum(
        jnp.dot(h1.astype(jnp.bfloat16), w2_ref[...],
                preferred_element_type=jnp.float32) + b2_ref[...], 0.0)

    # fused latent head: lanes [0:LAT]=mu, [LAT:2*LAT]=logvar, rest exactly 0
    head = jnp.dot(h2.astype(jnp.bfloat16), wh_ref[...],
                   preferred_element_type=jnp.float32) + bh_ref[...]
    head_ref[...] = head                               # lane-dense f32 store

    # ---- reparametrize: z = eps * exp(0.5 * logvar) + mu ----
    mu = head[:, 0:LAT]
    logvar = head[:, LAT:2 * LAT]
    z = eps * jnp.exp(0.5 * logvar) + mu               # (TB, LAT) f32

    # ---- decode ----
    # fc4 has K=2: two broadcast FMAs on the VPU, keep the MXU for fc5.
    h3 = jnp.maximum(
        z[:, 0:1] * w4_ref[0:1, :] + z[:, 1:2] * w4_ref[1:2, :] + b4_ref[...],
        0.0)
    logits = jnp.dot(h3.astype(jnp.bfloat16), w5_ref[...],
                     preferred_element_type=jnp.float32) + b5_ref[...]
    # sigmoid(x) == 0.5*(tanh(0.5*x)+1): single EUP transcendental, f32 math
    # (v5e has no bf16 EUP), bf16 lane-dense store (half the writeback bytes).
    recon_ref[...] = (0.5 * (jnp.tanh(0.5 * logits) + 1.0)
                      ).astype(recon_ref.dtype)


def _pick_batch_tile(B):
    if B > 512:
        return 512          # grid >= 2 automatically (B_pad >= 1024)
    if B > 256:
        return 256          # grid == 2 so both v7x TensorCores get work
    return _round_up(B, 8)  # single tile for small batches


def vae_forward(x_nchw, eps, padded_params):
    """x_nchw: (B, 1, 28, 28) float32, eps: (B, LAT) float32 ~ N(0,1)."""
    B = x_nchw.shape[0]
    TB = _pick_batch_tile(B)
    B_pad = _round_up(B, TB)
    grid = (B_pad // TB,)

    # Packed bf16 input: lanes [0:2) = eps, lanes [2:786) = flattened image.
    x_flat = x_nchw.reshape(B, IN_DIM)                 # == x.view(-1, 784)
    x_p = jnp.concatenate([eps.astype(jnp.float32), x_flat], axis=1
                          ).astype(jnp.bfloat16)
    if B_pad != B:
        x_p = jnp.pad(x_p, ((0, B_pad - B), (0, 0)))

    operands = (x_p,) + tuple(padded_params)

    out_shape = (
        jax.ShapeDtypeStruct((B_pad, IN_DIM), jnp.bfloat16),   # reconstruction
        jax.ShapeDtypeStruct((B_pad, HEAD_PAD), jnp.float32),  # [mu | logvar | 0]
    )
    flops = 2 * B_pad * (XW * HID_PAD + HID_PAD * HID_PAD
                         + HID_PAD * HEAD_PAD + LAT * HID_PAD
                         + HID_PAD * IN_DIM)
    transcendentals = B_pad * (LAT + IN_DIM)           # exp + tanh
    bytes_accessed = (
        sum(int(a.size) * a.dtype.itemsize for a in operands)
        + sum(math.prod(s.shape) * jnp.dtype(s.dtype).itemsize
              for s in out_shape))

    def call(single_buffer_weights):
        def batch_spec(width):
            return pl.BlockSpec((TB, width), lambda i: (i, 0))

        def resident_spec(shape):
            # Same block every grid step -> stays VMEM-resident; with a
            # constant index_map one buffer is enough (saves ~2.3 MiB VMEM).
            if single_buffer_weights:
                return pl.BlockSpec(shape, lambda i: (0, 0),
                                    pipeline_mode=pl.Buffered(1))
            return pl.BlockSpec(shape, lambda i: (0, 0))

        in_specs = [
            batch_spec(XW),                                                  # x
            resident_spec((XW, HID_PAD)), resident_spec((1, HID_PAD)),       # fc1
            resident_spec((HID_PAD, HID_PAD)), resident_spec((1, HID_PAD)),  # fc2
            resident_spec((HID_PAD, HEAD_PAD)), resident_spec((1, HEAD_PAD)),# fc31|fc32
            resident_spec((LAT_PAD, HID_PAD)), resident_spec((1, HID_PAD)),  # fc4
            resident_spec((HID_PAD, IN_DIM)), resident_spec((1, IN_DIM)),    # fc5
        ]
        out_specs = (batch_spec(IN_DIM), batch_spec(HEAD_PAD))
        return pl.pallas_call(
            vae_kernel,
            grid=grid,
            in_specs=in_specs,
            out_specs=out_specs,
            out_shape=out_shape,
            compiler_params=pltpu.CompilerParams(
                dimension_semantics=("parallel",),
                vmem_limit_bytes=32 * 1024 * 1024),
            cost_estimate=pl.CostEstimate(
                flops=flops,
                transcendentals=transcendentals,
                bytes_accessed=bytes_accessed),
        )(*operands)

    try:
        recon_p, head_p = call(single_buffer_weights=hasattr(pl, "Buffered"))
    except Exception:
        # Fallback: default (double) buffering of the resident weights if this
        # JAX build rejects pipeline_mode=pl.Buffered(1).
        recon_p, head_p = call(single_buffer_weights=False)

    recon = recon_p[:B, :]                 # bf16, already at logical width 784
    mu = head_p[:B, 0:LAT]
    logvar = head_p[:B, LAT:2 * LAT]
    return recon, mu, logvar


# ----------------------------- parameters ----------------------------------

def init_linear(key, fan_in, fan_out):
    """PyTorch-style uniform init; weight stored as (in, out)."""
    kw, kb = jax.random.split(key)
    bound = 1.0 / float(fan_in) ** 0.5
    w = jax.random.uniform(kw, (fan_in, fan_out), jnp.float32, -bound, bound)
    b = jax.random.uniform(kb, (fan_out,), jnp.float32, -bound, bound)
    return w, b


def make_params(key):
    keys = jax.random.split(key, 6)
    w1, b1 = init_linear(keys[0], IN_DIM, HID)     # fc1
    w2, b2 = init_linear(keys[1], HID, HID)        # fc2
    w31, b31 = init_linear(keys[2], HID, LAT)      # fc31 (mu)
    w32, b32 = init_linear(keys[3], HID, LAT)      # fc32 (logvar)
    w4, b4 = init_linear(keys[4], LAT, HID)        # fc4
    w5, b5 = init_linear(keys[5], HID, IN_DIM)     # fc5
    return (w1, b1, w2, b2, w31, b31, w32, b32, w4, b4, w5, b5)


def pad_params(params):
    """Zero-pad to kernel layout; MXU-path weights cast to bf16."""
    (w1, b1, w2, b2, w31, b31, w32, b32, w4, b4, w5, b5) = params

    def pad_w_bf16(w, rows, cols, row_off=0):
        out = jnp.zeros((rows, cols), jnp.bfloat16)
        return out.at[row_off:row_off + w.shape[0], :w.shape[1]].set(
            w.astype(jnp.bfloat16))

    def pad_b_f32(b, cols):
        return jnp.zeros((1, cols), jnp.float32).at[0, :b.shape[0]].set(b)

    # fc1: rows 0:LAT stay zero — those input lanes carry eps, not pixels.
    w1p = pad_w_bf16(w1, XW, HID_PAD, row_off=LAT)
    b1p = pad_b_f32(b1, HID_PAD)
    w2p = pad_w_bf16(w2, HID_PAD, HID_PAD)
    b2p = pad_b_f32(b2, HID_PAD)

    # fused mu|logvar head -> one lane-dense (HID_PAD, 128) weight
    whp = jnp.zeros((HID_PAD, HEAD_PAD), jnp.bfloat16)
    whp = whp.at[:HID, 0:LAT].set(w31.astype(jnp.bfloat16))
    whp = whp.at[:HID, LAT:2 * LAT].set(w32.astype(jnp.bfloat16))
    bhp = jnp.zeros((1, HEAD_PAD), jnp.float32)
    bhp = bhp.at[0, 0:LAT].set(b31).at[0, LAT:2 * LAT].set(b32)

    # fc4 stays f32: it is used on the VPU (K=2 outer product), not the MXU
    w4p = jnp.zeros((LAT_PAD, HID_PAD), jnp.float32).at[:LAT, :HID].set(w4)
    b4p = pad_b_f32(b4, HID_PAD)

    # fc5: output lanes kept at the logical width 784 (no padded lanes to
    # sigmoid / store / slice away afterwards).
    w5p = pad_w_bf16(w5, HID_PAD, IN_DIM)
    b5p = pad_b_f32(b5, IN_DIM)
    return (w1p, b1p, w2p, b2p, whp, bhp, w4p, b4p, w5p, b5p)


# ------------------------- pure-JAX reference ------------------------------

def vae_reference(x_nchw, eps, params):
    """Same math as the kernel: bf16 inputs at each dot, f32 accumulation;
    eps is bf16-rounded because it ships packed inside the bf16 input."""
    (w1, b1, w2, b2, w31, b31, w32, b32, w4, b4, w5, b5) = params
    x = x_nchw.reshape(x_nchw.shape[0], IN_DIM)
    eps = eps.astype(jnp.bfloat16).astype(jnp.float32)

    def mm(a, w):
        return jnp.dot(a.astype(jnp.bfloat16), w.astype(jnp.bfloat16),
                       preferred_element_type=jnp.float32)

    h1 = jax.nn.relu(mm(x, w1) + b1)
    h2 = jax.nn.relu(mm(h1, w2) + b2)
    mu = mm(h2, w31) + b31
    logvar = mm(h2, w32) + b32
    z = eps * jnp.exp(0.5 * logvar) + mu
    h3 = jax.nn.relu(z[:, 0:1] * w4[0:1, :] + z[:, 1:2] * w4[1:2, :] + b4)
    recon = jax.nn.sigmoid(mm(h3, w5) + b5)
    return recon, mu, logvar


if __name__ == "__main__":
    key = jax.random.PRNGKey(0)
    k_x, k_eps, k_p = jax.random.split(key, 3)

    B = 8
    x = jax.random.uniform(k_x, (B, 1, 28, 28), jnp.float32)   # MNIST-like NCHW
    # TODO(synk): eps ~ N(0,1) is drawn inside forward() in the PyTorch module;
    # here it is an explicit input so the kernel stays deterministic/testable.
    eps = jax.random.normal(k_eps, (B, LAT), jnp.float32)

    params = make_params(k_p)          # logical (PyTorch-shaped) params
    padded = pad_params(params)        # kernel-layout params

    recon, mu, logvar = vae_forward(x, eps, padded)
    jax.block_until_ready((recon, mu, logvar))

    r_ref, mu_ref, lv_ref = vae_reference(x, eps, params)
    assert recon.shape == (B, IN_DIM) and recon.dtype == jnp.bfloat16
    assert mu.shape == (B, LAT) and logvar.shape == (B, LAT)
    assert jnp.allclose(mu, mu_ref, atol=2e-3, rtol=2e-3)
    assert jnp.allclose(logvar, lv_ref, atol=2e-3, rtol=2e-3)
    assert jnp.allclose(recon.astype(jnp.float32), r_ref, atol=2e-3, rtol=2e-3)

    print("KERNEL_OK")
</pallas_src>

<mosaic_0001>
module attributes {stable_mosaic.version = 11 : i64} {
  func.func @vae_kernel(%arg0: i32, %arg1: memref<8x786xbf16, #tpu.memory_space<vmem>>, %arg2: memref<786x512xbf16, #tpu.memory_space<vmem>>, %arg3: memref<1x512xf32, #tpu.memory_space<vmem>>, %arg4: memref<512x512xbf16, #tpu.memory_space<vmem>>, %arg5: memref<1x512xf32, #tpu.memory_space<vmem>>, %arg6: memref<512x128xbf16, #tpu.memory_space<vmem>>, %arg7: memref<1x128xf32, #tpu.memory_space<vmem>>, %arg8: memref<8x512xf32, #tpu.memory_space<vmem>>, %arg9: memref<1x512xf32, #tpu.memory_space<vmem>>, %arg10: memref<512x784xbf16, #tpu.memory_space<vmem>>, %arg11: memref<1x784xf32, #tpu.memory_space<vmem>>, %arg12: memref<8x784xbf16, #tpu.memory_space<vmem>>, %arg13: memref<8x128xf32, #tpu.memory_space<vmem>>) attributes {dimension_semantics = [#tpu.dimension_semantics<parallel>], iteration_bounds = array<i64: 1>, scalar_prefetch = 0 : i64, scratch_operands = 0 : i64, tpu.core_type = #tpu.core_type<tc>, window_params = [{transform_indices = @transform_0, window_bounds = array<i64: 8, 786>}, {pipeline_mode = #tpu.pipeline_mode<synchronous>, transform_indices = @transform_1, window_bounds = array<i64: 786, 512>}, {pipeline_mode = #tpu.pipeline_mode<synchronous>, transform_indices = @transform_2, window_bounds = array<i64: 1, 512>}, {pipeline_mode = #tpu.pipeline_mode<synchronous>, transform_indices = @transform_3, window_bounds = array<i64: 512, 512>}, {pipeline_mode = #tpu.pipeline_mode<synchronous>, transform_indices = @transform_4, window_bounds = array<i64: 1, 512>}, {pipeline_mode = #tpu.pipeline_mode<synchronous>, transform_indices = @transform_5, window_bounds = array<i64: 512, 128>}, {pipeline_mode = #tpu.pipeline_mode<synchronous>, transform_indices = @transform_6, window_bounds = array<i64: 1, 128>}, {pipeline_mode = #tpu.pipeline_mode<synchronous>, transform_indices = @transform_7, window_bounds = array<i64: 8, 512>}, {pipeline_mode = #tpu.pipeline_mode<synchronous>, transform_indices = @transform_8, window_bounds = array<i64: 1, 512>}, {pipeline_mode = #tpu.pipeline_mode<synchronous>, transform_indices = @transform_9, window_bounds = array<i64: 512, 784>}, {pipeline_mode = #tpu.pipeline_mode<synchronous>, transform_indices = @transform_10, window_bounds = array<i64: 1, 784>}, {transform_indices = @transform_11, window_bounds = array<i64: 8, 784>}, {transform_indices = @transform_12, window_bounds = array<i64: 8, 128>}]} {
    %c0 = arith.constant 0 : index
    %c0_0 = arith.constant 0 : index
    %0 = vector.load %arg1[%c0, %c0_0] : memref<8x786xbf16, #tpu.memory_space<vmem>>, vector<8x786xbf16>
    %1 = vector.extract_strided_slice %0 {offsets = [0, 0], sizes = [8, 2], strides = [1, 1]} : vector<8x786xbf16> to vector<8x2xbf16>
    %2 = arith.extf %1 : vector<8x2xbf16> to vector<8x2xf32>
    %c0_1 = arith.constant 0 : index
    %c0_2 = arith.constant 0 : index
    %3 = vector.load %arg2[%c0_1, %c0_2] : memref<786x512xbf16, #tpu.memory_space<vmem>>, vector<786x512xbf16>
    %cst = arith.constant dense<0.000000e+00> : vector<8x512xf32>
    %4 = tpu.matmul %0, %3, %cst {dimension_numbers = #tpu.dot_dimension_numbers<[1], [0], [0], [1], [0, 0, 1, 1], [], []>} : vector<8x786xbf16>, vector<786x512xbf16>, vector<8x512xf32> -> vector<8x512xf32>
    %c0_3 = arith.constant 0 : index
    %c0_4 = arith.constant 0 : index
    %5 = vector.load %arg3[%c0_3, %c0_4] : memref<1x512xf32, #tpu.memory_space<vmem>>, vector<1x512xf32>
    %6 = vector.broadcast %5 : vector<1x512xf32> to vector<8x512xf32>
    %7 = arith.addf %4, %6 : vector<8x512xf32>
    %cst_5 = arith.constant 0.000000e+00 : f32
    %8 = vector.broadcast %cst_5 : f32 to vector<8x512xf32>
    %9 = arith.maximumf %7, %8 : vector<8x512xf32>
    %10 = arith.truncf %9 : vector<8x512xf32> to vector<8x512xbf16>
    %c0_6 = arith.constant 0 : index
    %c0_7 = arith.constant 0 : index
    %11 = vector.load %arg4[%c0_6, %c0_7] : memref<512x512xbf16, #tpu.memory_space<vmem>>, vector<512x512xbf16>
    %cst_8 = arith.constant dense<0.000000e+00> : vector<8x512xf32>
    %12 = tpu.matmul %10, %11, %cst_8 {dimension_numbers = #tpu.dot_dimension_numbers<[1], [0], [0], [1], [0, 0, 1, 1], [], []>} : vector<8x512xbf16>, vector<512x512xbf16>, vector<8x512xf32> -> vector<8x512xf32>
    %c0_9 = arith.constant 0 : index
    %c0_10 = arith.constant 0 : index
    %13 = vector.load %arg5[%c0_9, %c0_10] : memref<1x512xf32, #tpu.memory_space<vmem>>, vector<1x512xf32>
    %14 = vector.broadcast %13 : vector<1x512xf32> to vector<8x512xf32>
    %15 = arith.addf %12, %14 : vector<8x512xf32>
    %cst_11 = arith.constant 0.000000e+00 : f32
    %16 = vector.broadcast %cst_11 : f32 to vector<8x512xf32>
    %17 = arith.maximumf %15, %16 : vector<8x512xf32>
    %18 = arith.truncf %17 : vector<8x512xf32> to vector<8x512xbf16>
    %c0_12 = arith.constant 0 : index
    %c0_13 = arith.constant 0 : index
    %19 = vector.load %arg6[%c0_12, %c0_13] : memref<512x128xbf16, #tpu.memory_space<vmem>>, vector<512x128xbf16>
    %cst_14 = arith.constant dense<0.000000e+00> : vector<8x128xf32>
    %20 = tpu.matmul %18, %19, %cst_14 {dimension_numbers = #tpu.dot_dimension_numbers<[1], [0], [0], [1], [0, 0, 1, 1], [], []>} : vector<8x512xbf16>, vector<512x128xbf16>, vector<8x128xf32> -> vector<8x128xf32>
    %c0_15 = arith.constant 0 : index
    %c0_16 = arith.constant 0 : index
    %21 = vector.load %arg7[%c0_15, %c0_16] : memref<1x128xf32, #tpu.memory_space<vmem>>, vector<1x128xf32>
    %22 = vector.broadcast %21 : vector<1x128xf32> to vector<8x128xf32>
    %23 = arith.addf %20, %22 : vector<8x128xf32>
    %c0_17 = arith.constant 0 : index
    %c0_18 = arith.constant 0 : index
    %24 = vector.load %arg13[%c0_17, %c0_18] : memref<8x128xf32, #tpu.memory_space<vmem>>, vector<8x128xf32>
    tpu.vector_store %arg13[%c0_17, %c0_18], %23 {strides = array<i32>} : memref<8x128xf32, #tpu.memory_space<vmem>>, vector<8x128xf32>,
    %25 = vector.extract_strided_slice %23 {offsets = [0, 0], sizes = [8, 2], strides = [1, 1]} : vector<8x128xf32> to vector<8x2xf32>
    %26 = vector.extract_strided_slice %23 {offsets = [0, 2], sizes = [8, 2], strides = [1, 1]} : vector<8x128xf32> to vector<8x2xf32>
    %cst_19 = arith.constant 5.000000e-01 : f32
    %27 = vector.broadcast %cst_19 : f32 to vector<8x2xf32>
    %28 = arith.mulf %27, %26 : vector<8x2xf32>
    %29 = math.exp %28 : vector<8x2xf32>
    %30 = arith.mulf %2, %29 : vector<8x2xf32>
    %31 = arith.addf %30, %25 : vector<8x2xf32>
    %32 = vector.extract_strided_slice %31 {offsets = [0, 0], sizes = [8, 1], strides = [1, 1]} : vector<8x2xf32> to vector<8x1xf32>
    %c0_20 = arith.constant 0 : index
    %c0_21 = arith.constant 0 : index
    %33 = vector.load %arg8[%c0_20, %c0_21] : memref<8x512xf32, #tpu.memory_space<vmem>>, vector<1x512xf32>
    %34 = vector.broadcast %32 : vector<8x1xf32> to vector<8x512xf32>
    %35 = vector.broadcast %33 : vector<1x512xf32> to vector<8x512xf32>
    %36 = arith.mulf %34, %35 : vector<8x512xf32>
    %37 = vector.extract_strided_slice %31 {offsets = [0, 1], sizes = [8, 1], strides = [1, 1]} : vector<8x2xf32> to vector<8x1xf32>
    %c1 = arith.constant 1 : index
    %c0_22 = arith.constant 0 : index
    %38 = vector.load %arg8[%c1, %c0_22] : memref<8x512xf32, #tpu.memory_space<vmem>>, vector<1x512xf32>
    %39 = vector.broadcast %37 : vector<8x1xf32> to vector<8x512xf32>
    %40 = vector.broadcast %38 : vector<1x512xf32> to vector<8x512xf32>
    %41 = arith.mulf %39, %40 : vector<8x512xf32>
    %42 = arith.addf %36, %41 : vector<8x512xf32>
    %c0_23 = arith.constant 0 : index
    %c0_24 = arith.constant 0 : index
    %43 = vector.load %arg9[%c0_23, %c0_24] : memref<1x512xf32, #tpu.memory_space<vmem>>, vector<1x512xf32>
    %44 = vector.broadcast %43 : vector<1x512xf32> to vector<8x512xf32>
    %45 = arith.addf %42, %44 : vector<8x512xf32>
    %cst_25 = arith.constant 0.000000e+00 : f32
    %46 = vector.broadcast %cst_25 : f32 to vector<8x512xf32>
    %47 = arith.maximumf %45, %46 : vector<8x512xf32>
    %48 = arith.truncf %47 : vector<8x512xf32> to vector<8x512xbf16>
    %c0_26 = arith.constant 0 : index
    %c0_27 = arith.constant 0 : index
    %49 = vector.load %arg10[%c0_26, %c0_27] : memref<512x784xbf16, #tpu.memory_space<vmem>>, vector<512x784xbf16>
    %cst_28 = arith.constant dense<0.000000e+00> : vector<8x784xf32>
    %50 = tpu.matmul %48, %49, %cst_28 {dimension_numbers = #tpu.dot_dimension_numbers<[1], [0], [0], [1], [0, 0, 1, 1], [], []>} : vector<8x512xbf16>, vector<512x784xbf16>, vector<8x784xf32> -> vector<8x784xf32>
    %c0_29 = arith.constant 0 : index
    %c0_30 = arith.constant 0 : index
    %51 = vector.load %arg11[%c0_29, %c0_30] : memref<1x784xf32, #tpu.memory_space<vmem>>, vector<1x784xf32>
    %52 = vector.broadcast %51 : vector<1x784xf32> to vector<8x784xf32>
    %53 = arith.addf %50, %52 : vector<8x784xf32>
    %cst_31 = arith.constant 5.000000e-01 : f32
    %54 = vector.broadcast %cst_31 : f32 to vector<8x784xf32>
    %55 = arith.mulf %54, %53 : vector<8x784xf32>
    %56 = math.tanh %55 : vector<8x784xf32>
    %cst_32 = arith.constant 1.000000e+00 : f32
    %57 = vector.broadcast %cst_32 : f32 to vector<8x784xf32>
    %58 = arith.addf %56, %57 : vector<8x784xf32>
    %cst_33 = arith.constant 5.000000e-01 : f32
    %59 = vector.broadcast %cst_33 : f32 to vector<8x784xf32>
    %60 = arith.mulf %59, %58 : vector<8x784xf32>
    %61 = arith.truncf %60 : vector<8x784xf32> to vector<8x784xbf16>
    %c0_34 = arith.constant 0 : index
    %c0_35 = arith.constant 0 : index
    %62 = vector.load %arg12[%c0_34, %c0_35] : memref<8x784xbf16, #tpu.memory_space<vmem>>, vector<8x784xbf16>
    tpu.vector_store %arg12[%c0_34, %c0_35], %61 {strides = array<i32>} : memref<8x784xbf16, #tpu.memory_space<vmem>>, vector<8x784xbf16>,
    return
  }
  func.func @transform_0(%arg0: i32) -> (i32, i32) {
    %c0_i32 = arith.constant 0 : i32
    %c0_i32_0 = arith.constant 0 : i32
    return %arg0, %c0_i32 : i32, i32
  }
  func.func @transform_1(%arg0: i32) -> (i32, i32) {
    %c0_i32 = arith.constant 0 : i32
    %c0_i32_0 = arith.constant 0 : i32
    %c0_i32_1 = arith.constant 0 : i32
    return %c0_i32, %c0_i32_0 : i32, i32
  }
  func.func @transform_2(%arg0: i32) -> (i32, i32) {
    %c0_i32 = arith.constant 0 : i32
    %c0_i32_0 = arith.constant 0 : i32
    %c0_i32_1 = arith.constant 0 : i32
    return %c0_i32, %c0_i32_0 : i32, i32
  }
  func.func @transform_3(%arg0: i32) -> (i32, i32) {
    %c0_i32 = arith.constant 0 : i32
    %c0_i32_0 = arith.constant 0 : i32
    %c0_i32_1 = arith.constant 0 : i32
    return %c0_i32, %c0_i32_0 : i32, i32
  }
  func.func @transform_4(%arg0: i32) -> (i32, i32) {
    %c0_i32 = arith.constant 0 : i32
    %c0_i32_0 = arith.constant 0 : i32
    %c0_i32_1 = arith.constant 0 : i32
    return %c0_i32, %c0_i32_0 : i32, i32
  }
  func.func @transform_5(%arg0: i32) -> (i32, i32) {
    %c0_i32 = arith.constant 0 : i32
    %c0_i32_0 = arith.constant 0 : i32
    %c0_i32_1 = arith.constant 0 : i32
    return %c0_i32, %c0_i32_0 : i32, i32
  }
  func.func @transform_6(%arg0: i32) -> (i32, i32) {
    %c0_i32 = arith.constant 0 : i32
    %c0_i32_0 = arith.constant 0 : i32
    %c0_i32_1 = arith.constant 0 : i32
    return %c0_i32, %c0_i32_0 : i32, i32
  }
  func.func @transform_7(%arg0: i32) -> (i32, i32) {
    %c0_i32 = arith.constant 0 : i32
    %c0_i32_0 = arith.constant 0 : i32
    %c0_i32_1 = arith.constant 0 : i32
    return %c0_i32, %c0_i32_0 : i32, i32
  }
  func.func @transform_8(%arg0: i32) -> (i32, i32) {
    %c0_i32 = arith.constant 0 : i32
    %c0_i32_0 = arith.constant 0 : i32
    %c0_i32_1 = arith.constant 0 : i32
    return %c0_i32, %c0_i32_0 : i32, i32
  }
  func.func @transform_9(%arg0: i32) -> (i32, i32) {
    %c0_i32 = arith.constant 0 : i32
    %c0_i32_0 = arith.constant 0 : i32
    %c0_i32_1 = arith.constant 0 : i32
    return %c0_i32, %c0_i32_0 : i32, i32
  }
  func.func @transform_10(%arg0: i32) -> (i32, i32) {
    %c0_i32 = arith.constant 0 : i32
    %c0_i32_0 = arith.constant 0 : i32
    %c0_i32_1 = arith.constant 0 : i32
    return %c0_i32, %c0_i32_0 : i32, i32
  }
  func.func @transform_11(%arg0: i32) -> (i32, i32) {
    %c0_i32 = arith.constant 0 : i32
    %c0_i32_0 = arith.constant 0 : i32
    return %arg0, %c0_i32 : i32, i32
  }
  func.func @transform_12(%arg0: i32) -> (i32, i32) {
    %c0_i32 = arith.constant 0 : i32
    %c0_i32_0 = arith.constant 0 : i32
    return %arg0, %c0_i32 : i32, i32
  }
}

module attributes {stable_mosaic.version = 11 : i64} {
  func.func @vae_kernel(%arg0: i32, %arg1: memref<8x786xbf16, #tpu.memory_space<vmem>>, %arg2: memref<786x512xbf16, #tpu.memory_space<vmem>>, %arg3: memref<1x512xf32, #tpu.memory_space<vmem>>, %arg4: memref<512x512xbf16, #tpu.memory_space<vmem>>, %arg5: memref<1x512xf32, #tpu.memory_space<vmem>>, %arg6: memref<512x128xbf16, #tpu.memory_space<vmem>>, %arg7: memref<1x128xf32, #tpu.memory_space<vmem>>, %arg8: memref<8x512xf32, #tpu.memory_space<vmem>>, %arg9: memref<1x512xf32, #tpu.memory_space<vmem>>, %arg10: memref<512x784xbf16, #tpu.memory_space<vmem>>, %arg11: memref<1x784xf32, #tpu.memory_space<vmem>>, %arg12: memref<8x784xbf16, #tpu.memory_space<vmem>>, %arg13: memref<8x128xf32, #tpu.memory_space<vmem>>) attributes {dimension_semantics = [#tpu.dimension_semantics<parallel>], iteration_bounds = array<i64: 1>, scalar_prefetch = 0 : i64, scratch_operands = 0 : i64, tpu.core_type = #tpu.core_type<tc>, window_params = [{transform_indices = @transform_0, window_bounds = array<i64: 8, 786>}, {pipeline_mode = #tpu.pipeline_mode<synchronous>, transform_indices = @transform_1, window_bounds = array<i64: 786, 512>}, {pipeline_mode = #tpu.pipeline_mode<synchronous>, transform_indices = @transform_2, window_bounds = array<i64: 1, 512>}, {pipeline_mode = #tpu.pipeline_mode<synchronous>, transform_indices = @transform_3, window_bounds = array<i64: 512, 512>}, {pipeline_mode = #tpu.pipeline_mode<synchronous>, transform_indices = @transform_4, window_bounds = array<i64: 1, 512>}, {pipeline_mode = #tpu.pipeline_mode<synchronous>, transform_indices = @transform_5, window_bounds = array<i64: 512, 128>}, {pipeline_mode = #tpu.pipeline_mode<synchronous>, transform_indices = @transform_6, window_bounds = array<i64: 1, 128>}, {pipeline_mode = #tpu.pipeline_mode<synchronous>, transform_indices = @transform_7, window_bounds = array<i64: 8, 512>}, {pipeline_mode = #tpu.pipeline_mode<synchronous>, transform_indices = @transform_8, window_bounds = array<i64: 1, 512>}, {pipeline_mode = #tpu.pipeline_mode<synchronous>, transform_indices = @transform_9, window_bounds = array<i64: 512, 784>}, {pipeline_mode = #tpu.pipeline_mode<synchronous>, transform_indices = @transform_10, window_bounds = array<i64: 1, 784>}, {transform_indices = @transform_11, window_bounds = array<i64: 8, 784>}, {transform_indices = @transform_12, window_bounds = array<i64: 8, 128>}]} {
    %c0 = arith.constant 0 : index
    %c0_0 = arith.constant 0 : index
    %0 = vector.load %arg1[%c0, %c0_0] : memref<8x786xbf16, #tpu.memory_space<vmem>>, vector<8x786xbf16>
    %1 = vector.extract_strided_slice %0 {offsets = [0, 0], sizes = [8, 2], strides = [1, 1]} : vector<8x786xbf16> to vector<8x2xbf16>
    %2 = arith.extf %1 : vector<8x2xbf16> to vector<8x2xf32>
    %c0_1 = arith.constant 0 : index
    %c0_2 = arith.constant 0 : index
    %3 = vector.load %arg2[%c0_1, %c0_2] : memref<786x512xbf16, #tpu.memory_space<vmem>>, vector<786x512xbf16>
    %cst = arith.constant dense<0.000000e+00> : vector<8x512xf32>
    %4 = tpu.matmul %0, %3, %cst {dimension_numbers = #tpu.dot_dimension_numbers<[1], [0], [0], [1], [0, 0, 1, 1], [], []>} : vector<8x786xbf16>, vector<786x512xbf16>, vector<8x512xf32> -> vector<8x512xf32>
    %c0_3 = arith.constant 0 : index
    %c0_4 = arith.constant 0 : index
    %5 = vector.load %arg3[%c0_3, %c0_4] : memref<1x512xf32, #tpu.memory_space<vmem>>, vector<1x512xf32>
    %6 = vector.broadcast %5 : vector<1x512xf32> to vector<8x512xf32>
    %7 = arith.addf %4, %6 : vector<8x512xf32>
    %cst_5 = arith.constant 0.000000e+00 : f32
    %8 = vector.broadcast %cst_5 : f32 to vector<8x512xf32>
    %9 = arith.maximumf %7, %8 : vector<8x512xf32>
    %10 = arith.truncf %9 : vector<8x512xf32> to vector<8x512xbf16>
    %c0_6 = arith.constant 0 : index
    %c0_7 = arith.constant 0 : index
    %11 = vector.load %arg4[%c0_6, %c0_7] : memref<512x512xbf16, #tpu.memory_space<vmem>>, vector<512x512xbf16>
    %cst_8 = arith.constant dense<0.000000e+00> : vector<8x512xf32>
    %12 = tpu.matmul %10, %11, %cst_8 {dimension_numbers = #tpu.dot_dimension_numbers<[1], [0], [0], [1], [0, 0, 1, 1], [], []>} : vector<8x512xbf16>, vector<512x512xbf16>, vector<8x512xf32> -> vector<8x512xf32>
    %c0_9 = arith.constant 0 : index
    %c0_10 = arith.constant 0 : index
    %13 = vector.load %arg5[%c0_9, %c0_10] : memref<1x512xf32, #tpu.memory_space<vmem>>, vector<1x512xf32>
    %14 = vector.broadcast %13 : vector<1x512xf32> to vector<8x512xf32>
    %15 = arith.addf %12, %14 : vector<8x512xf32>
    %cst_11 = arith.constant 0.000000e+00 : f32
    %16 = vector.broadcast %cst_11 : f32 to vector<8x512xf32>
    %17 = arith.maximumf %15, %16 : vector<8x512xf32>
    %18 = arith.truncf %17 : vector<8x512xf32> to vector<8x512xbf16>
    %c0_12 = arith.constant 0 : index
    %c0_13 = arith.constant 0 : index
    %19 = vector.load %arg6[%c0_12, %c0_13] : memref<512x128xbf16, #tpu.memory_space<vmem>>, vector<512x128xbf16>
    %cst_14 = arith.constant dense<0.000000e+00> : vector<8x128xf32>
    %20 = tpu.matmul %18, %19, %cst_14 {dimension_numbers = #tpu.dot_dimension_numbers<[1], [0], [0], [1], [0, 0, 1, 1], [], []>} : vector<8x512xbf16>, vector<512x128xbf16>, vector<8x128xf32> -> vector<8x128xf32>
    %c0_15 = arith.constant 0 : index
    %c0_16 = arith.constant 0 : index
    %21 = vector.load %arg7[%c0_15, %c0_16] : memref<1x128xf32, #tpu.memory_space<vmem>>, vector<1x128xf32>
    %22 = vector.broadcast %21 : vector<1x128xf32> to vector<8x128xf32>
    %23 = arith.addf %20, %22 : vector<8x128xf32>
    %c0_17 = arith.constant 0 : index
    %c0_18 = arith.constant 0 : index
    %24 = vector.load %arg13[%c0_17, %c0_18] : memref<8x128xf32, #tpu.memory_space<vmem>>, vector<8x128xf32>
    tpu.vector_store %arg13[%c0_17, %c0_18], %23 {strides = array<i32>} : memref<8x128xf32, #tpu.memory_space<vmem>>, vector<8x128xf32>,
    %25 = vector.extract_strided_slice %23 {offsets = [0, 0], sizes = [8, 2], strides = [1, 1]} : vector<8x128xf32> to vector<8x2xf32>
    %26 = vector.extract_strided_slice %23 {offsets = [0, 2], sizes = [8, 2], strides = [1, 1]} : vector<8x128xf32> to vector<8x2xf32>
    %cst_19 = arith.constant 5.000000e-01 : f32
    %27 = vector.broadcast %cst_19 : f32 to vector<8x2xf32>
    %28 = arith.mulf %27, %26 : vector<8x2xf32>
    %29 = math.exp %28 : vector<8x2xf32>
    %30 = arith.mulf %2, %29 : vector<8x2xf32>
    %31 = arith.addf %30, %25 : vector<8x2xf32>
    %32 = vector.extract_strided_slice %31 {offsets = [0, 0], sizes = [8, 1], strides = [1, 1]} : vector<8x2xf32> to vector<8x1xf32>
    %c0_20 = arith.constant 0 : index
    %c0_21 = arith.constant 0 : index
    %33 = vector.load %arg8[%c0_20, %c0_21] : memref<8x512xf32, #tpu.memory_space<vmem>>, vector<1x512xf32>
    %34 = vector.broadcast %32 : vector<8x1xf32> to vector<8x512xf32>
    %35 = vector.broadcast %33 : vector<1x512xf32> to vector<8x512xf32>
    %36 = arith.mulf %34, %35 : vector<8x512xf32>
    %37 = vector.extract_strided_slice %31 {offsets = [0, 1], sizes = [8, 1], strides = [1, 1]} : vector<8x2xf32> to vector<8x1xf32>
    %c1 = arith.constant 1 : index
    %c0_22 = arith.constant 0 : index
    %38 = vector.load %arg8[%c1, %c0_22] : memref<8x512xf32, #tpu.memory_space<vmem>>, vector<1x512xf32>
    %39 = vector.broadcast %37 : vector<8x1xf32> to vector<8x512xf32>
    %40 = vector.broadcast %38 : vector<1x512xf32> to vector<8x512xf32>
    %41 = arith.mulf %39, %40 : vector<8x512xf32>
    %42 = arith.addf %36, %41 : vector<8x512xf32>
    %c0_23 = arith.constant 0 : index
    %c0_24 = arith.constant 0 : index
    %43 = vector.load %arg9[%c0_23, %c0_24] : memref<1x512xf32, #tpu.memory_space<vmem>>, vector<1x512xf32>
    %44 = vector.broadcast %43 : vector<1x512xf32> to vector<8x512xf32>
    %45 = arith.addf %42, %44 : vector<8x512xf32>
    %cst_25 = arith.constant 0.000000e+00 : f32
    %46 = vector.broadcast %cst_25 : f32 to vector<8x512xf32>
    %47 = arith.maximumf %45, %46 : vector<8x512xf32>
    %48 = arith.truncf %47 : vector<8x512xf32> to vector<8x512xbf16>
    %c0_26 = arith.constant 0 : index
    %c0_27 = arith.constant 0 : index
    %49 = vector.load %arg10[%c0_26, %c0_27] : memref<512x784xbf16, #tpu.memory_space<vmem>>, vector<512x784xbf16>
    %cst_28 = arith.constant dense<0.000000e+00> : vector<8x784xf32>
    %50 = tpu.matmul %48, %49, %cst_28 {dimension_numbers = #tpu.dot_dimension_numbers<[1], [0], [0], [1], [0, 0, 1, 1], [], []>} : vector<8x512xbf16>, vector<512x784xbf16>, vector<8x784xf32> -> vector<8x784xf32>
    %c0_29 = arith.constant 0 : index
    %c0_30 = arith.constant 0 : index
    %51 = vector.load %arg11[%c0_29, %c0_30] : memref<1x784xf32, #tpu.memory_space<vmem>>, vector<1x784xf32>
    %52 = vector.broadcast %51 : vector<1x784xf32> to vector<8x784xf32>
    %53 = arith.addf %50, %52 : vector<8x784xf32>
    %cst_31 = arith.constant 5.000000e-01 : f32
    %54 = vector.broadcast %cst_31 : f32 to vector<8x784xf32>
    %55 = arith.mulf %54, %53 : vector<8x784xf32>
    %56 = math.tanh %55 : vector<8x784xf32>
    %cst_32 = arith.constant 1.000000e+00 : f32
    %57 = vector.broadcast %cst_32 : f32 to vector<8x784xf32>
    %58 = arith.addf %56, %57 : vector<8x784xf32>
    %cst_33 = arith.constant 5.000000e-01 : f32
    %59 = vector.broadcast %cst_33 : f32 to vector<8x784xf32>
    %60 = arith.mulf %59, %58 : vector<8x784xf32>
    %61 = arith.truncf %60 : vector<8x784xf32> to vector<8x784xbf16>
    %c0_34 = arith.constant 0 : index
    %c0_35 = arith.constant 0 : index
    %62 = vector.load %arg12[%c0_34, %c0_35] : memref<8x784xbf16, #tpu.memory_space<vmem>>, vector<8x784xbf16>
    tpu.vector_store %arg12[%c0_34, %c0_35], %61 {strides = array<i32>} : memref<8x784xbf16, #tpu.memory_space<vmem>>, vector<8x784xbf16>,
    return
  }
  func.func @transform_0(%arg0: i32) -> (i32, i32) {
    %c0_i32 = arith.constant 0 : i32
    %c0_i32_0 = arith.constant 0 : i32
    return %arg0, %c0_i32 : i32, i32
  }
  func.func @transform_1(%arg0: i32) -> (i32, i32) {
    %c0_i32 = arith.constant 0 : i32
    %c0_i32_0 = arith.constant 0 : i32
    %c0_i32_1 = arith.constant 0 : i32
    return %c0_i32, %c0_i32_0 : i32, i32
  }
  func.func @transform_2(%arg0: i32) -> (i32, i32) {
    %c0_i32 = arith.constant 0 : i32
    %c0_i32_0 = arith.constant 0 : i32
    %c0_i32_1 = arith.constant 0 : i32
    return %c0_i32, %c0_i32_0 : i32, i32
  }
  func.func @transform_3(%arg0: i32) -> (i32, i32) {
    %c0_i32 = arith.constant 0 : i32
    %c0_i32_0 = arith.constant 0 : i32
    %c0_i32_1 = arith.constant 0 : i32
    return %c0_i32, %c0_i32_0 : i32, i32
  }
  func.func @transform_4(%arg0: i32) -> (i32, i32) {
    %c0_i32 = arith.constant 0 : i32
    %c0_i32_0 = arith.constant 0 : i32
    %c0_i32_1 = arith.constant 0 : i32
    return %c0_i32, %c0_i32_0 : i32, i32
  }
  func.func @transform_5(%arg0: i32) -> (i32, i32) {
    %c0_i32 = arith.constant 0 : i32
    %c0_i32_0 = arith.constant 0 : i32
    %c0_i32_1 = arith.constant 0 : i32
    return %c0_i32, %c0_i32_0 : i32, i32
  }
  func.func @transform_6(%arg0: i32) -> (i32, i32) {
    %c0_i32 = arith.constant 0 : i32
    %c0_i32_0 = arith.constant 0 : i32
    %c0_i32_1 = arith.constant 0 : i32
    return %c0_i32, %c0_i32_0 : i32, i32
  }
  func.func @transform_7(%arg0: i32) -> (i32, i32) {
    %c0_i32 = arith.constant 0 : i32
    %c0_i32_0 = arith.constant 0 : i32
    %c0_i32_1 = arith.constant 0 : i32
    return %c0_i32, %c0_i32_0 : i32, i32
  }
  func.func @transform_8(%arg0: i32) -> (i32, i32) {
    %c0_i32 = arith.constant 0 : i32
    %c0_i32_0 = arith.constant 0 : i32
    %c0_i32_1 = arith.constant 0 : i32
    return %c0_i32, %c0_i32_0 : i32, i32
  }
  func.func @transform_9(%arg0: i32) -> (i32, i32) {
    %c0_i32 = arith.constant 0 : i32
    %c0_i32_0 = arith.constant 0 : i32
    %c0_i32_1 = arith.constant 0 : i32
    return %c0_i32, %c0_i32_0 : i32, i32
  }
  func.func @transform_10(%arg0: i32) -> (i32, i32) {
    %c0_i32 = arith.constant 0 : i32
    %c0_i32_0 = arith.constant 0 : i32
    %c0_i32_1 = arith.constant 0 : i32
    return %c0_i32, %c0_i32_0 : i32, i32
  }
  func.func @transform_11(%arg0: i32) -> (i32, i32) {
    %c0_i32 = arith.constant 0 : i32
    %c0_i32_0 = arith.constant 0 : i32
    return %arg0, %c0_i32 : i32, i32
  }
  func.func @transform_12(%arg0: i32) -> (i32, i32) {
    %c0_i32 = arith.constant 0 : i32
    %c0_i32_0 = arith.constant 0 : i32
    return %arg0, %c0_i32 : i32, i32
  }
}

</mosaic_0001>

<bundles_post_ra>
// kernel: tpu_custom_call.1
= control target key start
LH: loop header
LB: loop body
LE: loop exit
PB: predicated region body
PF: predicated region fallthrough
CT: control target
= control target key end

     0   :  { %18 = vsyncpa [#allocation3], 0  ;;  %vm1274_vm0 = vcmask 1040384   ;;  %vm1270_vm1 = vcmask 146432   ;;  %s11584_s0 = inlined_call_operand.vmem [shape: bf16[8,786], index: 0, kind: input, shape index: {}]   ;;  %s11585_s1 = inlined_call_operand.vmem [shape: bf16[786,512], index: 1, kind: input, shape index: {}]   ;;  %s11586_s2 = inlined_call_operand.vmem [shape: f32[1,512], index: 2, kind: input, shape index: {}]   ;;  %s11587_s3 = inlined_call_operand.vmem [shape: bf16[512,512], index: 3, kind: input, shape index: {}]   ;;  %s11588_s4 = inlined_call_operand.vmem [shape: f32[1,512], index: 4, kind: input, shape index: {}]   ;;  %s11589_s5 = inlined_call_operand.vmem [shape: bf16[512,128], index: 5, kind: input, shape index: {}]   ;;  %s11590_s6 = inlined_call_operand.vmem [shape: f32[1,128], index: 6, kind: input, shape index: {}]   ;;  %s11591_s7 = inlined_call_operand.vmem [shape: f32[8,512], index: 7, kind: input, shape index: {}]   ;;  %s11592_s8 = inlined_call_operand.vmem [shape: f32[1,512], index: 8, kind: input, shape index: {}]   ;;  %s11593_s9 = inlined_call_operand.vmem [shape: bf16[512,784], index: 9, kind: input, shape index: {}]   ;;  %s11594_s10 = inlined_call_operand.vmem [shape: f32[1,784], index: 10, kind: input, shape index: {}]   ;;  %s11595_s11 = inlined_call_operand.hbm [shape: bf16[8,784], index: 11, kind: output, shape index: {0}]   ;;  %s11596_s12 = inlined_call_operand.hbm [shape: f32[8,128], index: 12, kind: output, shape index: {1}]  }
   0x1   :  { %v5010_v0 = vld [vmem:[%s11585_s1 + $0xe0] sm:$0xf]  ;;  %v7251_v1 = vld [vmem:[%s11585_s1 + $0xec] sm:$0xf0] }
   0x2   :  { %v5138_v2 = vld [vmem:[%s11585_s1 + $0x1e0] sm:$0xf]  ;;  %v5011_v3 = vor.u32 %v7251_v1, %v5010_v0  ;;  %v7283_v4 = vld [vmem:[%s11585_s1 + $0x1ec] sm:$0xf0] }
   0x3   :  { %v5266_v5 = vld [vmem:[%s11585_s1 + $0x2e0] sm:$0xf]  ;;  %v7315_v6 = vld [vmem:[%s11585_s1 + $0x2ec] sm:$0xf0]  ;;  %v5139_v7 = vor.u32 %v7283_v4, %v5138_v2 }
   0x4   :  { %v5267_v8 = vor.u32 %v7315_v6, %v5266_v5  ;;  %v5394_v9 = vld [vmem:[%s11585_s1 + $0x3e0] sm:$0xf]  ;;  %v7347_v10 = vld [vmem:[%s11585_s1 + $0x3ec] sm:$0xf0]  ;;  %1287 = vmatpush.bf16.msra.mxu0 %v5011_v3 }
   0x5   :  { %v4994_v11 = vld [vmem:[%s11585_s1 + $0xc0] sm:$0xf]  ;;  %v5395_v12 = vor.u32 %v7347_v10, %v5394_v9  ;;  %v7247_v13 = vld [vmem:[%s11585_s1 + $0xcc] sm:$0xf0]  ;;  %1300 = vmatpush.bf16.msra.mxu1 %v5139_v7 }
   0x6   :  { %v5122_v14 = vld [vmem:[%s11585_s1 + $0x1c0] sm:$0xf]  ;;  %v7279_v15 = vld [vmem:[%s11585_s1 + $0x1cc] sm:$0xf0]  ;;  %1313 = vmatpush.bf16.msra.mxu2 %v5267_v8  ;;  %v4995_v16 = vor.u32 %v7247_v13, %v4994_v11 }
   0x7   :  { %v5123_v17 = vor.u32 %v7279_v15, %v5122_v14  ;;  %v5250_v18 = vld [vmem:[%s11585_s1 + $0x2c0] sm:$0xf]  ;;  %v7311_v19 = vld [vmem:[%s11585_s1 + $0x2cc] sm:$0xf0]  ;;  %1326 = vmatpush.bf16.msra.mxu3 %v5395_v12 }
   0x8   :  { %v5378_v20 = vld [vmem:[%s11585_s1 + $0x3c0] sm:$0xf]  ;;  %v5251_v21 = vor.u32 %v7311_v19, %v5250_v18  ;;  %v7343_v22 = vld [vmem:[%s11585_s1 + $0x3cc] sm:$0xf0]  ;;  %1288 = vmatpush.bf16.msra.mxu0 %v4995_v16 }
   0x9   :  { %v4978_v23 = vld [vmem:[%s11585_s1 + $0xa0] sm:$0xf]  ;;  %v7243_v24 = vld [vmem:[%s11585_s1 + $0xac] sm:$0xf0]  ;;  %v5379_v25 = vor.u32 %v7343_v22, %v5378_v20  ;;  %1301 = vmatpush.bf16.msra.mxu1 %v5123_v17 }
   0xa   :  { %v5106_v26 = vld [vmem:[%s11585_s1 + $0x1a0] sm:$0xf]  ;;  %v7275_v27 = vld [vmem:[%s11585_s1 + $0x1ac] sm:$0xf0]  ;;  %v4979_v29 = vor.u32 %v7243_v24, %v4978_v23  ;;  %1314 = vmatpush.bf16.msra.mxu2 %v5251_v21 }
   0xb   :  { %v5234_v28 = vld [vmem:[%s11585_s1 + $0x2a0] sm:$0xf]  ;;  %v7307_v30 = vld [vmem:[%s11585_s1 + $0x2ac] sm:$0xf0]  ;;  %v5107_v33 = vor.u32 %v7275_v27, %v5106_v26  ;;  %1327 = vmatpush.bf16.msra.mxu3 %v5379_v25  ;;  %v44_v25 = vld [vmem:[%s11584_s0 + $0x8] sm:$0xff] }
   0xc   :  { %v5362_v31 = vld [vmem:[%s11585_s1 + $0x3a0] sm:$0xf]  ;;  %v7339_v32 = vld [vmem:[%s11585_s1 + $0x3ac] sm:$0xf0]  ;;  %v5235_v34 = vor.u32 %v7307_v30, %v5234_v28  ;;  %1289 = vmatpush.bf16.msra.mxu0 %v4979_v29 }
   0xd   :  { %v4962_v35 = vld [vmem:[%s11585_s1 + $0x80] sm:$0xf]  ;;  %v7239_v36 = vld [vmem:[%s11585_s1 + $0x8c] sm:$0xf0]  ;;  %v5363_v38 = vor.u32 %v7339_v32, %v5362_v31  ;;  %1302 = vmatpush.bf16.msra.mxu1 %v5107_v33 }
   0xe   :  { %v5090_v37 = vld [vmem:[%s11585_s1 + $0x180] sm:$0xf]  ;;  %v7271_v39 = vld [vmem:[%s11585_s1 + $0x18c] sm:$0xf0]  ;;  %v4963_v44 = vor.u32 %v7239_v36, %v4962_v35  ;;  %1315 = vmatpush.bf16.msra.mxu2 %v5235_v34 }
   0xf   :  { %v5218_v40 = vld [vmem:[%s11585_s1 + $0x280] sm:$0xf]  ;;  %v7303_v41 = vld [vmem:[%s11585_s1 + $0x28c] sm:$0xf0]  ;;  %v5091_v45 = vor.u32 %v7271_v39, %v5090_v37  ;;  %1328 = vmatpush.bf16.msra.mxu3 %v5363_v38  ;;  %v262_v38 = vunpack.c.l.b16 %v44_v25 }
  0x10   :  { %v5346_v42 = vld [vmem:[%s11585_s1 + $0x380] sm:$0xf]  ;;  %v7335_v43 = vld [vmem:[%s11585_s1 + $0x38c] sm:$0xf0]  ;;  %v5219_v46 = vor.u32 %v7303_v41, %v5218_v40  ;;  %1290 = vmatpush.bf16.msra.mxu0 %v4963_v44  ;;  %v7249_v41 = vld [vmem:[%s11585_s1 + $0xe4] sm:$0xf]  ;;  %v263_v44 = vunpack.c.h.b16 %v44_v25 }
  0x11   :  { %v4946_v47 = vld [vmem:[%s11585_s1 + $0x60] sm:$0xf]  ;;  %v7235_v48 = vld [vmem:[%s11585_s1 + $0x6c] sm:$0xf0]  ;;  %v5347_v50 = vor.u32 %v7335_v43, %v5346_v42  ;;  %1303 = vmatpush.bf16.msra.mxu1 %v5091_v45  ;;  %v5012_v42 = vld [vmem:[%s11585_s1 + $0xf0] sm:$0xf0] }
  0x12   :  { %v5074_v49 = vld [vmem:[%s11585_s1 + $0x160] sm:$0xf]  ;;  %v7267_v51 = vld [vmem:[%s11585_s1 + $0x16c] sm:$0xf0]  ;;  %v4947_v56 = vor.u32 %v7235_v48, %v4946_v47  ;;  %1316 = vmatpush.bf16.msra.mxu2 %v5219_v46  ;;  %v7273_v25 = vld [vmem:[%s11585_s1 + $0x1a4] sm:$0xf] }
  0x13   :  { %v5202_v52 = vld [vmem:[%s11585_s1 + $0x260] sm:$0xf]  ;;  %v7299_v53 = vld [vmem:[%s11585_s1 + $0x26c] sm:$0xf0]  ;;  %v5075_v57 = vor.u32 %v7267_v51, %v5074_v49  ;;  %1329 = vmatpush.bf16.msra.mxu3 %v5347_v50 }
  0x14   :  { %v5330_v54 = vld [vmem:[%s11585_s1 + $0x360] sm:$0xf]  ;;  %v7331_v55 = vld [vmem:[%s11585_s1 + $0x36c] sm:$0xf0]  ;;  %v5203_v58 = vor.u32 %v7299_v53, %v5202_v52  ;;  %1291 = vmatpush.bf16.msra.mxu0 %v4947_v56  ;;  %v8187_v56 = vpack.c.b16 %v262_v38, %v262_v38  ;;  %v7269_v38 = vld [vmem:[%s11585_s1 + $0x184] sm:$0xf] }
  0x15   :  { %v4930_v59 = vld [vmem:[%s11585_s1 + $0x40] sm:$0xf]  ;;  %v7231_v60 = vld [vmem:[%s11585_s1 + $0x4c] sm:$0xf0]  ;;  %v5331_v62 = vor.u32 %v7331_v55, %v5330_v54  ;;  %1304 = vmatpush.bf16.msra.mxu1 %v5075_v57  ;;  %v5015_v55 = vor.u32 %v7249_v41, %v5012_v42 }
  0x16   :  { %v5058_v61 = vld [vmem:[%s11585_s1 + $0x140] sm:$0xf]  ;;  %v7263_v63 = vld [vmem:[%s11585_s1 + $0x14c] sm:$0xf0]  ;;  %v4931_v4 = vor.u32 %v7231_v60, %v4930_v59  ;;  %1317 = vmatpush.bf16.msra.mxu2 %v5203_v58  ;;  %v7245_v58 = vld [vmem:[%s11585_s1 + $0xc4] sm:$0xf] }
  0x17   :  { %v5186_v0 = vld [vmem:[%s11585_s1 + $0x240] sm:$0xf]  ;;  %v7295_v1 = vld [vmem:[%s11585_s1 + $0x24c] sm:$0xf0]  ;;  %v5059_v5 = vor.u32 %v7263_v63, %v5058_v61  ;;  %1330 = vmatpush.bf16.msra.mxu3 %v5331_v62  ;;  %v4996_v59 = vld [vmem:[%s11585_s1 + $0xd0] sm:$0xf0]  ;;  %v8206_v63 = vpack.c.b16 %v263_v44, %v263_v44 }
  0x18   :  { %v5314_v2 = vld [vmem:[%s11585_s1 + $0x340] sm:$0xf]  ;;  %v7327_v3 = vld [vmem:[%s11585_s1 + $0x34c] sm:$0xf0]  ;;  %v5187_v6 = vor.u32 %v7295_v1, %v5186_v0  ;;  %1292 = vmatpush.bf16.msra.mxu0 %v4931_v4  ;;  %v7281_v60 = vld [vmem:[%s11585_s1 + $0x1e4] sm:$0xf] }
  0x19   :  { %v4914_v7 = vld [vmem:[%s11585_s1 + $0x20] sm:$0xf]  ;;  %v7227_v8 = vld [vmem:[%s11585_s1 + $0x2c] sm:$0xf0]  ;;  %v5315_v10 = vor.u32 %v7327_v3, %v5314_v2  ;;  %1305 = vmatpush.bf16.msra.mxu1 %v5059_v5  ;;  %v5140_v61 = vld [vmem:[%s11585_s1 + $0x1f0] sm:$0xf0] }
  0x1a   :  { %v5042_v9 = vld [vmem:[%s11585_s1 + $0x120] sm:$0xf]  ;;  %v7259_v11 = vld [vmem:[%s11585_s1 + $0x12c] sm:$0xf0]  ;;  %v4915_v17 = vor.u32 %v7227_v8, %v4914_v7  ;;  %1318 = vmatpush.bf16.msra.mxu2 %v5187_v6  ;;  %v4999_v6 = vor.u32 %v7245_v58, %v4996_v59  ;;  %v5143_v7 = vor.u32 %v7281_v60, %v5140_v61 }
  0x1b   :  { %v5170_v12 = vld [vmem:[%s11585_s1 + $0x220] sm:$0xf]  ;;  %v7291_v13 = vld [vmem:[%s11585_s1 + $0x22c] sm:$0xf0]  ;;  %v5043_v21 = vor.u32 %v7259_v11, %v5042_v9  ;;  %1331 = vmatpush.bf16.msra.mxu3 %v5315_v10  ;;  %v7241_v10 = vld [vmem:[%s11585_s1 + $0xa4] sm:$0xf] }
  0x1c   :  { %v5298_v14 = vld [vmem:[%s11585_s1 + $0x320] sm:$0xf]  ;;  %v7323_v15 = vld [vmem:[%s11585_s1 + $0x32c] sm:$0xf0]  ;;  %v5171_v22 = vor.u32 %v7291_v13, %v5170_v12  ;;  %1293 = vmatpush.bf16.msra.mxu0 %v4915_v17  ;;  %v4980_v11 = vld [vmem:[%s11585_s1 + $0xb0] sm:$0xf0] }
  0x1d   :  { %v8120_v16 = vld [vmem:[%s11585_s1 + $0x620] sm:$0x11]  ;;  %v7223_v19 = vld [vmem:[%s11585_s1 + $0xc] sm:$0xf0]  ;;  %v5299_v26 = vor.u32 %v7323_v15, %v5298_v14  ;;  %1306 = vmatpush.bf16.msra.mxu1 %v5043_v21  ;;  %v5124_v13 = vld [vmem:[%s11585_s1 + $0x1d0] sm:$0xf0] }
  0x1e   :  { %v4898_v18 = vld [vmem:[%s11585_s1] sm:$0xf]  ;;  %v870_v20 = vunpack.c.l.b16 %v8120_v16  ;;  %v7255_v24 = vld [vmem:[%s11585_s1 + $0x10c] sm:$0xf0]  ;;  %1319 = vmatpush.bf16.msra.mxu2 %v5171_v22  ;;  %v7277_v12 = vld [vmem:[%s11585_s1 + $0x1c4] sm:$0xf] }
  0x1f   :  { %v5026_v23 = vld [vmem:[%s11585_s1 + $0x100] sm:$0xf]  ;;  %v7287_v28 = vld [vmem:[%s11585_s1 + $0x20c] sm:$0xf0]  ;;  %v4899_v33 = vor.u32 %v7223_v19, %v4898_v18  ;;  %1332 = vmatpush.bf16.msra.mxu3 %v5299_v26  ;;  %v4983_v19 = vor.u32 %v7241_v10, %v4980_v11  ;;  %v5108_v26 = vld [vmem:[%s11585_s1 + $0x1b0] sm:$0xf0] }
  0x20   :  { %v5154_v27 = vld [vmem:[%s11585_s1 + $0x200] sm:$0xf]  ;;  %v7319_v30 = vld [vmem:[%s11585_s1 + $0x30c] sm:$0xf0]  ;;  %v5027_v34 = vor.u32 %v7255_v24, %v5026_v23  ;;  %v1070_v37 = vpack.c.b16 %v870_v20, %v870_v20  ;;  %v5127_v20 = vor.u32 %v7277_v12, %v5124_v13  ;;  %v7237_v23 = vld [vmem:[%s11585_s1 + $0x84] sm:$0xf] }
  0x21   :  { %v5282_v29 = vld [vmem:[%s11585_s1 + $0x300] sm:$0xf]  ;;  %v7379_v32 = vld [vmem:[%s11585_s1 + $0x4ec] sm:$0xf0]  ;;  %v5155_v40 = vor.u32 %v7287_v28, %v5154_v27  ;;  %1294 = vmatpush.bf16.msra.mxu0 %v4899_v33  ;;  %v4964_v24 = vld [vmem:[%s11585_s1 + $0x90] sm:$0xf0]  ;;  %v5111_v33 = vor.u32 %v7273_v25, %v5108_v26 }
  0x22   :  { %v5522_v31 = vld [vmem:[%s11585_s1 + $0x4e0] sm:$0xf]  ;;  %v7411_v36 = vld [vmem:[%s11585_s1 + $0x5ec] sm:$0xf0]  ;;  %v5283_v45 = vor.u32 %v7319_v30, %v5282_v29  ;;  %v1276_v54 = vsel %vm1274_vm0, %v1070_v37, 0  ;;  %1307 = vmatpush.bf16.msra.mxu1 %v5027_v34 }
  0x23   :  { %v5650_v35 = vld [vmem:[%s11585_s1 + $0x5e0] sm:$0xf]  ;;  %v5523_v46 = vor.u32 %v7379_v32, %v5522_v31  ;;  %v7375_v48 = vld [vmem:[%s11585_s1 + $0x4cc] sm:$0xf0]  ;;  %1320 = vmatpush.bf16.msra.mxu2 %v5155_v40  ;;  %v46_v31 = vld [vmem:[%s11584_s0 + $0x18] sm:$0xf]  ;;  %v4967_v32 = vor.u32 %v7237_v23, %v4964_v24 }
  0x24   :  { %v43_v39 = vld [vmem:[%s11584_s0] sm:$0xff]  ;;  %v5651_v50 = vor.u32 %v7411_v36, %v5650_v35  ;;  %v7407_v52 = vld [vmem:[%s11585_s1 + $0x5cc] sm:$0xf0]  ;;  %1333 = vmatpush.bf16.msra.mxu3 %v5283_v45  ;;  %v4948_v37 = vld [vmem:[%s11585_s1 + $0x70] sm:$0xf0]  ;;  %v266_v40 = vunpack.c.l.b16 %v46_v31 }
  0x25   :  { %v260_v43 = vunpack.c.l.b16 %v43_v39  ;;  %v5506_v47 = vld [vmem:[%s11585_s1 + $0x4c0] sm:$0xf]  ;;  %v261_v49 = vunpack.c.h.b16 %v43_v39  ;;  %v7415_v57 = vld [vmem:[%s11585_s1 + $0x60c] sm:$0xf0]  ;;  %1339 = vmatpush.bf16.msrb.mxu0 %v5523_v46  ;;  %v7233_v36 = vld [vmem:[%s11585_s1 + $0x64] sm:$0xf] }
  0x26   :  { %v5634_v51 = vld [vmem:[%s11585_s1 + $0x5c0] sm:$0xf]  ;;  %v5507_v0 = vor.u32 %v7375_v48, %v5506_v47  ;;  %1352 = vmatpush.bf16.msrb.mxu1 %v5651_v50  ;;  %v7371_v5 = vld [vmem:[%s11585_s1 + $0x4ac] sm:$0xf0]  ;;  %1321 = vmatmul.bf16.vlgmr.msra.gmra.mxu2 %v8187_v56  ;;  %v5092_v39 = vld [vmem:[%s11585_s1 + $0x190] sm:$0xf0]  ;;  %v4951_v45 = vor.u32 %v7233_v36, %v4948_v37 }
  0x27   :  { %v5666_v53 = vld [vmem:[%s11585_s1 + $0x600] sm:$0xf]  ;;  %v8204_v62 = vpack.c.b16 %v260_v43, %v260_v43  ;;  %v8208_v1 = vpack.c.b16 %v261_v49, %v261_v49  ;;  %1371 = vmatpush.bf16.msrb.mxu2 %v1276_v54  ;;  %v5635_v2 = vor.u32 %v7407_v52, %v5634_v51  ;;  %v7403_v9 = vld [vmem:[%s11585_s1 + $0x5ac] sm:$0xf0]  ;;  %1334 = vmatmul.bf16.vlgmr.msra.gmra.mxu3 %v8206_v63  ;;  %v7229_v49 = vld [vmem:[%s11585_s1 + $0x44] sm:$0xf] }
  0x28   :  { %v5667_v3 = vor.u32 %v7415_v57, %v5666_v53  ;;  %v5490_v4 = vld [vmem:[%s11585_s1 + $0x4a0] sm:$0xf]  ;;  %1378 = vmatpush.bf16.msrb.mxu3 %v5015_v55  ;;  %v7367_v18 = vld [vmem:[%s11585_s1 + $0x48c] sm:$0xf0]  ;;  %v5095_v46 = vor.u32 %v7269_v38, %v5092_v39  ;;  %v4932_v50 = vld [vmem:[%s11585_s1 + $0x50] sm:$0xf0]  ;;  %v8313_v53 = vpack.c.b16 %v266_v40, %v266_v40 }
  0x29   :  { %v5618_v8 = vld [vmem:[%s11585_s1 + $0x5a0] sm:$0xf]  ;;  %1295 = vmatmul.bf16.vlgmr.msra.gmra.mxu0 %v8204_v62  ;;  %v5491_v14 = vor.u32 %v7371_v5, %v5490_v4  ;;  %1308 = vmatmul.bf16.vlgmr.msra.gmra.mxu1 %v8208_v1  ;;  %v7399_v22 = vld [vmem:[%s11585_s1 + $0x58c] sm:$0xf0]  ;;  %v7265_v51 = vld [vmem:[%s11585_s1 + $0x164] sm:$0xf]  ;;  %v4935_v59 = vor.u32 %v7229_v49, %v4932_v50 }
  0x2a   :  { %1340 = vmatpush.bf16.msrb.mxu0 %v5507_v0  ;;  %1353 = vmatpush.bf16.msrb.mxu1 %v5635_v2  ;;  %v5619_v15 = vor.u32 %v7403_v9, %v5618_v8  ;;  %v5474_v17 = vld [vmem:[%s11585_s1 + $0x480] sm:$0xf]  ;;  %v7363_v30 = vld [vmem:[%s11585_s1 + $0x46c] sm:$0xf0]  ;;  %v5076_v52 = vld [vmem:[%s11585_s1 + $0x170] sm:$0xf0] }
  0x2b   :  { %1372 = vmatpush.bf16.msrb.mxu2 %v5667_v3  ;;  %v5602_v21 = vld [vmem:[%s11585_s1 + $0x580] sm:$0xf]  ;;  %v5475_v27 = vor.u32 %v7367_v18, %v5474_v17  ;;  %v7395_v35 = vld [vmem:[%s11585_s1 + $0x56c] sm:$0xf0]  ;;  %v5079_v60 = vor.u32 %v7265_v51, %v5076_v52  ;;  %v7225_v2 = vld [vmem:[%s11585_s1 + $0x24] sm:$0xf] }
  0x2c   :  { %1379 = vmatpush.bf16.msrb.mxu3 %v4999_v6  ;;  %v5603_v28 = vor.u32 %v7399_v22, %v5602_v21  ;;  %v5458_v29 = vld [vmem:[%s11585_s1 + $0x460] sm:$0xf]  ;;  %v7359_v44 = vld [vmem:[%s11585_s1 + $0x44c] sm:$0xf0]  ;;  %v4916_v3 = vld [vmem:[%s11585_s1 + $0x30] sm:$0xf0] }
  0x2d   :  { %v5586_v34 = vld [vmem:[%s11585_s1 + $0x560] sm:$0xf]  ;;  %v5459_v41 = vor.u32 %v7363_v30, %v5458_v29  ;;  %v7391_v48 = vld [vmem:[%s11585_s1 + $0x54c] sm:$0xf0]  ;;  %v7261_v4 = vld [vmem:[%s11585_s1 + $0x144] sm:$0xf] }
  0x2e   :  { %1341 = vmatpush.bf16.msrb.mxu0 %v5491_v14  ;;  %1354 = vmatpush.bf16.msrb.mxu1 %v5619_v15  ;;  %v5587_v42 = vor.u32 %v7395_v35, %v5586_v34  ;;  %v5442_v43 = vld [vmem:[%s11585_s1 + $0x440] sm:$0xf]  ;;  %v7355_v58 = vld [vmem:[%s11585_s1 + $0x42c] sm:$0xf0]  ;;  %v5060_v5 = vld [vmem:[%s11585_s1 + $0x150] sm:$0xf0]  ;;  %v4919_v14 = vor.u32 %v7225_v2, %v4916_v3 }
  0x2f   :  { %1391 = vmatpush.bf16.msra.mxu2 %v5143_v7  ;;  %v5570_v47 = vld [vmem:[%s11585_s1 + $0x540] sm:$0xf]  ;;  %v5443_v54 = vor.u32 %v7359_v44, %v5442_v43  ;;  %v7387_v0 = vld [vmem:[%s11585_s1 + $0x52c] sm:$0xf0]  ;;  %v7221_v12 = vld [vmem:[%s11585_s1 + $0x4] sm:$0xf]  ;;  %v5063_v15 = vor.u32 %v7261_v4, %v5060_v5 }
  0x30   :  { %1380 = vmatpush.bf16.msrb.mxu3 %v4983_v19  ;;  %v5571_v55 = vor.u32 %v7391_v48, %v5570_v47  ;;  %v5426_v57 = vld [vmem:[%s11585_s1 + $0x420] sm:$0xf]  ;;  %v7351_v8 = vld [vmem:[%s11585_s1 + $0x40c] sm:$0xf0]  ;;  %v4900_v17 = vld [vmem:[%s11585_s1 + $0x10] sm:$0xf0] }
  0x31   :  { %v5554_v61 = vld [vmem:[%s11585_s1 + $0x520] sm:$0xf]  ;;  %v5427_v6 = vor.u32 %v7355_v58, %v5426_v57  ;;  %v7383_v11 = vld [vmem:[%s11585_s1 + $0x50c] sm:$0xf0]  ;;  %v7313_v18 = vld [vmem:[%s11585_s1 + $0x2e4] sm:$0xf]  ;;  %v4903_v31 = vor.u32 %v7221_v12, %v4900_v17 }
  0x32   :  { %1342 = vmatpush.bf16.msrb.mxu0 %v5475_v27  ;;  %1355 = vmatpush.bf16.msrb.mxu1 %v5603_v28  ;;  %v5410_v7 = vld [vmem:[%s11585_s1 + $0x400] sm:$0xf]  ;;  %v5555_v10 = vor.u32 %v7387_v0, %v5554_v61  ;;  %v45_v13 = vld [vmem:[%s11584_s0 + $0x10] sm:$0xff]  ;;  %v7345_v22 = vld [vmem:[%s11585_s1 + $0x3e4] sm:$0xf] }
  0x33   :  { %1392 = vmatpush.bf16.msra.mxu2 %v5127_v20  ;;  %v5538_v9 = vld [vmem:[%s11585_s1 + $0x500] sm:$0xf]  ;;  %v5268_v19 = vld [vmem:[%s11585_s1 + $0x2f0] sm:$0xf0]  ;;  %v7257_v20 = vld [vmem:[%s11585_s1 + $0x124] sm:$0xf]  ;;  %v5411_v23 = vor.u32 %v7351_v8, %v5410_v7  ;;  %v264_v27 = vunpack.c.l.b16 %v45_v13  ;;  %v265_v28 = vunpack.c.h.b16 %v45_v13 }
  0x34   :  { %1381 = vmatpush.bf16.msrb.mxu3 %v4967_v32  ;;  %v5044_v21 = vld [vmem:[%s11585_s1 + $0x130] sm:$0xf0]  ;;  %v7377_v25 = vld [vmem:[%s11585_s1 + $0x4e4] sm:$0xf]  ;;  %v5539_v29 = vor.u32 %v7383_v11, %v5538_v9  ;;  %v5271_v30 = vor.u32 %v7313_v18, %v5268_v19 }
  0x35   :  { %v5396_v24 = vld [vmem:[%s11585_s1 + $0x3f0] sm:$0xf0]  ;;  %v5047_v32 = vor.u32 %v7257_v20, %v5044_v21  ;;  %v7253_v37 = vld [vmem:[%s11585_s1 + $0x104] sm:$0xf]  ;;  %v8401_v40 = vpack.c.b16 %v264_v27, %v264_v27 }
  0x36   :  { %1343 = vmatpush.bf16.msrb.mxu0 %v5459_v41  ;;  %1356 = vmatpush.bf16.msrb.mxu1 %v5587_v42  ;;  %v5524_v26 = vld [vmem:[%s11585_s1 + $0x4f0] sm:$0xf0]  ;;  %v5399_v35 = vor.u32 %v7345_v22, %v5396_v24  ;;  %v7341_v39 = vld [vmem:[%s11585_s1 + $0x3c4] sm:$0xf]  ;;  %v8403_v41 = vpack.c.b16 %v265_v28, %v265_v28 }
  0x37   :  { %1393 = vmatpush.bf16.msra.mxu2 %v5111_v33  ;;  %v7309_v33 = vld [vmem:[%s11585_s1 + $0x2c4] sm:$0xf]  ;;  %v5252_v34 = vld [vmem:[%s11585_s1 + $0x2d0] sm:$0xf0]  ;;  %v5527_v36 = vor.u32 %v7377_v25, %v5524_v26 }
  0x38   :  { %1382 = vmatpush.bf16.msrb.mxu3 %v4951_v45  ;;  %5680 = vmatmul.msk.bf16.vlgmr.msrb.gmra.mxu2 %vm1270_vm1, %v8313_v53  ;;  %v5028_v38 = vld [vmem:[%s11585_s1 + $0x110] sm:$0xf0]  ;;  %v7373_v43 = vld [vmem:[%s11585_s1 + $0x4c4] sm:$0xf]  ;;  %v5255_v45 = vor.u32 %v7309_v33, %v5252_v34 }
  0x39   :  { %v5380_v42 = vld [vmem:[%s11585_s1 + $0x3d0] sm:$0xf0]  ;;  %v5031_v48 = vor.u32 %v7253_v37, %v5028_v38  ;;  %v7305_v49 = vld [vmem:[%s11585_s1 + $0x2a4] sm:$0xf] }
  0x3a   :  { %1344 = vmatpush.bf16.msrb.mxu0 %v5443_v54  ;;  %1357 = vmatpush.bf16.msrb.mxu1 %v5571_v55  ;;  %v5508_v44 = vld [vmem:[%s11585_s1 + $0x4d0] sm:$0xf0]  ;;  %v5383_v51 = vor.u32 %v7341_v39, %v5380_v42  ;;  %v7337_v54 = vld [vmem:[%s11585_s1 + $0x3a4] sm:$0xf] }
  0x3b   :  { %1394 = vmatpush.bf16.msra.mxu2 %v5095_v46  ;;  %v7409_v46 = vld [vmem:[%s11585_s1 + $0x5e4] sm:$0xf]  ;;  %v5652_v47 = vld [vmem:[%s11585_s1 + $0x5f0] sm:$0xf0]  ;;  %v5511_v52 = vor.u32 %v7373_v43, %v5508_v44  ;;  %v871_v43 = vunpack.c.h.b16 %v8120_v16 }
  0x3c   :  { %1383 = vmatpush.bf16.msrb.mxu3 %v4935_v59  ;;  %v5236_v50 = vld [vmem:[%s11585_s1 + $0x2b0] sm:$0xf0]  ;;  %v5655_v55 = vor.u32 %v7409_v46, %v5652_v47  ;;  %v7369_v58 = vld [vmem:[%s11585_s1 + $0x4a4] sm:$0xf] }
  0x3d   :  { %v5364_v57 = vld [vmem:[%s11585_s1 + $0x3b0] sm:$0xf0]  ;;  %v7405_v61 = vld [vmem:[%s11585_s1 + $0x5c4] sm:$0xf] }
  0x3e   :  { %1345 = vmatpush.bf16.msrb.mxu0 %v5427_v6  ;;  %1358 = vmatpush.bf16.msrb.mxu1 %v5555_v10  ;;  %v5492_v59 = vld [vmem:[%s11585_s1 + $0x4b0] sm:$0xf0]  ;;  %v7301_v2 = vld [vmem:[%s11585_s1 + $0x284] sm:$0xf]  ;;  %v5367_v4 = vor.u32 %v7337_v54, %v5364_v57 }
  0x3f   :  { %1395 = vmatpush.bf16.msra.mxu2 %v5079_v60  ;;  %v5239_v60 = vor.u32 %v7305_v49, %v5236_v50  ;;  %v5636_v0 = vld [vmem:[%s11585_s1 + $0x5d0] sm:$0xf0]  ;;  %v5495_v5 = vor.u32 %v7369_v58, %v5492_v59  ;;  %v7333_v6 = vld [vmem:[%s11585_s1 + $0x384] sm:$0xf] }
  0x40   :  { %1384 = vmatpush.bf16.msrb.mxu3 %v4919_v14  ;;  %v5220_v3 = vld [vmem:[%s11585_s1 + $0x290] sm:$0xf0]  ;;  %v5639_v7 = vor.u32 %v7405_v61, %v5636_v0  ;;  %v7365_v9 = vld [vmem:[%s11585_s1 + $0x484] sm:$0xf] }
  0x41   :  { %v5348_v8 = vld [vmem:[%s11585_s1 + $0x390] sm:$0xf0]  ;;  %v5223_v11 = vor.u32 %v7301_v2, %v5220_v3  ;;  %v7401_v12 = vld [vmem:[%s11585_s1 + $0x5a4] sm:$0xf] }
  0x42   :  { %1346 = vmatpush.bf16.msrb.mxu0 %v5411_v23  ;;  %1359 = vmatpush.bf16.msrb.mxu1 %v5539_v29  ;;  %v5476_v10 = vld [vmem:[%s11585_s1 + $0x490] sm:$0xf0]  ;;  %v7297_v14 = vld [vmem:[%s11585_s1 + $0x264] sm:$0xf]  ;;  %v5351_v17 = vor.u32 %v7333_v6, %v5348_v8 }
  0x43   :  { %1396 = vmatpush.bf16.msra.mxu2 %v5063_v15  ;;  %v5620_v13 = vld [vmem:[%s11585_s1 + $0x5b0] sm:$0xf0]  ;;  %v5479_v18 = vor.u32 %v7365_v9, %v5476_v10  ;;  %v7329_v19 = vld [vmem:[%s11585_s1 + $0x364] sm:$0xf] }
  0x44   :  { %1385 = vmatpush.bf16.msrb.mxu3 %v4903_v31  ;;  %v5204_v15 = vld [vmem:[%s11585_s1 + $0x270] sm:$0xf0]  ;;  %v5623_v20 = vor.u32 %v7401_v12, %v5620_v13  ;;  %v7361_v22 = vld [vmem:[%s11585_s1 + $0x464] sm:$0xf] }
  0x45   :  { %1347 = vmatmul.bf16.vlgmr.msrb.gmra.mxu0 %v8401_v40  ;;  %1360 = vmatmul.bf16.vlgmr.msrb.gmra.mxu1 %v8403_v41  ;;  %v5332_v21 = vld [vmem:[%s11585_s1 + $0x370] sm:$0xf0]  ;;  %v5207_v24 = vor.u32 %v7297_v14, %v5204_v15  ;;  %v7397_v25 = vld [vmem:[%s11585_s1 + $0x584] sm:$0xf] }
  0x46   :  { %1404 = vmatpush.bf16.msra.mxu0 %v5271_v30  ;;  %1417 = vmatpush.bf16.msra.mxu1 %v5399_v35  ;;  %v5460_v23 = vld [vmem:[%s11585_s1 + $0x470] sm:$0xf0]  ;;  %v7293_v27 = vld [vmem:[%s11585_s1 + $0x244] sm:$0xf]  ;;  %v5335_v29 = vor.u32 %v7329_v19, %v5332_v21 }
  0x47   :  { %1397 = vmatpush.bf16.msra.mxu2 %v5047_v32  ;;  %1386 = vmatmul.bf16.vlgmr.msrb.gmra.mxu3 %v8204_v62  ;;  %v5604_v26 = vld [vmem:[%s11585_s1 + $0x590] sm:$0xf0]  ;;  %v5463_v30 = vor.u32 %v7361_v22, %v5460_v23  ;;  %v7325_v31 = vld [vmem:[%s11585_s1 + $0x344] sm:$0xf] }
  0x48   :  { %1430 = vmatpush.bf16.msra.mxu3 %v5527_v36  ;;  %v5188_v28 = vld [vmem:[%s11585_s1 + $0x250] sm:$0xf0]  ;;  %v5607_v32 = vor.u32 %v7397_v25, %v5604_v26  ;;  %v7357_v34 = vld [vmem:[%s11585_s1 + $0x444] sm:$0xf] }
  0x49   :  { %v5316_v33 = vld [vmem:[%s11585_s1 + $0x350] sm:$0xf0]  ;;  %v5191_v36 = vor.u32 %v7293_v27, %v5188_v28  ;;  %v7393_v37 = vld [vmem:[%s11585_s1 + $0x564] sm:$0xf] }
  0x4a   :  { %1405 = vmatpush.bf16.msra.mxu0 %v5255_v45  ;;  %1418 = vmatpush.bf16.msra.mxu1 %v5383_v51  ;;  %v5444_v35 = vld [vmem:[%s11585_s1 + $0x450] sm:$0xf0]  ;;  %v7289_v39 = vld [vmem:[%s11585_s1 + $0x224] sm:$0xf]  ;;  %v5319_v44 = vor.u32 %v7325_v31, %v5316_v33 }
  0x4b   :  { %1398 = vmatpush.bf16.msra.mxu2 %v5031_v48  ;;  %v5588_v38 = vld [vmem:[%s11585_s1 + $0x570] sm:$0xf0]  ;;  %v5447_v45 = vor.u32 %v7357_v34, %v5444_v35  ;;  %v7321_v46 = vld [vmem:[%s11585_s1 + $0x324] sm:$0xf] }
  0x4c   :  { %1431 = vmatpush.bf16.msra.mxu3 %v5511_v52  ;;  %v5172_v42 = vld [vmem:[%s11585_s1 + $0x230] sm:$0xf0]  ;;  %v5591_v48 = vor.u32 %v7393_v37, %v5588_v38  ;;  %v7353_v49 = vld [vmem:[%s11585_s1 + $0x424] sm:$0xf] }
  0x4d   :  { %v5300_v47 = vld [vmem:[%s11585_s1 + $0x330] sm:$0xf0]  ;;  %v7389_v50 = vld [vmem:[%s11585_s1 + $0x544] sm:$0xf]  ;;  %v5175_v51 = vor.u32 %v7289_v39, %v5172_v42 }
  0x4e   :  { %1406 = vmatpush.bf16.msra.mxu0 %v5239_v60  ;;  %1399 = vmatmul.bf16.vlgmr.msra.gmra.mxu2 %v8208_v1  ;;  %v5428_v16 = vld [vmem:[%s11585_s1 + $0x430] sm:$0xf0] }
  0x4f   :  { %1443 = vmatpush.bf16.msrb.mxu2 %v5655_v55  ;;  %1419 = vmatpush.bf16.msra.mxu1 %v5367_v4  ;;  %v5572_v52 = vld [vmem:[%s11585_s1 + $0x550] sm:$0xf0] }
  0x50   :  { %1432 = vmatpush.bf16.msra.mxu3 %v5495_v5 }
  0x52   :  { %1407 = vmatpush.bf16.msra.mxu0 %v5223_v11 }
  0x53   :  { %1444 = vmatpush.bf16.msrb.mxu2 %v5639_v7  ;;  %1420 = vmatpush.bf16.msra.mxu1 %v5351_v17 }
  0x54   :  { %1433 = vmatpush.bf16.msra.mxu3 %v5479_v18 }
  0x56   :  { %1408 = vmatpush.bf16.msra.mxu0 %v5207_v24 }
  0x57   :  { %1445 = vmatpush.bf16.msrb.mxu2 %v5623_v20  ;;  %1421 = vmatpush.bf16.msra.mxu1 %v5335_v29 }
  0x58   :  { %1434 = vmatpush.bf16.msra.mxu3 %v5463_v30 }
  0x5a   :  { %1409 = vmatpush.bf16.msra.mxu0 %v5191_v36 }
  0x5b   :  { %1446 = vmatpush.bf16.msrb.mxu2 %v5607_v32 }
  0x5c   :  { %19 = vsyncpa [#allocation5], 0  ;;  %v7285_v54 = vld [vmem:[%s11585_s1 + $0x204] sm:$0xf]  ;;  %v5156_v55 = vld [vmem:[%s11585_s1 + $0x210] sm:$0xf0]  ;;  %1422 = vmatpush.bf16.msra.mxu1 %v5319_v44  ;;  %1435 = vmatpush.bf16.msra.mxu3 %v5447_v45  ;;  %v5303_v57 = vor.u32 %v7321_v46, %v5300_v47  ;;  %v5431_v58 = vor.u32 %v7353_v49, %v5428_v16  ;;  %v1071_v60 = vpack.c.b16 %v871_v43, %v871_v43 }
  0x5d   :  { %v7317_v59 = vld [vmem:[%s11585_s1 + $0x304] sm:$0xf]  ;;  %v5274_v61 = vld [vmem:[%s11585_s1 + $0x2e8] sm:$0xf]  ;;  %v7316_v0 = vld [vmem:[%s11585_s1 + $0x2f4] sm:$0xf0]  ;;  %v5575_v2 = vor.u32 %v7389_v50, %v5572_v52  ;;  %v5159_v6 = vor.u32 %v7285_v54, %v5156_v55 }
  0x5e   :  { %v5284_v3 = vld [vmem:[%s11585_s1 + $0x310] sm:$0xf0]  ;;  %v7349_v4 = vld [vmem:[%s11585_s1 + $0x404] sm:$0xf]  ;;  %1410 = vmatpush.bf16.msra.mxu0 %v5175_v51  ;;  %v5018_v9 = vld [vmem:[%s11585_s1 + $0xe8] sm:$0xf]  ;;  %v5275_v11 = vor.u32 %v7316_v0, %v5274_v61 }
  0x5f   :  { %1447 = vmatpush.bf16.msrb.mxu2 %v5591_v48  ;;  %v5412_v5 = vld [vmem:[%s11585_s1 + $0x410] sm:$0xf0]  ;;  %v7385_v7 = vld [vmem:[%s11585_s1 + $0x524] sm:$0xf]  ;;  %v7252_v10 = vld [vmem:[%s11585_s1 + $0xf4] sm:$0xf0]  ;;  %v5287_v12 = vor.u32 %v7317_v59, %v5284_v3 }
  0x60   :  { %v5556_v8 = vld [vmem:[%s11585_s1 + $0x530] sm:$0xf0]  ;;  %1423 = vmatpush.bf16.msra.mxu1 %v5303_v57  ;;  %1436 = vmatpush.bf16.msra.mxu3 %v5431_v58  ;;  %v5415_v13 = vor.u32 %v7349_v4, %v5412_v5  ;;  %v1279_v14 = vsel %vm1274_vm0, %v1071_v60, 0  ;;  %v7381_v15 = vld [vmem:[%s11585_s1 + $0x504] sm:$0xf]  ;;  %v5019_v21 = vor.u32 %v7252_v10, %v5018_v9  ;;  %s7879_s19 = smov 126  }
  0x61   :  { %v5559_v17 = vor.u32 %v7385_v7, %v5556_v8  ;;  %v5540_v18 = vld [vmem:[%s11585_s1 + $0x510] sm:$0xf0]  ;;  %v5258_v19 = vld [vmem:[%s11585_s1 + $0x2c8] sm:$0xf]  ;;  %v7312_v20 = vld [vmem:[%s11585_s1 + $0x2d4] sm:$0xf0] }
  0x62   :  { %1411 = vmatpush.bf16.msra.mxu0 %v5159_v6  ;;  %v7413_v22 = vld [vmem:[%s11585_s1 + $0x604] sm:$0xf]  ;;  %v5668_v23 = vld [vmem:[%s11585_s1 + $0x610] sm:$0xf0]  ;;  %v5002_v24 = vld [vmem:[%s11585_s1 + $0xc8] sm:$0xf]  ;;  %v5259_v30 = vor.u32 %v7312_v20, %v5258_v19  ;;  %v5543_v31 = vor.u32 %v7381_v15, %v5540_v18 }
  0x63   :  { %1448 = vmatpush.bf16.msrb.mxu2 %v5575_v2  ;;  %v7248_v25 = vld [vmem:[%s11585_s1 + $0xd4] sm:$0xf0]  ;;  %v5146_v26 = vld [vmem:[%s11585_s1 + $0x1e8] sm:$0xf]  ;;  %v5671_v32 = vor.u32 %v7413_v22, %v5668_v23  ;;  %s4882_s28 = sshll.u32 %s11596_s12, 4  ;;  %s7883_s12 = smov [#allocation2]   ;;  %s4883_s28 = int_to_ptr.hbm [resolvable:$true] %s4882_s28 }
  0x64   :  { %v7284_v27 = vld [vmem:[%s11585_s1 + $0x1f4] sm:$0xf0]  ;;  %1424 = vmatpush.bf16.msra.mxu1 %v5287_v12  ;;  %1437 = vmatpush.bf16.msra.mxu3 %v5415_v13  ;;  %v5402_v28 = vld [vmem:[%s11585_s1 + $0x3e8] sm:$0xf]  ;;  %v5003_v35 = vor.u32 %v7248_v25, %v5002_v24  ;;  %s4869_s29 = sshll.u32 %s7883_s12, 4  ;;  %s4871_s14 = sshll.u32 %s11595_s11, 4  ;;  %s4870_s29 = int_to_ptr.vmem [resolvable:$true] %s4869_s29  ;;  %s4872_s14 = int_to_ptr.hbm [resolvable:$true] %s4871_s14 }
  0x65   :  { %v7348_v29 = vld [vmem:[%s11585_s1 + $0x3f4] sm:$0xf0]  ;;  %v5242_v33 = vld [vmem:[%s11585_s1 + $0x2a8] sm:$0xf]  ;;  %1412 = vmatmul.bf16.vlgmr.msra.gmra.mxu0 %v8187_v56  ;;  %v5147_v36 = vor.u32 %v7284_v27, %v5146_v26  ;;  %vm4862_vm2 = vcmask 125952  }
  0x66   :  { %1495 = vmatpush.bf16.msrb.mxu0 %v5275_v11  ;;  %v7308_v34 = vld [vmem:[%s11585_s1 + $0x2b4] sm:$0xf0]  ;;  %v4986_v37 = vld [vmem:[%s11585_s1 + $0xa8] sm:$0xf]  ;;  %v5403_v38 = vor.u32 %v7348_v29, %v5402_v28 }
  0x67   :  { %1449 = vmatpush.bf16.msrb.mxu2 %v5559_v17  ;;  %1438 = vmatmul.bf16.vlgmr.msra.gmra.mxu3 %v8401_v40  ;;  %v7244_v39 = vld [vmem:[%s11585_s1 + $0xb4] sm:$0xf0]  ;;  %v5130_v42 = vld [vmem:[%s11585_s1 + $0x1c8] sm:$0xf]  ;;  %v5243_v46 = vor.u32 %v7308_v34, %v5242_v33 }
  0x68   :  { %1462 = vmatpush.bf16.msrb.mxu3 %v1279_v14  ;;  %1469 = vmatpush.bf16.msrb.mxu1 %v5019_v21  ;;  %v7280_v43 = vld [vmem:[%s11585_s1 + $0x1d4] sm:$0xf0]  ;;  %v5386_v44 = vld [vmem:[%s11585_s1 + $0x3c8] sm:$0xf]  ;;  %v4987_v49 = vor.u32 %v7244_v39, %v4986_v37 }
  0x69   :  { %1425 = vmatmul.bf16.vlgmr.msra.gmra.mxu1 %v8206_v63  ;;  %v7344_v45 = vld [vmem:[%s11585_s1 + $0x3d4] sm:$0xf0]  ;;  %v5226_v47 = vld [vmem:[%s11585_s1 + $0x288] sm:$0xf]  ;;  %v5131_v16 = vor.u32 %v7280_v43, %v5130_v42 }
  0x6a   :  { %1496 = vmatpush.bf16.msrb.mxu0 %v5259_v30  ;;  %v7304_v48 = vld [vmem:[%s11585_s1 + $0x294] sm:$0xf0]  ;;  %v4970_v50 = vld [vmem:[%s11585_s1 + $0x88] sm:$0xf]  ;;  %v5387_v51 = vor.u32 %v7344_v45, %v5386_v44 }
  0x6b   :  { %1450 = vmatpush.bf16.msrb.mxu2 %v5543_v31  ;;  %v7240_v52 = vld [vmem:[%s11585_s1 + $0x94] sm:$0xf0]  ;;  %v5114_v54 = vld [vmem:[%s11585_s1 + $0x1a8] sm:$0xf]  ;;  %v5227_v59 = vor.u32 %v7304_v48, %v5226_v47 }
  0x6c   :  { %1463 = vmatpush.bf16.msrb.mxu3 %v5671_v32  ;;  %1470 = vmatpush.bf16.msrb.mxu1 %v5003_v35  ;;  %v7276_v55 = vld [vmem:[%s11585_s1 + $0x1b4] sm:$0xf0]  ;;  %v5370_v57 = vld [vmem:[%s11585_s1 + $0x3a8] sm:$0xf]  ;;  %v4971_v0 = vor.u32 %v7240_v52, %v4970_v50 }
  0x6d   :  { %v7340_v58 = vld [vmem:[%s11585_s1 + $0x3b4] sm:$0xf0]  ;;  %v5210_v60 = vld [vmem:[%s11585_s1 + $0x268] sm:$0xf]  ;;  %v5115_v2 = vor.u32 %v7276_v55, %v5114_v54 }
  0x6e   :  { %1451 = vmatmul.bf16.vlgmr.msrb.gmra.mxu2 %v8403_v41  ;;  %1497 = vmatpush.bf16.msrb.mxu0 %v5243_v46  ;;  %v7300_v61 = vld [vmem:[%s11585_s1 + $0x274] sm:$0xf0]  ;;  %v4954_v3 = vld [vmem:[%s11585_s1 + $0x68] sm:$0xf]  ;;  %v5371_v4 = vor.u32 %v7340_v58, %v5370_v57 }
  0x6f   :  { %1508 = vmatpush.bf16.msra.mxu2 %v5403_v38  ;;  %v7236_v5 = vld [vmem:[%s11585_s1 + $0x74] sm:$0xf0]  ;;  %v5098_v6 = vld [vmem:[%s11585_s1 + $0x188] sm:$0xf]  ;;  %v5211_v10 = vor.u32 %v7300_v61, %v5210_v60 }
  0x70   :  { %1482 = vmatpush.bf16.msra.mxu3 %v5147_v36  ;;  %1471 = vmatpush.bf16.msrb.mxu1 %v4987_v49  ;;  %v7272_v7 = vld [vmem:[%s11585_s1 + $0x194] sm:$0xf0]  ;;  %v5354_v8 = vld [vmem:[%s11585_s1 + $0x388] sm:$0xf]  ;;  %v4955_v13 = vor.u32 %v7236_v5, %v4954_v3 }
  0x71   :  { %v7336_v9 = vld [vmem:[%s11585_s1 + $0x394] sm:$0xf0]  ;;  %v5194_v11 = vld [vmem:[%s11585_s1 + $0x248] sm:$0xf]  ;;  %v5099_v14 = vor.u32 %v7272_v7, %v5098_v6  ;;  %v7282_v6 = vld [vmem:[%s11585_s1 + $0x1ec] sm:$0xf] }
  0x72   :  { %1498 = vmatpush.bf16.msrb.mxu0 %v5227_v59  ;;  %v7296_v12 = vld [vmem:[%s11585_s1 + $0x254] sm:$0xf0]  ;;  %v4938_v15 = vld [vmem:[%s11585_s1 + $0x48] sm:$0xf]  ;;  %v5355_v18 = vor.u32 %v7336_v9, %v5354_v8  ;;  %v5148_v7 = vld [vmem:[%s11585_s1 + $0x1f8] sm:$0xf0] }
  0x73   :  { %1509 = vmatpush.bf16.msra.mxu2 %v5387_v51  ;;  %v8706_v17 = vld [vmem:[%s11585_s1 + $0x628] sm:$0x11]  ;;  %v7232_v19 = vld [vmem:[%s11585_s1 + $0x54] sm:$0xf0]  ;;  %v5195_v24 = vor.u32 %v7296_v12, %v5194_v11 }
  0x74   :  { %1483 = vmatpush.bf16.msra.mxu3 %v5131_v16  ;;  %1472 = vmatpush.bf16.msrb.mxu1 %v4971_v0  ;;  %v5082_v20 = vld [vmem:[%s11585_s1 + $0x168] sm:$0xf]  ;;  %v7268_v21 = vld [vmem:[%s11585_s1 + $0x174] sm:$0xf0]  ;;  %v872_v27 = vunpack.c.l.b16 %v8706_v17  ;;  %v4939_v28 = vor.u32 %v7232_v19, %v4938_v15  ;;  %v7250_v12 = vld [vmem:[%s11585_s1 + $0xec] sm:$0xf] }
  0x75   :  { %v5338_v22 = vld [vmem:[%s11585_s1 + $0x368] sm:$0xf]  ;;  %v7332_v23 = vld [vmem:[%s11585_s1 + $0x374] sm:$0xf0]  ;;  %v5083_v29 = vor.u32 %v7268_v21, %v5082_v20  ;;  %v7278_v21 = vld [vmem:[%s11585_s1 + $0x1cc] sm:$0xf] }
  0x76   :  { %1499 = vmatpush.bf16.msrb.mxu0 %v5211_v10  ;;  %v5178_v25 = vld [vmem:[%s11585_s1 + $0x228] sm:$0xf]  ;;  %v7292_v26 = vld [vmem:[%s11585_s1 + $0x234] sm:$0xf0]  ;;  %v5339_v31 = vor.u32 %v7332_v23, %v5338_v22  ;;  %v1072_v42 = vpack.c.b16 %v872_v27, %v872_v27  ;;  %v5132_v22 = vld [vmem:[%s11585_s1 + $0x1d8] sm:$0xf0] }
  0x77   :  { %1510 = vmatpush.bf16.msra.mxu2 %v5371_v4  ;;  %v4922_v30 = vld [vmem:[%s11585_s1 + $0x28] sm:$0xf]  ;;  %5681 = vmatmul.msk.bf16.vlgmr.msrb.gmra.mxu3 %vm1270_vm1, %v8313_v53  ;;  %v7228_v32 = vld [vmem:[%s11585_s1 + $0x34] sm:$0xf0]  ;;  %v5179_v37 = vor.u32 %v7292_v26, %v5178_v25 }
  0x78   :  { %1484 = vmatpush.bf16.msra.mxu3 %v5115_v2  ;;  %1473 = vmatpush.bf16.msrb.mxu1 %v4955_v13  ;;  %v5066_v33 = vld [vmem:[%s11585_s1 + $0x148] sm:$0xf]  ;;  %v7264_v34 = vld [vmem:[%s11585_s1 + $0x154] sm:$0xf0]  ;;  %v4923_v43 = vor.u32 %v7228_v32, %v4922_v30  ;;  %v1282_v55 = vsel %vm1274_vm0, %v1072_v42, 0 }
  0x79   :  { %v5322_v35 = vld [vmem:[%s11585_s1 + $0x348] sm:$0xf]  ;;  %v7328_v36 = vld [vmem:[%s11585_s1 + $0x354] sm:$0xf0]  ;;  %v5067_v44 = vor.u32 %v7264_v34, %v5066_v33  ;;  %v5020_v13 = vld [vmem:[%s11585_s1 + $0xf8] sm:$0xf0] }
  0x7a   :  { %1500 = vmatpush.bf16.msrb.mxu0 %v5195_v24  ;;  %v5162_v38 = vld [vmem:[%s11585_s1 + $0x208] sm:$0xf]  ;;  %v7288_v39 = vld [vmem:[%s11585_s1 + $0x214] sm:$0xf0]  ;;  %v5323_v47 = vor.u32 %v7328_v36, %v5322_v35  ;;  %v5023_v24 = vor.u32 %v7250_v12, %v5020_v13  ;;  %v5004_v30 = vld [vmem:[%s11585_s1 + $0xd8] sm:$0xf0] }
  0x7b   :  { %1511 = vmatpush.bf16.msra.mxu2 %v5355_v18  ;;  %v4906_v45 = vld [vmem:[%s11585_s1 + $0x8] sm:$0xf]  ;;  %v7224_v46 = vld [vmem:[%s11585_s1 + $0x14] sm:$0xf0]  ;;  %v5163_v54 = vor.u32 %v7288_v39, %v5162_v38  ;;  %v5151_v18 = vor.u32 %v7282_v6, %v5148_v7  ;;  %v7274_v33 = vld [vmem:[%s11585_s1 + $0x1ac] sm:$0xf] }
  0x7c   :  { %1485 = vmatpush.bf16.msra.mxu3 %v5099_v14  ;;  %1474 = vmatpush.bf16.msrb.mxu1 %v4939_v28  ;;  %v5050_v48 = vld [vmem:[%s11585_s1 + $0x128] sm:$0xf]  ;;  %v7260_v49 = vld [vmem:[%s11585_s1 + $0x134] sm:$0xf0]  ;;  %v4907_v59 = vor.u32 %v7224_v46, %v4906_v45  ;;  %v5116_v34 = vld [vmem:[%s11585_s1 + $0x1b8] sm:$0xf0] }
  0x7d   :  { %v5306_v16 = vld [vmem:[%s11585_s1 + $0x328] sm:$0xf]  ;;  %v7324_v50 = vld [vmem:[%s11585_s1 + $0x334] sm:$0xf0]  ;;  %v5051_v60 = vor.u32 %v7260_v49, %v5050_v48  ;;  %v5119_v45 = vor.u32 %v7274_v33, %v5116_v34  ;;  %v5100_v48 = vld [vmem:[%s11585_s1 + $0x198] sm:$0xf0] }
  0x7e   :  { %1501 = vmatpush.bf16.msrb.mxu0 %v5179_v37  ;;  %v5530_v51 = vld [vmem:[%s11585_s1 + $0x4e8] sm:$0xf]  ;;  %v7380_v52 = vld [vmem:[%s11585_s1 + $0x4f4] sm:$0xf0]  ;;  %v5307_v3 = vor.u32 %v7324_v50, %v5306_v16  ;;  %v7234_v7 = vld [vmem:[%s11585_s1 + $0x6c] sm:$0xf] }
  0x7f   :  { %1512 = vmatpush.bf16.msra.mxu2 %v5339_v31  ;;  %v5034_v57 = vld [vmem:[%s11585_s1 + $0x108] sm:$0xf]  ;;  %v7256_v58 = vld [vmem:[%s11585_s1 + $0x114] sm:$0xf0]  ;;  %v5531_v4 = vor.u32 %v7380_v52, %v5530_v51  ;;  %v5135_v31 = vor.u32 %v7278_v21, %v5132_v22  ;;  %v5068_v12 = vld [vmem:[%s11585_s1 + $0x158] sm:$0xf0] }
  0x80   :  { %1486 = vmatpush.bf16.msra.mxu3 %v5083_v29  ;;  %1475 = vmatpush.bf16.msrb.mxu1 %v4923_v43  ;;  %v5290_v61 = vld [vmem:[%s11585_s1 + $0x308] sm:$0xf]  ;;  %v7416_v2 = vld [vmem:[%s11585_s1 + $0x614] sm:$0xf0]  ;;  %v5035_v15 = vor.u32 %v7256_v58, %v5034_v57  ;;  %v7246_v29 = vld [vmem:[%s11585_s1 + $0xcc] sm:$0xf] }
  0x81   :  { %v5674_v0 = vld [vmem:[%s11585_s1 + $0x608] sm:$0xf]  ;;  %v7320_v5 = vld [vmem:[%s11585_s1 + $0x314] sm:$0xf0]  ;;  %v5007_v36 = vor.u32 %v7246_v29, %v5004_v30  ;;  %v7242_v43 = vld [vmem:[%s11585_s1 + $0xac] sm:$0xf] }
  0x82   :  { %1502 = vmatpush.bf16.msrb.mxu0 %v5163_v54  ;;  %v5514_v8 = vld [vmem:[%s11585_s1 + $0x4c8] sm:$0xf]  ;;  %v7376_v9 = vld [vmem:[%s11585_s1 + $0x4d4] sm:$0xf0]  ;;  %v5675_v14 = vor.u32 %v7416_v2, %v5674_v0  ;;  %v5291_v19 = vor.u32 %v7320_v5, %v5290_v61  ;;  %v4972_v57 = vld [vmem:[%s11585_s1 + $0x98] sm:$0xf0] }
  0x83   :  { %1513 = vmatpush.bf16.msra.mxu2 %v5323_v47  ;;  %v5658_v10 = vld [vmem:[%s11585_s1 + $0x5e8] sm:$0xf]  ;;  %v7412_v11 = vld [vmem:[%s11585_s1 + $0x5f4] sm:$0xf0]  ;;  %v5515_v20 = vor.u32 %v7376_v9, %v5514_v8  ;;  %v7270_v47 = vld [vmem:[%s11585_s1 + $0x18c] sm:$0xf] }
  0x84   :  { %1487 = vmatpush.bf16.msra.mxu3 %v5067_v44  ;;  %1476 = vmatpush.bf16.msrb.mxu1 %v4907_v59  ;;  %v5659_v23 = vor.u32 %v7412_v11, %v5658_v10  ;;  %v5498_v25 = vld [vmem:[%s11585_s1 + $0x4a8] sm:$0xf]  ;;  %v7372_v26 = vld [vmem:[%s11585_s1 + $0x4b4] sm:$0xf0]  ;;  %v4988_v44 = vld [vmem:[%s11585_s1 + $0xb8] sm:$0xf0]  ;;  %v5103_v58 = vor.u32 %v7270_v47, %v5100_v48 }
  0x85   :  { %1503 = vmatmul.bf16.vlgmr.msrb.gmra.mxu0 %v8187_v56  ;;  %v5642_v27 = vld [vmem:[%s11585_s1 + $0x5c8] sm:$0xf]  ;;  %v7408_v28 = vld [vmem:[%s11585_s1 + $0x5d4] sm:$0xf0]  ;;  %v5499_v32 = vor.u32 %v7372_v26, %v5498_v25  ;;  %v4991_v16 = vor.u32 %v7242_v43, %v4988_v44  ;;  %v5084_v61 = vld [vmem:[%s11585_s1 + $0x178] sm:$0xf0] }
  0x86   :  { %1553 = vmatpush.bf16.msra.mxu0 %v1282_v55  ;;  %v5643_v35 = vor.u32 %v7408_v28, %v5642_v27  ;;  %v5482_v37 = vld [vmem:[%s11585_s1 + $0x488] sm:$0xf]  ;;  %v7368_v38 = vld [vmem:[%s11585_s1 + $0x494] sm:$0xf0]  ;;  %v7238_v55 = vld [vmem:[%s11585_s1 + $0x8c] sm:$0xf] }
  0x87   :  { %1514 = vmatpush.bf16.msra.mxu2 %v5307_v3  ;;  %1477 = vmatmul.bf16.vlgmr.msrb.gmra.mxu1 %v8204_v62  ;;  %v5626_v39 = vld [vmem:[%s11585_s1 + $0x5a8] sm:$0xf]  ;;  %v7404_v42 = vld [vmem:[%s11585_s1 + $0x5b4] sm:$0xf0]  ;;  %v5483_v46 = vor.u32 %v7368_v38, %v5482_v37  ;;  %v4975_v2 = vor.u32 %v7238_v55, %v4972_v57  ;;  %v4956_v8 = vld [vmem:[%s11585_s1 + $0x78] sm:$0xf0] }
  0x88   :  { %1488 = vmatpush.bf16.msra.mxu3 %v5051_v60  ;;  %1521 = vmatpush.bf16.msra.mxu1 %v5531_v4  ;;  %v5627_v49 = vor.u32 %v7404_v42, %v5626_v39  ;;  %v5466_v50 = vld [vmem:[%s11585_s1 + $0x468] sm:$0xf]  ;;  %v7364_v51 = vld [vmem:[%s11585_s1 + $0x474] sm:$0xf0]  ;;  %v7266_v60 = vld [vmem:[%s11585_s1 + $0x16c] sm:$0xf] }
  0x89   :  { %v5610_v52 = vld [vmem:[%s11585_s1 + $0x588] sm:$0xf]  ;;  %v7400_v54 = vld [vmem:[%s11585_s1 + $0x594] sm:$0xf0]  ;;  %v5467_v59 = vor.u32 %v7364_v51, %v5466_v50  ;;  %v5087_v9 = vor.u32 %v7266_v60, %v5084_v61  ;;  %v7262_v11 = vld [vmem:[%s11585_s1 + $0x14c] sm:$0xf] }
  0x8a   :  { %1554 = vmatpush.bf16.msra.mxu0 %v5675_v14  ;;  %v5611_v0 = vor.u32 %v7400_v54, %v5610_v52  ;;  %v5450_v3 = vld [vmem:[%s11585_s1 + $0x448] sm:$0xf]  ;;  %v7360_v4 = vld [vmem:[%s11585_s1 + $0x454] sm:$0xf0]  ;;  %v4959_v14 = vor.u32 %v7234_v7, %v4956_v8  ;;  %v7230_v21 = vld [vmem:[%s11585_s1 + $0x4c] sm:$0xf] }
  0x8b   :  { %1515 = vmatpush.bf16.msra.mxu2 %v5291_v19  ;;  %v5594_v5 = vld [vmem:[%s11585_s1 + $0x568] sm:$0xf]  ;;  %v7396_v6 = vld [vmem:[%s11585_s1 + $0x574] sm:$0xf0]  ;;  %v5451_v10 = vor.u32 %v7360_v4, %v5450_v3  ;;  %v4940_v22 = vld [vmem:[%s11585_s1 + $0x58] sm:$0xf0] }
  0x8c   :  { %1489 = vmatpush.bf16.msra.mxu3 %v5035_v15  ;;  %1522 = vmatpush.bf16.msra.mxu1 %v5515_v20  ;;  %v5595_v13 = vor.u32 %v7396_v6, %v5594_v5  ;;  %v5434_v15 = vld [vmem:[%s11585_s1 + $0x428] sm:$0xf]  ;;  %v7392_v20 = vld [vmem:[%s11585_s1 + $0x554] sm:$0xf0]  ;;  %v7258_v25 = vld [vmem:[%s11585_s1 + $0x12c] sm:$0xf]  ;;  %v4943_v28 = vor.u32 %v7230_v21, %v4940_v22 }
  0x8d   :  { %v5578_v19 = vld [vmem:[%s11585_s1 + $0x548] sm:$0xf]  ;;  %v5052_v26 = vld [vmem:[%s11585_s1 + $0x138] sm:$0xf0]  ;;  %v7352_v30 = vld [vmem:[%s11585_s1 + $0x414] sm:$0xf0] }
  0x8e   :  { %1573 = vmatpush.bf16.msrb.mxu0 %v5151_v18  ;;  %1516 = vmatmul.bf16.vlgmr.msra.gmra.mxu2 %v8206_v63  ;;  %v7356_v18 = vld [vmem:[%s11585_s1 + $0x434] sm:$0xf0]  ;;  %v5579_v27 = vor.u32 %v7392_v20, %v5578_v19  ;;  %v5418_v29 = vld [vmem:[%s11585_s1 + $0x408] sm:$0xf]  ;;  %v7226_v33 = vld [vmem:[%s11585_s1 + $0x2c] sm:$0xf]  ;;  %v5055_v37 = vor.u32 %v7258_v25, %v5052_v26 }
  0x8f   :  { %1560 = vmatpush.bf16.msrb.mxu2 %v5023_v24  ;;  %1490 = vmatmul.bf16.vlgmr.msra.gmra.mxu3 %v8208_v1  ;;  %v5435_v24 = vor.u32 %v7356_v18, %v5434_v15  ;;  %v4924_v34 = vld [vmem:[%s11585_s1 + $0x38] sm:$0xf0]  ;;  %v5419_v38 = vor.u32 %v7352_v30, %v5418_v29  ;;  %v5546_v39 = vld [vmem:[%s11585_s1 + $0x508] sm:$0xf]  ;;  %v7254_v42 = vld [vmem:[%s11585_s1 + $0x10c] sm:$0xf] }
  0x90   :  { %1534 = vmatpush.bf16.msrb.mxu3 %v5659_v23  ;;  %1523 = vmatpush.bf16.msra.mxu1 %v5499_v32  ;;  %v5071_v23 = vor.u32 %v7262_v11, %v5068_v12  ;;  %v7388_v32 = vld [vmem:[%s11585_s1 + $0x534] sm:$0xf0]  ;;  %v5036_v43 = vld [vmem:[%s11585_s1 + $0x118] sm:$0xf0]  ;;  %v7410_v47 = vld [vmem:[%s11585_s1 + $0x5ec] sm:$0xf] }
  0x91   :  { %v5660_v48 = vld [vmem:[%s11585_s1 + $0x5f8] sm:$0xf0]  ;;  %v7310_v51 = vld [vmem:[%s11585_s1 + $0x2cc] sm:$0xf]  ;;  %v5039_v57 = vor.u32 %v7254_v42, %v5036_v43 }
  0x92   :  { %1574 = vmatpush.bf16.msrb.mxu0 %v5135_v31  ;;  %v5562_v31 = vld [vmem:[%s11585_s1 + $0x528] sm:$0xf]  ;;  %v4908_v50 = vld [vmem:[%s11585_s1 + $0x18] sm:$0xf0]  ;;  %v7346_v54 = vld [vmem:[%s11585_s1 + $0x3ec] sm:$0xf]  ;;  %v5663_v60 = vor.u32 %v7410_v47, %v5660_v48 }
  0x93   :  { %1561 = vmatpush.bf16.msrb.mxu2 %v5007_v36  ;;  %v5276_v36 = vld [vmem:[%s11585_s1 + $0x2f8] sm:$0xf0]  ;;  %v5563_v44 = vor.u32 %v7388_v32, %v5562_v31  ;;  %v7306_v6 = vld [vmem:[%s11585_s1 + $0x2ac] sm:$0xf] }
  0x94   :  { %1535 = vmatpush.bf16.msrb.mxu3 %v5643_v35  ;;  %1524 = vmatpush.bf16.msra.mxu1 %v5483_v46  ;;  %v7314_v35 = vld [vmem:[%s11585_s1 + $0x2ec] sm:$0xf]  ;;  %v7384_v46 = vld [vmem:[%s11585_s1 + $0x514] sm:$0xf0]  ;;  %v5260_v52 = vld [vmem:[%s11585_s1 + $0x2d8] sm:$0xf0] }
  0x95   :  { %5682 = vmatmul.msk.bf16.vlgmr.msra.gmra.mxu0 %vm1270_vm1, %v8313_v53  ;;  %v5404_v55 = vld [vmem:[%s11585_s1 + $0x3f8] sm:$0xf0]  ;;  %v5547_v61 = vor.u32 %v7384_v46, %v5546_v39  ;;  %v5263_v4 = vor.u32 %v7310_v51, %v5260_v52  ;;  %v7374_v11 = vld [vmem:[%s11585_s1 + $0x4cc] sm:$0xf] }
  0x96   :  { %1575 = vmatpush.bf16.msrb.mxu0 %v5119_v45  ;;  %v4927_v45 = vor.u32 %v7226_v33, %v4924_v34  ;;  %v5644_v3 = vld [vmem:[%s11585_s1 + $0x5d8] sm:$0xf0]  ;;  %v5407_v5 = vor.u32 %v7346_v54, %v5404_v55  ;;  %v7302_v20 = vld [vmem:[%s11585_s1 + $0x28c] sm:$0xf] }
  0x97   :  { %1562 = vmatpush.bf16.msrb.mxu2 %v4991_v16  ;;  %v7222_v16 = vld [vmem:[%s11585_s1 + $0xc] sm:$0xf]  ;;  %v5244_v8 = vld [vmem:[%s11585_s1 + $0x2b8] sm:$0xf0] }
  0x98   :  { %1536 = vmatpush.bf16.msrb.mxu3 %v5627_v49  ;;  %1525 = vmatpush.bf16.msra.mxu1 %v5467_v59  ;;  %v5279_v49 = vor.u32 %v7314_v35, %v5276_v36  ;;  %v5532_v59 = vld [vmem:[%s11585_s1 + $0x4f8] sm:$0xf0]  ;;  %v5247_v18 = vor.u32 %v7306_v6, %v5244_v8  ;;  %v7370_v25 = vld [vmem:[%s11585_s1 + $0x4ac] sm:$0xf] }
  0x99   :  { %v5516_v12 = vld [vmem:[%s11585_s1 + $0x4d8] sm:$0xf0]  ;;  %v7298_v31 = vld [vmem:[%s11585_s1 + $0x26c] sm:$0xf] }
  0x9a   :  { %1576 = vmatpush.bf16.msrb.mxu0 %v5103_v58  ;;  %v7378_v58 = vld [vmem:[%s11585_s1 + $0x4ec] sm:$0xf]  ;;  %v5628_v15 = vld [vmem:[%s11585_s1 + $0x5b8] sm:$0xf0]  ;;  %v5519_v21 = vor.u32 %v7374_v11, %v5516_v12 }
  0x9b   :  { %1563 = vmatpush.bf16.msrb.mxu2 %v4975_v2  ;;  %v7406_v2 = vld [vmem:[%s11585_s1 + $0x5cc] sm:$0xf]  ;;  %v5535_v7 = vor.u32 %v7378_v58, %v5532_v59  ;;  %v5228_v22 = vld [vmem:[%s11585_s1 + $0x298] sm:$0xf0] }
  0x9c   :  { %1537 = vmatpush.bf16.msrb.mxu3 %v5611_v0  ;;  %1526 = vmatpush.bf16.msra.mxu1 %v5451_v10  ;;  %v4911_v0 = vor.u32 %v7222_v16, %v4908_v50  ;;  %v5388_v10 = vld [vmem:[%s11585_s1 + $0x3d8] sm:$0xf0]  ;;  %v5231_v29 = vor.u32 %v7302_v20, %v5228_v22  ;;  %v7334_v34 = vld [vmem:[%s11585_s1 + $0x38c] sm:$0xf] }
  0x9d   :  { %v5500_v26 = vld [vmem:[%s11585_s1 + $0x4b8] sm:$0xf0]  ;;  %v7394_v42 = vld [vmem:[%s11585_s1 + $0x56c] sm:$0xf] }
  0x9e   :  { %1577 = vmatpush.bf16.msrb.mxu0 %v5087_v9  ;;  %v7342_v9 = vld [vmem:[%s11585_s1 + $0x3cc] sm:$0xf]  ;;  %v5212_v33 = vld [vmem:[%s11585_s1 + $0x278] sm:$0xf0] }
  0x9f   :  { %1564 = vmatpush.bf16.msrb.mxu2 %v4959_v14  ;;  %v7402_v14 = vld [vmem:[%s11585_s1 + $0x5ac] sm:$0xf]  ;;  %v5391_v19 = vor.u32 %v7342_v9, %v5388_v10  ;;  %v5356_v35 = vld [vmem:[%s11585_s1 + $0x398] sm:$0xf0]  ;;  %v873_v10 = vunpack.c.h.b16 %v8706_v17 }
  0xa0   :  { %1538 = vmatpush.bf16.msrb.mxu3 %v5595_v13  ;;  %1527 = vmatpush.bf16.msra.mxu1 %v5435_v24  ;;  %v5647_v13 = vor.u32 %v7406_v2, %v5644_v3  ;;  %v5372_v24 = vld [vmem:[%s11585_s1 + $0x3b8] sm:$0xf0]  ;;  %v7294_v46 = vld [vmem:[%s11585_s1 + $0x24c] sm:$0xf] }
  0xa1   :  { %v5596_v43 = vld [vmem:[%s11585_s1 + $0x578] sm:$0xf0]  ;;  %v7330_v16 = vld [vmem:[%s11585_s1 + $0x36c] sm:$0xf] }
  0xa2   :  { %1578 = vmatpush.bf16.msrb.mxu0 %v5071_v23  ;;  %v7338_v23 = vld [vmem:[%s11585_s1 + $0x3ac] sm:$0xf]  ;;  %v5340_v50 = vld [vmem:[%s11585_s1 + $0x378] sm:$0xf0]  ;;  %v5599_v54 = vor.u32 %v7394_v42, %v5596_v43 }
  0xa3   :  { %1565 = vmatpush.bf16.msrb.mxu2 %v4943_v28  ;;  %v7398_v28 = vld [vmem:[%s11585_s1 + $0x58c] sm:$0xf]  ;;  %v5375_v30 = vor.u32 %v7338_v23, %v5372_v24  ;;  %v5468_v52 = vld [vmem:[%s11585_s1 + $0x478] sm:$0xf0] }
  0xa4   :  { %1539 = vmatpush.bf16.msrb.mxu3 %v5579_v27  ;;  %1528 = vmatpush.bf16.msra.mxu1 %v5419_v38  ;;  %v5631_v27 = vor.u32 %v7402_v14, %v5628_v15  ;;  %v5484_v38 = vld [vmem:[%s11585_s1 + $0x498] sm:$0xf0]  ;;  %v7362_v51 = vld [vmem:[%s11585_s1 + $0x46c] sm:$0xf] }
  0xa5   :  { %v5580_v58 = vld [vmem:[%s11585_s1 + $0x558] sm:$0xf0]  ;;  %v5471_v2 = vor.u32 %v7362_v51, %v5468_v52  ;;  %v7386_v11 = vld [vmem:[%s11585_s1 + $0x52c] sm:$0xf]  ;;  %v5782_v51 = vld [vmem:[%s11587_s3 + $0xc0] sm:$0xf] }
  0xa6   :  { %1579 = vmatpush.bf16.msrb.mxu0 %v5055_v37  ;;  %v9082_v32 = vpop.f32.mrf.mxu0  ;;  %v9093_v36 = vpop.f32.mrf.mxu1  ;;  %v7366_v37 = vld [vmem:[%s11585_s1 + $0x48c] sm:$0xf]  ;;  %v5180_v3 = vld [vmem:[%s11585_s1 + $0x238] sm:$0xf0]  ;;  %v7443_v52 = vld [vmem:[%s11587_s3 + $0xcc] sm:$0xf0] }
  0xa7   :  { %1566 = vmatpush.bf16.msrb.mxu2 %v4927_v45  ;;  %1529 = vmatmul.bf16.vlgmr.msra.gmra.mxu1 %v8401_v40  ;;  %v5359_v45 = vor.u32 %v7334_v34, %v5356_v35  ;;  %v5487_v48 = vor.u32 %v7366_v37, %v5484_v38  ;;  %v5452_v8 = vld [vmem:[%s11585_s1 + $0x458] sm:$0xf0]  ;;  %v7286_v15 = vld [vmem:[%s11585_s1 + $0x20c] sm:$0xf]  ;;  %v5798_v37 = vld [vmem:[%s11587_s3 + $0xe0] sm:$0xf] }
  0xa8   :  { %1540 = vmatpush.bf16.msrb.mxu3 %v5563_v44  ;;  %1586 = vmatpush.bf16.msrb.mxu1 %v5279_v49  ;;  %v5215_v44 = vor.u32 %v7298_v31, %v5212_v33  ;;  %v5196_v49 = vld [vmem:[%s11585_s1 + $0x258] sm:$0xf0]  ;;  %v7322_v20 = vld [vmem:[%s11585_s1 + $0x32c] sm:$0xf]  ;;  %v7447_v38 = vld [vmem:[%s11587_s3 + $0xec] sm:$0xf0] }
  0xa9   :  { %v9110_v47 = vpop.f32.mrf.mxu2  ;;  %v5199_v59 = vor.u32 %v7294_v46, %v5196_v49  ;;  %v5564_v12 = vld [vmem:[%s11585_s1 + $0x538] sm:$0xf0]  ;;  %v7354_v22 = vld [vmem:[%s11585_s1 + $0x42c] sm:$0xf]  ;;  %v7479_v49 = vld [vmem:[%s11587_s3 + $0x1ec] sm:$0xf0] }
  0xaa   :  { %1580 = vmatpush.bf16.msrb.mxu0 %v5039_v57  ;;  %v9127_v55 = vpop.f32.mrf.mxu3  ;;  %v7390_v57 = vld [vmem:[%s11585_s1 + $0x54c] sm:$0xf]  ;;  %v5164_v17 = vld [vmem:[%s11585_s1 + $0x218] sm:$0xf0]  ;;  %v5567_v24 = vor.u32 %v7386_v11, %v5564_v12  ;;  %v5878_v11 = vld [vmem:[%s11587_s3 + $0x180] sm:$0xf] }
  0xab   :  { %1567 = vmatpush.bf16.msrb.mxu2 %v4911_v0  ;;  %v5583_v9 = vor.u32 %v7390_v57, %v5580_v58  ;;  %v5436_v23 = vld [vmem:[%s11585_s1 + $0x438] sm:$0xf0]  ;;  %v7318_v31 = vld [vmem:[%s11585_s1 + $0x30c] sm:$0xf]  ;;  %v7467_v12 = vld [vmem:[%s11587_s3 + $0x18c] sm:$0xf0] }
  0xac   :  { %1541 = vmatpush.bf16.msrb.mxu3 %v5547_v61  ;;  %1587 = vmatpush.bf16.msrb.mxu1 %v5263_v4  ;;  %v7290_v61 = vld [vmem:[%s11585_s1 + $0x22c] sm:$0xf]  ;;  %v5292_v33 = vld [vmem:[%s11585_s1 + $0x318] sm:$0xf0] }
  0xad   :  { %1581 = vmatmul.bf16.vlgmr.msrb.gmra.mxu0 %v8208_v1  ;;  %v5612_v1 = vld [vmem:[%s11585_s1 + $0x598] sm:$0xf0]  ;;  %v7326_v4 = vld [vmem:[%s11585_s1 + $0x34c] sm:$0xf]  ;;  %v5295_v46 = vor.u32 %v7318_v31, %v5292_v33  ;;  %v5702_v31 = vld [vmem:[%s11587_s3 + $0x20] sm:$0xf] }
  0xae   :  { %1625 = vmatpush.bf16.msra.mxu0 %v5663_v60  ;;  %1568 = vmatmul.bf16.vlgmr.msrb.gmra.mxu2 %v8204_v62  ;;  %v5503_v62 = vor.u32 %v7370_v25, %v5500_v26  ;;  %v5615_v39 = vor.u32 %v7398_v28, %v5612_v1  ;;  %v5343_v60 = vor.u32 %v7330_v16, %v5340_v50  ;;  %v1298_v0 = vpop.f32.mrf.mxu0  ;;  %v1311_v6 = vpop.f32.mrf.mxu1  ;;  %v5548_v28 = vld [vmem:[%s11585_s1 + $0x518] sm:$0xf0]  ;;  %v9187_v1 = vld [vmem:[%s11586_s2] sm:$0xf]  ;;  %v7350_v34 = vld [vmem:[%s11585_s1 + $0x40c] sm:$0xf] }
  0xaf   :  { %1612 = vmatpush.bf16.msra.mxu2 %v5535_v7  ;;  %1542 = vmatmul.bf16.vlgmr.msrb.gmra.mxu3 %v8403_v41  ;;  %v7358_v7 = vld [vmem:[%s11585_s1 + $0x44c] sm:$0xf]  ;;  %v1073_v25 = vpack.c.b16 %v873_v10, %v873_v10  ;;  %v5420_v35 = vld [vmem:[%s11585_s1 + $0x418] sm:$0xf0]  ;;  %v5799_v50 = vor.u32 %v7447_v38, %v5798_v37  ;;  %v5783_v0 = vor.u32 %v7443_v52, %v5782_v51  ;;  %v5830_v37 = vld [vmem:[%s11587_s3 + $0x120] sm:$0xf] }
  0xb0   :  { %1599 = vmatpush.bf16.msra.mxu3 %v5407_v5  ;;  %1588 = vmatpush.bf16.msrb.mxu1 %v5247_v18  ;;  %v5324_v5 = vld [vmem:[%s11585_s1 + $0x358] sm:$0xf0]  ;;  %v7414_v43 = vld [vmem:[%s11585_s1 + $0x60c] sm:$0xf]  ;;  %v5423_v16 = vor.u32 %v7350_v34, %v5420_v35  ;;  %v5686_v35 = vld [vmem:[%s11587_s3] sm:$0xf] }
  0xb1   :  { %v5327_v14 = vor.u32 %v7326_v4, %v5324_v5  ;;  %v1324_v18 = vpop.f32.mrf.mxu2  ;;  %v1285_v42 = vsel %vm1274_vm0, %v1073_v25, 0  ;;  %v7471_v4 = vld [vmem:[%s11587_s3 + $0x1ac] sm:$0xf0] }
  0xb2   :  { %1626 = vmatpush.bf16.msra.mxu0 %v5647_v13  ;;  %v5183_v13 = vor.u32 %v7290_v61, %v5180_v3  ;;  %v1337_v26 = vpop.f32.mrf.mxu3  ;;  %v7475_v61 = vld [vmem:[%s11587_s3 + $0x1cc] sm:$0xf0] }
  0xb3   :  { %1613 = vmatpush.bf16.msra.mxu2 %v5519_v21  ;;  %v5308_v21 = vld [vmem:[%s11585_s1 + $0x338] sm:$0xf0]  ;;  %v7455_v38 = vld [vmem:[%s11587_s3 + $0x12c] sm:$0xf0] }
  0xb4   :  { %1600 = vmatpush.bf16.msra.mxu3 %v5391_v19  ;;  %1589 = vmatpush.bf16.msrb.mxu1 %v5231_v29  ;;  %v5455_v19 = vor.u32 %v7358_v7, %v5452_v8  ;;  %v5167_v29 = vor.u32 %v7286_v15, %v5164_v17  ;;  %v5879_v15 = vor.u32 %v7467_v12, %v5878_v11  ;;  %v5862_v17 = vld [vmem:[%s11587_s3 + $0x160] sm:$0xf]  ;;  %v7451_v52 = vld [vmem:[%s11587_s3 + $0x10c] sm:$0xf0] }
  0xb6   :  { %1627 = vmatpush.bf16.msra.mxu0 %v5631_v27  ;;  %v7382_v27 = vld [vmem:[%s11585_s1 + $0x50c] sm:$0xf] }
  0xb7   :  { %1614 = vmatpush.bf16.msra.mxu2 %v5503_v62  ;;  %v5439_v62 = vor.u32 %v7354_v22, %v5436_v23 }
  0xb8   :  { %1601 = vmatpush.bf16.msra.mxu3 %v5375_v30  ;;  %1590 = vmatpush.bf16.msrb.mxu1 %v5215_v44  ;;  %v5311_v30 = vor.u32 %v7322_v20, %v5308_v21  ;;  %v5676_v44 = vld [vmem:[%s11585_s1 + $0x618] sm:$0xf0]  ;;  %v7463_v20 = vld [vmem:[%s11587_s3 + $0x16c] sm:$0xf0] }
  0xb9   :  { %v5863_v25 = vor.u32 %v7463_v20, %v5862_v17  ;;  %v5752_v17 = vld [vmem:[%s11587_s3 + $0x90] sm:$0xf0] }
  0xba   :  { %1628 = vmatpush.bf16.msra.mxu0 %v5615_v39  ;;  %v5551_v39 = vor.u32 %v7382_v27, %v5548_v28  ;;  %v5846_v28 = vld [vmem:[%s11587_s3 + $0x140] sm:$0xf] }
  0xbb   :  { %1615 = vmatpush.bf16.msra.mxu2 %v5487_v48  ;;  %v5926_v48 = vld [vmem:[%s11587_s3 + $0x1e0] sm:$0xf]  ;;  %v9227_v57 = vpop.f32.mrf.mxu2 }
  0xbc   :  { %1602 = vmatpush.bf16.msra.mxu3 %v5359_v45  ;;  %1591 = vmatpush.bf16.msrb.mxu1 %v5199_v59  ;;  %v248_v45 = vperm.slane %v9187_v1, 0  ;;  %v5927_v58 = vor.u32 %v7479_v49, %v5926_v48  ;;  %v5831_v49 = vor.u32 %v7455_v38, %v5830_v37  ;;  %v5974_v38 = vld [vmem:[%s11587_s3 + $0x240] sm:$0xf] }
  0xbe   :  { %1629 = vmatpush.bf16.msra.mxu0 %v5599_v54  ;;  %v5679_v54 = vor.u32 %v7414_v43, %v5676_v44  ;;  %v1297_v59 = vadd.f32 %v9082_v32, %v248_v45  ;;  %v7439_v32 = vld [vmem:[%s11587_s3 + $0xac] sm:$0xf0]  ;;  %v6054_v43 = vld [vmem:[%s11587_s3 + $0x2e0] sm:$0xf]  ;;  %v7445_v45 = vld [vmem:[%s11587_s3 + $0xe4] sm:$0xf] }
  0xbf   :  { %1616 = vmatpush.bf16.msra.mxu2 %v5471_v2  ;;  %v7511_v44 = vld [vmem:[%s11587_s3 + $0x2ec] sm:$0xf0] }
  0xc0   :  { %1603 = vmatpush.bf16.msra.mxu3 %v5343_v60  ;;  %1592 = vmatpush.bf16.msrb.mxu1 %v5183_v13  ;;  %v5910_v60 = vld [vmem:[%s11587_s3 + $0x1c0] sm:$0xf]  ;;  %v1310_v3 = vadd.f32 %v9093_v36, %v1297_v59  ;;  %v6055_v48 = vor.u32 %v7511_v44, %v6054_v43 }
  0xc1   :  { %v5911_v2 = vor.u32 %v7475_v61, %v5910_v60  ;;  %v5734_v13 = vld [vmem:[%s11587_s3 + $0x60] sm:$0xf]  ;;  %v7507_v61 = vld [vmem:[%s11587_s3 + $0x2cc] sm:$0xf0] }
  0xc2   :  { %1630 = vmatpush.bf16.msra.mxu0 %v5583_v9  ;;  %v1348_v5 = vpop.f32.mrf.mxu0  ;;  %v1361_v6 = vpop.f32.mrf.mxu1  ;;  %v1323_v9 = vadd.f32 %v9110_v47, %v1310_v3  ;;  %v6038_v60 = vld [vmem:[%s11587_s3 + $0x2c0] sm:$0xf] }
  0xc3   :  { %1617 = vmatpush.bf16.msra.mxu2 %v5455_v19  ;;  %v1376_v36 = vpop.f32.mrf.mxu2 }
  0xc4   :  { %1604 = vmatpush.bf16.msra.mxu3 %v5327_v14  ;;  %1593 = vmatpush.bf16.msrb.mxu1 %v5167_v29  ;;  %v7431_v14 = vld [vmem:[%s11587_s3 + $0x6c] sm:$0xf0]  ;;  %v1336_v47 = vadd.f32 %v9127_v55, %v1323_v9  ;;  %v5718_v55 = vld [vmem:[%s11587_s3 + $0x40] sm:$0xf]  ;;  %v5768_v36 = vld [vmem:[%s11587_s3 + $0xb0] sm:$0xf0] }
  0xc5   :  { %v5735_v19 = vor.u32 %v7431_v14, %v5734_v13  ;;  %v7459_v29 = vld [vmem:[%s11587_s3 + $0x14c] sm:$0xf0]  ;;  %v5896_v13 = vld [vmem:[%s11587_s3 + $0x1b0] sm:$0xf0]  ;;  %v6006_v14 = vld [vmem:[%s11587_s3 + $0x280] sm:$0xf] }
  0xc6   :  { %1631 = vmatpush.bf16.msra.mxu0 %v5567_v24  ;;  %v1349_v23 = vadd.f32 %v1348_v5, %v1336_v47  ;;  %v7427_v24 = vld [vmem:[%s11587_s3 + $0x4c] sm:$0xf0] }
  0xc7   :  { %1618 = vmatpush.bf16.msra.mxu2 %v5439_v62  ;;  %1594 = vmatmul.bf16.vlgmr.msrb.gmra.mxu1 %v8187_v56  ;;  %v5766_v56 = vld [vmem:[%s11587_s3 + $0xa0] sm:$0xf]  ;;  %v5719_v27 = vor.u32 %v7427_v24, %v5718_v55  ;;  %v5847_v62 = vor.u32 %v7459_v29, %v5846_v28  ;;  %v7499_v47 = vld [vmem:[%s11587_s3 + $0x28c] sm:$0xf0]  ;;  %v5880_v24 = vld [vmem:[%s11587_s3 + $0x190] sm:$0xf0] }
  0xc8   :  { %1605 = vmatpush.bf16.msra.mxu3 %v5311_v30  ;;  %1644 = vmatpush.bf16.msra.mxu1 %v1285_v42  ;;  %v5767_v7 = vor.u32 %v7439_v32, %v5766_v56  ;;  %v1362_v30 = vadd.f32 %v1361_v6, %v1349_v23  ;;  %v7419_v42 = vld [vmem:[%s11587_s3 + $0xc] sm:$0xf0]  ;;  %v5784_v56 = vld [vmem:[%s11587_s3 + $0xd0] sm:$0xf0]  ;;  %v6039_v32 = vor.u32 %v7507_v61, %v6038_v60  ;;  %v7465_v23 = vld [vmem:[%s11587_s3 + $0x184] sm:$0xf] }
  0xc9   :  { %v5687_v51 = vor.u32 %v7419_v42, %v5686_v35  ;;  %v5912_v6 = vld [vmem:[%s11587_s3 + $0x1d0] sm:$0xf0]  ;;  %v6007_v20 = vor.u32 %v7499_v47, %v6006_v14  ;;  %v7429_v28 = vld [vmem:[%s11587_s3 + $0x64] sm:$0xf] }
  0xca   :  { %1632 = vmatpush.bf16.msra.mxu0 %v5551_v39  ;;  %v9273_v18 = vpop.f32.mrf.mxu3  ;;  %v1350_v21 = vpop.f32.mrf.mxu0  ;;  %v1375_v39 = vadd.f32 %v9227_v57, %v1362_v30  ;;  %v5928_v57 = vld [vmem:[%s11587_s3 + $0x1f0] sm:$0xf0]  ;;  %v7425_v42 = vld [vmem:[%s11587_s3 + $0x44] sm:$0xf] }
  0xcb   :  { %1619 = vmatpush.bf16.msra.mxu2 %v5423_v16  ;;  %v1363_v22 = vpop.f32.mrf.mxu1  ;;  %v5814_v16 = vld [vmem:[%s11587_s3 + $0x100] sm:$0xf]  ;;  %v249_v21 = vperm.slane %v9187_v1, 1  ;;  %v5736_v29 = vld [vmem:[%s11587_s3 + $0x70] sm:$0xf0] }
  0xcc   :  { %1606 = vmatpush.bf16.msra.mxu3 %v5295_v46  ;;  %1645 = vmatpush.bf16.msra.mxu1 %v5679_v54  ;;  %v5800_v46 = vld [vmem:[%s11587_s3 + $0xf0] sm:$0xf0]  ;;  %v7477_v54 = vld [vmem:[%s11587_s3 + $0x1e4] sm:$0xf] }
  0xcd   :  { %1633 = vmatmul.bf16.vlgmr.msra.gmra.mxu0 %v8403_v41  ;;  %v5894_v41 = vld [vmem:[%s11587_s3 + $0x1a0] sm:$0xf]  ;;  %v5803_v59 = vor.u32 %v7445_v45, %v5800_v46  ;;  %v5931_v3 = vor.u32 %v7477_v54, %v5928_v57  ;;  %v5864_v35 = vld [vmem:[%s11587_s3 + $0x170] sm:$0xf0]  ;;  %v7457_v46 = vld [vmem:[%s11587_s3 + $0x144] sm:$0xf] }
  0xce   :  { %1620 = vmatmul.bf16.vlgmr.msra.gmra.mxu2 %v8401_v40  ;;  %v7435_v40 = vld [vmem:[%s11587_s3 + $0x8c] sm:$0xf0]  ;;  %v5895_v8 = vor.u32 %v7471_v4, %v5894_v41  ;;  %v7473_v41 = vld [vmem:[%s11587_s3 + $0x1c4] sm:$0xf] }
  0xcf   :  { %1607 = vmatmul.bf16.vlgmr.msra.gmra.mxu3 %v8206_v63  ;;  %v5750_v63 = vld [vmem:[%s11587_s3 + $0x80] sm:$0xf]  ;;  %2463 = vmatpush.bf16.msrb.mxu2 %v6055_v48  ;;  %v5915_v9 = vor.u32 %v7473_v41, %v5912_v6  ;;  %v7421_v54 = vld [vmem:[%s11587_s3 + $0x24] sm:$0xf]  ;;  %v5688_v41 = vld [vmem:[%s11587_s3 + $0x10] sm:$0xf0] }
  0xd0   :  { %2437 = vmatpush.bf16.msrb.mxu3 %v5799_v50  ;;  %2450 = vmatpush.bf16.msrb.mxu1 %v5927_v58  ;;  %v5751_v10 = vor.u32 %v7435_v40, %v5750_v63  ;;  %v1651_v58 = vmax.f32 %v1375_v39, 0.0  ;;  %v7503_v63 = vld [vmem:[%s11587_s3 + $0x2ac] sm:$0xf0]  ;;  %v7437_v40 = vld [vmem:[%s11587_s3 + $0xa4] sm:$0xf] }
  0xd1   :  { %v9289_v26 = vpop.f32.mrf.mxu2  ;;  %v5771_v12 = vor.u32 %v7437_v40, %v5768_v36  ;;  %v7491_v39 = vld [vmem:[%s11587_s3 + $0x24c] sm:$0xf0]  ;;  %v7417_v61 = vld [vmem:[%s11587_s3 + $0x4] sm:$0xf]  ;;  %v5806_v40 = vld [vmem:[%s11587_s3 + $0xe8] sm:$0xf] }
  0xd2   :  { %v1389_v33 = vpop.f32.mrf.mxu3  ;;  %v9355_v4 = vpack.c.bf16 %v1651_v58, %v1651_v58  ;;  %v5975_v44 = vor.u32 %v7491_v39, %v5974_v38  ;;  %v7509_v6 = vld [vmem:[%s11587_s3 + $0x2e4] sm:$0xf]  ;;  %v7448_v36 = vld [vmem:[%s11587_s3 + $0xf4] sm:$0xf0]  ;;  %v6024_v39 = vld [vmem:[%s11587_s3 + $0x2b0] sm:$0xf0] }
  0xd3   :  { %2464 = vmatpush.bf16.msrb.mxu2 %v6039_v32  ;;  %v1388_v33 = vadd.f32 %v9273_v18, %v249_v21  ;;  %v5720_v18 = vld [vmem:[%s11587_s3 + $0x50] sm:$0xf0]  ;;  %v5807_v47 = vor.u32 %v7448_v36, %v5806_v40  ;;  %v5790_v21 = vld [vmem:[%s11587_s3 + $0xc8] sm:$0xf] }
  0xd4   :  { %2438 = vmatpush.bf16.msrb.mxu3 %v5783_v0  ;;  %2451 = vmatpush.bf16.msrb.mxu1 %v5911_v2  ;;  %v7441_v0 = vld [vmem:[%s11587_s3 + $0xc4] sm:$0xf]  ;;  %v5815_v2 = vor.u32 %v7451_v52, %v5814_v16  ;;  %v5723_v16 = vor.u32 %v7425_v42, %v5720_v18  ;;  %v7487_v52 = vld [vmem:[%s11587_s3 + $0x22c] sm:$0xf0]  ;;  %v5832_v32 = vld [vmem:[%s11587_s3 + $0x130] sm:$0xf0] }
  0xd5   :  { %v5787_v5 = vor.u32 %v7441_v0, %v5784_v56  ;;  %v1401_v48 = vadd.f32 %v9289_v26, %v1388_v33  ;;  %v5704_v26 = vld [vmem:[%s11587_s3 + $0x30] sm:$0xf0]  ;;  %v7453_v0 = vld [vmem:[%s11587_s3 + $0x124] sm:$0xf]  ;;  %v7539_v33 = vld [vmem:[%s11587_s3 + $0x3cc] sm:$0xf0] }
  0xd6   :  { %v5707_v56 = vor.u32 %v7421_v54, %v5704_v26  ;;  %v6008_v26 = vld [vmem:[%s11587_s3 + $0x290] sm:$0xf0]  ;;  %v5886_v36 = vld [vmem:[%s11587_s3 + $0x188] sm:$0xf] }
  0xd7   :  { %5683 = vmatmul.msk.bf16.vlgmr.msra.gmra.mxu1 %vm1270_vm1, %v8313_v53  ;;  %v7423_v53 = vld [vmem:[%s11587_s3 + $0x2c] sm:$0xf0] }
  0xd8   :  { %2439 = vmatpush.bf16.msrb.mxu3 %v5767_v7  ;;  %2452 = vmatpush.bf16.msrb.mxu1 %v5895_v8  ;;  %v5703_v34 = vor.u32 %v7423_v53, %v5702_v31  ;;  %v6022_v7 = vld [vmem:[%s11587_s3 + $0x2a0] sm:$0xf]  ;;  %v5883_v53 = vor.u32 %v7465_v23, %v5880_v24 }
  0xd9   :  { %v1402_v50 = vpop.f32.mrf.mxu2  ;;  %v6023_v8 = vor.u32 %v7503_v63, %v6022_v7  ;;  %v6056_v7 = vld [vmem:[%s11587_s3 + $0x2f0] sm:$0xf0] }
  0xda   :  { %v5848_v50 = vld [vmem:[%s11587_s3 + $0x150] sm:$0xf0] }
  0xdb   :  { %2465 = vmatpush.bf16.msrb.mxu2 %v6023_v8  ;;  %v5851_v60 = vor.u32 %v7457_v46, %v5848_v50  ;;  %v6059_v8 = vor.u32 %v7509_v6, %v6056_v7  ;;  %v5992_v7 = vld [vmem:[%s11587_s3 + $0x270] sm:$0xf0] }
  0xdc   :  { %2440 = vmatpush.bf16.msrb.mxu3 %v5751_v10  ;;  %2453 = vmatpush.bf16.msrb.mxu1 %v5879_v15  ;;  %v7469_v10 = vld [vmem:[%s11587_s3 + $0x1a4] sm:$0xf] }
  0xdd   :  { %v5899_v22 = vor.u32 %v7469_v10, %v5896_v13  ;;  %v5816_v13 = vld [vmem:[%s11587_s3 + $0x110] sm:$0xf0] }
  0xdf   :  { %2466 = vmatpush.bf16.msrb.mxu2 %v6007_v20 }
  0xe0   :  { %2441 = vmatpush.bf16.msrb.mxu3 %v5735_v19  ;;  %2454 = vmatpush.bf16.msrb.mxu1 %v5863_v25  ;;  %v7433_v19 = vld [vmem:[%s11587_s3 + $0x84] sm:$0xf]  ;;  %v5990_v25 = vld [vmem:[%s11587_s3 + $0x260] sm:$0xf] }
  0xe1   :  { %v5755_v55 = vor.u32 %v7433_v19, %v5752_v17  ;;  %v7543_v19 = vld [vmem:[%s11587_s3 + $0x3ec] sm:$0xf0]  ;;  %v7505_v17 = vld [vmem:[%s11587_s3 + $0x2c4] sm:$0xf] }
  0xe2   :  { %v1413_v11 = vpop.f32.mrf.mxu0 }
  0xe3   :  { %v1414_v58 = vadd.f32 %v1413_v11, %v1401_v48  ;;  %v5691_v11 = vor.u32 %v7417_v61, %v5688_v41  ;;  %v6150_v48 = vld [vmem:[%s11587_s3 + $0x3a0] sm:$0xf]  ;;  %v5902_v61 = vld [vmem:[%s11587_s3 + $0x1a8] sm:$0xf] }
  0xe4   :  { %2442 = vmatpush.bf16.msrb.mxu3 %v5719_v27  ;;  %2455 = vmatpush.bf16.msrb.mxu1 %v5847_v62  ;;  %v7495_v27 = vld [vmem:[%s11587_s3 + $0x26c] sm:$0xf0]  ;;  %v7461_v62 = vld [vmem:[%s11587_s3 + $0x164] sm:$0xf]  ;;  %v5742_v41 = vld [vmem:[%s11587_s3 + $0x68] sm:$0xf] }
  0xe5   :  { %v5991_v30 = vor.u32 %v7495_v27, %v5990_v25  ;;  %v5867_v45 = vor.u32 %v7461_v62, %v5864_v35  ;;  %v6166_v62 = vld [vmem:[%s11587_s3 + $0x3c0] sm:$0xf] }
  0xe6   :  { %v9385_v15 = vpop.f32.mrf.mxu1  ;;  %v6167_v38 = vor.u32 %v7539_v33, %v6166_v62  ;;  %v5960_v62 = vld [vmem:[%s11587_s3 + $0x230] sm:$0xf0] }
  0xe7   :  { %2467 = vmatpush.bf16.msrb.mxu2 %v5991_v30  ;;  %v1427_v63 = vadd.f32 %v9385_v15, %v1414_v58  ;;  %v6182_v15 = vld [vmem:[%s11587_s3 + $0x3e0] sm:$0xf]  ;;  %v7480_v30 = vld [vmem:[%s11587_s3 + $0x1f4] sm:$0xf0] }
  0xe8   :  { %2443 = vmatpush.bf16.msrb.mxu3 %v5703_v34  ;;  %2456 = vmatpush.bf16.msrb.mxu1 %v5831_v49  ;;  %v5739_v34 = vor.u32 %v7429_v28, %v5736_v29  ;;  %v6183_v23 = vor.u32 %v7543_v19, %v6182_v15  ;;  %v5934_v29 = vld [vmem:[%s11587_s3 + $0x1e8] sm:$0xf]  ;;  %v5976_v19 = vld [vmem:[%s11587_s3 + $0x250] sm:$0xf0] }
  0xe9   :  { %v5935_v42 = vor.u32 %v7480_v30, %v5934_v29  ;;  %v5710_v30 = vld [vmem:[%s11587_s3 + $0x28] sm:$0xf] }
  0xea   :  { %v1439_v31 = vpop.f32.mrf.mxu3  ;;  %v1415_v37 = vpop.f32.mrf.mxu0  ;;  %2476 = vmatpush.bf16.msrb.mxu0 %v6183_v23  ;;  %v7464_v23 = vld [vmem:[%s11587_s3 + $0x174] sm:$0xf0] }
  0xeb   :  { %2468 = vmatpush.bf16.msrb.mxu2 %v5975_v44  ;;  %v1440_v10 = vadd.f32 %v1439_v31, %v1427_v63  ;;  %v5774_v31 = vld [vmem:[%s11587_s3 + $0xa8] sm:$0xf]  ;;  %v7440_v37 = vld [vmem:[%s11587_s3 + $0xb4] sm:$0xf0] }
  0xec   :  { %2444 = vmatpush.bf16.msrb.mxu3 %v5687_v51  ;;  %2457 = vmatpush.bf16.msrb.mxu1 %v5815_v2  ;;  %v5958_v51 = vld [vmem:[%s11587_s3 + $0x220] sm:$0xf]  ;;  %v5918_v44 = vld [vmem:[%s11587_s3 + $0x1c8] sm:$0xf]  ;;  %v5775_v46 = vor.u32 %v7440_v37, %v5774_v31  ;;  %v7424_v31 = vld [vmem:[%s11587_s3 + $0x34] sm:$0xf0] }
  0xed   :  { %v5959_v57 = vor.u32 %v7487_v52, %v5958_v51  ;;  %v5942_v2 = vld [vmem:[%s11587_s3 + $0x200] sm:$0xf]  ;;  %v5758_v51 = vld [vmem:[%s11587_s3 + $0x88] sm:$0xf]  ;;  %v7436_v52 = vld [vmem:[%s11587_s3 + $0x94] sm:$0xf0] }
  0xee   :  { %v1428_v43 = vpop.f32.mrf.mxu1  ;;  %2477 = vmatpush.bf16.msrb.mxu0 %v6167_v38  ;;  %v7460_v37 = vld [vmem:[%s11587_s3 + $0x154] sm:$0xf0]  ;;  %v5711_v38 = vor.u32 %v7424_v31, %v5710_v30 }
  0xef   :  { %2445 = vmatmul.bf16.vlgmr.msrb.gmra.mxu3 %v9355_v4  ;;  %2469 = vmatpush.bf16.msrb.mxu2 %v5959_v57 }
  0xf0   :  { %2489 = vmatpush.bf16.msra.mxu3 %v5803_v59  ;;  %2502 = vmatpush.bf16.msra.mxu1 %v5931_v3  ;;  %v7483_v3 = vld [vmem:[%s11587_s3 + $0x20c] sm:$0xf0] }
  0xf1   :  { %v1452_v49 = vpop.f32.mrf.mxu2 }
  0xf2   :  { %v1441_v59 = vpop.f32.mrf.mxu3  ;;  %v1453_v20 = vadd.f32 %v1452_v49, %v1440_v10  ;;  %v7535_v49 = vld [vmem:[%s11587_s3 + $0x3ac] sm:$0xf0]  ;;  %v6118_v10 = vld [vmem:[%s11587_s3 + $0x360] sm:$0xf] }
  0xf3   :  { %v6151_v54 = vor.u32 %v7535_v49, %v6150_v48  ;;  %v5944_v48 = vld [vmem:[%s11587_s3 + $0x210] sm:$0xf0] }
  0xf4   :  { %2490 = vmatpush.bf16.msra.mxu3 %v5787_v5  ;;  %2503 = vmatpush.bf16.msra.mxu1 %v5915_v9  ;;  %v5943_v5 = vor.u32 %v7483_v3, %v5942_v2  ;;  %v5835_v9 = vor.u32 %v7453_v0, %v5832_v32  ;;  %v7472_v0 = vld [vmem:[%s11587_s3 + $0x1b4] sm:$0xf0]  ;;  %v6134_v32 = vld [vmem:[%s11587_s3 + $0x380] sm:$0xf]  ;;  %v7531_v2 = vld [vmem:[%s11587_s3 + $0x38c] sm:$0xf0] }
  0xf5   :  { %2478 = vmatpush.bf16.msrb.mxu0 %v6151_v54  ;;  %v7493_v3 = vld [vmem:[%s11587_s3 + $0x264] sm:$0xf]  ;;  %v6135_v6 = vor.u32 %v7531_v2, %v6134_v32  ;;  %v5903_v63 = vor.u32 %v7472_v0, %v5902_v61  ;;  %v6070_v61 = vld [vmem:[%s11587_s3 + $0x300] sm:$0xf]  ;;  %v7515_v0 = vld [vmem:[%s11587_s3 + $0x30c] sm:$0xf0] }
  0xf6   :  { %2470 = vmatpush.bf16.msrb.mxu2 %v5943_v5  ;;  %v7432_v5 = vld [vmem:[%s11587_s3 + $0x74] sm:$0xf0]  ;;  %v5995_v40 = vor.u32 %v7493_v3, %v5992_v7  ;;  %v6071_v2 = vor.u32 %v7515_v0, %v6070_v61  ;;  %v7541_v3 = vld [vmem:[%s11587_s3 + $0x3e4] sm:$0xf]  ;;  %v7442_v7 = vld [vmem:[%s11587_s3 + $0xcc] sm:$0xf] }
  0xf7   :  { %v7462_v61 = vld [vmem:[%s11587_s3 + $0x16c] sm:$0xf]  ;;  %v5872_v0 = vld [vmem:[%s11587_s3 + $0x178] sm:$0xf0] }
  0xf8   :  { %2491 = vmatpush.bf16.msra.mxu3 %v5771_v12  ;;  %2504 = vmatpush.bf16.msra.mxu1 %v5899_v22  ;;  %v7449_v12 = vld [vmem:[%s11587_s3 + $0x104] sm:$0xf]  ;;  %v7444_v22 = vld [vmem:[%s11587_s3 + $0xd4] sm:$0xf0] }
  0xf9   :  { %v1454_v14 = vpop.f32.mrf.mxu2  ;;  %v5819_v25 = vor.u32 %v7449_v12, %v5816_v13  ;;  %2479 = vmatpush.bf16.msrb.mxu0 %v6135_v6  ;;  %v7489_v12 = vld [vmem:[%s11587_s3 + $0x244] sm:$0xf] }
  0xfa   :  { %2515 = vmatpush.bf16.msra.mxu2 %v6059_v8  ;;  %v1465_v24 = vpop.f32.mrf.mxu3  ;;  %v7468_v8 = vld [vmem:[%s11587_s3 + $0x194] sm:$0xf0]  ;;  %v5726_v14 = vld [vmem:[%s11587_s3 + $0x48] sm:$0xf] }
  0xfb   :  { %v1466_v28 = vadd.f32 %v1465_v24, %v1453_v20 }
  0xfc   :  { %2492 = vmatpush.bf16.msra.mxu3 %v5755_v55  ;;  %2505 = vmatpush.bf16.msra.mxu1 %v5883_v53  ;;  %v6040_v55 = vld [vmem:[%s11587_s3 + $0x2d0] sm:$0xf0]  ;;  %v5791_v53 = vor.u32 %v7444_v22, %v5790_v21  ;;  %v5979_v21 = vor.u32 %v7489_v12, %v5976_v19  ;;  %v5870_v22 = vld [vmem:[%s11587_s3 + $0x168] sm:$0xf]  ;;  %v5776_v19 = vld [vmem:[%s11587_s3 + $0xb8] sm:$0xf0] }
  0xfd   :  { %v6043_v27 = vor.u32 %v7505_v17, %v6040_v55  ;;  %v1652_v35 = vmax.f32 %v1466_v28, 0.0  ;;  %v5887_v17 = vor.u32 %v7468_v8, %v5886_v36  ;;  %v7485_v28 = vld [vmem:[%s11587_s3 + $0x224] sm:$0xf]  ;;  %v5871_v33 = vor.u32 %v7464_v23, %v5870_v22  ;;  %v5822_v36 = vld [vmem:[%s11587_s3 + $0x108] sm:$0xf] }
  0xfe   :  { %v7452_v8 = vld [vmem:[%s11587_s3 + $0x114] sm:$0xf0]  ;;  %v6168_v12 = vld [vmem:[%s11587_s3 + $0x3d0] sm:$0xf0]  ;;  %v7474_v22 = vld [vmem:[%s11587_s3 + $0x1cc] sm:$0xf] }
  0xff   :  { %2516 = vmatpush.bf16.msra.mxu2 %v6043_v27  ;;  %v9530_v43 = vpack.c.bf16 %v1652_v35, %v1652_v35  ;;  %v7523_v27 = vld [vmem:[%s11587_s3 + $0x34c] sm:$0xf0]  ;;  %v5854_v35 = vld [vmem:[%s11587_s3 + $0x148] sm:$0xf]  ;;  %v5920_v23 = vld [vmem:[%s11587_s3 + $0x1d8] sm:$0xf0] }
 0x100   :  { %2493 = vmatpush.bf16.msra.mxu3 %v5739_v34  ;;  %2506 = vmatpush.bf16.msra.mxu1 %v5867_v45  ;;  %v7501_v34 = vld [vmem:[%s11587_s3 + $0x2a4] sm:$0xf]  ;;  %v7476_v45 = vld [vmem:[%s11587_s3 + $0x1d4] sm:$0xf0]  ;;  %v5855_v49 = vor.u32 %v7460_v37, %v5854_v35  ;;  %v6136_v37 = vld [vmem:[%s11587_s3 + $0x390] sm:$0xf0] }
 0x101   :  { %v6027_v18 = vor.u32 %v7501_v34, %v6024_v39  ;;  %2458 = vmatmul.bf16.vlgmr.msrb.gmra.mxu1 %v9530_v43  ;;  %v5919_v58 = vor.u32 %v7476_v45, %v5918_v44  ;;  %v5963_v34 = vor.u32 %v7485_v28, %v5960_v62  ;;  %v6086_v39 = vld [vmem:[%s11587_s3 + $0x320] sm:$0xf]  ;;  %v5694_v44 = vld [vmem:[%s11587_s3 + $0x8] sm:$0xf]  ;;  %v7420_v45 = vld [vmem:[%s11587_s3 + $0x14] sm:$0xf0]  ;;  %v5923_v62 = vor.u32 %v7474_v22, %v5920_v23 }
 0x102   :  { %v9548_v50 = vpop.f32.mrf.mxu0  ;;  %v1467_v57 = vpop.f32.mrf.mxu3  ;;  %v5760_v28 = vld [vmem:[%s11587_s3 + $0x98] sm:$0xf0]  ;;  %v6046_v22 = vld [vmem:[%s11587_s3 + $0x2c8] sm:$0xf]  ;;  %v7454_v23 = vld [vmem:[%s11587_s3 + $0x12c] sm:$0xf] }
 0x103   :  { %2517 = vmatpush.bf16.msra.mxu2 %v6027_v18  ;;  %v7481_v18 = vld [vmem:[%s11587_s3 + $0x204] sm:$0xf]  ;;  %v7456_v57 = vld [vmem:[%s11587_s3 + $0x134] sm:$0xf0] }
 0x104   :  { %2494 = vmatpush.bf16.msra.mxu3 %v5723_v16  ;;  %2507 = vmatpush.bf16.msra.mxu1 %v5851_v60  ;;  %v7497_v16 = vld [vmem:[%s11587_s3 + $0x284] sm:$0xf]  ;;  %v9559_v59 = vpop.f32.mrf.mxu1  ;;  %v5947_v54 = vor.u32 %v7481_v18, %v5944_v48  ;;  %v5888_v48 = vld [vmem:[%s11587_s3 + $0x198] sm:$0xf0] }
 0x105   :  { %v6011_v60 = vor.u32 %v7497_v16, %v6008_v26  ;;  %v7446_v16 = vld [vmem:[%s11587_s3 + $0xec] sm:$0xf]  ;;  %v5838_v26 = vld [vmem:[%s11587_s3 + $0x128] sm:$0xf] }
 0x106   :  { %v5839_v6 = vor.u32 %v7456_v57, %v5838_v26 }
 0x107   :  { %2518 = vmatpush.bf16.msra.mxu2 %v6011_v60 }
 0x108   :  { %2495 = vmatpush.bf16.msra.mxu3 %v5707_v56  ;;  %2508 = vmatpush.bf16.msra.mxu1 %v5835_v9  ;;  %v5759_v56 = vor.u32 %v7436_v52, %v5758_v51  ;;  %v5743_v9 = vor.u32 %v7432_v5, %v5742_v41  ;;  %v5808_v51 = vld [vmem:[%s11587_s3 + $0xf8] sm:$0xf0]  ;;  %v6184_v41 = vld [vmem:[%s11587_s3 + $0x3f0] sm:$0xf0]  ;;  %v250_v5 = vperm.slane %v9187_v1, 2 }
 0x10a   :  { %v1506_v13 = vpop.f32.mrf.mxu0 }
 0x10b   :  { %2519 = vmatpush.bf16.msra.mxu2 %v5995_v40  ;;  %v6187_v40 = vor.u32 %v7541_v3, %v6184_v41  ;;  %v7422_v41 = vld [vmem:[%s11587_s3 + $0x2c] sm:$0xf] }
 0x10c   :  { %2496 = vmatpush.bf16.msra.mxu3 %v5691_v11  ;;  %2509 = vmatpush.bf16.msra.mxu1 %v5819_v25  ;;  %v7527_v11 = vld [vmem:[%s11587_s3 + $0x36c] sm:$0xf0]  ;;  %v1480_v20 = vpop.f32.mrf.mxu1  ;;  %v6102_v25 = vld [vmem:[%s11587_s3 + $0x340] sm:$0xf] }
 0x10d   :  { %v6119_v15 = vor.u32 %v7527_v11, %v6118_v10  ;;  %v5936_v10 = vld [vmem:[%s11587_s3 + $0x1f8] sm:$0xf0]  ;;  %v7537_v11 = vld [vmem:[%s11587_s3 + $0x3c4] sm:$0xf]  ;;  %v1479_v20 = vadd.f32 %v9559_v59, %v250_v5  ;;  %v6152_v59 = vld [vmem:[%s11587_s3 + $0x3b0] sm:$0xf0] }
 0x10e   :  { %v5712_v5 = vld [vmem:[%s11587_s3 + $0x38] sm:$0xf0] }
 0x10f   :  { %2497 = vmatmul.bf16.vlgmr.msra.gmra.mxu3 %v9355_v4  ;;  %2480 = vmatpush.bf16.msrb.mxu0 %v6119_v15  ;;  %v7438_v15 = vld [vmem:[%s11587_s3 + $0xac] sm:$0xf] }
 0x110   :  { %2541 = vmatpush.bf16.msrb.mxu3 %v5807_v47  ;;  %2554 = vmatpush.bf16.msrb.mxu1 %v5935_v42  ;;  %v7428_v47 = vld [vmem:[%s11587_s3 + $0x54] sm:$0xf0]  ;;  %v7519_v42 = vld [vmem:[%s11587_s3 + $0x32c] sm:$0xf0] }
 0x111   :  { %v5727_v24 = vor.u32 %v7428_v47, %v5726_v14  ;;  %2520 = vmatpush.bf16.msra.mxu2 %v5979_v21  ;;  %v9626_v29 = vpop.f32.mrf.mxu2  ;;  %2510 = vmatmul.bf16.vlgmr.msra.gmra.mxu1 %v9530_v43  ;;  %v6171_v14 = vor.u32 %v7537_v11, %v6168_v12  ;;  %v5823_v47 = vor.u32 %v7452_v8, %v5822_v36  ;;  %v6062_v8 = vld [vmem:[%s11587_s3 + $0x2e8] sm:$0xf] }
 0x112   :  { %v9615_v55 = vpop.f32.mrf.mxu3  ;;  %v9668_v52 = vpop.f32.mrf.mxu0  ;;  %v5715_v12 = vor.u32 %v7422_v41, %v5712_v5  ;;  %v7484_v41 = vld [vmem:[%s11587_s3 + $0x214] sm:$0xf0] }
 0x113   :  { %v1492_v31 = vadd.f32 %v9615_v55, %v1479_v20  ;;  %v7529_v55 = vld [vmem:[%s11587_s3 + $0x384] sm:$0xf] }
 0x114   :  { %2542 = vmatpush.bf16.msrb.mxu3 %v5791_v53  ;;  %2555 = vmatpush.bf16.msrb.mxu1 %v5919_v58  ;;  %v6103_v53 = vor.u32 %v7523_v27, %v6102_v25  ;;  %v5695_v58 = vor.u32 %v7420_v45, %v5694_v44  ;;  %v7533_v25 = vld [vmem:[%s11587_s3 + $0x3a4] sm:$0xf]  ;;  %v7434_v27 = vld [vmem:[%s11587_s3 + $0x8c] sm:$0xf] }
 0x115   :  { %2521 = vmatpush.bf16.msra.mxu2 %v5963_v34  ;;  %v6155_v30 = vor.u32 %v7533_v25, %v6152_v59  ;;  %v5904_v34 = vld [vmem:[%s11587_s3 + $0x1b8] sm:$0xf0]  ;;  %v5763_v35 = vor.u32 %v7434_v27, %v5760_v28  ;;  %v1505_v18 = vadd.f32 %v9548_v50, %v1492_v31  ;;  %v6120_v50 = vld [vmem:[%s11587_s3 + $0x370] sm:$0xf0]  ;;  %v7508_v27 = vld [vmem:[%s11587_s3 + $0x2d4] sm:$0xf0] }
 0x116   :  { %2481 = vmatpush.bf16.msrb.mxu0 %v6103_v53  ;;  %v7513_v28 = vld [vmem:[%s11587_s3 + $0x304] sm:$0xf] }
 0x117   :  { %v1518_v57 = vadd.f32 %v9626_v29, %v1505_v18  ;;  %v6104_v29 = vld [vmem:[%s11587_s3 + $0x350] sm:$0xf0]  ;;  %v6014_v18 = vld [vmem:[%s11587_s3 + $0x288] sm:$0xf] }
 0x118   :  { %2543 = vmatpush.bf16.msrb.mxu3 %v5775_v46  ;;  %2556 = vmatpush.bf16.msrb.mxu1 %v5903_v63  ;;  %v6087_v46 = vor.u32 %v7519_v42, %v6086_v39  ;;  %v5792_v63 = vld [vmem:[%s11587_s3 + $0xd8] sm:$0xf0]  ;;  %v6139_v42 = vor.u32 %v7529_v55, %v6136_v37  ;;  %v6030_v37 = vld [vmem:[%s11587_s3 + $0x2a8] sm:$0xf] }
 0x119   :  { %2522 = vmatpush.bf16.msra.mxu2 %v5947_v54  ;;  %v1519_v32 = vpop.f32.mrf.mxu2  ;;  %v5795_v13 = vor.u32 %v7442_v7, %v5792_v63  ;;  %v5744_v39 = vld [vmem:[%s11587_s3 + $0x78] sm:$0xf0]  ;;  %v5875_v63 = vor.u32 %v7462_v61, %v5872_v0  ;;  %v7488_v61 = vld [vmem:[%s11587_s3 + $0x234] sm:$0xf0] }
 0x11a   :  { %2482 = vmatpush.bf16.msrb.mxu0 %v6087_v46  ;;  %v1493_v60 = vpop.f32.mrf.mxu3  ;;  %v7466_v46 = vld [vmem:[%s11587_s3 + $0x18c] sm:$0xf]  ;;  %v5728_v54 = vld [vmem:[%s11587_s3 + $0x58] sm:$0xf0] }
 0x11b   :  { %v5824_v55 = vld [vmem:[%s11587_s3 + $0x118] sm:$0xf0] }
 0x11c   :  { %2544 = vmatpush.bf16.msrb.mxu3 %v5759_v56  ;;  %2557 = vmatpush.bf16.msrb.mxu1 %v5887_v17  ;;  %v5811_v56 = vor.u32 %v7446_v16, %v5808_v51  ;;  %v1558_v17 = vpop.f32.mrf.mxu0  ;;  %v7525_v16 = vld [vmem:[%s11587_s3 + $0x364] sm:$0xf]  ;;  %v7426_v51 = vld [vmem:[%s11587_s3 + $0x4c] sm:$0xf] }
 0x11d   :  { %v6123_v26 = vor.u32 %v7525_v16, %v6120_v50  ;;  %v5731_v32 = vor.u32 %v7426_v51, %v5728_v54  ;;  %v5998_v16 = vld [vmem:[%s11587_s3 + $0x268] sm:$0xf] }
 0x11e   :  { %2483 = vmatpush.bf16.msrb.mxu0 %v6071_v2  ;;  %v7521_v2 = vld [vmem:[%s11587_s3 + $0x344] sm:$0xf] }
 0x120   :  { %2545 = vmatpush.bf16.msrb.mxu3 %v5743_v9  ;;  %2558 = vmatpush.bf16.msrb.mxu1 %v5871_v33  ;;  %v7478_v9 = vld [vmem:[%s11587_s3 + $0x1ec] sm:$0xf] }
 0x121   :  { %v5939_v21 = vor.u32 %v7478_v9, %v5936_v10  ;;  %v7470_v33 = vld [vmem:[%s11587_s3 + $0x1ac] sm:$0xf]  ;;  %v5856_v10 = vld [vmem:[%s11587_s3 + $0x158] sm:$0xf0] }
 0x122   :  { %2528 = vmatpush.bf16.msra.mxu0 %v6187_v40  ;;  %v5907_v44 = vor.u32 %v7470_v33, %v5904_v34  ;;  %v7458_v9 = vld [vmem:[%s11587_s3 + $0x14c] sm:$0xf]  ;;  %v6047_v34 = vor.u32 %v7508_v27, %v6046_v22 }
 0x123   :  { %v5859_v20 = vor.u32 %v7458_v9, %v5856_v10  ;;  %v6190_v9 = vld [vmem:[%s11587_s3 + $0x3e8] sm:$0xf]  ;;  %v7502_v22 = vld [vmem:[%s11587_s3 + $0x2ac] sm:$0xf] }
 0x124   :  { %2546 = vmatpush.bf16.msrb.mxu3 %v5727_v24  ;;  %2559 = vmatpush.bf16.msrb.mxu1 %v5855_v49  ;;  %v5779_v24 = vor.u32 %v7438_v15, %v5776_v19  ;;  %v1530_v53 = vpop.f32.mrf.mxu1  ;;  %v7418_v15 = vld [vmem:[%s11587_s3 + $0xc] sm:$0xf] }
 0x126   :  { %2529 = vmatpush.bf16.msra.mxu0 %v6171_v14  ;;  %v7517_v14 = vld [vmem:[%s11587_s3 + $0x324] sm:$0xf] }
 0x128   :  { %2547 = vmatpush.bf16.msrb.mxu3 %v5711_v38  ;;  %2560 = vmatpush.bf16.msrb.mxu1 %v5839_v6  ;;  %v7430_v38 = vld [vmem:[%s11587_s3 + $0x6c] sm:$0xf]  ;;  %v6107_v6 = vor.u32 %v7521_v2, %v6104_v29 }
 0x129   :  { %v5747_v49 = vor.u32 %v7430_v38, %v5744_v39  ;;  %v7504_v38 = vld [vmem:[%s11587_s3 + $0x2b4] sm:$0xf0] }
 0x12a   :  { %2530 = vmatpush.bf16.msra.mxu0 %v6155_v30  ;;  %v9760_v45 = vpop.f32.mrf.mxu0  ;;  %v6072_v30 = vld [vmem:[%s11587_s3 + $0x310] sm:$0xf0] }
 0x12c   :  { %2548 = vmatpush.bf16.msrb.mxu3 %v5695_v58  ;;  %2561 = vmatpush.bf16.msrb.mxu1 %v5823_v47  ;;  %v5891_v58 = vor.u32 %v7466_v46, %v5888_v48  ;;  %v1532_v60 = vpop.f32.mrf.mxu1  ;;  %v6088_v47 = vld [vmem:[%s11587_s3 + $0x330] sm:$0xf0]  ;;  %v251_v46 = vperm.slane %v9187_v1, 3  ;;  %v5982_v1 = vld [vmem:[%s11587_s3 + $0x248] sm:$0xf] }
 0x12d   :  { %v6091_v19 = vor.u32 %v7517_v14, %v6088_v47 }
 0x12e   :  { %2531 = vmatpush.bf16.msra.mxu0 %v6139_v42  ;;  %v6031_v42 = vor.u32 %v7504_v38, %v6030_v37  ;;  %v6000_v37 = vld [vmem:[%s11587_s3 + $0x278] sm:$0xf0] }
 0x12f   :  { %2549 = vmatmul.bf16.vlgmr.msrb.gmra.mxu3 %v9355_v4  ;;  %2562 = vmatmul.bf16.vlgmr.msrb.gmra.mxu1 %v9530_v43 }
 0x130   :  { %2593 = vmatpush.bf16.msra.mxu3 %v5811_v56  ;;  %2606 = vmatpush.bf16.msra.mxu1 %v5939_v21  ;;  %v1531_v56 = vadd.f32 %v1530_v53, %v1518_v57  ;;  %v6075_v53 = vor.u32 %v7513_v28, %v6072_v30  ;;  %v6158_v28 = vld [vmem:[%s11587_s3 + $0x3a8] sm:$0xf]  ;;  %v7536_v30 = vld [vmem:[%s11587_s3 + $0x3b4] sm:$0xf0] }
 0x131   :  { %v1569_v40 = vpop.f32.mrf.mxu2 }
 0x132   :  { %2532 = vmatpush.bf16.msra.mxu0 %v6123_v26  ;;  %v1543_v3 = vpop.f32.mrf.mxu3  ;;  %v1584_v36 = vpop.f32.mrf.mxu0  ;;  %v1570_v50 = vadd.f32 %v1569_v40, %v251_v46  ;;  %v7492_v26 = vld [vmem:[%s11587_s3 + $0x254] sm:$0xf0]  ;;  %v5984_v46 = vld [vmem:[%s11587_s3 + $0x258] sm:$0xf0] }
 0x133   :  { %v1544_v7 = vadd.f32 %v1543_v3, %v1531_v56  ;;  %v5950_v3 = vld [vmem:[%s11587_s3 + $0x208] sm:$0xf] }
 0x134   :  { %2594 = vmatpush.bf16.msra.mxu3 %v5795_v13  ;;  %2607 = vmatpush.bf16.msra.mxu1 %v5923_v62  ;;  %v7512_v13 = vld [vmem:[%s11587_s3 + $0x2f4] sm:$0xf0]  ;;  %v1583_v57 = vadd.f32 %v9760_v45, %v1570_v50  ;;  %v5951_v40 = vor.u32 %v7484_v41, %v5950_v3  ;;  %v7486_v50 = vld [vmem:[%s11587_s3 + $0x22c] sm:$0xf] }
 0x135   :  { %v1557_v11 = vadd.f32 %v9668_v52, %v1544_v7  ;;  %v5696_v52 = vld [vmem:[%s11587_s3 + $0x18] sm:$0xf0]  ;;  %v6063_v21 = vor.u32 %v7512_v13, %v6062_v8 }
 0x136   :  { %2533 = vmatpush.bf16.msra.mxu0 %v6107_v6  ;;  %v5699_v59 = vor.u32 %v7418_v15, %v5696_v52  ;;  %v7510_v6 = vld [vmem:[%s11587_s3 + $0x2ec] sm:$0xf]  ;;  %v6064_v7 = vld [vmem:[%s11587_s3 + $0x2f8] sm:$0xf0] }
 0x137   :  { %v1653_v17 = vmax.f32 %v1557_v11, 0.0  ;;  %v6067_v8 = vor.u32 %v7510_v6, %v6064_v7  ;;  %v7544_v11 = vld [vmem:[%s11587_s3 + $0x3f4] sm:$0xf0]  ;;  %v6048_v13 = vld [vmem:[%s11587_s3 + $0x2d8] sm:$0xf0] }
 0x138   :  { %2595 = vmatpush.bf16.msra.mxu3 %v5779_v24  ;;  %2608 = vmatpush.bf16.msra.mxu1 %v5907_v44  ;;  %v5840_v24 = vld [vmem:[%s11587_s3 + $0x138] sm:$0xf0]  ;;  %v7500_v44 = vld [vmem:[%s11587_s3 + $0x294] sm:$0xf0]  ;;  %v6191_v52 = vor.u32 %v7544_v11, %v6190_v9 }
 0x139   :  { %v9833_v25 = vpack.c.bf16 %v1653_v17, %v1653_v17  ;;  %v5843_v62 = vor.u32 %v7454_v23, %v5840_v24  ;;  %v1571_v33 = vpop.f32.mrf.mxu2  ;;  %v6015_v48 = vor.u32 %v7500_v44, %v6014_v18  ;;  %v6174_v17 = vld [vmem:[%s11587_s3 + $0x3c8] sm:$0xf]  ;;  %v6032_v23 = vld [vmem:[%s11587_s3 + $0x2b8] sm:$0xf0]  ;;  %v7528_v18 = vld [vmem:[%s11587_s3 + $0x374] sm:$0xf0] }
 0x13a   :  { %2534 = vmatpush.bf16.msra.mxu0 %v6091_v19  ;;  %v1545_v31 = vpop.f32.mrf.mxu3  ;;  %v6035_v27 = vor.u32 %v7502_v22, %v6032_v23  ;;  %v7490_v44 = vld [vmem:[%s11587_s3 + $0x24c] sm:$0xf]  ;;  %v6176_v6 = vld [vmem:[%s11587_s3 + $0x3d8] sm:$0xf0] }
 0x13b   :  { %2471 = vmatmul.bf16.vlgmr.msrb.gmra.mxu2 %v9833_v25  ;;  %v7498_v31 = vld [vmem:[%s11587_s3 + $0x28c] sm:$0xf]  ;;  %v6144_v9 = vld [vmem:[%s11587_s3 + $0x398] sm:$0xf0] }
 0x13c   :  { %2596 = vmatpush.bf16.msra.mxu3 %v5763_v35  ;;  %2609 = vmatpush.bf16.msra.mxu1 %v5891_v58  ;;  %v7450_v35 = vld [vmem:[%s11587_s3 + $0x10c] sm:$0xf]  ;;  %v5983_v58 = vor.u32 %v7492_v26, %v5982_v1 }
 0x13d   :  { %2567 = vmatpush.bf16.msrb.mxu2 %v6063_v21  ;;  %v5827_v39 = vor.u32 %v7450_v35, %v5824_v55  ;;  %v7540_v21 = vld [vmem:[%s11587_s3 + $0x3d4] sm:$0xf0]  ;;  %v7494_v55 = vld [vmem:[%s11587_s3 + $0x26c] sm:$0xf] }
 0x13e   :  { %2535 = vmatpush.bf16.msra.mxu0 %v6075_v53  ;;  %v6016_v53 = vld [vmem:[%s11587_s3 + $0x298] sm:$0xf0]  ;;  %v7532_v35 = vld [vmem:[%s11587_s3 + $0x394] sm:$0xf0]  ;;  %v7518_v23 = vld [vmem:[%s11587_s3 + $0x32c] sm:$0xf] }
 0x13f   :  { %v6019_v33 = vor.u32 %v7498_v31, %v6016_v53 }
 0x140   :  { %2597 = vmatpush.bf16.msra.mxu3 %v5747_v49  ;;  %2610 = vmatpush.bf16.msra.mxu1 %v5875_v63 }
 0x141   :  { %2568 = vmatpush.bf16.msrb.mxu2 %v6047_v34  ;;  %v6142_v34 = vld [vmem:[%s11587_s3 + $0x388] sm:$0xf] }
 0x142   :  { %v6143_v38 = vor.u32 %v7532_v35, %v6142_v34 }
 0x144   :  { %2598 = vmatpush.bf16.msra.mxu3 %v5731_v32  ;;  %2611 = vmatpush.bf16.msra.mxu1 %v5859_v20  ;;  %v1595_v49 = vpop.f32.mrf.mxu1 }
 0x145   :  { %2569 = vmatpush.bf16.msrb.mxu2 %v6031_v42  ;;  %v1596_v0 = vadd.f32 %v1595_v49, %v1583_v57  ;;  %v6126_v42 = vld [vmem:[%s11587_s3 + $0x368] sm:$0xf]  ;;  %v5987_v49 = vor.u32 %v7490_v44, %v5984_v46 }
 0x146   :  { %v6094_v57 = vld [vmem:[%s11587_s3 + $0x328] sm:$0xf] }
 0x147   :  { %v7550_v44 = vld [vmem:[%s11589_s5 + $0x28] sm:$0xff] }
 0x148   :  { %2599 = vmatpush.bf16.msra.mxu3 %v5715_v12  ;;  %2612 = vmatpush.bf16.msra.mxu1 %v5843_v62  ;;  %v7506_v12 = vld [vmem:[%s11587_s3 + $0x2cc] sm:$0xf]  ;;  %v6159_v62 = vor.u32 %v7536_v30, %v6158_v28  ;;  %v6080_v30 = vld [vmem:[%s11587_s3 + $0x318] sm:$0xf0] }
 0x149   :  { %2570 = vmatpush.bf16.msrb.mxu2 %v6015_v48  ;;  %v6051_v19 = vor.u32 %v7506_v12, %v6048_v13  ;;  %v6127_v48 = vor.u32 %v7528_v18, %v6126_v42  ;;  %v7526_v12 = vld [vmem:[%s11587_s3 + $0x36c] sm:$0xf]  ;;  %v6128_v13 = vld [vmem:[%s11587_s3 + $0x378] sm:$0xf0] }
 0x14a   :  { %v1634_v51 = vpop.f32.mrf.mxu0  ;;  %v7514_v28 = vld [vmem:[%s11587_s3 + $0x30c] sm:$0xf] }
 0x14b   :  { %2523 = vmatmul.bf16.vlgmr.msra.gmra.mxu2 %v9833_v25 }
 0x14c   :  { %2600 = vmatpush.bf16.msra.mxu3 %v5699_v59  ;;  %2613 = vmatpush.bf16.msra.mxu1 %v5827_v39  ;;  %v1597_v60 = vpop.f32.mrf.mxu1  ;;  %v6175_v59 = vor.u32 %v7540_v21, %v6174_v17  ;;  %v6003_v39 = vor.u32 %v7494_v55, %v6000_v37  ;;  %v6112_v17 = vld [vmem:[%s11587_s3 + $0x358] sm:$0xf0] }
 0x14d   :  { %v7482_v60 = vld [vmem:[%s11587_s3 + $0x20c] sm:$0xf]  ;;  %v7552_v37 = vld [vmem:[%s11589_s5 + $0x38] sm:$0xff] }
 0x14f   :  { %2601 = vmatmul.bf16.vlgmr.msra.gmra.mxu3 %v9355_v4  ;;  %v7496_v4 = vld [vmem:[%s11587_s3 + $0x274] sm:$0xf0]  ;;  %2614 = vmatmul.bf16.vlgmr.msra.gmra.mxu1 %v9530_v43  ;;  %v5966_v43 = vld [vmem:[%s11587_s3 + $0x228] sm:$0xf] }
 0x150   :  { %v5999_v54 = vor.u32 %v7496_v4, %v5998_v16  ;;  %v5967_v45 = vor.u32 %v7488_v61, %v5966_v43  ;;  %v6110_v16 = vld [vmem:[%s11587_s3 + $0x348] sm:$0xf]  ;;  %v7524_v4 = vld [vmem:[%s11587_s3 + $0x354] sm:$0xf0]  ;;  %v5952_v43 = vld [vmem:[%s11587_s3 + $0x218] sm:$0xf0]  ;;  %2913 = vmatpush.bf16.msrb.mxu3 %v7552_v37 }
 0x151   :  { %v1621_v2 = vpop.f32.mrf.mxu2  ;;  %v6111_v1 = vor.u32 %v7524_v4, %v6110_v16  ;;  %v7548_v4 = vld [vmem:[%s11589_s5 + $0x18] sm:$0xff]  ;;  %v7569_v37 = vld [vmem:[%s11589_s5 + $0xc0] sm:$0xff] }
 0x152   :  { %2571 = vmatpush.bf16.msrb.mxu2 %v5999_v54  ;;  %v1608_v56 = vpop.f32.mrf.mxu3  ;;  %v1636_v29 = vpop.f32.mrf.mxu0 }
 0x153   :  { %v1609_v32 = vadd.f32 %v1608_v56, %v1596_v0  ;;  %v5955_v0 = vor.u32 %v7482_v60, %v5952_v43  ;;  %v6078_v56 = vld [vmem:[%s11587_s3 + $0x308] sm:$0xf]  ;;  %v6192_v29 = vld [vmem:[%s11587_s3 + $0x3f8] sm:$0xf0] }
 0x154   :  { %v1647_v36 = vpop.f32.mrf.mxu1 }
 0x155   :  { %v1622_v5 = vadd.f32 %v1621_v2, %v1609_v32  ;;  %v7516_v32 = vld [vmem:[%s11587_s3 + $0x314] sm:$0xf0]  ;;  %v7542_v2 = vld [vmem:[%s11587_s3 + $0x3ec] sm:$0xf] }
 0x156   :  { %2572 = vmatpush.bf16.msrb.mxu2 %v5983_v58  ;;  %v7520_v58 = vld [vmem:[%s11587_s3 + $0x334] sm:$0xf0]  ;;  %v6079_v3 = vor.u32 %v7516_v32, %v6078_v56  ;;  %v6195_v41 = vor.u32 %v7542_v2, %v6192_v29  ;;  %v7555_v56 = vld [vmem:[%s11589_s5 + $0x50] sm:$0xff] }
 0x157   :  { %v1635_v63 = vadd.f32 %v1634_v51, %v1622_v5  ;;  %v5968_v51 = vld [vmem:[%s11587_s3 + $0x238] sm:$0xf0]  ;;  %v6095_v61 = vor.u32 %v7520_v58, %v6094_v57  ;;  %v7538_v5 = vld [vmem:[%s11587_s3 + $0x3cc] sm:$0xf]  ;;  %v7545_v57 = vld [vmem:[%s11589_s5] sm:$0xff] }
 0x158   :  { %v5971_v26 = vor.u32 %v7486_v50, %v5968_v51  ;;  %v6179_v7 = vor.u32 %v7538_v5, %v6176_v6  ;;  %v7560_v50 = vld [vmem:[%s11589_s5 + $0x78] sm:$0xff]  ;;  %v7559_v51 = vld [vmem:[%s11589_s5 + $0x70] sm:$0xff]  ;;  %v7557_v58 = vld [vmem:[%s11589_s5 + $0x60] sm:$0xff] }
 0x159   :  { %v1648_v10 = vadd.f32 %v1647_v36, %v1635_v63  ;;  %v1623_v15 = vpop.f32.mrf.mxu2  ;;  %v7534_v63 = vld [vmem:[%s11587_s3 + $0x3ac] sm:$0xf]  ;;  %v10016_v36 = vld [vmem:[%s11588_s4] sm:$0xf]  ;;  %2926 = vmatpush.bf16.msrb.mxu1 %v7560_v50  ;;  %v7567_v32 = vld [vmem:[%s11589_s5 + $0xb0] sm:$0xff] }
 0x15a   :  { %2573 = vmatpush.bf16.msrb.mxu2 %v5967_v45  ;;  %v1610_v14 = vpop.f32.mrf.mxu3  ;;  %v6131_v15 = vor.u32 %v7526_v12, %v6128_v13  ;;  %v1790_v31 = vperm.slane %v10016_v36, 1  ;;  %v1792_v43 = vperm.slane %v10016_v36, 3  ;;  %v7554_v5 = vld [vmem:[%s11589_s5 + $0x48] sm:$0xff] }
 0x15b   :  { %v1654_v47 = vmax.f32 %v1648_v10, 0.0  ;;  %v1789_v10 = vperm.slane %v10016_v36, 0  ;;  %v7566_v6 = vld [vmem:[%s11589_s5 + $0xa8] sm:$0xff] }
 0x15c   :  { %v1649_v24 = vpop.f32.mrf.mxu1  ;;  %v7562_v12 = vld [vmem:[%s11589_s5 + $0x88] sm:$0xff] }
 0x15d   :  { %v9913_v20 = vpack.c.bf16 %v1654_v47, %v1654_v47  ;;  %v6096_v24 = vld [vmem:[%s11587_s3 + $0x338] sm:$0xf0]  ;;  %2927 = vmatpush.bf16.msrb.mxu1 %v7559_v51 }
 0x15e   :  { %2574 = vmatpush.bf16.msrb.mxu2 %v5951_v40  ;;  %v6160_v40 = vld [vmem:[%s11587_s3 + $0x3b8] sm:$0xf0] }
 0x15f   :  { %2484 = vmatmul.bf16.vlgmr.msrb.gmra.mxu0 %v9913_v20 }
 0x160   :  { %2580 = vmatpush.bf16.msrb.mxu0 %v6191_v52 }
 0x161   :  { %2575 = vmatmul.bf16.vlgmr.msrb.gmra.mxu2 %v9833_v25 }
 0x162   :  { %2619 = vmatpush.bf16.msra.mxu2 %v6067_v8  ;;  %v7530_v8 = vld [vmem:[%s11587_s3 + $0x38c] sm:$0xf] }
 0x163   :  { %v6147_v11 = vor.u32 %v7530_v8, %v6144_v9  ;;  %v7564_v8 = vld [vmem:[%s11589_s5 + $0x98] sm:$0xff]  ;;  %v7563_v9 = vld [vmem:[%s11589_s5 + $0x90] sm:$0xff] }
 0x164   :  { %2581 = vmatpush.bf16.msrb.mxu0 %v6175_v59 }
 0x166   :  { %2620 = vmatpush.bf16.msra.mxu2 %v6051_v19  ;;  %v7522_v19 = vld [vmem:[%s11587_s3 + $0x34c] sm:$0xf] }
 0x167   :  { %v6115_v22 = vor.u32 %v7522_v19, %v6112_v17  ;;  %v7576_v19 = vld [vmem:[%s11589_s5 + $0xf8] sm:$0xff] }
 0x168   :  { %2582 = vmatpush.bf16.msrb.mxu0 %v6159_v62  ;;  %v6083_v62 = vor.u32 %v7514_v28, %v6080_v30 }
 0x16a   :  { %2621 = vmatpush.bf16.msra.mxu2 %v6035_v27  ;;  %v6099_v27 = vor.u32 %v7518_v23, %v6096_v24  ;;  %v7574_v23 = vld [vmem:[%s11589_s5 + $0xe8] sm:$0xff] }
 0x16c   :  { %2583 = vmatpush.bf16.msrb.mxu0 %v6143_v38  ;;  %v1791_v38 = vperm.slane %v10016_v36, 2  ;;  %v7565_v36 = vld [vmem:[%s11589_s5 + $0xa0] sm:$0xff] }
 0x16e   :  { %2622 = vmatpush.bf16.msra.mxu2 %v6019_v33 }
 0x16f   :  { %2536 = vmatmul.bf16.vlgmr.msra.gmra.mxu0 %v9913_v20 }
 0x170   :  { %2584 = vmatpush.bf16.msrb.mxu0 %v6127_v48  ;;  %v7549_v48 = vld [vmem:[%s11589_s5 + $0x20] sm:$0xff] }
 0x172   :  { %2623 = vmatpush.bf16.msra.mxu2 %v6003_v39  ;;  %v2446_v54 = vpop.f32.mrf.mxu3  ;;  %v7551_v39 = vld [vmem:[%s11589_s5 + $0x30] sm:$0xff] }
 0x173   :  { %v2447_v14 = vadd.f32 %v2446_v54, %v1789_v10  ;;  %2914 = vmatpush.bf16.msrb.mxu3 %v7551_v39  ;;  %v7547_v54 = vld [vmem:[%s11589_s5 + $0x10] sm:$0xff] }
 0x174   :  { %2585 = vmatpush.bf16.msrb.mxu0 %v6111_v1  ;;  %v7546_v1 = vld [vmem:[%s11589_s5 + $0x8] sm:$0xff] }
 0x176   :  { %2624 = vmatpush.bf16.msra.mxu2 %v5987_v49 }
 0x177   :  { %2915 = vmatpush.bf16.msrb.mxu3 %v7550_v44 }
 0x178   :  { %2586 = vmatpush.bf16.msrb.mxu0 %v6095_v61  ;;  %v7556_v61 = vld [vmem:[%s11589_s5 + $0x58] sm:$0xff] }
 0x17a   :  { %2625 = vmatpush.bf16.msra.mxu2 %v5971_v26  ;;  %v2448_v45 = vpop.f32.mrf.mxu3  ;;  %v7558_v26 = vld [vmem:[%s11589_s5 + $0x68] sm:$0xff] }
 0x17b   :  { %2916 = vmatpush.bf16.msrb.mxu3 %v7549_v48  ;;  %2928 = vmatpush.bf16.msrb.mxu1 %v7558_v26 }
 0x17c   :  { %2587 = vmatpush.bf16.msrb.mxu0 %v6079_v3 }
 0x17e   :  { %2626 = vmatpush.bf16.msra.mxu2 %v5955_v0  ;;  %v2459_v47 = vpop.f32.mrf.mxu1  ;;  %v7568_v0 = vld [vmem:[%s11589_s5 + $0xb8] sm:$0xff] }
 0x17f   :  { %2588 = vmatmul.bf16.vlgmr.msrb.gmra.mxu0 %v9913_v20  ;;  %v10031_v52 = vadd.f32 %v2459_v47, %v2447_v14  ;;  %2917 = vmatpush.bf16.msrb.mxu3 %v7548_v4 }
 0x180   :  { %2632 = vmatpush.bf16.msra.mxu0 %v6195_v41  ;;  %2929 = vmatpush.bf16.msrb.mxu1 %v7557_v58 }
 0x181   :  { %2627 = vmatmul.bf16.vlgmr.msra.gmra.mxu2 %v9833_v25  ;;  %v6163_v25 = vor.u32 %v7534_v63, %v6160_v40  ;;  %v7553_v40 = vld [vmem:[%s11589_s5 + $0x40] sm:$0xff] }
 0x182   :  { %2939 = vmatpush.bf16.msrb.mxu2 %v7568_v0 }
 0x183   :  { %2918 = vmatpush.bf16.msrb.mxu3 %v7547_v54 }
 0x184   :  { %2633 = vmatpush.bf16.msra.mxu0 %v6179_v7  ;;  %2930 = vmatpush.bf16.msrb.mxu1 %v7556_v61 }
 0x186   :  { %v2461_v59 = vpop.f32.mrf.mxu1  ;;  %2940 = vmatpush.bf16.msrb.mxu2 %v7567_v32 }
 0x187   :  { %2919 = vmatpush.bf16.msrb.mxu3 %v7546_v1  ;;  %v7573_v59 = vld [vmem:[%s11589_s5 + $0xe0] sm:$0xff] }
 0x188   :  { %2634 = vmatpush.bf16.msra.mxu0 %v6163_v25  ;;  %2931 = vmatpush.bf16.msrb.mxu1 %v7555_v56 }
 0x18a   :  { %2941 = vmatpush.bf16.msrb.mxu2 %v7566_v6  ;;  %v7881_v6 = vmov 0  }
 0x18b   :  { %2920 = vmatpush.bf16.msrb.mxu3 %v7545_v57  ;;  %7806 = vset.pattern.permute.xlu0 %v7881_v6  ;;  %v6607_v6 = vld [vmem:[%s11593_s9 + $0x230] sm:$0xf] }
 0x18c   :  { %2635 = vmatpush.bf16.msra.mxu0 %v6147_v11  ;;  %2932 = vmatpush.bf16.msrb.mxu1 %v7554_v5  ;;  %v7880_v5 = vmov 1  }
 0x18d   :  { %7807 = vset.pattern.permute.xlu1 %v7880_v5 }
 0x18e   :  { %v2511_v34 = vpop.f32.mrf.mxu1  ;;  %2942 = vmatpush.bf16.msrb.mxu2 %v7565_v36 }
 0x190   :  { %2636 = vmatpush.bf16.msra.mxu0 %v6131_v15  ;;  %2933 = vmatpush.bf16.msrb.mxu1 %v7553_v40  ;;  %v7561_v15 = vld [vmem:[%s11589_s5 + $0x80] sm:$0xff]  ;;  %v6747_v40 = vld [vmem:[%s11593_s9 + $0x348] sm:$0xf] }
 0x192   :  { %v2498_v21 = vpop.f32.mrf.mxu3  ;;  %2943 = vmatpush.bf16.msrb.mxu2 %v7564_v8  ;;  %v6971_v8 = vld [vmem:[%s11593_s9 + $0x508] sm:$0xf] }
 0x193   :  { %v2499_v33 = vadd.f32 %v2498_v21, %v1790_v31  ;;  %v7572_v31 = vld [vmem:[%s11589_s5 + $0xd8] sm:$0xff] }
 0x194   :  { %2637 = vmatpush.bf16.msra.mxu0 %v6115_v22 }
 0x195   :  { %v10052_v35 = vadd.f32 %v2511_v34, %v2499_v33  ;;  %v7571_v33 = vld [vmem:[%s11589_s5 + $0xd0] sm:$0xff] }
 0x196   :  { %v2513_v55 = vpop.f32.mrf.mxu1  ;;  %2944 = vmatpush.bf16.msrb.mxu2 %v7563_v9  ;;  %v7741_v9 = vld [vmem:[%s11593_s9 + $0x520] sm:$0xf0] }
 0x198   :  { %2638 = vmatpush.bf16.msra.mxu0 %v6099_v27 }
 0x19a   :  { %v2500_v53 = vpop.f32.mrf.mxu3  ;;  %2945 = vmatpush.bf16.msrb.mxu2 %v7562_v12  ;;  %v7195_v12 = vld [vmem:[%s11593_s9 + $0x6c8] sm:$0xf] }
 0x19c   :  { %2639 = vmatpush.bf16.msra.mxu0 %v6083_v62 }
 0x19e   :  { %2946 = vmatpush.bf16.msrb.mxu2 %v7561_v15  ;;  %v7622_v15 = vld [vmem:[%s11593_s9 + $0x168] sm:$0xf0] }
 0x19f   :  { %2640 = vmatmul.bf16.vlgmr.msra.gmra.mxu0 %v9913_v20 }
 0x1a0   :  { %2952 = vmatpush.bf16.msrb.mxu0 %v7576_v19  ;;  %v6719_v19 = vld [vmem:[%s11593_s9 + $0x310] sm:$0xf] }
 0x1ac   :  { %v2563_v18 = vpop.f32.mrf.mxu1 }
 0x1b2   :  { %v2550_v42 = vpop.f32.mrf.mxu3 }
 0x1b3   :  { %v2551_v20 = vadd.f32 %v2550_v42, %v1791_v38 }
 0x1b4   :  { %v2565_v16 = vpop.f32.mrf.mxu1 }
 0x1b5   :  { %v10065_v46 = vadd.f32 %v2563_v18, %v2551_v20 }
 0x1ba   :  { %v2552_v49 = vpop.f32.mrf.mxu3 }
 0x1be   :  { %v2472_v60 = vpop.f32.mrf.mxu2 }
 0x1bf   :  { %v2473_v11 = vadd.f32 %v2472_v60, %v10031_v52  ;;  %v7575_v52 = vld [vmem:[%s11589_s5 + $0xf0] sm:$0xff] }
 0x1c0   :  { %2953 = vmatpush.bf16.msrb.mxu0 %v7575_v52 }
 0x1c4   :  { %2954 = vmatpush.bf16.msrb.mxu0 %v7574_v23  ;;  %v7734_v23 = vld [vmem:[%s11593_s9 + $0x4e8] sm:$0xf0] }
 0x1c6   :  { %v2474_v41 = vpop.f32.mrf.mxu2 }
 0x1c8   :  { %2955 = vmatpush.bf16.msrb.mxu0 %v7573_v59 }
 0x1cc   :  { %v2615_v29 = vpop.f32.mrf.mxu1  ;;  %2956 = vmatpush.bf16.msrb.mxu0 %v7572_v31 }
 0x1ce   :  { %v2524_v25 = vpop.f32.mrf.mxu2 }
 0x1cf   :  { %v2525_v27 = vadd.f32 %v2524_v25, %v10052_v35  ;;  %v7570_v35 = vld [vmem:[%s11589_s5 + $0xc8] sm:$0xff]  ;;  %v7685_v25 = vld [vmem:[%s11593_s9 + $0x360] sm:$0xf0] }
 0x1d0   :  { %2957 = vmatpush.bf16.msrb.mxu0 %v7571_v33  ;;  %v6915_v33 = vld [vmem:[%s11593_s9 + $0x498] sm:$0xf] }
 0x1d2   :  { %v2602_v2 = vpop.f32.mrf.mxu3 }
 0x1d3   :  { %v2603_v45 = vadd.f32 %v2602_v2, %v1792_v43  ;;  %v7809_v43 = vld [vmem:[%s11590_s6] ss:$0 sm:$0xff] }
 0x1d4   :  { %v2617_v63 = vpop.f32.mrf.mxu1  ;;  %2958 = vmatpush.bf16.msrb.mxu0 %v7570_v35  ;;  %v7727_v35 = vld [vmem:[%s11593_s9 + $0x4b0] sm:$0xf0] }
 0x1d5   :  { %v10107_v3 = vadd.f32 %v2615_v29, %v2603_v45  ;;  %v7629_v63 = vld [vmem:[%s11593_s9 + $0x1a0] sm:$0xf0] }
 0x1d6   :  { %v2526_v10 = vpop.f32.mrf.mxu2 }
 0x1d7   :  { %v6748_v10 = vor.u32 %v7685_v25, %v6747_v40  ;;  %v6831_v40 = vld [vmem:[%s11593_s9 + $0x3f0] sm:$0xf] }
 0x1d8   :  { %2959 = vmatpush.bf16.msrb.mxu0 %v7569_v37  ;;  %v7783_v37 = vld [vmem:[%s11593_s9 + $0x670] sm:$0xf0]  ;;  %v7055_v25 = vld [vmem:[%s11593_s9 + $0x5b0] sm:$0xf] }
 0x1d9   :  { %4476 = vmatpush.bf16.msra.mxu1 %v6748_v10 }
 0x1da   :  { %v2604_v7 = vpop.f32.mrf.mxu3 }
 0x1db   :  { %v6523_v7 = vld [vmem:[%s11593_s9 + $0x188] sm:$0xf] }
 0x1dc   :  { %v2485_v13 = vpop.f32.mrf.mxu0  ;;  %v6524_v36 = vor.u32 %v7629_v63, %v6523_v7  ;;  %v7650_v63 = vld [vmem:[%s11593_s9 + $0x248] sm:$0xf0] }
 0x1dd   :  { %v2486_v14 = vadd.f32 %v2485_v13, %v2473_v11  ;;  %v6972_v11 = vor.u32 %v7741_v9, %v6971_v8  ;;  %v7797_v13 = vld [vmem:[%s11593_s9 + $0x6e0] sm:$0xf0]  ;;  %v7762_v8 = vld [vmem:[%s11593_s9 + $0x5c8] sm:$0xf0]  ;;  %v6608_v10 = vor.u32 %v7650_v63, %v6607_v6  ;;  %v7612_v6 = vld [vmem:[%s11593_s9 + $0x11c] sm:$0xf] }
 0x1de   :  { %4463 = vmatpush.bf16.msra.mxu3 %v6524_v36  ;;  %v7706_v36 = vld [vmem:[%s11593_s9 + $0x408] sm:$0xf0]  ;;  %v7668_v63 = vld [vmem:[%s11593_s9 + $0x2dc] sm:$0xf] }
 0x1df   :  { %v2645_v47 = vmax.f32 %v2486_v14, 0.0  ;;  %v6495_v14 = vld [vmem:[%s11593_s9 + $0x150] sm:$0xf]  ;;  %4489 = vmatpush.bf16.msra.mxu2 %v6972_v11  ;;  %v6832_v11 = vor.u32 %v7706_v36, %v6831_v40  ;;  %v6693_v36 = vld [vmem:[%s11593_s9 + $0x2f4] sm:$0xf0] }
 0x1e1   :  { %v2649_v17 = vpack.c.bf16 %v2645_v47, %v2645_v47  ;;  %v7196_v47 = vor.u32 %v7797_v13, %v7195_v12  ;;  %v6355_v12 = vld [vmem:[%s11593_s9 + $0x38] sm:$0xf]  ;;  %v7587_v13 = vld [vmem:[%s11593_s9 + $0x50] sm:$0xf0] }
 0x1e3   :  { %2921 = vmatmul.bf16.vlgmr.msrb.gmra.mxu3 %v2649_v17  ;;  %v7678_v17 = vld [vmem:[%s11593_s9 + $0x328] sm:$0xf0]  ;;  %4502 = vmatpush.bf16.msra.mxu0 %v7196_v47  ;;  %v7056_v47 = vor.u32 %v7762_v8, %v7055_v25  ;;  %v7724_v25 = vld [vmem:[%s11593_s9 + $0x49c] sm:$0xf]  ;;  %v6917_v8 = vld [vmem:[%s11593_s9 + $0x4b4] sm:$0xf0] }
 0x1e4   :  { %v2576_v21 = vpop.f32.mrf.mxu2  ;;  %v2487_v22 = vpop.f32.mrf.mxu0  ;;  %v6720_v52 = vor.u32 %v7678_v17, %v6719_v19  ;;  %v6803_v19 = vld [vmem:[%s11593_s9 + $0x3b8] sm:$0xf]  ;;  %v7699_v17 = vld [vmem:[%s11593_s9 + $0x3d0] sm:$0xf0] }
 0x1e5   :  { %v2577_v55 = vadd.f32 %v2576_v21, %v10065_v46  ;;  %v6496_v21 = vor.u32 %v7622_v15, %v6495_v14  ;;  %v6943_v22 = vld [vmem:[%s11593_s9 + $0x4d0] sm:$0xf]  ;;  %v6579_v14 = vld [vmem:[%s11593_s9 + $0x1f8] sm:$0xf]  ;;  %v7643_v15 = vld [vmem:[%s11593_s9 + $0x210] sm:$0xf0] }
 0x1e6   :  { %v6944_v59 = vor.u32 %v7734_v23, %v6943_v22  ;;  %4477 = vmatpush.bf16.msra.mxu1 %v6720_v52  ;;  %v7755_v52 = vld [vmem:[%s11593_s9 + $0x590] sm:$0xf0]  ;;  %v6356_v22 = vor.u32 %v7587_v13, %v6355_v12  ;;  %v7826_v23 = vld [vmem:[%s11584_s0] sm:$0xff]  ;;  %v6696_v12 = vor.u32 %v7668_v63, %v6693_v36  ;;  %v6920_v13 = vor.u32 %v7724_v25, %v6917_v8 }
 0x1e7   :  { %4464 = vmatpush.bf16.msra.mxu3 %v6496_v21  ;;  %v7027_v21 = vld [vmem:[%s11593_s9 + $0x578] sm:$0xf]  ;;  %v7689_v63 = vld [vmem:[%s11593_s9 + $0x384] sm:$0xf] }
 0x1e8   :  { %4490 = vmatpush.bf16.msra.mxu2 %v6944_v59  ;;  %v6580_v59 = vor.u32 %v7643_v15, %v6579_v14  ;;  %v7605_v14 = vld [vmem:[%s11593_s9 + $0xe4] sm:$0xf] }
 0x1e9   :  { %v7661_v15 = vld [vmem:[%s11593_s9 + $0x2a4] sm:$0xf] }
 0x1ea   :  { %v7745_v8 = vld [vmem:[%s11593_s9 + $0x544] sm:$0xf] }
 0x1ec   :  { %v2578_v24 = vpop.f32.mrf.mxu2  ;;  %v2537_v28 = vpop.f32.mrf.mxu0 }
 0x1ed   :  { %v2538_v30 = vadd.f32 %v2537_v28, %v2525_v27  ;;  %v7167_v24 = vld [vmem:[%s11593_s9 + $0x690] sm:$0xf]  ;;  %v7790_v27 = vld [vmem:[%s11593_s9 + $0x6a8] sm:$0xf0]  ;;  %v6467_v28 = vld [vmem:[%s11593_s9 + $0x118] sm:$0xf] }
 0x1ee   :  { %v7168_v31 = vor.u32 %v7790_v27, %v7167_v24  ;;  %v47_v24 = vunpack.c.l.bf16 %v7826_v23  ;;  %v6804_v27 = vor.u32 %v7699_v17, %v6803_v19  ;;  %v6665_v17 = vld [vmem:[%s11593_s9 + $0x2bc] sm:$0xf0] }
 0x1ef   :  { %v2646_v53 = vmax.f32 %v2538_v30, 0.0  ;;  %v7615_v30 = vld [vmem:[%s11593_s9 + $0x130] sm:$0xf0]  ;;  %v7113_v23 = vld [vmem:[%s11593_s9 + $0x63c] sm:$0xf0] }
 0x1f0   :  { %4503 = vmatpush.bf16.msra.mxu0 %v7168_v31  ;;  %v7028_v31 = vor.u32 %v7755_v52, %v7027_v21  ;;  %v7717_v21 = vld [vmem:[%s11593_s9 + $0x464] sm:$0xf]  ;;  %v6889_v52 = vld [vmem:[%s11593_s9 + $0x47c] sm:$0xf0] }
 0x1f1   :  { %v2650_v62 = vpack.c.bf16 %v2646_v53, %v2646_v53  ;;  %v6691_v53 = vld [vmem:[%s11593_s9 + $0x2d8] sm:$0xf] }
 0x1f3   :  { %2934 = vmatmul.bf16.vlgmr.msrb.gmra.mxu1 %v2650_v62  ;;  %v7671_v62 = vld [vmem:[%s11593_s9 + $0x2f0] sm:$0xf0] }
 0x1f4   :  { %v2539_v34 = vpop.f32.mrf.mxu0 }
 0x1f5   :  { %v6468_v34 = vor.u32 %v7615_v30, %v6467_v28  ;;  %v6327_v28 = vld [vmem:[%s11593_s9] sm:$0xf]  ;;  %v7580_v30 = vld [vmem:[%s11593_s9 + $0x18] sm:$0xf0] }
 0x1f7   :  { %4465 = vmatpush.bf16.msra.mxu3 %v6468_v34  ;;  %v7692_v34 = vld [vmem:[%s11593_s9 + $0x398] sm:$0xf0] }
 0x1fc   :  { %v2589_v38 = vpop.f32.mrf.mxu0 }
 0x1fd   :  { %v2590_v39 = vadd.f32 %v2589_v38, %v2577_v55  ;;  %v7139_v55 = vld [vmem:[%s11593_s9 + $0x658] sm:$0xf]  ;;  %v6692_v38 = vor.u32 %v7671_v62, %v6691_v53  ;;  %v6551_v53 = vld [vmem:[%s11593_s9 + $0x1c0] sm:$0xf]  ;;  %v7636_v62 = vld [vmem:[%s11593_s9 + $0x1d8] sm:$0xf0] }
 0x1ff   :  { %v2647_v18 = vmax.f32 %v2590_v39, 0.0  ;;  %v6916_v39 = vor.u32 %v7727_v35, %v6915_v33  ;;  %4478 = vmatpush.bf16.msra.mxu1 %v6692_v38  ;;  %v6775_v33 = vld [vmem:[%s11593_s9 + $0x380] sm:$0xf]  ;;  %v6328_v38 = vor.u32 %v7580_v30, %v6327_v28  ;;  %v7598_v28 = vld [vmem:[%s11593_s9 + $0xac] sm:$0xf] }
 0x200   :  { %v6999_v35 = vld [vmem:[%s11593_s9 + $0x540] sm:$0xf]  ;;  %v7654_v30 = vld [vmem:[%s11593_s9 + $0x26c] sm:$0xf] }
 0x201   :  { %v2651_v44 = vpack.c.bf16 %v2647_v18, %v2647_v18  ;;  %v7608_v18 = vld [vmem:[%s11593_s9 + $0xf8] sm:$0xf0]  ;;  %4491 = vmatpush.bf16.msra.mxu2 %v6916_v39  ;;  %v7626_v39 = vld [vmem:[%s11593_s9 + $0x18c] sm:$0xf] }
 0x203   :  { %2947 = vmatmul.bf16.vlgmr.msrb.gmra.mxu2 %v2651_v44  ;;  %v6663_v44 = vld [vmem:[%s11593_s9 + $0x2a0] sm:$0xf] }
 0x204   :  { %v2628_v42 = vpop.f32.mrf.mxu2  ;;  %v2591_v20 = vpop.f32.mrf.mxu0 }
 0x205   :  { %v2629_v49 = vadd.f32 %v2628_v42, %v10107_v3  ;;  %v6439_v42 = vld [vmem:[%s11593_s9 + $0xe0] sm:$0xf]  ;;  %v7140_v20 = vor.u32 %v7783_v37, %v7139_v55  ;;  %v7748_v55 = vld [vmem:[%s11593_s9 + $0x558] sm:$0xf0] }
 0x207   :  { %4504 = vmatpush.bf16.msra.mxu0 %v7140_v20  ;;  %v6749_v20 = vld [vmem:[%s11593_s9 + $0x364] sm:$0xf0] }
 0x20c   :  { %v2630_v48 = vpop.f32.mrf.mxu2 }
 0x20d   :  { %v7664_v48 = vld [vmem:[%s11593_s9 + $0x2b8] sm:$0xf0] }
 0x21c   :  { %v2641_v16 = vpop.f32.mrf.mxu0 }
 0x21d   :  { %v2642_v4 = vadd.f32 %v2641_v16, %v2629_v49  ;;  %v6887_v49 = vld [vmem:[%s11593_s9 + $0x460] sm:$0xf]  ;;  %v7720_v16 = vld [vmem:[%s11593_s9 + $0x478] sm:$0xf0] }
 0x21f   :  { %v2648_v50 = vmax.f32 %v2642_v4, 0.0  ;;  %v7111_v4 = vld [vmem:[%s11593_s9 + $0x620] sm:$0xf] }
 0x221   :  { %v2652_v51 = vpack.c.bf16 %v2648_v50, %v2648_v50  ;;  %v7776_v50 = vld [vmem:[%s11593_s9 + $0x638] sm:$0xf0] }
 0x223   :  { %2960 = vmatmul.bf16.vlgmr.msrb.gmra.mxu0 %v2652_v51  ;;  %v6440_v51 = vor.u32 %v7608_v18, %v6439_v42  ;;  %v6525_v42 = vld [vmem:[%s11593_s9 + $0x1a4] sm:$0xf0]  ;;  %v7682_v18 = vld [vmem:[%s11593_s9 + $0x34c] sm:$0xf] }
 0x224   :  { %v2643_v46 = vpop.f32.mrf.mxu0 }
 0x225   :  { %v6664_v46 = vor.u32 %v7664_v48, %v6663_v44  ;;  %4466 = vmatpush.bf16.msra.mxu3 %v6440_v51  ;;  %v7738_v48 = vld [vmem:[%s11593_s9 + $0x50c] sm:$0xf]  ;;  %v7197_v51 = vld [vmem:[%s11593_s9 + $0x6e4] sm:$0xf0] }
 0x227   :  { %4479 = vmatpush.bf16.msra.mxu1 %v6664_v46 }
 0x266   :  { %v2922_v54 = vpop.f32.mrf.mxu3 }
 0x267   :  { %v2923_v61 = vadd.f32 %v7809_v43, %v2922_v54  ;;  %v6888_v54 = vor.u32 %v7720_v16, %v6887_v49  ;;  %v6859_v43 = vld [vmem:[%s11593_s9 + $0x428] sm:$0xf]  ;;  %v6552_v16 = vor.u32 %v7636_v62, %v6551_v53  ;;  %v7710_v62 = vld [vmem:[%s11593_s9 + $0x42c] sm:$0xf] }
 0x268   :  { %v6973_v49 = vld [vmem:[%s11593_s9 + $0x524] sm:$0xf0] }
 0x269   :  { %4492 = vmatpush.bf16.msra.mxu2 %v6888_v54  ;;  %v7000_v54 = vor.u32 %v7748_v55, %v6999_v35  ;;  %v6637_v53 = vld [vmem:[%s11593_s9 + $0x284] sm:$0xf0] }
 0x26a   :  { %v7085_v35 = vld [vmem:[%s11593_s9 + $0x604] sm:$0xf0] }
 0x26e   :  { %v2924_v1 = vpop.f32.mrf.mxu3 }
 0x26f   :  { %v6411_v1 = vld [vmem:[%s11593_s9 + $0xa8] sm:$0xf] }
 0x270   :  { %v2935_v26 = vpop.f32.mrf.mxu1 }
 0x271   :  { %v2936_v0 = vadd.f32 %v2935_v26, %v2923_v61  ;;  %v7601_v26 = vld [vmem:[%s11593_s9 + $0xc0] sm:$0xf0] }
 0x272   :  { %v7713_v61 = vld [vmem:[%s11593_s9 + $0x440] sm:$0xf0] }
 0x278   :  { %v2937_v57 = vpop.f32.mrf.mxu1 }
 0x279   :  { %v6635_v57 = vld [vmem:[%s11593_s9 + $0x268] sm:$0xf] }
 0x286   :  { %v2948_v58 = vpop.f32.mrf.mxu2 }
 0x287   :  { %v2949_v56 = vadd.f32 %v2948_v58, %v2936_v0  ;;  %v7112_v58 = vor.u32 %v7776_v50, %v7111_v4  ;;  %v7083_v0 = vld [vmem:[%s11593_s9 + $0x5e8] sm:$0xf]  ;;  %v6776_v4 = vor.u32 %v7692_v34, %v6775_v33  ;;  %v7794_v50 = vld [vmem:[%s11593_s9 + $0x6cc] sm:$0xf] }
 0x288   :  { %v6861_v33 = vld [vmem:[%s11593_s9 + $0x444] sm:$0xf0]  ;;  %v7766_v34 = vld [vmem:[%s11593_s9 + $0x5ec] sm:$0xf] }
 0x289   :  { %4505 = vmatpush.bf16.msra.mxu0 %v7112_v58  ;;  %v7619_v58 = vld [vmem:[%s11593_s9 + $0x154] sm:$0xf] }
 0x28e   :  { %v2950_v60 = vpop.f32.mrf.mxu2 }
 0x28f   :  { %v7657_v60 = vld [vmem:[%s11593_s9 + $0x280] sm:$0xf0] }
 0x2a0   :  { %v2961_v32 = vpop.f32.mrf.mxu0 }
 0x2a1   :  { %v10164_v2 = vadd.f32 %v2961_v32, %v2949_v56  ;;  %v7769_v56 = vld [vmem:[%s11593_s9 + $0x600] sm:$0xf0]  ;;  %v6412_v32 = vor.u32 %v7601_v26, %v6411_v1  ;;  %v6528_v1 = vor.u32 %v7626_v39, %v6525_v42  ;;  %v6752_v26 = vor.u32 %v7682_v18, %v6749_v20  ;;  %v7591_v42 = vld [vmem:[%s11593_s9 + $0x74] sm:$0xf]  ;;  %v6385_v18 = vld [vmem:[%s11593_s9 + $0x8c] sm:$0xf0] }
 0x2a2   :  { %v7084_v7 = vor.u32 %v7769_v56, %v7083_v0  ;;  %v7731_v0 = vld [vmem:[%s11593_s9 + $0x4d4] sm:$0xf]  ;;  %v6945_v56 = vld [vmem:[%s11593_s9 + $0x4ec] sm:$0xf0]  ;;  %v7088_v39 = vor.u32 %v7766_v34, %v7085_v35  ;;  %v6388_v20 = vor.u32 %v7591_v42, %v6385_v18 }
 0x2a3   :  { %v2966_v29 = vmul.f32 0.5, %v10164_v2  ;;  %2965 = vst [vmem:[#allocation4] sm:$0xff] %v10164_v2  ;;  %4467 = vmatpush.bf16.msra.mxu3 %v6412_v32  ;;  %v7787_v32 = vld [vmem:[%s11593_s9 + $0x694] sm:$0xf]  ;;  %v6531_v18 = vld [vmem:[%s11593_s9 + $0x190] sm:$0xf] }
 0x2a4   :  { %4506 = vmatpush.bf16.msra.mxu0 %v7084_v7  ;;  %v6469_v7 = vld [vmem:[%s11593_s9 + $0x134] sm:$0xf0] }
 0x2a5   :  { %v2967_v45 = vmul.f32 1.442695, %v2966_v29  ;;  %v6636_v29 = vor.u32 %v7657_v60, %v6635_v57  ;;  %v6976_v57 = vor.u32 %v7738_v48, %v6973_v49  ;;  %v6497_v60 = vld [vmem:[%s11593_s9 + $0x16c] sm:$0xf0]  ;;  %v7703_v49 = vld [vmem:[%s11593_s9 + $0x3f4] sm:$0xf] }
 0x2a6   :  { %v6609_v48 = vld [vmem:[%s11593_s9 + $0x24c] sm:$0xf0] }
 0x2a7   :  { %7810 = vpow2.f32 %v2967_v45  ;;  %v6860_v45 = vor.u32 %v7713_v61, %v6859_v43  ;;  %4480 = vmatpush.bf16.msra.mxu1 %v6636_v29  ;;  %v7675_v43 = vld [vmem:[%s11593_s9 + $0x314] sm:$0xf]  ;;  %v6721_v61 = vld [vmem:[%s11593_s9 + $0x32c] sm:$0xf0] }
 0x2a8   :  { %v2963_v3 = vpop.f32.mrf.mxu0  ;;  %4507 = vmatpush.bf16.msra.mxu0 %v7056_v47  ;;  %v7169_v29 = vld [vmem:[%s11593_s9 + $0x6ac] sm:$0xf0]  ;;  %v6441_v47 = vld [vmem:[%s11593_s9 + $0xfc] sm:$0xf0] }
 0x2a9   :  { %v6383_v3 = vld [vmem:[%s11593_s9 + $0x70] sm:$0xf]  ;;  %4493 = vmatpush.bf16.msra.mxu2 %v6860_v45  ;;  %v6500_v45 = vor.u32 %v7619_v58, %v6497_v60  ;;  %v7172_v40 = vor.u32 %v7787_v32, %v7169_v29  ;;  %v6581_v60 = vld [vmem:[%s11593_s9 + $0x214] sm:$0xf0] }
 0x2aa   :  { %v7029_v32 = vld [vmem:[%s11593_s9 + $0x594] sm:$0xf0] }
 0x2ab   :  { %4481 = vmatpush.bf16.msra.mxu1 %v6608_v10  ;;  %v7141_v10 = vld [vmem:[%s11593_s9 + $0x674] sm:$0xf0] }
 0x2ac   :  { %4508 = vmatpush.bf16.msra.mxu0 %v7028_v31 }
 0x2ad   :  { %v7811_v41 = vpop.eup %7810  ;;  %4494 = vmatpush.bf16.msra.mxu2 %v6832_v11  ;;  %v6472_v11 = vor.u32 %v7612_v6, %v6469_v7  ;;  %v6553_v7 = vld [vmem:[%s11593_s9 + $0x1dc] sm:$0xf0] }
 0x2ae   :  { %2970 = vrot.lane.b32.xlu0 %v7811_v41, %s7879_s19  ;;  %v7594_v41 = vld [vmem:[%s11593_s9 + $0x88] sm:$0xf0] }
 0x2af   :  { %v6384_v9 = vor.u32 %v7594_v41, %v6383_v3  ;;  %4482 = vmatpush.bf16.msra.mxu1 %v6580_v59  ;;  %v6724_v3 = vor.u32 %v7675_v43, %v6721_v61  ;;  %v6948_v41 = vor.u32 %v7731_v0, %v6945_v56  ;;  %v6668_v59 = vor.u32 %v7661_v15, %v6665_v17  ;;  %v7696_v43 = vld [vmem:[%s11593_s9 + $0x3bc] sm:$0xf] }
 0x2b0   :  { %4509 = vmatpush.bf16.msra.mxu0 %v7000_v54  ;;  %v7752_v56 = vld [vmem:[%s11593_s9 + $0x57c] sm:$0xf] }
 0x2b1   :  { %4468 = vmatpush.bf16.msra.mxu3 %v6384_v9  ;;  %4495 = vmatpush.bf16.msra.mxu2 %v6804_v27  ;;  %v7780_v9 = vld [vmem:[%s11593_s9 + $0x65c] sm:$0xf]  ;;  %v6892_v27 = vor.u32 %v7717_v21, %v6889_v52  ;;  %v7032_v29 = vor.u32 %v7752_v56, %v7029_v32 }
 0x2b2   :  { %v7144_v19 = vor.u32 %v7780_v9, %v7141_v10  ;;  %v7001_v9 = vld [vmem:[%s11593_s9 + $0x55c] sm:$0xf0] }
 0x2b3   :  { %4483 = vmatpush.bf16.msra.mxu1 %v6552_v16  ;;  %v6833_v16 = vld [vmem:[%s11593_s9 + $0x40c] sm:$0xf0]  ;;  %v7004_v10 = vor.u32 %v7745_v8, %v7001_v9 }
 0x2b5   :  { %4469 = vmatpush.bf16.msra.mxu3 %v6356_v22  ;;  %4496 = vmatpush.bf16.msra.mxu2 %v6776_v4  ;;  %v7773_v22 = vld [vmem:[%s11593_s9 + $0x624] sm:$0xf] }
 0x2b6   :  { %v7116_v31 = vor.u32 %v7773_v22, %v7113_v23 }
 0x2b7   :  { %4528 = vmatpush.bf16.msrb.mxu1 %v6752_v26  ;;  %v6357_v26 = vld [vmem:[%s11593_s9 + $0x54] sm:$0xf0] }
 0x2b9   :  { %4470 = vmatpush.bf16.msra.mxu3 %v6328_v38  ;;  %4541 = vmatpush.bf16.msrb.mxu2 %v6976_v57  ;;  %v6864_v38 = vor.u32 %v7710_v62, %v6861_v33  ;;  %v7640_v57 = vld [vmem:[%s11593_s9 + $0x1fc] sm:$0xf] }
 0x2ba   :  { %v6584_v61 = vor.u32 %v7640_v57, %v6581_v60  ;;  %v7798_v60 = vld [vmem:[%s11593_s9 + $0x6e8] sm:$0xf0] }
 0x2bb   :  { %4529 = vmatpush.bf16.msrb.mxu1 %v6724_v3  ;;  %v6329_v3 = vld [vmem:[%s11593_s9 + $0x1c] sm:$0xf0] }
 0x2bd   :  { %4515 = vmatpush.bf16.msrb.mxu3 %v6528_v1  ;;  %4542 = vmatpush.bf16.msrb.mxu2 %v6948_v41  ;;  %v7584_v1 = vld [vmem:[%s11593_s9 + $0x3c] sm:$0xf]  ;;  %v7633_v41 = vld [vmem:[%s11593_s9 + $0x1c4] sm:$0xf] }
 0x2be   :  { %v6360_v58 = vor.u32 %v7584_v1, %v6357_v26  ;;  %v6556_v36 = vor.u32 %v7633_v41, %v6553_v7  ;;  %v7679_v7 = vld [vmem:[%s11593_s9 + $0x330] sm:$0xf0] }
 0x2bf   :  { %4530 = vmatpush.bf16.msrb.mxu1 %v6696_v12  ;;  %v2975_v12 = vld [vmem:[%s11591_s7] ss:$8 sm:$0xf] }
 0x2c0   :  { %v2982_v17 = vperm.slane %v2975_v12, 0  ;;  %v2983_v21 = vperm.slane %v2975_v12, 1  ;;  %v2984_v52 = vperm.slane %v2975_v12, 2  ;;  %v2985_v22 = vperm.slane %v2975_v12, 3 }
 0x2c1   :  { %4516 = vmatpush.bf16.msrb.mxu3 %v6500_v45  ;;  %4543 = vmatpush.bf16.msrb.mxu2 %v6920_v13  ;;  %v7577_v45 = vld [vmem:[%s11593_s9 + $0x4] sm:$0xf] }
 0x2c2   :  { %v6332_v6 = vor.u32 %v7577_v45, %v6329_v3  ;;  %v7623_v45 = vld [vmem:[%s11593_s9 + $0x170] sm:$0xf0] }
 0x2c3   :  { %4531 = vmatpush.bf16.msrb.mxu1 %v6668_v59 }
 0x2c5   :  { %4517 = vmatpush.bf16.msrb.mxu3 %v6472_v11  ;;  %4544 = vmatpush.bf16.msrb.mxu2 %v6892_v27  ;;  %v6324_v11 = vld [vmem:[%s11591_s7 + $0x1] ss:$8 sm:$0xf] }
 0x2c6   :  { %v3001_v13 = vperm.slane %v6324_v11, 0  ;;  %v3004_v15 = vperm.slane %v6324_v11, 3 }
 0x2c9   :  { %4545 = vmatpush.bf16.msrb.mxu2 %v6864_v38 }
 0x320   :  { %v2971_v37 = vpop.permute.xlu0 %2970 }
 0x321   :  { %v2973_v44 = vmul.f32 %v2971_v37, %v47_v24  ;;  %v6444_v24 = vor.u32 %v7605_v14, %v6441_v47  ;;  %v6640_v37 = vor.u32 %v7654_v30, %v6637_v53  ;;  %v3002_v14 = vperm.slane %v6324_v11, 1 }
 0x322   :  { %v3003_v47 = vperm.slane %v6324_v11, 2  ;;  %v7616_v11 = vld [vmem:[%s11593_s9 + $0x138] sm:$0xf0] }
 0x323   :  { %v2974_v46 = vadd.f32 %v2973_v44, %v10164_v2  ;;  %v7200_v2 = vor.u32 %v7794_v50, %v7197_v51  ;;  %4518 = vmatpush.bf16.msrb.mxu3 %v6444_v24  ;;  %4532 = vmatpush.bf16.msrb.mxu1 %v6640_v37  ;;  %v7647_v44 = vld [vmem:[%s11593_s9 + $0x234] sm:$0xf]  ;;  %v6836_v50 = vor.u32 %v7703_v49, %v6833_v16  ;;  %v7630_v16 = vld [vmem:[%s11593_s9 + $0x1a8] sm:$0xf0] }
 0x324   :  { %v6612_v4 = vor.u32 %v7647_v44, %v6609_v48  ;;  %v7759_v51 = vld [vmem:[%s11593_s9 + $0x5b4] sm:$0xf] }
 0x325   :  { %2997 = vperm.xlu1 %7807, %v2974_v46   ;;  %2978 = vperm.xlu0 %7806, %v2974_v46   ;;  %v7057_v46 = vld [vmem:[%s11593_s9 + $0x5cc] sm:$0xf0] }
 0x326   :  { %4554 = vmatpush.bf16.msrb.mxu0 %v7200_v2  ;;  %v7060_v54 = vor.u32 %v7759_v51, %v7057_v46  ;;  %4546 = vmatpush.bf16.msrb.mxu2 %v6836_v50  ;;  %v6805_v2 = vld [vmem:[%s11593_s9 + $0x3d4] sm:$0xf0]  ;;  %v7686_v50 = vld [vmem:[%s11593_s9 + $0x368] sm:$0xf0]  ;;  %v6979_v51 = vld [vmem:[%s11593_s9 + $0x510] sm:$0xf] }
 0x327   :  { %4533 = vmatpush.bf16.msrb.mxu1 %v6612_v4  ;;  %v6808_v0 = vor.u32 %v7696_v43, %v6805_v2  ;;  %v6755_v4 = vld [vmem:[%s11593_s9 + $0x350] sm:$0xf]  ;;  %v7742_v46 = vld [vmem:[%s11593_s9 + $0x528] sm:$0xf0]  ;;  %v6532_v43 = vor.u32 %v7630_v16, %v6531_v18 }
 0x328   :  { %v6756_v2 = vor.u32 %v7686_v50, %v6755_v4  ;;  %v6980_v3 = vor.u32 %v7742_v46, %v6979_v51  ;;  %v6867_v18 = vld [vmem:[%s11593_s9 + $0x430] sm:$0xf]  ;;  %v6391_v4 = vld [vmem:[%s11593_s9 + $0x78] sm:$0xf]  ;;  %v7595_v50 = vld [vmem:[%s11593_s9 + $0x90] sm:$0xf0] }
 0x32a   :  { %4555 = vmatpush.bf16.msrb.mxu0 %v7172_v40  ;;  %4547 = vmatpush.bf16.msrb.mxu2 %v6808_v0  ;;  %v6777_v40 = vld [vmem:[%s11593_s9 + $0x39c] sm:$0xf0] }
 0x32b   :  { %4534 = vmatpush.bf16.msrb.mxu1 %v6584_v61  ;;  %v6780_v25 = vor.u32 %v7689_v63, %v6777_v40  ;;  %v6951_v63 = vld [vmem:[%s11593_s9 + $0x4d8] sm:$0xf]  ;;  %v7735_v40 = vld [vmem:[%s11593_s9 + $0x4f0] sm:$0xf0] }
 0x32c   :  { %v6952_v12 = vor.u32 %v7735_v40, %v6951_v63  ;;  %v6811_v63 = vld [vmem:[%s11593_s9 + $0x3c0] sm:$0xf]  ;;  %v7700_v40 = vld [vmem:[%s11593_s9 + $0x3d8] sm:$0xf0] }
 0x32d   :  { %7808 = vset.pattern.permute.xlu0 %v7880_v5  ;;  %v6413_v5 = vld [vmem:[%s11593_s9 + $0xc4] sm:$0xf0] }
 0x32e   :  { %4556 = vmatpush.bf16.msrb.mxu0 %v7144_v19  ;;  %v6416_v55 = vor.u32 %v7598_v28, %v6413_v5  ;;  %4548 = vmatpush.bf16.msrb.mxu2 %v6780_v25  ;;  %v3017_v19 = vld [vmem:[%s11592_s8] sm:$0xf]  ;;  %v7791_v25 = vld [vmem:[%s11593_s9 + $0x6b0] sm:$0xf0] }
 0x32f   :  { %4535 = vmatpush.bf16.msrb.mxu1 %v6556_v36  ;;  %v3019_v24 = vperm.slane %v3017_v19, 0  ;;  %v3020_v59 = vperm.slane %v3017_v19, 1  ;;  %v3021_v27 = vperm.slane %v3017_v19, 2  ;;  %v3022_v28 = vperm.slane %v3017_v19, 3  ;;  %v7175_v36 = vld [vmem:[%s11593_s9 + $0x698] sm:$0xf] }
 0x330   :  { %4519 = vmatpush.bf16.msrb.mxu3 %v6416_v55  ;;  %v7728_v19 = vld [vmem:[%s11593_s9 + $0x4b8] sm:$0xf0] }
 0x332   :  { %4557 = vmatpush.bf16.msrb.mxu0 %v7116_v31 }
 0x334   :  { %4520 = vmatpush.bf16.msrb.mxu3 %v6388_v20 }
 0x336   :  { %4558 = vmatpush.bf16.msrb.mxu0 %v7088_v39 }
 0x338   :  { %4521 = vmatpush.bf16.msrb.mxu3 %v6360_v58 }
 0x33a   :  { %4559 = vmatpush.bf16.msrb.mxu0 %v7060_v54  ;;  %v7203_v54 = vld [vmem:[%s11593_s9 + $0x6d0] sm:$0xf] }
 0x33b   :  { %v7204_v41 = vor.u32 %v7798_v60, %v7203_v54  ;;  %v6615_v54 = vld [vmem:[%s11593_s9 + $0x238] sm:$0xf]  ;;  %v7763_v60 = vld [vmem:[%s11593_s9 + $0x5d0] sm:$0xf0] }
 0x33c   :  { %4522 = vmatpush.bf16.msrb.mxu3 %v6332_v6  ;;  %v6727_v6 = vld [vmem:[%s11593_s9 + $0x318] sm:$0xf] }
 0x33d   :  { %v6728_v9 = vor.u32 %v7679_v7, %v6727_v6  ;;  %v6587_v6 = vld [vmem:[%s11593_s9 + $0x200] sm:$0xf]  ;;  %v7644_v7 = vld [vmem:[%s11593_s9 + $0x218] sm:$0xf0] }
 0x33e   :  { %4560 = vmatpush.bf16.msrb.mxu0 %v7032_v29  ;;  %v6503_v29 = vld [vmem:[%s11593_s9 + $0x158] sm:$0xf] }
 0x33f   :  { %v6504_v8 = vor.u32 %v7623_v45, %v6503_v29  ;;  %v6363_v29 = vld [vmem:[%s11593_s9 + $0x40] sm:$0xf]  ;;  %v7588_v45 = vld [vmem:[%s11593_s9 + $0x58] sm:$0xf0] }
 0x342   :  { %4561 = vmatpush.bf16.msrb.mxu0 %v7004_v10  ;;  %v6475_v10 = vld [vmem:[%s11593_s9 + $0x120] sm:$0xf] }
 0x397   :  { %v2998_v23 = vpop.permute.xlu1 %2997  ;;  %v2979_v5 = vpop.permute.xlu0 %2978 }
 0x398   :  { %v3009_v30 = vmul.f32 %v3001_v13, %v2998_v23  ;;  %v3010_v31 = vmul.f32 %v3002_v14, %v2998_v23  ;;  %v3011_v53 = vmul.f32 %v3003_v47, %v2998_v23  ;;  %v3012_v62 = vmul.f32 %v3004_v15, %v2998_v23  ;;  %v6699_v14 = vld [vmem:[%s11593_s9 + $0x2e0] sm:$0xf]  ;;  %v7672_v47 = vld [vmem:[%s11593_s9 + $0x2f8] sm:$0xf0]  ;;  %v6447_v23 = vld [vmem:[%s11593_s9 + $0xe8] sm:$0xf] }
 0x399   :  { %v2990_v33 = vmul.f32 %v2982_v17, %v2979_v5  ;;  %v2991_v34 = vmul.f32 %v2983_v21, %v2979_v5  ;;  %v2992_v35 = vmul.f32 %v2984_v52, %v2979_v5  ;;  %v2993_v55 = vmul.f32 %v2985_v22, %v2979_v5  ;;  %v6923_v15 = vld [vmem:[%s11593_s9 + $0x4a0] sm:$0xf]  ;;  %v7784_v21 = vld [vmem:[%s11593_s9 + $0x678] sm:$0xf0]  ;;  %v7665_v5 = vld [vmem:[%s11593_s9 + $0x2c0] sm:$0xf0] }
 0x39a   :  { %v7176_v13 = vor.u32 %v7791_v25, %v7175_v36  ;;  %v7147_v17 = vld [vmem:[%s11593_s9 + $0x660] sm:$0xf]  ;;  %v6476_v52 = vor.u32 %v7616_v11, %v6475_v10  ;;  %v6700_v22 = vor.u32 %v7672_v47, %v6699_v14  ;;  %v7756_v25 = vld [vmem:[%s11593_s9 + $0x598] sm:$0xf0]  ;;  %v6588_v10 = vor.u32 %v7644_v7, %v6587_v6  ;;  %v7581_v11 = vld [vmem:[%s11593_s9 + $0x20] sm:$0xf0] }
 0x39b   :  { %v3013_v37 = vadd.f32 %v3009_v30, %v2990_v33  ;;  %v3014_v38 = vadd.f32 %v3010_v31, %v2991_v34  ;;  %v3015_v39 = vadd.f32 %v3011_v53, %v2992_v35  ;;  %v3016_v42 = vadd.f32 %v3012_v62, %v2993_v55  ;;  %v6895_v30 = vld [vmem:[%s11593_s9 + $0x468] sm:$0xf]  ;;  %v7721_v31 = vld [vmem:[%s11593_s9 + $0x480] sm:$0xf0]  ;;  %v6419_v35 = vld [vmem:[%s11593_s9 + $0xb0] sm:$0xf] }
 0x39c   :  { %v7119_v53 = vld [vmem:[%s11593_s9 + $0x628] sm:$0xf]  ;;  %v7777_v62 = vld [vmem:[%s11593_s9 + $0x640] sm:$0xf0]  ;;  %v7602_v55 = vld [vmem:[%s11593_s9 + $0xc8] sm:$0xf0]  ;;  %v6812_v14 = vor.u32 %v7700_v40, %v6811_v63 }
 0x39d   :  { %v3027_v44 = vadd.f32 %v3019_v24, %v3013_v37  ;;  %v3028_v20 = vadd.f32 %v3020_v59, %v3014_v38  ;;  %v3029_v48 = vadd.f32 %v3021_v27, %v3015_v39  ;;  %v3030_v49 = vadd.f32 %v3022_v28, %v3016_v42  ;;  %v7609_v24 = vld [vmem:[%s11593_s9 + $0x100] sm:$0xf0]  ;;  %v6671_v28 = vld [vmem:[%s11593_s9 + $0x2a8] sm:$0xf]  ;;  %v6643_v39 = vld [vmem:[%s11593_s9 + $0x270] sm:$0xf] }
 0x39e   :  { %v6924_v59 = vor.u32 %v7728_v19, %v6923_v15  ;;  %v7148_v27 = vor.u32 %v7784_v21, %v7147_v17  ;;  %v6448_v33 = vor.u32 %v7609_v24, %v6447_v23  ;;  %v6672_v34 = vor.u32 %v7665_v5, %v6671_v28  ;;  %v7658_v42 = vld [vmem:[%s11593_s9 + $0x288] sm:$0xf0]  ;;  %v7035_v36 = vld [vmem:[%s11593_s9 + $0x580] sm:$0xf]  ;;  %v6783_v15 = vld [vmem:[%s11593_s9 + $0x388] sm:$0xf] }
 0x39f   :  { %v3031_v1 = vmax.f32 %v3027_v44, 0.0  ;;  %v3032_v26 = vmax.f32 %v3028_v20, 0.0  ;;  %v3033_v57 = vmax.f32 %v3029_v48, 0.0  ;;  %v3034_v58 = vmax.f32 %v3030_v49, 0.0  ;;  %v7714_v44 = vld [vmem:[%s11593_s9 + $0x448] sm:$0xf0] }
 0x3a0   :  { %v6896_v37 = vor.u32 %v7721_v31, %v6895_v30  ;;  %v7120_v38 = vor.u32 %v7777_v62, %v7119_v53  ;;  %v7091_v20 = vld [vmem:[%s11593_s9 + $0x5f0] sm:$0xf]  ;;  %v7770_v48 = vld [vmem:[%s11593_s9 + $0x608] sm:$0xf0]  ;;  %v6420_v49 = vor.u32 %v7602_v55, %v6419_v35  ;;  %v6644_v16 = vor.u32 %v7658_v42, %v6643_v39  ;;  %v7693_v19 = vld [vmem:[%s11593_s9 + $0x3a0] sm:$0xf0] }
 0x3a1   :  { %v10591_v61 = vpack.c.bf16 %v3031_v1, %v3031_v1  ;;  %v10593_v0 = vpack.c.bf16 %v3032_v26, %v3032_v26  ;;  %v10595_v56 = vpack.c.bf16 %v3033_v57, %v3033_v57  ;;  %v10597_v32 = vpack.c.bf16 %v3034_v58, %v3034_v58  ;;  %v7651_v1 = vld [vmem:[%s11593_s9 + $0x250] sm:$0xf0]  ;;  %v6839_v26 = vld [vmem:[%s11593_s9 + $0x3f8] sm:$0xf]  ;;  %v7007_v17 = vld [vmem:[%s11593_s9 + $0x548] sm:$0xf] }
 0x3a2   :  { %v6868_v51 = vor.u32 %v7714_v44, %v6867_v18  ;;  %v7092_v46 = vor.u32 %v7770_v48, %v7091_v20  ;;  %v7707_v57 = vld [vmem:[%s11593_s9 + $0x410] sm:$0xf0]  ;;  %v7063_v58 = vld [vmem:[%s11593_s9 + $0x5b8] sm:$0xf]  ;;  %v7036_v47 = vor.u32 %v7756_v25, %v7035_v36  ;;  %v7749_v21 = vld [vmem:[%s11593_s9 + $0x560] sm:$0xf0]  ;;  %v6784_v53 = vor.u32 %v7693_v19, %v6783_v15 }
 0x3a3   :  { %4471 = vmatmul.bf16.vlgmr.msra.gmra.mxu3 %v10591_v61  ;;  %4484 = vmatmul.bf16.vlgmr.msra.gmra.mxu1 %v10593_v0  ;;  %v7683_v23 = vld [vmem:[%s11593_s9 + $0x354] sm:$0xf]  ;;  %v6757_v24 = vld [vmem:[%s11593_s9 + $0x36c] sm:$0xf0]  ;;  %v7008_v62 = vor.u32 %v7749_v21, %v7007_v17  ;;  %v7620_v35 = vld [vmem:[%s11593_s9 + $0x15c] sm:$0xf] }
 0x3a4   :  { %4497 = vmatmul.bf16.vlgmr.msra.gmra.mxu2 %v10595_v56  ;;  %4510 = vmatmul.bf16.vlgmr.msra.gmra.mxu0 %v10597_v32  ;;  %v6981_v5 = vld [vmem:[%s11593_s9 + $0x52c] sm:$0xf0]  ;;  %v7795_v30 = vld [vmem:[%s11593_s9 + $0x6d4] sm:$0xf]  ;;  %v6505_v55 = vld [vmem:[%s11593_s9 + $0x174] sm:$0xf0] }
 0x3a5   :  { %4567 = vmatpush.bf16.msra.mxu3 %v6532_v43  ;;  %4580 = vmatpush.bf16.msra.mxu1 %v6756_v2  ;;  %v6392_v43 = vor.u32 %v7595_v50, %v6391_v4  ;;  %v6616_v2 = vor.u32 %v7651_v1, %v6615_v54  ;;  %v7205_v31 = vld [vmem:[%s11593_s9 + $0x6ec] sm:$0xf0]  ;;  %v7676_v39 = vld [vmem:[%s11593_s9 + $0x31c] sm:$0xf]  ;;  %v6729_v42 = vld [vmem:[%s11593_s9 + $0x334] sm:$0xf0] }
 0x3a6   :  { %4593 = vmatpush.bf16.msra.mxu2 %v6980_v3  ;;  %4606 = vmatpush.bf16.msra.mxu0 %v7204_v41  ;;  %v6840_v3 = vor.u32 %v7707_v57, %v6839_v26  ;;  %v7064_v41 = vor.u32 %v7763_v60, %v7063_v58  ;;  %v7732_v18 = vld [vmem:[%s11593_s9 + $0x4dc] sm:$0xf]  ;;  %v6953_v44 = vld [vmem:[%s11593_s9 + $0x4f4] sm:$0xf0]  ;;  %v7613_v4 = vld [vmem:[%s11593_s9 + $0x124] sm:$0xf] }
 0x3a7   :  { %v7788_v20 = vld [vmem:[%s11593_s9 + $0x69c] sm:$0xf]  ;;  %v7177_v48 = vld [vmem:[%s11593_s9 + $0x6b4] sm:$0xf0]  ;;  %v6477_v50 = vld [vmem:[%s11593_s9 + $0x13c] sm:$0xf0] }
 0x3a8   :  { %v7669_v54 = vld [vmem:[%s11593_s9 + $0x2e4] sm:$0xf]  ;;  %v6701_v1 = vld [vmem:[%s11593_s9 + $0x2fc] sm:$0xf0]  ;;  %v7662_v6 = vld [vmem:[%s11593_s9 + $0x2ac] sm:$0xf] }
 0x3a9   :  { %4568 = vmatpush.bf16.msra.mxu3 %v6504_v8  ;;  %4581 = vmatpush.bf16.msra.mxu1 %v6728_v9  ;;  %v6335_v8 = vld [vmem:[%s11593_s9 + $0x8] sm:$0xf]  ;;  %v6364_v9 = vor.u32 %v7588_v45, %v6363_v29  ;;  %v7725_v26 = vld [vmem:[%s11593_s9 + $0x4a4] sm:$0xf]  ;;  %v6925_v57 = vld [vmem:[%s11593_s9 + $0x4bc] sm:$0xf0] }
 0x3aa   :  { %4594 = vmatpush.bf16.msra.mxu2 %v6952_v12  ;;  %4607 = vmatpush.bf16.msra.mxu0 %v7176_v13  ;;  %v6559_v12 = vld [vmem:[%s11593_s9 + $0x1c8] sm:$0xf]  ;;  %v7637_v13 = vld [vmem:[%s11593_s9 + $0x1e0] sm:$0xf0]  ;;  %v7149_v60 = vld [vmem:[%s11593_s9 + $0x67c] sm:$0xf0] }
 0x3ab   :  { %v6560_v28 = vor.u32 %v7637_v13, %v6559_v12  ;;  %v7781_v58 = vld [vmem:[%s11593_s9 + $0x664] sm:$0xf]  ;;  %v7606_v29 = vld [vmem:[%s11593_s9 + $0xec] sm:$0xf]  ;;  %v6449_v45 = vld [vmem:[%s11593_s9 + $0x104] sm:$0xf0] }
 0x3ac   :  { %v6673_v7 = vld [vmem:[%s11593_s9 + $0x2c4] sm:$0xf0]  ;;  %v7718_v63 = vld [vmem:[%s11593_s9 + $0x46c] sm:$0xf]  ;;  %v7711_v15 = vld [vmem:[%s11593_s9 + $0x434] sm:$0xf] }
 0x3ad   :  { %4569 = vmatpush.bf16.msra.mxu3 %v6476_v52  ;;  %4582 = vmatpush.bf16.msra.mxu1 %v6700_v22  ;;  %v7627_v52 = vld [vmem:[%s11593_s9 + $0x194] sm:$0xf]  ;;  %v6533_v22 = vld [vmem:[%s11593_s9 + $0x1ac] sm:$0xf0]  ;;  %v6897_v40 = vld [vmem:[%s11593_s9 + $0x484] sm:$0xf0] }
 0x3ae   :  { %4595 = vmatpush.bf16.msra.mxu2 %v6924_v59  ;;  %4608 = vmatpush.bf16.msra.mxu0 %v7148_v27  ;;  %v7739_v59 = vld [vmem:[%s11593_s9 + $0x514] sm:$0xf]  ;;  %v6336_v27 = vor.u32 %v7581_v11, %v6335_v8  ;;  %v7774_v36 = vld [vmem:[%s11593_s9 + $0x62c] sm:$0xf]  ;;  %v7121_v25 = vld [vmem:[%s11593_s9 + $0x644] sm:$0xf0]  ;;  %v6452_v8 = vor.u32 %v7606_v29, %v6449_v45  ;;  %v6900_v12 = vor.u32 %v7718_v63, %v6897_v40 }
 0x3af   :  { %v6421_v11 = vld [vmem:[%s11593_s9 + $0xcc] sm:$0xf0]  ;;  %v7124_v13 = vor.u32 %v7774_v36, %v7121_v25  ;;  %v7767_v17 = vld [vmem:[%s11593_s9 + $0x5f4] sm:$0xf]  ;;  %v6763_v29 = vld [vmem:[%s11593_s9 + $0x358] sm:$0xf] }
 0x3b0   :  { %v6869_v19 = vld [vmem:[%s11593_s9 + $0x44c] sm:$0xf0]  ;;  %v7687_v45 = vld [vmem:[%s11593_s9 + $0x370] sm:$0xf0]  ;;  %v7211_v63 = vld [vmem:[%s11593_s9 + $0x6d8] sm:$0xf] }
 0x3b1   :  { %4570 = vmatpush.bf16.msra.mxu3 %v6448_v33  ;;  %4583 = vmatpush.bf16.msra.mxu1 %v6672_v34  ;;  %v6536_v33 = vor.u32 %v7627_v52, %v6533_v22  ;;  %v6760_v34 = vor.u32 %v7683_v23, %v6757_v24  ;;  %v7093_v21 = vld [vmem:[%s11593_s9 + $0x60c] sm:$0xf0]  ;;  %v7592_v23 = vld [vmem:[%s11593_s9 + $0x7c] sm:$0xf]  ;;  %v6393_v24 = vld [vmem:[%s11593_s9 + $0x94] sm:$0xf0] }
 0x3b2   :  { %4596 = vmatpush.bf16.msra.mxu2 %v6896_v37  ;;  %4609 = vmatpush.bf16.msra.mxu0 %v7120_v38  ;;  %v6984_v37 = vor.u32 %v7739_v59, %v6981_v5  ;;  %v7208_v38 = vor.u32 %v7795_v30, %v7205_v31  ;;  %v6872_v59 = vor.u32 %v7711_v15, %v6869_v19  ;;  %v6617_v5 = vld [vmem:[%s11593_s9 + $0x254] sm:$0xf0]  ;;  %v7704_v30 = vld [vmem:[%s11593_s9 + $0x3fc] sm:$0xf]  ;;  %v7799_v40 = vld [vmem:[%s11593_s9 + $0x6f0] sm:$0xf0] }
 0x3b3   :  { %4523 = vmatmul.bf16.vlgmr.msrb.gmra.mxu3 %v10591_v61  ;;  %4536 = vmatmul.bf16.vlgmr.msrb.gmra.mxu1 %v10593_v0  ;;  %v6841_v31 = vld [vmem:[%s11593_s9 + $0x414] sm:$0xf0]  ;;  %v6959_v15 = vld [vmem:[%s11593_s9 + $0x4e0] sm:$0xf]  ;;  %v7736_v19 = vld [vmem:[%s11593_s9 + $0x4f8] sm:$0xf0] }
 0x3b4   :  { %4549 = vmatmul.bf16.vlgmr.msrb.gmra.mxu2 %v10595_v56  ;;  %4562 = vmatmul.bf16.vlgmr.msrb.gmra.mxu0 %v10597_v32 }
 0x3b5   :  { %4571 = vmatpush.bf16.msra.mxu3 %v6420_v49  ;;  %4584 = vmatpush.bf16.msra.mxu1 %v6644_v16  ;;  %v6508_v49 = vor.u32 %v7620_v35, %v6505_v55  ;;  %v6732_v16 = vor.u32 %v7676_v39, %v6729_v42  ;;  %v7585_v35 = vld [vmem:[%s11593_s9 + $0x44] sm:$0xf]  ;;  %v6365_v55 = vld [vmem:[%s11593_s9 + $0x5c] sm:$0xf0] }
 0x3b6   :  { %4597 = vmatpush.bf16.msra.mxu2 %v6868_v51  ;;  %4610 = vmatpush.bf16.msra.mxu0 %v7092_v46  ;;  %v6956_v51 = vor.u32 %v7732_v18, %v6953_v44  ;;  %v7180_v46 = vor.u32 %v7788_v20, %v7177_v48  ;;  %v7641_v39 = vld [vmem:[%s11593_s9 + $0x204] sm:$0xf]  ;;  %v6589_v42 = vld [vmem:[%s11593_s9 + $0x21c] sm:$0xf0] }
 0x3b7   :  { %v7697_v18 = vld [vmem:[%s11593_s9 + $0x3c4] sm:$0xf]  ;;  %v6813_v44 = vld [vmem:[%s11593_s9 + $0x3dc] sm:$0xf0] }
 0x3b8   :  { %v7753_v20 = vld [vmem:[%s11593_s9 + $0x584] sm:$0xf]  ;;  %v7037_v48 = vld [vmem:[%s11593_s9 + $0x59c] sm:$0xf0] }
 0x3b9   :  { %4572 = vmatpush.bf16.msra.mxu3 %v6392_v43  ;;  %4585 = vmatpush.bf16.msra.mxu1 %v6616_v2  ;;  %v6480_v43 = vor.u32 %v7613_v4, %v6477_v50  ;;  %v6704_v2 = vor.u32 %v7669_v54, %v6701_v1  ;;  %v6592_v4 = vor.u32 %v7641_v39, %v6589_v42  ;;  %v6337_v50 = vld [vmem:[%s11593_s9 + $0x24] sm:$0xf0]  ;;  %v6679_v39 = vld [vmem:[%s11593_s9 + $0x2b0] sm:$0xf]  ;;  %v7666_v42 = vld [vmem:[%s11593_s9 + $0x2c8] sm:$0xf0] }
 0x3ba   :  { %4598 = vmatpush.bf16.msra.mxu2 %v6840_v3  ;;  %4611 = vmatpush.bf16.msra.mxu0 %v7064_v41  ;;  %v6928_v3 = vor.u32 %v7725_v26, %v6925_v57  ;;  %v7152_v41 = vor.u32 %v7781_v58, %v7149_v60  ;;  %v6816_v54 = vor.u32 %v7697_v18, %v6813_v44  ;;  %v7690_v26 = vld [vmem:[%s11593_s9 + $0x38c] sm:$0xf]  ;;  %v6785_v57 = vld [vmem:[%s11593_s9 + $0x3a4] sm:$0xf0]  ;;  %v6903_v18 = vld [vmem:[%s11593_s9 + $0x470] sm:$0xf] }
 0x3bb   :  { %v7040_v1 = vor.u32 %v7753_v20, %v7037_v48  ;;  %v7746_v58 = vld [vmem:[%s11593_s9 + $0x54c] sm:$0xf]  ;;  %v7009_v60 = vld [vmem:[%s11593_s9 + $0x564] sm:$0xf0]  ;;  %v6788_v36 = vor.u32 %v7690_v26, %v6785_v57  ;;  %v7127_v20 = vld [vmem:[%s11593_s9 + $0x630] sm:$0xf] }
 0x3bc   :  { %v7012_v25 = vor.u32 %v7746_v58, %v7009_v60  ;;  %v7722_v44 = vld [vmem:[%s11593_s9 + $0x488] sm:$0xf0]  ;;  %v6875_v26 = vld [vmem:[%s11593_s9 + $0x438] sm:$0xf]  ;;  %v7715_v57 = vld [vmem:[%s11593_s9 + $0x450] sm:$0xf0] }
 0x3bd   :  { %4573 = vmatpush.bf16.msra.mxu3 %v6364_v9  ;;  %4586 = vmatpush.bf16.msra.mxu1 %v6588_v10  ;;  %v6676_v9 = vor.u32 %v7662_v6, %v6673_v7  ;;  %v7599_v10 = vld [vmem:[%s11593_s9 + $0xb4] sm:$0xf]  ;;  %v7778_v48 = vld [vmem:[%s11593_s9 + $0x648] sm:$0xf0]  ;;  %v7099_v58 = vld [vmem:[%s11593_s9 + $0x5f8] sm:$0xf] }
 0x3be   :  { %4599 = vmatpush.bf16.msra.mxu2 %v6812_v14  ;;  %4612 = vmatpush.bf16.msra.mxu0 %v7036_v47  ;;  %v7655_v14 = vld [vmem:[%s11593_s9 + $0x274] sm:$0xf]  ;;  %v6645_v47 = vld [vmem:[%s11593_s9 + $0x28c] sm:$0xf0]  ;;  %v6424_v52 = vor.u32 %v7599_v10, %v6421_v11  ;;  %v6511_v10 = vld [vmem:[%s11593_s9 + $0x160] sm:$0xf] }
 0x3bf   :  { %v6648_v22 = vor.u32 %v7655_v14, %v6645_v47  ;;  %v7743_v7 = vld [vmem:[%s11593_s9 + $0x530] sm:$0xf0]  ;;  %v7624_v11 = vld [vmem:[%s11593_s9 + $0x178] sm:$0xf0]  ;;  %v6735_v14 = vld [vmem:[%s11593_s9 + $0x320] sm:$0xf] }
 0x3c0   :  { %v7680_v47 = vld [vmem:[%s11593_s9 + $0x338] sm:$0xf0]  ;;  %v7771_v60 = vld [vmem:[%s11593_s9 + $0x610] sm:$0xf0] }
 0x3c1   :  { %4574 = vmatpush.bf16.msra.mxu3 %v6336_v27  ;;  %4587 = vmatpush.bf16.msra.mxu1 %v6560_v28  ;;  %v7096_v27 = vor.u32 %v7767_v17, %v7093_v21  ;;  %v7648_v28 = vld [vmem:[%s11593_s9 + $0x23c] sm:$0xf]  ;;  %v7183_v17 = vld [vmem:[%s11593_s9 + $0x6a0] sm:$0xf] }
 0x3c2   :  { %4600 = vmatpush.bf16.msra.mxu2 %v6784_v53  ;;  %4613 = vmatpush.bf16.msra.mxu0 %v7008_v62  ;;  %v7760_v53 = vld [vmem:[%s11593_s9 + $0x5bc] sm:$0xf]  ;;  %v7065_v62 = vld [vmem:[%s11593_s9 + $0x5d4] sm:$0xf0] }
 0x3c3   :  { %v7792_v21 = vld [vmem:[%s11593_s9 + $0x6b8] sm:$0xf0] }
 0x3c4   :  { %4575 = vmatmul.bf16.vlgmr.msra.gmra.mxu3 %v10591_v61  ;;  %4588 = vmatmul.bf16.vlgmr.msra.gmra.mxu1 %v10593_v0 }
 0x3c5   :  { %4619 = vmatpush.bf16.msrb.mxu3 %v6536_v33  ;;  %4632 = vmatpush.bf16.msrb.mxu1 %v6760_v34  ;;  %v6396_v33 = vor.u32 %v7592_v23, %v6393_v24  ;;  %v6620_v34 = vor.u32 %v7648_v28, %v6617_v5  ;;  %v6483_v23 = vld [vmem:[%s11593_s9 + $0x128] sm:$0xf]  ;;  %v7617_v24 = vld [vmem:[%s11593_s9 + $0x140] sm:$0xf0] }
 0x3c6   :  { %4645 = vmatpush.bf16.msrb.mxu2 %v6984_v37  ;;  %4658 = vmatpush.bf16.msrb.mxu0 %v7208_v38  ;;  %v6844_v37 = vor.u32 %v7704_v30, %v6841_v31  ;;  %v7068_v38 = vor.u32 %v7760_v53, %v7065_v62  ;;  %v6707_v28 = vld [vmem:[%s11593_s9 + $0x2e8] sm:$0xf]  ;;  %v7673_v5 = vld [vmem:[%s11593_s9 + $0x300] sm:$0xf0] }
 0x3c7   :  { %4601 = vmatmul.bf16.vlgmr.msra.gmra.mxu2 %v10595_v56  ;;  %4614 = vmatmul.bf16.vlgmr.msra.gmra.mxu0 %v10597_v32  ;;  %v6931_v30 = vld [vmem:[%s11593_s9 + $0x4a8] sm:$0xf]  ;;  %v7729_v31 = vld [vmem:[%s11593_s9 + $0x4c0] sm:$0xf0] }
 0x3c8   :  { %v7155_v53 = vld [vmem:[%s11593_s9 + $0x668] sm:$0xf]  ;;  %v7785_v62 = vld [vmem:[%s11593_s9 + $0x680] sm:$0xf0] }
 0x3c9   :  { %4620 = vmatpush.bf16.msrb.mxu3 %v6508_v49  ;;  %4633 = vmatpush.bf16.msrb.mxu1 %v6732_v16  ;;  %v7578_v49 = vld [vmem:[%s11593_s9 + $0xc] sm:$0xf]  ;;  %v6368_v16 = vor.u32 %v7585_v35, %v6365_v55  ;;  %v6455_v35 = vld [vmem:[%s11593_s9 + $0xf0] sm:$0xf] }
 0x3ca   :  { %4646 = vmatpush.bf16.msrb.mxu2 %v6956_v51  ;;  %4659 = vmatpush.bf16.msrb.mxu0 %v7180_v46  ;;  %v7634_v51 = vld [vmem:[%s11593_s9 + $0x1cc] sm:$0xf]  ;;  %v6561_v46 = vld [vmem:[%s11593_s9 + $0x1e4] sm:$0xf0] }
 0x3cb   :  { %v6564_v6 = vor.u32 %v7634_v51, %v6561_v46  ;;  %v7610_v55 = vld [vmem:[%s11593_s9 + $0x108] sm:$0xf0]  ;;  %v6904_v51 = vor.u32 %v7722_v44, %v6903_v18  ;;  %v7128_v46 = vor.u32 %v7778_v48, %v7127_v20  ;;  %v7796_v18 = vld [vmem:[%s11593_s9 + $0x6dc] sm:$0xf]  ;;  %v7213_v44 = vld [vmem:[%s11593_s9 + $0x6f4] sm:$0xf0] }
 0x3cd   :  { %4621 = vmatpush.bf16.msrb.mxu3 %v6480_v43  ;;  %4634 = vmatpush.bf16.msrb.mxu1 %v6704_v2  ;;  %v6539_v43 = vld [vmem:[%s11593_s9 + $0x198] sm:$0xf]  ;;  %v7631_v2 = vld [vmem:[%s11593_s9 + $0x1b0] sm:$0xf0] }
 0x3ce   :  { %4647 = vmatpush.bf16.msrb.mxu2 %v6928_v3  ;;  %4660 = vmatpush.bf16.msrb.mxu0 %v7152_v41  ;;  %v6987_v3 = vld [vmem:[%s11593_s9 + $0x518] sm:$0xf]  ;;  %v6340_v41 = vor.u32 %v7578_v49, %v6337_v50  ;;  %v6456_v49 = vor.u32 %v7610_v55, %v6455_v35  ;;  %v7603_v50 = vld [vmem:[%s11593_s9 + $0xd0] sm:$0xf0]  ;;  %v7684_v35 = vld [vmem:[%s11593_s9 + $0x35c] sm:$0xf] }
 0x3cf   :  { %v6765_v55 = vld [vmem:[%s11593_s9 + $0x374] sm:$0xf0] }
 0x3d1   :  { %4622 = vmatpush.bf16.msrb.mxu3 %v6452_v8  ;;  %4635 = vmatpush.bf16.msrb.mxu1 %v6676_v9  ;;  %v6540_v8 = vor.u32 %v7631_v2, %v6539_v43  ;;  %v6764_v9 = vor.u32 %v7687_v45, %v6763_v29  ;;  %v6399_v29 = vld [vmem:[%s11593_s9 + $0x80] sm:$0xf]  ;;  %v7596_v45 = vld [vmem:[%s11593_s9 + $0x98] sm:$0xf0] }
 0x3d2   :  { %4648 = vmatpush.bf16.msrb.mxu2 %v6900_v12  ;;  %4661 = vmatpush.bf16.msrb.mxu0 %v7124_v13  ;;  %v6988_v12 = vor.u32 %v7743_v7, %v6987_v3  ;;  %v7212_v13 = vor.u32 %v7799_v40, %v7211_v63  ;;  %v6876_v3 = vor.u32 %v7715_v57, %v6875_v26  ;;  %v7652_v7 = vld [vmem:[%s11593_s9 + $0x258] sm:$0xf0]  ;;  %v6847_v63 = vld [vmem:[%s11593_s9 + $0x400] sm:$0xf]  ;;  %v7733_v26 = vld [vmem:[%s11593_s9 + $0x4e4] sm:$0xf] }
 0x3d3   :  { %v7708_v40 = vld [vmem:[%s11593_s9 + $0x418] sm:$0xf0]  ;;  %v6961_v57 = vld [vmem:[%s11593_s9 + $0x4fc] sm:$0xf0] }
 0x3d5   :  { %4623 = vmatpush.bf16.msrb.mxu3 %v6424_v52  ;;  %4636 = vmatpush.bf16.msrb.mxu1 %v6648_v22  ;;  %v6512_v52 = vor.u32 %v7624_v11, %v6511_v10  ;;  %v6736_v22 = vor.u32 %v7680_v47, %v6735_v14  ;;  %v6371_v10 = vld [vmem:[%s11593_s9 + $0x48] sm:$0xf]  ;;  %v7589_v11 = vld [vmem:[%s11593_s9 + $0x60] sm:$0xf0] }
 0x3d6   :  { %4649 = vmatpush.bf16.msrb.mxu2 %v6872_v59  ;;  %4662 = vmatpush.bf16.msrb.mxu0 %v7096_v27  ;;  %v6960_v59 = vor.u32 %v7736_v19, %v6959_v15  ;;  %v7184_v27 = vor.u32 %v7792_v21, %v7183_v17  ;;  %v6595_v14 = vld [vmem:[%s11593_s9 + $0x208] sm:$0xf]  ;;  %v7645_v47 = vld [vmem:[%s11593_s9 + $0x220] sm:$0xf0] }
 0x3d7   :  { %v6819_v15 = vld [vmem:[%s11593_s9 + $0x3c8] sm:$0xf]  ;;  %v7701_v19 = vld [vmem:[%s11593_s9 + $0x3e0] sm:$0xf0] }
 0x3d8   :  { %v7043_v17 = vld [vmem:[%s11593_s9 + $0x588] sm:$0xf]  ;;  %v7757_v21 = vld [vmem:[%s11593_s9 + $0x5a0] sm:$0xf0] }
 0x3d9   :  { %4624 = vmatpush.bf16.msrb.mxu3 %v6396_v33  ;;  %4637 = vmatpush.bf16.msrb.mxu1 %v6620_v34  ;;  %v6484_v33 = vor.u32 %v7617_v24, %v6483_v23  ;;  %v6708_v34 = vor.u32 %v7673_v5, %v6707_v28  ;;  %v6596_v23 = vor.u32 %v7645_v47, %v6595_v14  ;;  %v7582_v24 = vld [vmem:[%s11593_s9 + $0x28] sm:$0xf0]  ;;  %v7663_v14 = vld [vmem:[%s11593_s9 + $0x2b4] sm:$0xf]  ;;  %v6681_v47 = vld [vmem:[%s11593_s9 + $0x2cc] sm:$0xf0] }
 0x3da   :  { %4650 = vmatpush.bf16.msrb.mxu2 %v6844_v37  ;;  %4663 = vmatpush.bf16.msrb.mxu0 %v7068_v38  ;;  %v6932_v37 = vor.u32 %v7729_v31, %v6931_v30  ;;  %v7156_v38 = vor.u32 %v7785_v62, %v7155_v53  ;;  %v6820_v28 = vor.u32 %v7701_v19, %v6819_v15  ;;  %v6791_v30 = vld [vmem:[%s11593_s9 + $0x390] sm:$0xf]  ;;  %v7694_v31 = vld [vmem:[%s11593_s9 + $0x3a8] sm:$0xf0]  ;;  %v7719_v15 = vld [vmem:[%s11593_s9 + $0x474] sm:$0xf] }
 0x3db   :  { %v7044_v5 = vor.u32 %v7757_v21, %v7043_v17  ;;  %v7015_v53 = vld [vmem:[%s11593_s9 + $0x550] sm:$0xf]  ;;  %v7750_v62 = vld [vmem:[%s11593_s9 + $0x568] sm:$0xf0]  ;;  %v6792_v20 = vor.u32 %v7694_v31, %v6791_v30  ;;  %v7775_v17 = vld [vmem:[%s11593_s9 + $0x634] sm:$0xf] }
 0x3dc   :  { %v7016_v48 = vor.u32 %v7750_v62, %v7015_v53  ;;  %v6905_v19 = vld [vmem:[%s11593_s9 + $0x48c] sm:$0xf0]  ;;  %v7712_v30 = vld [vmem:[%s11593_s9 + $0x43c] sm:$0xf]  ;;  %v6877_v31 = vld [vmem:[%s11593_s9 + $0x454] sm:$0xf0] }
 0x3dd   :  { %4625 = vmatpush.bf16.msrb.mxu3 %v6368_v16  ;;  %4638 = vmatpush.bf16.msrb.mxu1 %v6592_v4  ;;  %v6680_v16 = vor.u32 %v7666_v42, %v6679_v39  ;;  %v6427_v4 = vld [vmem:[%s11593_s9 + $0xb8] sm:$0xf]  ;;  %v7129_v21 = vld [vmem:[%s11593_s9 + $0x64c] sm:$0xf0]  ;;  %v7768_v53 = vld [vmem:[%s11593_s9 + $0x5fc] sm:$0xf] }
 0x3de   :  { %4651 = vmatpush.bf16.msrb.mxu2 %v6816_v54  ;;  %4664 = vmatpush.bf16.msrb.mxu0 %v7040_v1  ;;  %v6651_v54 = vld [vmem:[%s11593_s9 + $0x278] sm:$0xf]  ;;  %v7659_v1 = vld [vmem:[%s11593_s9 + $0x290] sm:$0xf0]  ;;  %v6428_v43 = vor.u32 %v7603_v50, %v6427_v4  ;;  %v7621_v4 = vld [vmem:[%s11593_s9 + $0x164] sm:$0xf] }
 0x3df   :  { %v6652_v2 = vor.u32 %v7659_v1, %v6651_v54  ;;  %v6989_v42 = vld [vmem:[%s11593_s9 + $0x534] sm:$0xf0]  ;;  %v6513_v50 = vld [vmem:[%s11593_s9 + $0x17c] sm:$0xf0]  ;;  %v7677_v54 = vld [vmem:[%s11593_s9 + $0x324] sm:$0xf] }
 0x3e0   :  { %v6737_v1 = vld [vmem:[%s11593_s9 + $0x33c] sm:$0xf0]  ;;  %v7101_v62 = vld [vmem:[%s11593_s9 + $0x614] sm:$0xf0] }
 0x3e1   :  { %4626 = vmatpush.bf16.msrb.mxu3 %v6340_v41  ;;  %4639 = vmatpush.bf16.msrb.mxu1 %v6564_v6  ;;  %v7100_v41 = vor.u32 %v7771_v60, %v7099_v58  ;;  %v6623_v6 = vld [vmem:[%s11593_s9 + $0x240] sm:$0xf]  ;;  %v7789_v58 = vld [vmem:[%s11593_s9 + $0x6a4] sm:$0xf] }
 0x3e2   :  { %4652 = vmatpush.bf16.msrb.mxu2 %v6788_v36  ;;  %4665 = vmatpush.bf16.msrb.mxu0 %v7012_v25  ;;  %v7071_v36 = vld [vmem:[%s11593_s9 + $0x5c0] sm:$0xf]  ;;  %v7764_v25 = vld [vmem:[%s11593_s9 + $0x5d8] sm:$0xf0] }
 0x3e3   :  { %v7185_v60 = vld [vmem:[%s11593_s9 + $0x6bc] sm:$0xf0] }
 0x3e4   :  { %4627 = vmatmul.bf16.vlgmr.msrb.gmra.mxu3 %v10591_v61  ;;  %4640 = vmatmul.bf16.vlgmr.msrb.gmra.mxu1 %v10593_v0 }
 0x3e5   :  { %4671 = vmatpush.bf16.msra.mxu3 %v6540_v8  ;;  %4684 = vmatpush.bf16.msra.mxu1 %v6764_v9  ;;  %v6400_v8 = vor.u32 %v7596_v45, %v6399_v29  ;;  %v6624_v9 = vor.u32 %v7652_v7, %v6623_v6  ;;  %v7614_v29 = vld [vmem:[%s11593_s9 + $0x12c] sm:$0xf]  ;;  %v6485_v45 = vld [vmem:[%s11593_s9 + $0x144] sm:$0xf0] }
 0x3e6   :  { %4697 = vmatpush.bf16.msra.mxu2 %v6988_v12  ;;  %4710 = vmatpush.bf16.msra.mxu0 %v7212_v13  ;;  %v6848_v12 = vor.u32 %v7708_v40, %v6847_v63  ;;  %v7072_v13 = vor.u32 %v7764_v25, %v7071_v36  ;;  %v7670_v6 = vld [vmem:[%s11593_s9 + $0x2ec] sm:$0xf]  ;;  %v6709_v7 = vld [vmem:[%s11593_s9 + $0x304] sm:$0xf0] }
 0x3e7   :  { %4653 = vmatmul.bf16.vlgmr.msrb.gmra.mxu2 %v10595_v56  ;;  %4666 = vmatmul.bf16.vlgmr.msrb.gmra.mxu0 %v10597_v32  ;;  %v7726_v63 = vld [vmem:[%s11593_s9 + $0x4ac] sm:$0xf]  ;;  %v6933_v40 = vld [vmem:[%s11593_s9 + $0x4c4] sm:$0xf0] }
 0x3e8   :  { %v7782_v36 = vld [vmem:[%s11593_s9 + $0x66c] sm:$0xf]  ;;  %v7157_v25 = vld [vmem:[%s11593_s9 + $0x684] sm:$0xf0] }
 0x3e9   :  { %4672 = vmatpush.bf16.msra.mxu3 %v6512_v52  ;;  %4685 = vmatpush.bf16.msra.mxu1 %v6736_v22  ;;  %v6343_v52 = vld [vmem:[%s11593_s9 + $0x10] sm:$0xf]  ;;  %v6372_v22 = vor.u32 %v7589_v11, %v6371_v10  ;;  %v7607_v10 = vld [vmem:[%s11593_s9 + $0xf4] sm:$0xf] }
 0x3ea   :  { %4698 = vmatpush.bf16.msra.mxu2 %v6960_v59  ;;  %4711 = vmatpush.bf16.msra.mxu0 %v7184_v27  ;;  %v6567_v59 = vld [vmem:[%s11593_s9 + $0x1d0] sm:$0xf]  ;;  %v7638_v27 = vld [vmem:[%s11593_s9 + $0x1e8] sm:$0xf0] }
 0x3eb   :  { %v6568_v39 = vor.u32 %v7638_v27, %v6567_v59  ;;  %v6457_v11 = vld [vmem:[%s11593_s9 + $0x10c] sm:$0xf0]  ;;  %v6908_v59 = vor.u32 %v7719_v15, %v6905_v19  ;;  %v7132_v27 = vor.u32 %v7775_v17, %v7129_v21  ;;  %v7219_v15 = vld [vmem:[%s11593_s9 + $0x6e0] sm:$0xf]  ;;  %v7800_v19 = vld [vmem:[%s11593_s9 + $0x6f8] sm:$0xf0] }
 0x3ed   :  { %4673 = vmatpush.bf16.msra.mxu3 %v6484_v33  ;;  %4686 = vmatpush.bf16.msra.mxu1 %v6708_v34  ;;  %v7628_v33 = vld [vmem:[%s11593_s9 + $0x19c] sm:$0xf]  ;;  %v6541_v34 = vld [vmem:[%s11593_s9 + $0x1b4] sm:$0xf0] }
 0x3ee   :  { %4699 = vmatpush.bf16.msra.mxu2 %v6932_v37  ;;  %4712 = vmatpush.bf16.msra.mxu0 %v7156_v38  ;;  %v7740_v37 = vld [vmem:[%s11593_s9 + $0x51c] sm:$0xf]  ;;  %v6344_v38 = vor.u32 %v7582_v24, %v6343_v52  ;;  %v6460_v52 = vor.u32 %v7607_v10, %v6457_v11  ;;  %v6429_v24 = vld [vmem:[%s11593_s9 + $0xd4] sm:$0xf0]  ;;  %v6771_v10 = vld [vmem:[%s11593_s9 + $0x360] sm:$0xf] }
 0x3ef   :  { %v7688_v11 = vld [vmem:[%s11593_s9 + $0x378] sm:$0xf0] }
 0x3f1   :  { %4674 = vmatpush.bf16.msra.mxu3 %v6456_v49  ;;  %4687 = vmatpush.bf16.msra.mxu1 %v6680_v16  ;;  %v6544_v49 = vor.u32 %v7628_v33, %v6541_v34  ;;  %v6768_v16 = vor.u32 %v7684_v35, %v6765_v55  ;;  %v7593_v35 = vld [vmem:[%s11593_s9 + $0x84] sm:$0xf]  ;;  %v6401_v55 = vld [vmem:[%s11593_s9 + $0x9c] sm:$0xf0] }
 0x3f2   :  { %4700 = vmatpush.bf16.msra.mxu2 %v6904_v51  ;;  %4713 = vmatpush.bf16.msra.mxu0 %v7128_v46  ;;  %v6992_v51 = vor.u32 %v7740_v37, %v6989_v42  ;;  %v7216_v46 = vor.u32 %v7796_v18, %v7213_v44  ;;  %v6880_v37 = vor.u32 %v7712_v30, %v6877_v31  ;;  %v6625_v42 = vld [vmem:[%s11593_s9 + $0x25c] sm:$0xf0]  ;;  %v7705_v18 = vld [vmem:[%s11593_s9 + $0x404] sm:$0xf]  ;;  %v6967_v30 = vld [vmem:[%s11593_s9 + $0x4e8] sm:$0xf] }
 0x3f3   :  { %v6849_v44 = vld [vmem:[%s11593_s9 + $0x41c] sm:$0xf0]  ;;  %v7737_v31 = vld [vmem:[%s11593_s9 + $0x500] sm:$0xf0] }
 0x3f5   :  { %4675 = vmatpush.bf16.msra.mxu3 %v6428_v43  ;;  %4688 = vmatpush.bf16.msra.mxu1 %v6652_v2  ;;  %v6516_v43 = vor.u32 %v7621_v4, %v6513_v50  ;;  %v6740_v2 = vor.u32 %v7677_v54, %v6737_v1  ;;  %v7586_v4 = vld [vmem:[%s11593_s9 + $0x4c] sm:$0xf]  ;;  %v6373_v50 = vld [vmem:[%s11593_s9 + $0x64] sm:$0xf0] }
 0x3f6   :  { %4701 = vmatpush.bf16.msra.mxu2 %v6876_v3  ;;  %4714 = vmatpush.bf16.msra.mxu0 %v7100_v41  ;;  %v6964_v3 = vor.u32 %v7733_v26, %v6961_v57  ;;  %v7188_v41 = vor.u32 %v7789_v58, %v7185_v60  ;;  %v7642_v54 = vld [vmem:[%s11593_s9 + $0x20c] sm:$0xf]  ;;  %v6597_v1 = vld [vmem:[%s11593_s9 + $0x224] sm:$0xf0] }
 0x3f7   :  { %v7698_v26 = vld [vmem:[%s11593_s9 + $0x3cc] sm:$0xf]  ;;  %v6821_v57 = vld [vmem:[%s11593_s9 + $0x3e4] sm:$0xf0] }
 0x3f8   :  { %v7754_v58 = vld [vmem:[%s11593_s9 + $0x58c] sm:$0xf]  ;;  %v7045_v60 = vld [vmem:[%s11593_s9 + $0x5a4] sm:$0xf0] }
 0x3f9   :  { %4676 = vmatpush.bf16.msra.mxu3 %v6400_v8  ;;  %4689 = vmatpush.bf16.msra.mxu1 %v6624_v9  ;;  %v6488_v8 = vor.u32 %v7614_v29, %v6485_v45  ;;  %v6712_v9 = vor.u32 %v7670_v6, %v6709_v7  ;;  %v6600_v29 = vor.u32 %v7642_v54, %v6597_v1  ;;  %v6345_v45 = vld [vmem:[%s11593_s9 + $0x2c] sm:$0xf0]  ;;  %v6687_v54 = vld [vmem:[%s11593_s9 + $0x2b8] sm:$0xf] }
 0x3fa   :  { %4702 = vmatpush.bf16.msra.mxu2 %v6848_v12  ;;  %4715 = vmatpush.bf16.msra.mxu0 %v7072_v13  ;;  %v6936_v12 = vor.u32 %v7726_v63, %v6933_v40  ;;  %v7160_v13 = vor.u32 %v7782_v36, %v7157_v25  ;;  %v6824_v6 = vor.u32 %v7698_v26, %v6821_v57  ;;  %v7691_v63 = vld [vmem:[%s11593_s9 + $0x394] sm:$0xf]  ;;  %v6793_v40 = vld [vmem:[%s11593_s9 + $0x3ac] sm:$0xf0] }
 0x3fb   :  { %v7048_v7 = vor.u32 %v7754_v58, %v7045_v60  ;;  %v7747_v36 = vld [vmem:[%s11593_s9 + $0x554] sm:$0xf]  ;;  %v7017_v25 = vld [vmem:[%s11593_s9 + $0x56c] sm:$0xf0]  ;;  %v6796_v17 = vor.u32 %v7691_v63, %v6793_v40  ;;  %v6911_v58 = vld [vmem:[%s11593_s9 + $0x478] sm:$0xf] }
 0x3fc   :  { %v7020_v21 = vor.u32 %v7747_v36, %v7017_v25  ;;  %v7667_v57 = vld [vmem:[%s11593_s9 + $0x2d0] sm:$0xf0]  ;;  %v11459_v60 = vld [vmem:[%s11594_s10] sm:$0x7f] }
 0x3fd   :  { %4677 = vmatpush.bf16.msra.mxu3 %v6372_v22  ;;  %4690 = vmatpush.bf16.msra.mxu1 %v6596_v23  ;;  %v6684_v22 = vor.u32 %v7663_v14, %v6681_v47  ;;  %v7600_v23 = vld [vmem:[%s11593_s9 + $0xbc] sm:$0xf]  ;;  %v6659_v25 = vld [vmem:[%s11593_s9 + $0x280] sm:$0xf] }
 0x3fe   :  { %4703 = vmatpush.bf16.msra.mxu2 %v6820_v28  ;;  %4716 = vmatpush.bf16.msra.mxu0 %v7044_v5  ;;  %v7656_v28 = vld [vmem:[%s11593_s9 + $0x27c] sm:$0xf]  ;;  %v6653_v5 = vld [vmem:[%s11593_s9 + $0x294] sm:$0xf0]  ;;  %v6432_v33 = vor.u32 %v7600_v23, %v6429_v24  ;;  %v6519_v23 = vld [vmem:[%s11593_s9 + $0x168] sm:$0xf] }
 0x3ff   :  { %v6656_v34 = vor.u32 %v7656_v28, %v6653_v5  ;;  %v7744_v47 = vld [vmem:[%s11593_s9 + $0x538] sm:$0xf0]  ;;  %v7625_v24 = vld [vmem:[%s11593_s9 + $0x180] sm:$0xf0]  ;;  %v6743_v28 = vld [vmem:[%s11593_s9 + $0x328] sm:$0xf] }
 0x400   :  { %v7681_v5 = vld [vmem:[%s11593_s9 + $0x340] sm:$0xf0] }
 0x401   :  { %4678 = vmatpush.bf16.msra.mxu3 %v6344_v38  ;;  %4691 = vmatpush.bf16.msra.mxu1 %v6568_v39  ;;  %v7104_v38 = vor.u32 %v7768_v53, %v7101_v62  ;;  %v7649_v39 = vld [vmem:[%s11593_s9 + $0x244] sm:$0xf]  ;;  %v7191_v53 = vld [vmem:[%s11593_s9 + $0x6a8] sm:$0xf] }
 0x402   :  { %4704 = vmatpush.bf16.msra.mxu2 %v6792_v20  ;;  %4717 = vmatpush.bf16.msra.mxu0 %v7016_v48  ;;  %v7761_v20 = vld [vmem:[%s11593_s9 + $0x5c4] sm:$0xf]  ;;  %v7073_v48 = vld [vmem:[%s11593_s9 + $0x5dc] sm:$0xf0] }
 0x403   :  { %v7793_v62 = vld [vmem:[%s11593_s9 + $0x6c0] sm:$0xf0] }
 0x404   :  { %4679 = vmatmul.bf16.vlgmr.msra.gmra.mxu3 %v10591_v61  ;;  %4692 = vmatmul.bf16.vlgmr.msra.gmra.mxu1 %v10593_v0 }
 0x405   :  { %4723 = vmatpush.bf16.msrb.mxu3 %v6544_v49  ;;  %4736 = vmatpush.bf16.msrb.mxu1 %v6768_v16  ;;  %v6404_v49 = vor.u32 %v7593_v35, %v6401_v55  ;;  %v6628_v16 = vor.u32 %v7649_v39, %v6625_v42  ;;  %v6491_v35 = vld [vmem:[%s11593_s9 + $0x130] sm:$0xf]  ;;  %v7618_v55 = vld [vmem:[%s11593_s9 + $0x148] sm:$0xf0] }
 0x406   :  { %4749 = vmatpush.bf16.msrb.mxu2 %v6992_v51  ;;  %4762 = vmatpush.bf16.msrb.mxu0 %v7216_v46  ;;  %v6852_v51 = vor.u32 %v7705_v18, %v6849_v44  ;;  %v7076_v46 = vor.u32 %v7761_v20, %v7073_v48  ;;  %v6715_v39 = vld [vmem:[%s11593_s9 + $0x2f0] sm:$0xf]  ;;  %v7674_v42 = vld [vmem:[%s11593_s9 + $0x308] sm:$0xf0] }
 0x407   :  { %4705 = vmatmul.bf16.vlgmr.msra.gmra.mxu2 %v10595_v56  ;;  %4718 = vmatmul.bf16.vlgmr.msra.gmra.mxu0 %v10597_v32  ;;  %v6939_v18 = vld [vmem:[%s11593_s9 + $0x4b0] sm:$0xf]  ;;  %v7730_v44 = vld [vmem:[%s11593_s9 + $0x4c8] sm:$0xf0] }
 0x408   :  { %v7163_v20 = vld [vmem:[%s11593_s9 + $0x670] sm:$0xf]  ;;  %v7786_v48 = vld [vmem:[%s11593_s9 + $0x688] sm:$0xf0]  ;;  %v6940_v1 = vor.u32 %v7730_v44, %v6939_v18 }
 0x409   :  { %4724 = vmatpush.bf16.msrb.mxu3 %v6516_v43  ;;  %4737 = vmatpush.bf16.msrb.mxu1 %v6740_v2  ;;  %v7579_v43 = vld [vmem:[%s11593_s9 + $0x14] sm:$0xf]  ;;  %v6376_v2 = vor.u32 %v7586_v4, %v6373_v50  ;;  %v6716_v4 = vor.u32 %v7674_v42, %v6715_v39  ;;  %v7164_v26 = vor.u32 %v7786_v48, %v7163_v20  ;;  %v7646_v39 = vld [vmem:[%s11593_s9 + $0x228] sm:$0xf0]  ;;  %v6827_v42 = vld [vmem:[%s11593_s9 + $0x3d0] sm:$0xf] }
 0x40a   :  { %4750 = vmatpush.bf16.msrb.mxu2 %v6964_v3  ;;  %4763 = vmatpush.bf16.msrb.mxu0 %v7188_v41  ;;  %v7635_v3 = vld [vmem:[%s11593_s9 + $0x1d4] sm:$0xf]  ;;  %v6569_v41 = vld [vmem:[%s11593_s9 + $0x1ec] sm:$0xf0]  ;;  %v7702_v44 = vld [vmem:[%s11593_s9 + $0x3e8] sm:$0xf0] }
 0x40b   :  { %v6572_v14 = vor.u32 %v7635_v3, %v6569_v41  ;;  %v6688_v3 = vor.u32 %v7667_v57, %v6687_v54  ;;  %v3297_v41 = vperm.slane %v11459_v60, 0  ;;  %v7051_v20 = vld [vmem:[%s11593_s9 + $0x590] sm:$0xf]  ;;  %v7758_v48 = vld [vmem:[%s11593_s9 + $0x5a8] sm:$0xf0]  ;;  %v6828_v57 = vor.u32 %v7702_v44, %v6827_v42 }
 0x40c   :  { %v6351_v54 = vld [vmem:[%s11593_s9 + $0x18] sm:$0xf] }
 0x40d   :  { %4725 = vmatpush.bf16.msrb.mxu3 %v6488_v8  ;;  %4738 = vmatpush.bf16.msrb.mxu1 %v6712_v9  ;;  %v6547_v8 = vld [vmem:[%s11593_s9 + $0x1a0] sm:$0xf]  ;;  %v7632_v9 = vld [vmem:[%s11593_s9 + $0x1b8] sm:$0xf0] }
 0x40e   :  { %4751 = vmatpush.bf16.msrb.mxu2 %v6936_v12  ;;  %4764 = vmatpush.bf16.msrb.mxu0 %v7160_v13  ;;  %v6995_v12 = vld [vmem:[%s11593_s9 + $0x520] sm:$0xf]  ;;  %v6348_v13 = vor.u32 %v7579_v43, %v6345_v45  ;;  %v7723_v43 = vld [vmem:[%s11593_s9 + $0x490] sm:$0xf0] }
 0x40f   :  { %v6912_v63 = vor.u32 %v7723_v43, %v6911_v58  ;;  %v7052_v58 = vor.u32 %v7758_v48, %v7051_v20  ;;  %v7639_v43 = vld [vmem:[%s11593_s9 + $0x1f0] sm:$0xf0] }
 0x411   :  { %4726 = vmatpush.bf16.msrb.mxu3 %v6460_v52  ;;  %4739 = vmatpush.bf16.msrb.mxu1 %v6684_v22  ;;  %v6548_v52 = vor.u32 %v7632_v9, %v6547_v8  ;;  %v6772_v22 = vor.u32 %v7688_v11, %v6771_v10  ;;  %v7660_v8 = vld [vmem:[%s11593_s9 + $0x298] sm:$0xf0]  ;;  %v6883_v9 = vld [vmem:[%s11593_s9 + $0x440] sm:$0xf] }
 0x412   :  { %4752 = vmatpush.bf16.msrb.mxu2 %v6908_v59  ;;  %4765 = vmatpush.bf16.msrb.mxu0 %v7132_v27  ;;  %v6996_v59 = vor.u32 %v7744_v47, %v6995_v12  ;;  %v7220_v27 = vor.u32 %v7800_v19, %v7219_v15  ;;  %v7716_v11 = vld [vmem:[%s11593_s9 + $0x458] sm:$0xf0]  ;;  %v7107_v12 = vld [vmem:[%s11593_s9 + $0x600] sm:$0xf]  ;;  %v6660_v19 = vor.u32 %v7660_v8, %v6659_v25 }
 0x415   :  { %4727 = vmatpush.bf16.msrb.mxu3 %v6432_v33  ;;  %4740 = vmatpush.bf16.msrb.mxu1 %v6656_v34  ;;  %v6520_v33 = vor.u32 %v7625_v24, %v6519_v23  ;;  %v6744_v34 = vor.u32 %v7681_v5, %v6743_v28  ;;  %v6631_v24 = vld [vmem:[%s11593_s9 + $0x248] sm:$0xf]  ;;  %v7709_v28 = vld [vmem:[%s11593_s9 + $0x420] sm:$0xf0] }
 0x416   :  { %4753 = vmatpush.bf16.msrb.mxu2 %v6880_v37  ;;  %4766 = vmatpush.bf16.msrb.mxu0 %v7104_v38  ;;  %v6968_v37 = vor.u32 %v7737_v31, %v6967_v30  ;;  %v7192_v38 = vor.u32 %v7793_v62, %v7191_v53  ;;  %v7079_v5 = vld [vmem:[%s11593_s9 + $0x5c8] sm:$0xf]  ;;  %v7765_v30 = vld [vmem:[%s11593_s9 + $0x5e0] sm:$0xf0] }
 0x419   :  { %4728 = vmatpush.bf16.msrb.mxu3 %v6404_v49  ;;  %4741 = vmatpush.bf16.msrb.mxu1 %v6628_v16  ;;  %v6492_v16 = vor.u32 %v7618_v55, %v6491_v35  ;;  %v7080_v55 = vor.u32 %v7765_v30, %v7079_v5 }
 0x41a   :  { %4754 = vmatpush.bf16.msrb.mxu2 %v6852_v51  ;;  %4767 = vmatpush.bf16.msrb.mxu0 %v7076_v46  ;;  %v6463_v51 = vld [vmem:[%s11593_s9 + $0xf8] sm:$0xf]  ;;  %v7611_v46 = vld [vmem:[%s11593_s9 + $0x110] sm:$0xf0] }
 0x41b   :  { %v6464_v45 = vor.u32 %v7611_v46, %v6463_v51 }
 0x41d   :  { %4729 = vmatpush.bf16.msrb.mxu3 %v6376_v2  ;;  %4742 = vmatpush.bf16.msrb.mxu1 %v6600_v29  ;;  %v7135_v2 = vld [vmem:[%s11593_s9 + $0x638] sm:$0xf]  ;;  %v7779_v29 = vld [vmem:[%s11593_s9 + $0x650] sm:$0xf0] }
 0x41e   :  { %4755 = vmatpush.bf16.msrb.mxu2 %v6824_v6  ;;  %4768 = vmatpush.bf16.msrb.mxu0 %v7048_v7  ;;  %v6435_v6 = vld [vmem:[%s11593_s9 + $0xc0] sm:$0xf]  ;;  %v7604_v7 = vld [vmem:[%s11593_s9 + $0xd8] sm:$0xf0]  ;;  %v7136_v40 = vor.u32 %v7779_v29, %v7135_v2  ;;  %v6799_v2 = vld [vmem:[%s11593_s9 + $0x398] sm:$0xf] }
 0x41f   :  { %v6436_v15 = vor.u32 %v7604_v7, %v6435_v6  ;;  %v7695_v29 = vld [vmem:[%s11593_s9 + $0x3b0] sm:$0xf0] }
 0x420   :  { %v4485_v49 = vpop.f32.mrf.mxu1 }
 0x421   :  { %4730 = vmatpush.bf16.msrb.mxu3 %v6348_v13  ;;  %4743 = vmatpush.bf16.msrb.mxu1 %v6572_v14  ;;  %v11439_v50 = vpop.f32.mrf.mxu0  ;;  %v7772_v13 = vld [vmem:[%s11593_s9 + $0x618] sm:$0xf0] }
 0x422   :  { %4756 = vmatpush.bf16.msrb.mxu2 %v6796_v17  ;;  %4769 = vmatpush.bf16.msrb.mxu0 %v7020_v21  ;;  %v6407_v21 = vld [vmem:[%s11593_s9 + $0x88] sm:$0xf]  ;;  %v7108_v23 = vor.u32 %v7772_v13, %v7107_v12 }
 0x424   :  { %4731 = vmatmul.bf16.vlgmr.msrb.gmra.mxu3 %v10591_v61  ;;  %4744 = vmatmul.bf16.vlgmr.msrb.gmra.mxu1 %v10593_v0 }
 0x425   :  { %4775 = vmatpush.bf16.msra.mxu3 %v6548_v52  ;;  %4788 = vmatpush.bf16.msra.mxu1 %v6772_v22  ;;  %v7597_v52 = vld [vmem:[%s11593_s9 + $0xa0] sm:$0xf0]  ;;  %v6884_v22 = vor.u32 %v7716_v11, %v6883_v9 }
 0x426   :  { %4801 = vmatpush.bf16.msra.mxu2 %v6996_v59  ;;  %4814 = vmatpush.bf16.msra.mxu0 %v7220_v27  ;;  %v4472_v36 = vpop.f32.mrf.mxu3  ;;  %v7653_v59 = vld [vmem:[%s11593_s9 + $0x260] sm:$0xf0]  ;;  %v6855_v27 = vld [vmem:[%s11593_s9 + $0x408] sm:$0xf]  ;;  %v6408_v53 = vor.u32 %v7597_v52, %v6407_v21 }
 0x427   :  { %4757 = vmatmul.bf16.vlgmr.msrb.gmra.mxu2 %v10595_v56  ;;  %4770 = vmatmul.bf16.vlgmr.msrb.gmra.mxu0 %v10597_v32  ;;  %v4498_v10 = vpop.f32.mrf.mxu2  ;;  %v4473_v47 = vadd.f32 %v4472_v36, %v3297_v41  ;;  %v6632_v62 = vor.u32 %v7653_v59, %v6631_v24  ;;  %v6856_v35 = vor.u32 %v7709_v28, %v6855_v27  ;;  %v3298_v41 = vperm.slane %v11459_v60, 1 }
 0x428   :  { %v4487_v14 = vpop.f32.mrf.mxu1 }
 0x429   :  { %4776 = vmatpush.bf16.msra.mxu3 %v6520_v33  ;;  %4789 = vmatpush.bf16.msra.mxu1 %v6744_v34  ;;  %v4513_v17 = vpop.f32.mrf.mxu0  ;;  %v4486_v31 = vadd.f32 %v4485_v49, %v4473_v47  ;;  %v6379_v33 = vld [vmem:[%s11593_s9 + $0x50] sm:$0xf]  ;;  %v7590_v34 = vld [vmem:[%s11593_s9 + $0x68] sm:$0xf0] }
 0x42a   :  { %4802 = vmatpush.bf16.msra.mxu2 %v6968_v37  ;;  %4815 = vmatpush.bf16.msra.mxu0 %v7192_v38  ;;  %v6603_v38 = vld [vmem:[%s11593_s9 + $0x210] sm:$0xf] }
 0x42b   :  { %v6604_v51 = vor.u32 %v7646_v39, %v6603_v38 }
 0x42d   :  { %4777 = vmatpush.bf16.msra.mxu3 %v6492_v16  ;;  %4790 = vmatpush.bf16.msra.mxu1 %v6716_v4  ;;  %v4499_v16 = vadd.f32 %v4498_v10, %v4486_v31  ;;  %v6380_v4 = vor.u32 %v7590_v34, %v6379_v33  ;;  %v3299_v31 = vperm.slane %v11459_v60, 2 }
 0x42e   :  { %4803 = vmatpush.bf16.msra.mxu2 %v6940_v1  ;;  %4816 = vmatpush.bf16.msra.mxu0 %v7164_v26  ;;  %v4474_v37 = vpop.f32.mrf.mxu3  ;;  %v7583_v1 = vld [vmem:[%s11593_s9 + $0x30] sm:$0xf0]  ;;  %v6575_v26 = vld [vmem:[%s11593_s9 + $0x1d8] sm:$0xf] }
 0x42f   :  { %v4500_v18 = vpop.f32.mrf.mxu2  ;;  %v4512_v6 = vadd.f32 %v11439_v50, %v4499_v16  ;;  %v6352_v7 = vor.u32 %v7583_v1, %v6351_v54 }
 0x430   :  { %v4537_v49 = vpop.f32.mrf.mxu1 }
 0x431   :  { %4778 = vmatpush.bf16.msra.mxu3 %v6464_v45  ;;  %4791 = vmatpush.bf16.msra.mxu1 %v6688_v3  ;;  %v4563_v46 = vpop.f32.mrf.mxu0  ;;  %v7023_v45 = vld [vmem:[%s11593_s9 + $0x558] sm:$0xf]  ;;  %v7751_v3 = vld [vmem:[%s11593_s9 + $0x570] sm:$0xf0]  ;;  %v4827_v11 = vmul.f32 0.5, %v4512_v6  ;;  %s7882_s9 = smov [#allocation4]  }
 0x432   :  { %4804 = vmatpush.bf16.msra.mxu2 %v6912_v63  ;;  %4817 = vmatpush.bf16.msra.mxu0 %v7136_v40  ;;  %v6576_v63 = vor.u32 %v7639_v43, %v6575_v26  ;;  %v6800_v40 = vor.u32 %v7695_v29, %v6799_v2  ;;  %v7024_v36 = vor.u32 %v7751_v3, %v7023_v45  ;;  %s4880_s4 = sshll.u32 %s7882_s9, 4  ;;  %s4881_s4 = int_to_ptr.vmem [resolvable:$true] %s4880_s4 }
 0x433   :  { %7812 = vtanh.f32 %v4827_v11  ;;  %4885 = dma.vmem_to_hbm [thread:$0]  %s4881_s4, 128, %s4883_s28, [#allocation5]  }
 0x435   :  { %4779 = vmatpush.bf16.msra.mxu3 %v6436_v15  ;;  %4792 = vmatpush.bf16.msra.mxu1 %v6660_v19 }
 0x436   :  { %4805 = vmatpush.bf16.msra.mxu2 %v6884_v22  ;;  %4818 = vmatpush.bf16.msra.mxu0 %v7108_v23  ;;  %v4524_v25 = vpop.f32.mrf.mxu3 }
 0x437   :  { %v4525_v8 = vadd.f32 %v4524_v25, %v3298_v41  ;;  %v4550_v9 = vpop.f32.mrf.mxu2 }
 0x438   :  { %v4539_v10 = vpop.f32.mrf.mxu1 }
 0x439   :  { %4780 = vmatpush.bf16.msra.mxu3 %v6408_v53  ;;  %4793 = vmatpush.bf16.msra.mxu1 %v6632_v62  ;;  %v4538_v12 = vadd.f32 %v4537_v49, %v4525_v8  ;;  %v4565_v13 = vpop.f32.mrf.mxu0  ;;  %v7813_v21 = vpop.eup %7812 }
 0x43a   :  { %4806 = vmatpush.bf16.msra.mxu2 %v6856_v35  ;;  %4819 = vmatpush.bf16.msra.mxu0 %v7080_v55  ;;  %v4841_v22 = vadd.f32 1.0, %v7813_v21  ;;  %v3300_v55 = vperm.slane %v11459_v60, 3 }
 0x43b   :  { %v4551_v50 = vadd.f32 %v4550_v9, %v4538_v12  ;;  %v3302_v12 = vperm.slane %v11459_v60, 5 }
 0x43c   :  { %v4848_v27 = vmul.f32 0.5, %v4841_v22 }
 0x43d   :  { %4781 = vmatpush.bf16.msra.mxu3 %v6380_v4  ;;  %4794 = vmatpush.bf16.msra.mxu1 %v6604_v51  ;;  %v4564_v14 = vadd.f32 %v4563_v46, %v4551_v50 }
 0x43e   :  { %4807 = vmatpush.bf16.msra.mxu2 %v6828_v57  ;;  %4820 = vmatpush.bf16.msra.mxu0 %v7052_v58  ;;  %v4526_v47 = vpop.f32.mrf.mxu3 }
 0x43f   :  { %v4828_v15 = vmul.f32 0.5, %v4564_v14  ;;  %v4552_v19 = vpop.f32.mrf.mxu2 }
 0x441   :  { %4782 = vmatpush.bf16.msra.mxu3 %v6352_v7  ;;  %4795 = vmatpush.bf16.msra.mxu1 %v6576_v63  ;;  %7814 = vtanh.f32 %v4828_v15  ;;  %v4589_v17 = vpop.f32.mrf.mxu1 }
 0x442   :  { %4808 = vmatpush.bf16.msra.mxu2 %v6800_v40  ;;  %4821 = vmatpush.bf16.msra.mxu0 %v7024_v36  ;;  %v3301_v36 = vperm.slane %v11459_v60, 4 }
 0x444   :  { %4783 = vmatmul.bf16.vlgmr.msra.gmra.mxu3 %v10591_v61  ;;  %4796 = vmatmul.bf16.vlgmr.msra.gmra.mxu1 %v10593_v0  ;;  %v4615_v52 = vpop.f32.mrf.mxu0 }
 0x445   :  { %4809 = vmatmul.bf16.vlgmr.msra.gmra.mxu2 %v10595_v56  ;;  %4822 = vmatmul.bf16.vlgmr.msra.gmra.mxu0 %v10597_v32 }
 0x447   :  { %v7815_v23 = vpop.eup %7814  ;;  %v4576_v59 = vpop.f32.mrf.mxu3 }
 0x448   :  { %v4842_v24 = vadd.f32 1.0, %v7815_v23  ;;  %v4577_v53 = vadd.f32 %v4576_v59, %v3299_v31 }
 0x449   :  { %v4591_v28 = vpop.f32.mrf.mxu1 }
 0x44a   :  { %v4602_v61 = vpop.f32.mrf.mxu2  ;;  %v4849_v0 = vmul.f32 0.5, %v4842_v24  ;;  %v4590_v62 = vadd.f32 %v4589_v17, %v4577_v53  ;;  %v3303_v53 = vperm.slane %v11459_v60, 6 }
 0x44c   :  { %v4617_v5 = vpop.f32.mrf.mxu0  ;;  %v4855_v30 = vpack.c.bf16 %v4849_v0, %v4848_v27  ;;  %v4603_v34 = vadd.f32 %v4602_v61, %v4590_v62 }
 0x44e   :  { %4859 = vst [vmem:[#allocation2] sm:$0xff] %v4855_v30  ;;  %v4616_v37 = vadd.f32 %v4615_v52, %v4603_v34 }
 0x44f   :  { %v4578_v56 = vpop.f32.mrf.mxu3 }
 0x450   :  { %v4829_v44 = vmul.f32 0.5, %v4616_v37 }
 0x452   :  { %v4604_v32 = vpop.f32.mrf.mxu2  ;;  %7816 = vtanh.f32 %v4829_v44 }
 0x458   :  { %v7817_v54 = vpop.eup %7816 }
 0x459   :  { %v4843_v1 = vadd.f32 1.0, %v7817_v54 }
 0x45b   :  { %v4850_v58 = vmul.f32 0.5, %v4843_v1 }
 0x461   :  { %v4641_v33 = vpop.f32.mrf.mxu1 }
 0x464   :  { %v4667_v35 = vpop.f32.mrf.mxu0 }
 0x467   :  { %v4628_v38 = vpop.f32.mrf.mxu3 }
 0x468   :  { %v4629_v39 = vadd.f32 %v4628_v38, %v3300_v55 }
 0x469   :  { %v4643_v18 = vpop.f32.mrf.mxu1 }
 0x46a   :  { %v4654_v42 = vpop.f32.mrf.mxu2  ;;  %v4642_v20 = vadd.f32 %v4641_v33, %v4629_v39 }
 0x46c   :  { %v4669_v48 = vpop.f32.mrf.mxu0  ;;  %v4655_v49 = vadd.f32 %v4654_v42, %v4642_v20 }
 0x46e   :  { %v4668_v16 = vadd.f32 %v4667_v35, %v4655_v49 }
 0x46f   :  { %v4630_v4 = vpop.f32.mrf.mxu3 }
 0x470   :  { %v4830_v51 = vmul.f32 0.5, %v4668_v16 }
 0x472   :  { %v4656_v46 = vpop.f32.mrf.mxu2  ;;  %7818 = vtanh.f32 %v4830_v51 }
 0x478   :  { %v7819_v26 = vpop.eup %7818 }
 0x479   :  { %v4844_v57 = vadd.f32 1.0, %v7819_v26 }
 0x47b   :  { %v4851_v43 = vmul.f32 0.5, %v4844_v57 }
 0x47d   :  { %v4856_v2 = vpack.c.bf16 %v4851_v43, %v4850_v58 }
 0x47f   :  { %4860 = vst [vmem:[#allocation2 + $0x8] sm:$0xff] %v4856_v2 }
 0x481   :  { %v4693_v29 = vpop.f32.mrf.mxu1 }
 0x484   :  { %v4719_v45 = vpop.f32.mrf.mxu0 }
 0x487   :  { %v4680_v3 = vpop.f32.mrf.mxu3 }
 0x488   :  { %v4681_v25 = vadd.f32 %v4680_v3, %v3301_v36 }
 0x489   :  { %v4695_v6 = vpop.f32.mrf.mxu1 }
 0x48a   :  { %v4706_v41 = vpop.f32.mrf.mxu2  ;;  %v4694_v8 = vadd.f32 %v4693_v29, %v4681_v25 }
 0x48c   :  { %v4721_v7 = vpop.f32.mrf.mxu0  ;;  %v4707_v10 = vadd.f32 %v4706_v41, %v4694_v8 }
 0x48e   :  { %v4720_v13 = vadd.f32 %v4719_v45, %v4707_v10 }
 0x48f   :  { %v4682_v63 = vpop.f32.mrf.mxu3 }
 0x490   :  { %v4831_v19 = vmul.f32 0.5, %v4720_v13 }
 0x492   :  { %v4708_v40 = vpop.f32.mrf.mxu2  ;;  %7820 = vtanh.f32 %v4831_v19 }
 0x498   :  { %v7821_v61 = vpop.eup %7820 }
 0x499   :  { %v4845_v27 = vadd.f32 1.0, %v7821_v61 }
 0x49b   :  { %v4852_v5 = vmul.f32 0.5, %v4845_v27 }
 0x4a1   :  { %v4745_v9 = vpop.f32.mrf.mxu1 }
 0x4a4   :  { %v4771_v11 = vpop.f32.mrf.mxu0 }
 0x4a7   :  { %v4732_v50 = vpop.f32.mrf.mxu3 }
 0x4a8   :  { %v4733_v14 = vadd.f32 %v4732_v50, %v3302_v12 }
 0x4a9   :  { %v4747_v15 = vpop.f32.mrf.mxu1 }
 0x4aa   :  { %v4758_v47 = vpop.f32.mrf.mxu2  ;;  %v4746_v17 = vadd.f32 %v4745_v9, %v4733_v14 }
 0x4ac   :  { %v4773_v21 = vpop.f32.mrf.mxu0  ;;  %v4759_v52 = vadd.f32 %v4758_v47, %v4746_v17 }
 0x4ae   :  { %v4772_v22 = vadd.f32 %v4771_v11, %v4759_v52 }
 0x4af   :  { %v4734_v23 = vpop.f32.mrf.mxu3 }
 0x4b0   :  { %v4832_v24 = vmul.f32 0.5, %v4772_v22 }
 0x4b2   :  { %v4760_v59 = vpop.f32.mrf.mxu2  ;;  %7822 = vtanh.f32 %v4832_v24 }
 0x4b8   :  { %v7823_v0 = vpop.eup %7822 }
 0x4b9   :  { %v4846_v28 = vadd.f32 1.0, %v7823_v0 }
 0x4bb   :  { %v4853_v30 = vmul.f32 0.5, %v4846_v28 }
 0x4bd   :  { %v4857_v56 = vpack.c.bf16 %v4853_v30, %v4852_v5 }
 0x4bf   :  { %4861 = vst [vmem:[#allocation2 + $0x10] sm:$0xff] %v4857_v56 }
 0x4c1   :  { %v4797_v32 = vpop.f32.mrf.mxu1 }
 0x4c2   :  { %v4823_v31 = vpop.f32.mrf.mxu0 }
 0x4c7   :  { %v4784_v62 = vpop.f32.mrf.mxu3 }
 0x4c8   :  { %v4785_v33 = vadd.f32 %v4784_v62, %v3303_v53  ;;  %v4810_v34 = vpop.f32.mrf.mxu2 }
 0x4c9   :  { %v4799_v35 = vpop.f32.mrf.mxu1 }
 0x4ca   :  { %v4798_v55 = vadd.f32 %v4797_v32, %v4785_v33  ;;  %v4825_v37 = vpop.f32.mrf.mxu0 }
 0x4cc   :  { %v4811_v38 = vadd.f32 %v4810_v34, %v4798_v55 }
 0x4ce   :  { %v4824_v39 = vadd.f32 %v4823_v31, %v4811_v38 }
 0x4cf   :  { %v4786_v42 = vpop.f32.mrf.mxu3 }
 0x4d0   :  { %v4833_v18 = vmul.f32 0.5, %v4824_v39  ;;  %v4812_v44 = vpop.f32.mrf.mxu2 }
 0x4d2   :  { %7824 = vtanh.f32 %v4833_v18 }
 0x4d8   :  { %v7825_v20 = vpop.eup %7824 }
 0x4d9   :  { %v4847_v48 = vadd.f32 1.0, %v7825_v20 }
 0x4db   :  { %v4854_v60 = vmul.f32 0.5, %v4847_v48 }
 0x4dd   :  { %v4858_v49 = vpack.c.bf16 %v4854_v60, %v4854_v60 }
 0x4df   :  { %4863 = vst.msk [vmem:[#allocation2 + $0x18] sm:$0xf] %vm4862_vm2, %v4858_v49 }
 0x4e0   :  { %4874 = dma.vmem_to_hbm [thread:$0]  %s4870_s29, 448, %s4872_s14, [#allocation3]  }
 0x4e1   :  { %7875 = dma.done.wait [#allocation3], 448  }
 0x4e2   :  { %7876 = vsyncadd [#allocation3], 4294966848 }
 0x4e3   :  { %7877 = dma.done.wait [#allocation5], 128  }
 0x4e4   :  { %7878 = vsyncadd [#allocation5], 4294967168 }
 0x4e5   :  { %4894 = vsyncpa [#allocation3], 1 }
 0x4e6   :  { %4895 = vsyncpa [#allocation5], 1 }

// kernel: tpu_custom_call.1
= control target key start
LH: loop header
LB: loop body
LE: loop exit
PB: predicated region body
PF: predicated region fallthrough
CT: control target
= control target key end

     0   :  { %18 = vsyncpa [#allocation3], 0  ;;  %vm1274_vm0 = vcmask 1040384   ;;  %vm1270_vm1 = vcmask 146432   ;;  %s11584_s0 = inlined_call_operand.vmem [shape: bf16[8,786], index: 0, kind: input, shape index: {}]   ;;  %s11585_s1 = inlined_call_operand.vmem [shape: bf16[786,512], index: 1, kind: input, shape index: {}]   ;;  %s11586_s2 = inlined_call_operand.vmem [shape: f32[1,512], index: 2, kind: input, shape index: {}]   ;;  %s11587_s3 = inlined_call_operand.vmem [shape: bf16[512,512], index: 3, kind: input, shape index: {}]   ;;  %s11588_s4 = inlined_call_operand.vmem [shape: f32[1,512], index: 4, kind: input, shape index: {}]   ;;  %s11589_s5 = inlined_call_operand.vmem [shape: bf16[512,128], index: 5, kind: input, shape index: {}]   ;;  %s11590_s6 = inlined_call_operand.vmem [shape: f32[1,128], index: 6, kind: input, shape index: {}]   ;;  %s11591_s7 = inlined_call_operand.vmem [shape: f32[8,512], index: 7, kind: input, shape index: {}]   ;;  %s11592_s8 = inlined_call_operand.vmem [shape: f32[1,512], index: 8, kind: input, shape index: {}]   ;;  %s11593_s9 = inlined_call_operand.vmem [shape: bf16[512,784], index: 9, kind: input, shape index: {}]   ;;  %s11594_s10 = inlined_call_operand.vmem [shape: f32[1,784], index: 10, kind: input, shape index: {}]   ;;  %s11595_s11 = inlined_call_operand.hbm [shape: bf16[8,784], index: 11, kind: output, shape index: {0}]   ;;  %s11596_s12 = inlined_call_operand.hbm [shape: f32[8,128], index: 12, kind: output, shape index: {1}]  }
   0x1   :  { %v5010_v0 = vld [vmem:[%s11585_s1 + $0xe0] sm:$0xf]  ;;  %v7251_v1 = vld [vmem:[%s11585_s1 + $0xec] sm:$0xf0] }
   0x2   :  { %v5138_v2 = vld [vmem:[%s11585_s1 + $0x1e0] sm:$0xf]  ;;  %v5011_v3 = vor.u32 %v7251_v1, %v5010_v0  ;;  %v7283_v4 = vld [vmem:[%s11585_s1 + $0x1ec] sm:$0xf0] }
   0x3   :  { %v5266_v5 = vld [vmem:[%s11585_s1 + $0x2e0] sm:$0xf]  ;;  %v7315_v6 = vld [vmem:[%s11585_s1 + $0x2ec] sm:$0xf0]  ;;  %v5139_v7 = vor.u32 %v7283_v4, %v5138_v2 }
   0x4   :  { %v5267_v8 = vor.u32 %v7315_v6, %v5266_v5  ;;  %v5394_v9 = vld [vmem:[%s11585_s1 + $0x3e0] sm:$0xf]  ;;  %v7347_v10 = vld [vmem:[%s11585_s1 + $0x3ec] sm:$0xf0]  ;;  %1287 = vmatpush.bf16.msra.mxu0 %v5011_v3 }
   0x5   :  { %v4994_v11 = vld [vmem:[%s11585_s1 + $0xc0] sm:$0xf]  ;;  %v5395_v12 = vor.u32 %v7347_v10, %v5394_v9  ;;  %v7247_v13 = vld [vmem:[%s11585_s1 + $0xcc] sm:$0xf0]  ;;  %1300 = vmatpush.bf16.msra.mxu1 %v5139_v7 }
   0x6   :  { %v5122_v14 = vld [vmem:[%s11585_s1 + $0x1c0] sm:$0xf]  ;;  %v7279_v15 = vld [vmem:[%s11585_s1 + $0x1cc] sm:$0xf0]  ;;  %1313 = vmatpush.bf16.msra.mxu2 %v5267_v8  ;;  %v4995_v16 = vor.u32 %v7247_v13, %v4994_v11 }
   0x7   :  { %v5123_v17 = vor.u32 %v7279_v15, %v5122_v14  ;;  %v5250_v18 = vld [vmem:[%s11585_s1 + $0x2c0] sm:$0xf]  ;;  %v7311_v19 = vld [vmem:[%s11585_s1 + $0x2cc] sm:$0xf0]  ;;  %1326 = vmatpush.bf16.msra.mxu3 %v5395_v12 }
   0x8   :  { %v5378_v20 = vld [vmem:[%s11585_s1 + $0x3c0] sm:$0xf]  ;;  %v5251_v21 = vor.u32 %v7311_v19, %v5250_v18  ;;  %v7343_v22 = vld [vmem:[%s11585_s1 + $0x3cc] sm:$0xf0]  ;;  %1288 = vmatpush.bf16.msra.mxu0 %v4995_v16 }
   0x9   :  { %v4978_v23 = vld [vmem:[%s11585_s1 + $0xa0] sm:$0xf]  ;;  %v7243_v24 = vld [vmem:[%s11585_s1 + $0xac] sm:$0xf0]  ;;  %v5379_v25 = vor.u32 %v7343_v22, %v5378_v20  ;;  %1301 = vmatpush.bf16.msra.mxu1 %v5123_v17 }
   0xa   :  { %v5106_v26 = vld [vmem:[%s11585_s1 + $0x1a0] sm:$0xf]  ;;  %v7275_v27 = vld [vmem:[%s11585_s1 + $0x1ac] sm:$0xf0]  ;;  %v4979_v29 = vor.u32 %v7243_v24, %v4978_v23  ;;  %1314 = vmatpush.bf16.msra.mxu2 %v5251_v21 }
   0xb   :  { %v5234_v28 = vld [vmem:[%s11585_s1 + $0x2a0] sm:$0xf]  ;;  %v7307_v30 = vld [vmem:[%s11585_s1 + $0x2ac] sm:$0xf0]  ;;  %v5107_v33 = vor.u32 %v7275_v27, %v5106_v26  ;;  %1327 = vmatpush.bf16.msra.mxu3 %v5379_v25  ;;  %v44_v25 = vld [vmem:[%s11584_s0 + $0x8] sm:$0xff] }
   0xc   :  { %v5362_v31 = vld [vmem:[%s11585_s1 + $0x3a0] sm:$0xf]  ;;  %v7339_v32 = vld [vmem:[%s11585_s1 + $0x3ac] sm:$0xf0]  ;;  %v5235_v34 = vor.u32 %v7307_v30, %v5234_v28  ;;  %1289 = vmatpush.bf16.msra.mxu0 %v4979_v29 }
   0xd   :  { %v4962_v35 = vld [vmem:[%s11585_s1 + $0x80] sm:$0xf]  ;;  %v7239_v36 = vld [vmem:[%s11585_s1 + $0x8c] sm:$0xf0]  ;;  %v5363_v38 = vor.u32 %v7339_v32, %v5362_v31  ;;  %1302 = vmatpush.bf16.msra.mxu1 %v5107_v33 }
   0xe   :  { %v5090_v37 = vld [vmem:[%s11585_s1 + $0x180] sm:$0xf]  ;;  %v7271_v39 = vld [vmem:[%s11585_s1 + $0x18c] sm:$0xf0]  ;;  %v4963_v44 = vor.u32 %v7239_v36, %v4962_v35  ;;  %1315 = vmatpush.bf16.msra.mxu2 %v5235_v34 }
   0xf   :  { %v5218_v40 = vld [vmem:[%s11585_s1 + $0x280] sm:$0xf]  ;;  %v7303_v41 = vld [vmem:[%s11585_s1 + $0x28c] sm:$0xf0]  ;;  %v5091_v45 = vor.u32 %v7271_v39, %v5090_v37  ;;  %1328 = vmatpush.bf16.msra.mxu3 %v5363_v38  ;;  %v262_v38 = vunpack.c.l.b16 %v44_v25 }
  0x10   :  { %v5346_v42 = vld [vmem:[%s11585_s1 + $0x380] sm:$0xf]  ;;  %v7335_v43 = vld [vmem:[%s11585_s1 + $0x38c] sm:$0xf0]  ;;  %v5219_v46 = vor.u32 %v7303_v41, %v5218_v40  ;;  %1290 = vmatpush.bf16.msra.mxu0 %v4963_v44  ;;  %v7249_v41 = vld [vmem:[%s11585_s1 + $0xe4] sm:$0xf]  ;;  %v263_v44 = vunpack.c.h.b16 %v44_v25 }
  0x11   :  { %v4946_v47 = vld [vmem:[%s11585_s1 + $0x60] sm:$0xf]  ;;  %v7235_v48 = vld [vmem:[%s11585_s1 + $0x6c] sm:$0xf0]  ;;  %v5347_v50 = vor.u32 %v7335_v43, %v5346_v42  ;;  %1303 = vmatpush.bf16.msra.mxu1 %v5091_v45  ;;  %v5012_v42 = vld [vmem:[%s11585_s1 + $0xf0] sm:$0xf0] }
  0x12   :  { %v5074_v49 = vld [vmem:[%s11585_s1 + $0x160] sm:$0xf]  ;;  %v7267_v51 = vld [vmem:[%s11585_s1 + $0x16c] sm:$0xf0]  ;;  %v4947_v56 = vor.u32 %v7235_v48, %v4946_v47  ;;  %1316 = vmatpush.bf16.msra.mxu2 %v5219_v46  ;;  %v7273_v25 = vld [vmem:[%s11585_s1 + $0x1a4] sm:$0xf] }
  0x13   :  { %v5202_v52 = vld [vmem:[%s11585_s1 + $0x260] sm:$0xf]  ;;  %v7299_v53 = vld [vmem:[%s11585_s1 + $0x26c] sm:$0xf0]  ;;  %v5075_v57 = vor.u32 %v7267_v51, %v5074_v49  ;;  %1329 = vmatpush.bf16.msra.mxu3 %v5347_v50 }
  0x14   :  { %v5330_v54 = vld [vmem:[%s11585_s1 + $0x360] sm:$0xf]  ;;  %v7331_v55 = vld [vmem:[%s11585_s1 + $0x36c] sm:$0xf0]  ;;  %v5203_v58 = vor.u32 %v7299_v53, %v5202_v52  ;;  %1291 = vmatpush.bf16.msra.mxu0 %v4947_v56  ;;  %v8187_v56 = vpack.c.b16 %v262_v38, %v262_v38  ;;  %v7269_v38 = vld [vmem:[%s11585_s1 + $0x184] sm:$0xf] }
  0x15   :  { %v4930_v59 = vld [vmem:[%s11585_s1 + $0x40] sm:$0xf]  ;;  %v7231_v60 = vld [vmem:[%s11585_s1 + $0x4c] sm:$0xf0]  ;;  %v5331_v62 = vor.u32 %v7331_v55, %v5330_v54  ;;  %1304 = vmatpush.bf16.msra.mxu1 %v5075_v57  ;;  %v5015_v55 = vor.u32 %v7249_v41, %v5012_v42 }
  0x16   :  { %v5058_v61 = vld [vmem:[%s11585_s1 + $0x140] sm:$0xf]  ;;  %v7263_v63 = vld [vmem:[%s11585_s1 + $0x14c] sm:$0xf0]  ;;  %v4931_v4 = vor.u32 %v7231_v60, %v4930_v59  ;;  %1317 = vmatpush.bf16.msra.mxu2 %v5203_v58  ;;  %v7245_v58 = vld [vmem:[%s11585_s1 + $0xc4] sm:$0xf] }
  0x17   :  { %v5186_v0 = vld [vmem:[%s11585_s1 + $0x240] sm:$0xf]  ;;  %v7295_v1 = vld [vmem:[%s11585_s1 + $0x24c] sm:$0xf0]  ;;  %v5059_v5 = vor.u32 %v7263_v63, %v5058_v61  ;;  %1330 = vmatpush.bf16.msra.mxu3 %v5331_v62  ;;  %v4996_v59 = vld [vmem:[%s11585_s1 + $0xd0] sm:$0xf0]  ;;  %v8206_v63 = vpack.c.b16 %v263_v44, %v263_v44 }
  0x18   :  { %v5314_v2 = vld [vmem:[%s11585_s1 + $0x340] sm:$0xf]  ;;  %v7327_v3 = vld [vmem:[%s11585_s1 + $0x34c] sm:$0xf0]  ;;  %v5187_v6 = vor.u32 %v7295_v1, %v5186_v0  ;;  %1292 = vmatpush.bf16.msra.mxu0 %v4931_v4  ;;  %v7281_v60 = vld [vmem:[%s11585_s1 + $0x1e4] sm:$0xf] }
  0x19   :  { %v4914_v7 = vld [vmem:[%s11585_s1 + $0x20] sm:$0xf]  ;;  %v7227_v8 = vld [vmem:[%s11585_s1 + $0x2c] sm:$0xf0]  ;;  %v5315_v10 = vor.u32 %v7327_v3, %v5314_v2  ;;  %1305 = vmatpush.bf16.msra.mxu1 %v5059_v5  ;;  %v5140_v61 = vld [vmem:[%s11585_s1 + $0x1f0] sm:$0xf0] }
  0x1a   :  { %v5042_v9 = vld [vmem:[%s11585_s1 + $0x120] sm:$0xf]  ;;  %v7259_v11 = vld [vmem:[%s11585_s1 + $0x12c] sm:$0xf0]  ;;  %v4915_v17 = vor.u32 %v7227_v8, %v4914_v7  ;;  %1318 = vmatpush.bf16.msra.mxu2 %v5187_v6  ;;  %v4999_v6 = vor.u32 %v7245_v58, %v4996_v59  ;;  %v5143_v7 = vor.u32 %v7281_v60, %v5140_v61 }
  0x1b   :  { %v5170_v12 = vld [vmem:[%s11585_s1 + $0x220] sm:$0xf]  ;;  %v7291_v13 = vld [vmem:[%s11585_s1 + $0x22c] sm:$0xf0]  ;;  %v5043_v21 = vor.u32 %v7259_v11, %v5042_v9  ;;  %1331 = vmatpush.bf16.msra.mxu3 %v5315_v10  ;;  %v7241_v10 = vld [vmem:[%s11585_s1 + $0xa4] sm:$0xf] }
  0x1c   :  { %v5298_v14 = vld [vmem:[%s11585_s1 + $0x320] sm:$0xf]  ;;  %v7323_v15 = vld [vmem:[%s11585_s1 + $0x32c] sm:$0xf0]  ;;  %v5171_v22 = vor.u32 %v7291_v13, %v5170_v12  ;;  %1293 = vmatpush.bf16.msra.mxu0 %v4915_v17  ;;  %v4980_v11 = vld [vmem:[%s11585_s1 + $0xb0] sm:$0xf0] }
  0x1d   :  { %v8120_v16 = vld [vmem:[%s11585_s1 + $0x620] sm:$0x11]  ;;  %v7223_v19 = vld [vmem:[%s11585_s1 + $0xc] sm:$0xf0]  ;;  %v5299_v26 = vor.u32 %v7323_v15, %v5298_v14  ;;  %1306 = vmatpush.bf16.msra.mxu1 %v5043_v21  ;;  %v5124_v13 = vld [vmem:[%s11585_s1 + $0x1d0] sm:$0xf0] }
  0x1e   :  { %v4898_v18 = vld [vmem:[%s11585_s1] sm:$0xf]  ;;  %v870_v20 = vunpack.c.l.b16 %v8120_v16  ;;  %v7255_v24 = vld [vmem:[%s11585_s1 + $0x10c] sm:$0xf0]  ;;  %1319 = vmatpush.bf16.msra.mxu2 %v5171_v22  ;;  %v7277_v12 = vld [vmem:[%s11585_s1 + $0x1c4] sm:$0xf] }
  0x1f   :  { %v5026_v23 = vld [vmem:[%s11585_s1 + $0x100] sm:$0xf]  ;;  %v7287_v28 = vld [vmem:[%s11585_s1 + $0x20c] sm:$0xf0]  ;;  %v4899_v33 = vor.u32 %v7223_v19, %v4898_v18  ;;  %1332 = vmatpush.bf16.msra.mxu3 %v5299_v26  ;;  %v4983_v19 = vor.u32 %v7241_v10, %v4980_v11  ;;  %v5108_v26 = vld [vmem:[%s11585_s1 + $0x1b0] sm:$0xf0] }
  0x20   :  { %v5154_v27 = vld [vmem:[%s11585_s1 + $0x200] sm:$0xf]  ;;  %v7319_v30 = vld [vmem:[%s11585_s1 + $0x30c] sm:$0xf0]  ;;  %v5027_v34 = vor.u32 %v7255_v24, %v5026_v23  ;;  %v1070_v37 = vpack.c.b16 %v870_v20, %v870_v20  ;;  %v5127_v20 = vor.u32 %v7277_v12, %v5124_v13  ;;  %v7237_v23 = vld [vmem:[%s11585_s1 + $0x84] sm:$0xf] }
  0x21   :  { %v5282_v29 = vld [vmem:[%s11585_s1 + $0x300] sm:$0xf]  ;;  %v7379_v32 = vld [vmem:[%s11585_s1 + $0x4ec] sm:$0xf0]  ;;  %v5155_v40 = vor.u32 %v7287_v28, %v5154_v27  ;;  %1294 = vmatpush.bf16.msra.mxu0 %v4899_v33  ;;  %v4964_v24 = vld [vmem:[%s11585_s1 + $0x90] sm:$0xf0]  ;;  %v5111_v33 = vor.u32 %v7273_v25, %v5108_v26 }
  0x22   :  { %v5522_v31 = vld [vmem:[%s11585_s1 + $0x4e0] sm:$0xf]  ;;  %v7411_v36 = vld [vmem:[%s11585_s1 + $0x5ec] sm:$0xf0]  ;;  %v5283_v45 = vor.u32 %v7319_v30, %v5282_v29  ;;  %v1276_v54 = vsel %vm1274_vm0, %v1070_v37, 0  ;;  %1307 = vmatpush.bf16.msra.mxu1 %v5027_v34 }
  0x23   :  { %v5650_v35 = vld [vmem:[%s11585_s1 + $0x5e0] sm:$0xf]  ;;  %v5523_v46 = vor.u32 %v7379_v32, %v5522_v31  ;;  %v7375_v48 = vld [vmem:[%s11585_s1 + $0x4cc] sm:$0xf0]  ;;  %1320 = vmatpush.bf16.msra.mxu2 %v5155_v40  ;;  %v46_v31 = vld [vmem:[%s11584_s0 + $0x18] sm:$0xf]  ;;  %v4967_v32 = vor.u32 %v7237_v23, %v4964_v24 }
  0x24   :  { %v43_v39 = vld [vmem:[%s11584_s0] sm:$0xff]  ;;  %v5651_v50 = vor.u32 %v7411_v36, %v5650_v35  ;;  %v7407_v52 = vld [vmem:[%s11585_s1 + $0x5cc] sm:$0xf0]  ;;  %1333 = vmatpush.bf16.msra.mxu3 %v5283_v45  ;;  %v4948_v37 = vld [vmem:[%s11585_s1 + $0x70] sm:$0xf0]  ;;  %v266_v40 = vunpack.c.l.b16 %v46_v31 }
  0x25   :  { %v260_v43 = vunpack.c.l.b16 %v43_v39  ;;  %v5506_v47 = vld [vmem:[%s11585_s1 + $0x4c0] sm:$0xf]  ;;  %v261_v49 = vunpack.c.h.b16 %v43_v39  ;;  %v7415_v57 = vld [vmem:[%s11585_s1 + $0x60c] sm:$0xf0]  ;;  %1339 = vmatpush.bf16.msrb.mxu0 %v5523_v46  ;;  %v7233_v36 = vld [vmem:[%s11585_s1 + $0x64] sm:$0xf] }
  0x26   :  { %v5634_v51 = vld [vmem:[%s11585_s1 + $0x5c0] sm:$0xf]  ;;  %v5507_v0 = vor.u32 %v7375_v48, %v5506_v47  ;;  %1352 = vmatpush.bf16.msrb.mxu1 %v5651_v50  ;;  %v7371_v5 = vld [vmem:[%s11585_s1 + $0x4ac] sm:$0xf0]  ;;  %1321 = vmatmul.bf16.vlgmr.msra.gmra.mxu2 %v8187_v56  ;;  %v5092_v39 = vld [vmem:[%s11585_s1 + $0x190] sm:$0xf0]  ;;  %v4951_v45 = vor.u32 %v7233_v36, %v4948_v37 }
  0x27   :  { %v5666_v53 = vld [vmem:[%s11585_s1 + $0x600] sm:$0xf]  ;;  %v8204_v62 = vpack.c.b16 %v260_v43, %v260_v43  ;;  %v8208_v1 = vpack.c.b16 %v261_v49, %v261_v49  ;;  %1371 = vmatpush.bf16.msrb.mxu2 %v1276_v54  ;;  %v5635_v2 = vor.u32 %v7407_v52, %v5634_v51  ;;  %v7403_v9 = vld [vmem:[%s11585_s1 + $0x5ac] sm:$0xf0]  ;;  %1334 = vmatmul.bf16.vlgmr.msra.gmra.mxu3 %v8206_v63  ;;  %v7229_v49 = vld [vmem:[%s11585_s1 + $0x44] sm:$0xf] }
  0x28   :  { %v5667_v3 = vor.u32 %v7415_v57, %v5666_v53  ;;  %v5490_v4 = vld [vmem:[%s11585_s1 + $0x4a0] sm:$0xf]  ;;  %1378 = vmatpush.bf16.msrb.mxu3 %v5015_v55  ;;  %v7367_v18 = vld [vmem:[%s11585_s1 + $0x48c] sm:$0xf0]  ;;  %v5095_v46 = vor.u32 %v7269_v38, %v5092_v39  ;;  %v4932_v50 = vld [vmem:[%s11585_s1 + $0x50] sm:$0xf0]  ;;  %v8313_v53 = vpack.c.b16 %v266_v40, %v266_v40 }
  0x29   :  { %v5618_v8 = vld [vmem:[%s11585_s1 + $0x5a0] sm:$0xf]  ;;  %1295 = vmatmul.bf16.vlgmr.msra.gmra.mxu0 %v8204_v62  ;;  %v5491_v14 = vor.u32 %v7371_v5, %v5490_v4  ;;  %1308 = vmatmul.bf16.vlgmr.msra.gmra.mxu1 %v8208_v1  ;;  %v7399_v22 = vld [vmem:[%s11585_s1 + $0x58c] sm:$0xf0]  ;;  %v7265_v51 = vld [vmem:[%s11585_s1 + $0x164] sm:$0xf]  ;;  %v4935_v59 = vor.u32 %v7229_v49, %v4932_v50 }
  0x2a   :  { %1340 = vmatpush.bf16.msrb.mxu0 %v5507_v0  ;;  %1353 = vmatpush.bf16.msrb.mxu1 %v5635_v2  ;;  %v5619_v15 = vor.u32 %v7403_v9, %v5618_v8  ;;  %v5474_v17 = vld [vmem:[%s11585_s1 + $0x480] sm:$0xf]  ;;  %v7363_v30 = vld [vmem:[%s11585_s1 + $0x46c] sm:$0xf0]  ;;  %v5076_v52 = vld [vmem:[%s11585_s1 + $0x170] sm:$0xf0] }
  0x2b   :  { %1372 = vmatpush.bf16.msrb.mxu2 %v5667_v3  ;;  %v5602_v21 = vld [vmem:[%s11585_s1 + $0x580] sm:$0xf]  ;;  %v5475_v27 = vor.u32 %v7367_v18, %v5474_v17  ;;  %v7395_v35 = vld [vmem:[%s11585_s1 + $0x56c] sm:$0xf0]  ;;  %v5079_v60 = vor.u32 %v7265_v51, %v5076_v52  ;;  %v7225_v2 = vld [vmem:[%s11585_s1 + $0x24] sm:$0xf] }
  0x2c   :  { %1379 = vmatpush.bf16.msrb.mxu3 %v4999_v6  ;;  %v5603_v28 = vor.u32 %v7399_v22, %v5602_v21  ;;  %v5458_v29 = vld [vmem:[%s11585_s1 + $0x460] sm:$0xf]  ;;  %v7359_v44 = vld [vmem:[%s11585_s1 + $0x44c] sm:$0xf0]  ;;  %v4916_v3 = vld [vmem:[%s11585_s1 + $0x30] sm:$0xf0] }
  0x2d   :  { %v5586_v34 = vld [vmem:[%s11585_s1 + $0x560] sm:$0xf]  ;;  %v5459_v41 = vor.u32 %v7363_v30, %v5458_v29  ;;  %v7391_v48 = vld [vmem:[%s11585_s1 + $0x54c] sm:$0xf0]  ;;  %v7261_v4 = vld [vmem:[%s11585_s1 + $0x144] sm:$0xf] }
  0x2e   :  { %1341 = vmatpush.bf16.msrb.mxu0 %v5491_v14  ;;  %1354 = vmatpush.bf16.msrb.mxu1 %v5619_v15  ;;  %v5587_v42 = vor.u32 %v7395_v35, %v5586_v34  ;;  %v5442_v43 = vld [vmem:[%s11585_s1 + $0x440] sm:$0xf]  ;;  %v7355_v58 = vld [vmem:[%s11585_s1 + $0x42c] sm:$0xf0]  ;;  %v5060_v5 = vld [vmem:[%s11585_s1 + $0x150] sm:$0xf0]  ;;  %v4919_v14 = vor.u32 %v7225_v2, %v4916_v3 }
  0x2f   :  { %1391 = vmatpush.bf16.msra.mxu2 %v5143_v7  ;;  %v5570_v47 = vld [vmem:[%s11585_s1 + $0x540] sm:$0xf]  ;;  %v5443_v54 = vor.u32 %v7359_v44, %v5442_v43  ;;  %v7387_v0 = vld [vmem:[%s11585_s1 + $0x52c] sm:$0xf0]  ;;  %v7221_v12 = vld [vmem:[%s11585_s1 + $0x4] sm:$0xf]  ;;  %v5063_v15 = vor.u32 %v7261_v4, %v5060_v5 }
  0x30   :  { %1380 = vmatpush.bf16.msrb.mxu3 %v4983_v19  ;;  %v5571_v55 = vor.u32 %v7391_v48, %v5570_v47  ;;  %v5426_v57 = vld [vmem:[%s11585_s1 + $0x420] sm:$0xf]  ;;  %v7351_v8 = vld [vmem:[%s11585_s1 + $0x40c] sm:$0xf0]  ;;  %v4900_v17 = vld [vmem:[%s11585_s1 + $0x10] sm:$0xf0] }
  0x31   :  { %v5554_v61 = vld [vmem:[%s11585_s1 + $0x520] sm:$0xf]  ;;  %v5427_v6 = vor.u32 %v7355_v58, %v5426_v57  ;;  %v7383_v11 = vld [vmem:[%s11585_s1 + $0x50c] sm:$0xf0]  ;;  %v7313_v18 = vld [vmem:[%s11585_s1 + $0x2e4] sm:$0xf]  ;;  %v4903_v31 = vor.u32 %v7221_v12, %v4900_v17 }
  0x32   :  { %1342 = vmatpush.bf16.msrb.mxu0 %v5475_v27  ;;  %1355 = vmatpush.bf16.msrb.mxu1 %v5603_v28  ;;  %v5410_v7 = vld [vmem:[%s11585_s1 + $0x400] sm:$0xf]  ;;  %v5555_v10 = vor.u32 %v7387_v0, %v5554_v61  ;;  %v45_v13 = vld [vmem:[%s11584_s0 + $0x10] sm:$0xff]  ;;  %v7345_v22 = vld [vmem:[%s11585_s1 + $0x3e4] sm:$0xf] }
  0x33   :  { %1392 = vmatpush.bf16.msra.mxu2 %v5127_v20  ;;  %v5538_v9 = vld [vmem:[%s11585_s1 + $0x500] sm:$0xf]  ;;  %v5268_v19 = vld [vmem:[%s11585_s1 + $0x2f0] sm:$0xf0]  ;;  %v7257_v20 = vld [vmem:[%s11585_s1 + $0x124] sm:$0xf]  ;;  %v5411_v23 = vor.u32 %v7351_v8, %v5410_v7  ;;  %v264_v27 = vunpack.c.l.b16 %v45_v13  ;;  %v265_v28 = vunpack.c.h.b16 %v45_v13 }
  0x34   :  { %1381 = vmatpush.bf16.msrb.mxu3 %v4967_v32  ;;  %v5044_v21 = vld [vmem:[%s11585_s1 + $0x130] sm:$0xf0]  ;;  %v7377_v25 = vld [vmem:[%s11585_s1 + $0x4e4] sm:$0xf]  ;;  %v5539_v29 = vor.u32 %v7383_v11, %v5538_v9  ;;  %v5271_v30 = vor.u32 %v7313_v18, %v5268_v19 }
  0x35   :  { %v5396_v24 = vld [vmem:[%s11585_s1 + $0x3f0] sm:$0xf0]  ;;  %v5047_v32 = vor.u32 %v7257_v20, %v5044_v21  ;;  %v7253_v37 = vld [vmem:[%s11585_s1 + $0x104] sm:$0xf]  ;;  %v8401_v40 = vpack.c.b16 %v264_v27, %v264_v27 }
  0x36   :  { %1343 = vmatpush.bf16.msrb.mxu0 %v5459_v41  ;;  %1356 = vmatpush.bf16.msrb.mxu1 %v5587_v42  ;;  %v5524_v26 = vld [vmem:[%s11585_s1 + $0x4f0] sm:$0xf0]  ;;  %v5399_v35 = vor.u32 %v7345_v22, %v5396_v24  ;;  %v7341_v39 = vld [vmem:[%s11585_s1 + $0x3c4] sm:$0xf]  ;;  %v8403_v41 = vpack.c.b16 %v265_v28, %v265_v28 }
  0x37   :  { %1393 = vmatpush.bf16.msra.mxu2 %v5111_v33  ;;  %v7309_v33 = vld [vmem:[%s11585_s1 + $0x2c4] sm:$0xf]  ;;  %v5252_v34 = vld [vmem:[%s11585_s1 + $0x2d0] sm:$0xf0]  ;;  %v5527_v36 = vor.u32 %v7377_v25, %v5524_v26 }
  0x38   :  { %1382 = vmatpush.bf16.msrb.mxu3 %v4951_v45  ;;  %5680 = vmatmul.msk.bf16.vlgmr.msrb.gmra.mxu2 %vm1270_vm1, %v8313_v53  ;;  %v5028_v38 = vld [vmem:[%s11585_s1 + $0x110] sm:$0xf0]  ;;  %v7373_v43 = vld [vmem:[%s11585_s1 + $0x4c4] sm:$0xf]  ;;  %v5255_v45 = vor.u32 %v7309_v33, %v5252_v34 }
  0x39   :  { %v5380_v42 = vld [vmem:[%s11585_s1 + $0x3d0] sm:$0xf0]  ;;  %v5031_v48 = vor.u32 %v7253_v37, %v5028_v38  ;;  %v7305_v49 = vld [vmem:[%s11585_s1 + $0x2a4] sm:$0xf] }
  0x3a   :  { %1344 = vmatpush.bf16.msrb.mxu0 %v5443_v54  ;;  %1357 = vmatpush.bf16.msrb.mxu1 %v5571_v55  ;;  %v5508_v44 = vld [vmem:[%s11585_s1 + $0x4d0] sm:$0xf0]  ;;  %v5383_v51 = vor.u32 %v7341_v39, %v5380_v42  ;;  %v7337_v54 = vld [vmem:[%s11585_s1 + $0x3a4] sm:$0xf] }
  0x3b   :  { %1394 = vmatpush.bf16.msra.mxu2 %v5095_v46  ;;  %v7409_v46 = vld [vmem:[%s11585_s1 + $0x5e4] sm:$0xf]  ;;  %v5652_v47 = vld [vmem:[%s11585_s1 + $0x5f0] sm:$0xf0]  ;;  %v5511_v52 = vor.u32 %v7373_v43, %v5508_v44  ;;  %v871_v43 = vunpack.c.h.b16 %v8120_v16 }
  0x3c   :  { %1383 = vmatpush.bf16.msrb.mxu3 %v4935_v59  ;;  %v5236_v50 = vld [vmem:[%s11585_s1 + $0x2b0] sm:$0xf0]  ;;  %v5655_v55 = vor.u32 %v7409_v46, %v5652_v47  ;;  %v7369_v58 = vld [vmem:[%s11585_s1 + $0x4a4] sm:$0xf] }
  0x3d   :  { %v5364_v57 = vld [vmem:[%s11585_s1 + $0x3b0] sm:$0xf0]  ;;  %v7405_v61 = vld [vmem:[%s11585_s1 + $0x5c4] sm:$0xf] }
  0x3e   :  { %1345 = vmatpush.bf16.msrb.mxu0 %v5427_v6  ;;  %1358 = vmatpush.bf16.msrb.mxu1 %v5555_v10  ;;  %v5492_v59 = vld [vmem:[%s11585_s1 + $0x4b0] sm:$0xf0]  ;;  %v7301_v2 = vld [vmem:[%s11585_s1 + $0x284] sm:$0xf]  ;;  %v5367_v4 = vor.u32 %v7337_v54, %v5364_v57 }
  0x3f   :  { %1395 = vmatpush.bf16.msra.mxu2 %v5079_v60  ;;  %v5239_v60 = vor.u32 %v7305_v49, %v5236_v50  ;;  %v5636_v0 = vld [vmem:[%s11585_s1 + $0x5d0] sm:$0xf0]  ;;  %v5495_v5 = vor.u32 %v7369_v58, %v5492_v59  ;;  %v7333_v6 = vld [vmem:[%s11585_s1 + $0x384] sm:$0xf] }
  0x40   :  { %1384 = vmatpush.bf16.msrb.mxu3 %v4919_v14  ;;  %v5220_v3 = vld [vmem:[%s11585_s1 + $0x290] sm:$0xf0]  ;;  %v5639_v7 = vor.u32 %v7405_v61, %v5636_v0  ;;  %v7365_v9 = vld [vmem:[%s11585_s1 + $0x484] sm:$0xf] }
  0x41   :  { %v5348_v8 = vld [vmem:[%s11585_s1 + $0x390] sm:$0xf0]  ;;  %v5223_v11 = vor.u32 %v7301_v2, %v5220_v3  ;;  %v7401_v12 = vld [vmem:[%s11585_s1 + $0x5a4] sm:$0xf] }
  0x42   :  { %1346 = vmatpush.bf16.msrb.mxu0 %v5411_v23  ;;  %1359 = vmatpush.bf16.msrb.mxu1 %v5539_v29  ;;  %v5476_v10 = vld [vmem:[%s11585_s1 + $0x490] sm:$0xf0]  ;;  %v7297_v14 = vld [vmem:[%s11585_s1 + $0x264] sm:$0xf]  ;;  %v5351_v17 = vor.u32 %v7333_v6, %v5348_v8 }
  0x43   :  { %1396 = vmatpush.bf16.msra.mxu2 %v5063_v15  ;;  %v5620_v13 = vld [vmem:[%s11585_s1 + $0x5b0] sm:$0xf0]  ;;  %v5479_v18 = vor.u32 %v7365_v9, %v5476_v10  ;;  %v7329_v19 = vld [vmem:[%s11585_s1 + $0x364] sm:$0xf] }
  0x44   :  { %1385 = vmatpush.bf16.msrb.mxu3 %v4903_v31  ;;  %v5204_v15 = vld [vmem:[%s11585_s1 + $0x270] sm:$0xf0]  ;;  %v5623_v20 = vor.u32 %v7401_v12, %v5620_v13  ;;  %v7361_v22 = vld [vmem:[%s11585_s1 + $0x464] sm:$0xf] }
  0x45   :  { %1347 = vmatmul.bf16.vlgmr.msrb.gmra.mxu0 %v8401_v40  ;;  %1360 = vmatmul.bf16.vlgmr.msrb.gmra.mxu1 %v8403_v41  ;;  %v5332_v21 = vld [vmem:[%s11585_s1 + $0x370] sm:$0xf0]  ;;  %v5207_v24 = vor.u32 %v7297_v14, %v5204_v15  ;;  %v7397_v25 = vld [vmem:[%s11585_s1 + $0x584] sm:$0xf] }
  0x46   :  { %1404 = vmatpush.bf16.msra.mxu0 %v5271_v30  ;;  %1417 = vmatpush.bf16.msra.mxu1 %v5399_v35  ;;  %v5460_v23 = vld [vmem:[%s11585_s1 + $0x470] sm:$0xf0]  ;;  %v7293_v27 = vld [vmem:[%s11585_s1 + $0x244] sm:$0xf]  ;;  %v5335_v29 = vor.u32 %v7329_v19, %v5332_v21 }
  0x47   :  { %1397 = vmatpush.bf16.msra.mxu2 %v5047_v32  ;;  %1386 = vmatmul.bf16.vlgmr.msrb.gmra.mxu3 %v8204_v62  ;;  %v5604_v26 = vld [vmem:[%s11585_s1 + $0x590] sm:$0xf0]  ;;  %v5463_v30 = vor.u32 %v7361_v22, %v5460_v23  ;;  %v7325_v31 = vld [vmem:[%s11585_s1 + $0x344] sm:$0xf] }
  0x48   :  { %1430 = vmatpush.bf16.msra.mxu3 %v5527_v36  ;;  %v5188_v28 = vld [vmem:[%s11585_s1 + $0x250] sm:$0xf0]  ;;  %v5607_v32 = vor.u32 %v7397_v25, %v5604_v26  ;;  %v7357_v34 = vld [vmem:[%s11585_s1 + $0x444] sm:$0xf] }
  0x49   :  { %v5316_v33 = vld [vmem:[%s11585_s1 + $0x350] sm:$0xf0]  ;;  %v5191_v36 = vor.u32 %v7293_v27, %v5188_v28  ;;  %v7393_v37 = vld [vmem:[%s11585_s1 + $0x564] sm:$0xf] }
  0x4a   :  { %1405 = vmatpush.bf16.msra.mxu0 %v5255_v45  ;;  %1418 = vmatpush.bf16.msra.mxu1 %v5383_v51  ;;  %v5444_v35 = vld [vmem:[%s11585_s1 + $0x450] sm:$0xf0]  ;;  %v7289_v39 = vld [vmem:[%s11585_s1 + $0x224] sm:$0xf]  ;;  %v5319_v44 = vor.u32 %v7325_v31, %v5316_v33 }
  0x4b   :  { %1398 = vmatpush.bf16.msra.mxu2 %v5031_v48  ;;  %v5588_v38 = vld [vmem:[%s11585_s1 + $0x570] sm:$0xf0]  ;;  %v5447_v45 = vor.u32 %v7357_v34, %v5444_v35  ;;  %v7321_v46 = vld [vmem:[%s11585_s1 + $0x324] sm:$0xf] }
  0x4c   :  { %1431 = vmatpush.bf16.msra.mxu3 %v5511_v52  ;;  %v5172_v42 = vld [vmem:[%s11585_s1 + $0x230] sm:$0xf0]  ;;  %v5591_v48 = vor.u32 %v7393_v37, %v5588_v38  ;;  %v7353_v49 = vld [vmem:[%s11585_s1 + $0x424] sm:$0xf] }
  0x4d   :  { %v5300_v47 = vld [vmem:[%s11585_s1 + $0x330] sm:$0xf0]  ;;  %v7389_v50 = vld [vmem:[%s11585_s1 + $0x544] sm:$0xf]  ;;  %v5175_v51 = vor.u32 %v7289_v39, %v5172_v42 }
  0x4e   :  { %1406 = vmatpush.bf16.msra.mxu0 %v5239_v60  ;;  %1399 = vmatmul.bf16.vlgmr.msra.gmra.mxu2 %v8208_v1  ;;  %v5428_v16 = vld [vmem:[%s11585_s1 + $0x430] sm:$0xf0] }
  0x4f   :  { %1443 = vmatpush.bf16.msrb.mxu2 %v5655_v55  ;;  %1419 = vmatpush.bf16.msra.mxu1 %v5367_v4  ;;  %v5572_v52 = vld [vmem:[%s11585_s1 + $0x550] sm:$0xf0] }
  0x50   :  { %1432 = vmatpush.bf16.msra.mxu3 %v5495_v5 }
  0x52   :  { %1407 = vmatpush.bf16.msra.mxu0 %v5223_v11 }
  0x53   :  { %1444 = vmatpush.bf16.msrb.mxu2 %v5639_v7  ;;  %1420 = vmatpush.bf16.msra.mxu1 %v5351_v17 }
  0x54   :  { %1433 = vmatpush.bf16.msra.mxu3 %v5479_v18 }
  0x56   :  { %1408 = vmatpush.bf16.msra.mxu0 %v5207_v24 }
  0x57   :  { %1445 = vmatpush.bf16.msrb.mxu2 %v5623_v20  ;;  %1421 = vmatpush.bf16.msra.mxu1 %v5335_v29 }
  0x58   :  { %1434 = vmatpush.bf16.msra.mxu3 %v5463_v30 }
  0x5a   :  { %1409 = vmatpush.bf16.msra.mxu0 %v5191_v36 }
  0x5b   :  { %1446 = vmatpush.bf16.msrb.mxu2 %v5607_v32 }
  0x5c   :  { %19 = vsyncpa [#allocation5], 0  ;;  %v7285_v54 = vld [vmem:[%s11585_s1 + $0x204] sm:$0xf]  ;;  %v5156_v55 = vld [vmem:[%s11585_s1 + $0x210] sm:$0xf0]  ;;  %1422 = vmatpush.bf16.msra.mxu1 %v5319_v44  ;;  %1435 = vmatpush.bf16.msra.mxu3 %v5447_v45  ;;  %v5303_v57 = vor.u32 %v7321_v46, %v5300_v47  ;;  %v5431_v58 = vor.u32 %v7353_v49, %v5428_v16  ;;  %v1071_v60 = vpack.c.b16 %v871_v43, %v871_v43 }
  0x5d   :  { %v7317_v59 = vld [vmem:[%s11585_s1 + $0x304] sm:$0xf]  ;;  %v5274_v61 = vld [vmem:[%s11585_s1 + $0x2e8] sm:$0xf]  ;;  %v7316_v0 = vld [vmem:[%s11585_s1 + $0x2f4] sm:$0xf0]  ;;  %v5575_v2 = vor.u32 %v7389_v50, %v5572_v52  ;;  %v5159_v6 = vor.u32 %v7285_v54, %v5156_v55 }
  0x5e   :  { %v5284_v3 = vld [vmem:[%s11585_s1 + $0x310] sm:$0xf0]  ;;  %v7349_v4 = vld [vmem:[%s11585_s1 + $0x404] sm:$0xf]  ;;  %1410 = vmatpush.bf16.msra.mxu0 %v5175_v51  ;;  %v5018_v9 = vld [vmem:[%s11585_s1 + $0xe8] sm:$0xf]  ;;  %v5275_v11 = vor.u32 %v7316_v0, %v5274_v61 }
  0x5f   :  { %1447 = vmatpush.bf16.msrb.mxu2 %v5591_v48  ;;  %v5412_v5 = vld [vmem:[%s11585_s1 + $0x410] sm:$0xf0]  ;;  %v7385_v7 = vld [vmem:[%s11585_s1 + $0x524] sm:$0xf]  ;;  %v7252_v10 = vld [vmem:[%s11585_s1 + $0xf4] sm:$0xf0]  ;;  %v5287_v12 = vor.u32 %v7317_v59, %v5284_v3 }
  0x60   :  { %v5556_v8 = vld [vmem:[%s11585_s1 + $0x530] sm:$0xf0]  ;;  %1423 = vmatpush.bf16.msra.mxu1 %v5303_v57  ;;  %1436 = vmatpush.bf16.msra.mxu3 %v5431_v58  ;;  %v5415_v13 = vor.u32 %v7349_v4, %v5412_v5  ;;  %v1279_v14 = vsel %vm1274_vm0, %v1071_v60, 0  ;;  %v7381_v15 = vld [vmem:[%s11585_s1 + $0x504] sm:$0xf]  ;;  %v5019_v21 = vor.u32 %v7252_v10, %v5018_v9  ;;  %s7879_s19 = smov 126  }
  0x61   :  { %v5559_v17 = vor.u32 %v7385_v7, %v5556_v8  ;;  %v5540_v18 = vld [vmem:[%s11585_s1 + $0x510] sm:$0xf0]  ;;  %v5258_v19 = vld [vmem:[%s11585_s1 + $0x2c8] sm:$0xf]  ;;  %v7312_v20 = vld [vmem:[%s11585_s1 + $0x2d4] sm:$0xf0] }
  0x62   :  { %1411 = vmatpush.bf16.msra.mxu0 %v5159_v6  ;;  %v7413_v22 = vld [vmem:[%s11585_s1 + $0x604] sm:$0xf]  ;;  %v5668_v23 = vld [vmem:[%s11585_s1 + $0x610] sm:$0xf0]  ;;  %v5002_v24 = vld [vmem:[%s11585_s1 + $0xc8] sm:$0xf]  ;;  %v5259_v30 = vor.u32 %v7312_v20, %v5258_v19  ;;  %v5543_v31 = vor.u32 %v7381_v15, %v5540_v18 }
  0x63   :  { %1448 = vmatpush.bf16.msrb.mxu2 %v5575_v2  ;;  %v7248_v25 = vld [vmem:[%s11585_s1 + $0xd4] sm:$0xf0]  ;;  %v5146_v26 = vld [vmem:[%s11585_s1 + $0x1e8] sm:$0xf]  ;;  %v5671_v32 = vor.u32 %v7413_v22, %v5668_v23  ;;  %s4882_s28 = sshll.u32 %s11596_s12, 4  ;;  %s7883_s12 = smov [#allocation2]   ;;  %s4883_s28 = int_to_ptr.hbm [resolvable:$true] %s4882_s28 }
  0x64   :  { %v7284_v27 = vld [vmem:[%s11585_s1 + $0x1f4] sm:$0xf0]  ;;  %1424 = vmatpush.bf16.msra.mxu1 %v5287_v12  ;;  %1437 = vmatpush.bf16.msra.mxu3 %v5415_v13  ;;  %v5402_v28 = vld [vmem:[%s11585_s1 + $0x3e8] sm:$0xf]  ;;  %v5003_v35 = vor.u32 %v7248_v25, %v5002_v24  ;;  %s4869_s29 = sshll.u32 %s7883_s12, 4  ;;  %s4871_s14 = sshll.u32 %s11595_s11, 4  ;;  %s4870_s29 = int_to_ptr.vmem [resolvable:$true] %s4869_s29  ;;  %s4872_s14 = int_to_ptr.hbm [resolvable:$true] %s4871_s14 }
  0x65   :  { %v7348_v29 = vld [vmem:[%s11585_s1 + $0x3f4] sm:$0xf0]  ;;  %v5242_v33 = vld [vmem:[%s11585_s1 + $0x2a8] sm:$0xf]  ;;  %1412 = vmatmul.bf16.vlgmr.msra.gmra.mxu0 %v8187_v56  ;;  %v5147_v36 = vor.u32 %v7284_v27, %v5146_v26  ;;  %vm4862_vm2 = vcmask 125952  }
  0x66   :  { %1495 = vmatpush.bf16.msrb.mxu0 %v5275_v11  ;;  %v7308_v34 = vld [vmem:[%s11585_s1 + $0x2b4] sm:$0xf0]  ;;  %v4986_v37 = vld [vmem:[%s11585_s1 + $0xa8] sm:$0xf]  ;;  %v5403_v38 = vor.u32 %v7348_v29, %v5402_v28 }
  0x67   :  { %1449 = vmatpush.bf16.msrb.mxu2 %v5559_v17  ;;  %1438 = vmatmul.bf16.vlgmr.msra.gmra.mxu3 %v8401_v40  ;;  %v7244_v39 = vld [vmem:[%s11585_s1 + $0xb4] sm:$0xf0]  ;;  %v5130_v42 = vld [vmem:[%s11585_s1 + $0x1c8] sm:$0xf]  ;;  %v5243_v46 = vor.u32 %v7308_v34, %v5242_v33 }
  0x68   :  { %1462 = vmatpush.bf16.msrb.mxu3 %v1279_v14  ;;  %1469 = vmatpush.bf16.msrb.mxu1 %v5019_v21  ;;  %v7280_v43 = vld [vmem:[%s11585_s1 + $0x1d4] sm:$0xf0]  ;;  %v5386_v44 = vld [vmem:[%s11585_s1 + $0x3c8] sm:$0xf]  ;;  %v4987_v49 = vor.u32 %v7244_v39, %v4986_v37 }
  0x69   :  { %1425 = vmatmul.bf16.vlgmr.msra.gmra.mxu1 %v8206_v63  ;;  %v7344_v45 = vld [vmem:[%s11585_s1 + $0x3d4] sm:$0xf0]  ;;  %v5226_v47 = vld [vmem:[%s11585_s1 + $0x288] sm:$0xf]  ;;  %v5131_v16 = vor.u32 %v7280_v43, %v5130_v42 }
  0x6a   :  { %1496 = vmatpush.bf16.msrb.mxu0 %v5259_v30  ;;  %v7304_v48 = vld [vmem:[%s11585_s1 + $0x294] sm:$0xf0]  ;;  %v4970_v50 = vld [vmem:[%s11585_s1 + $0x88] sm:$0xf]  ;;  %v5387_v51 = vor.u32 %v7344_v45, %v5386_v44 }
  0x6b   :  { %1450 = vmatpush.bf16.msrb.mxu2 %v5543_v31  ;;  %v7240_v52 = vld [vmem:[%s11585_s1 + $0x94] sm:$0xf0]  ;;  %v5114_v54 = vld [vmem:[%s11585_s1 + $0x1a8] sm:$0xf]  ;;  %v5227_v59 = vor.u32 %v7304_v48, %v5226_v47 }
  0x6c   :  { %1463 = vmatpush.bf16.msrb.mxu3 %v5671_v32  ;;  %1470 = vmatpush.bf16.msrb.mxu1 %v5003_v35  ;;  %v7276_v55 = vld [vmem:[%s11585_s1 + $0x1b4] sm:$0xf0]  ;;  %v5370_v57 = vld [vmem:[%s11585_s1 + $0x3a8] sm:$0xf]  ;;  %v4971_v0 = vor.u32 %v7240_v52, %v4970_v50 }
  0x6d   :  { %v7340_v58 = vld [vmem:[%s11585_s1 + $0x3b4] sm:$0xf0]  ;;  %v5210_v60 = vld [vmem:[%s11585_s1 + $0x268] sm:$0xf]  ;;  %v5115_v2 = vor.u32 %v7276_v55, %v5114_v54 }
  0x6e   :  { %1451 = vmatmul.bf16.vlgmr.msrb.gmra.mxu2 %v8403_v41  ;;  %1497 = vmatpush.bf16.msrb.mxu0 %v5243_v46  ;;  %v7300_v61 = vld [vmem:[%s11585_s1 + $0x274] sm:$0xf0]  ;;  %v4954_v3 = vld [vmem:[%s11585_s1 + $0x68] sm:$0xf]  ;;  %v5371_v4 = vor.u32 %v7340_v58, %v5370_v57 }
  0x6f   :  { %1508 = vmatpush.bf16.msra.mxu2 %v5403_v38  ;;  %v7236_v5 = vld [vmem:[%s11585_s1 + $0x74] sm:$0xf0]  ;;  %v5098_v6 = vld [vmem:[%s11585_s1 + $0x188] sm:$0xf]  ;;  %v5211_v10 = vor.u32 %v7300_v61, %v5210_v60 }
  0x70   :  { %1482 = vmatpush.bf16.msra.mxu3 %v5147_v36  ;;  %1471 = vmatpush.bf16.msrb.mxu1 %v4987_v49  ;;  %v7272_v7 = vld [vmem:[%s11585_s1 + $0x194] sm:$0xf0]  ;;  %v5354_v8 = vld [vmem:[%s11585_s1 + $0x388] sm:$0xf]  ;;  %v4955_v13 = vor.u32 %v7236_v5, %v4954_v3 }
  0x71   :  { %v7336_v9 = vld [vmem:[%s11585_s1 + $0x394] sm:$0xf0]  ;;  %v5194_v11 = vld [vmem:[%s11585_s1 + $0x248] sm:$0xf]  ;;  %v5099_v14 = vor.u32 %v7272_v7, %v5098_v6  ;;  %v7282_v6 = vld [vmem:[%s11585_s1 + $0x1ec] sm:$0xf] }
  0x72   :  { %1498 = vmatpush.bf16.msrb.mxu0 %v5227_v59  ;;  %v7296_v12 = vld [vmem:[%s11585_s1 + $0x254] sm:$0xf0]  ;;  %v4938_v15 = vld [vmem:[%s11585_s1 + $0x48] sm:$0xf]  ;;  %v5355_v18 = vor.u32 %v7336_v9, %v5354_v8  ;;  %v5148_v7 = vld [vmem:[%s11585_s1 + $0x1f8] sm:$0xf0] }
  0x73   :  { %1509 = vmatpush.bf16.msra.mxu2 %v5387_v51  ;;  %v8706_v17 = vld [vmem:[%s11585_s1 + $0x628] sm:$0x11]  ;;  %v7232_v19 = vld [vmem:[%s11585_s1 + $0x54] sm:$0xf0]  ;;  %v5195_v24 = vor.u32 %v7296_v12, %v5194_v11 }
  0x74   :  { %1483 = vmatpush.bf16.msra.mxu3 %v5131_v16  ;;  %1472 = vmatpush.bf16.msrb.mxu1 %v4971_v0  ;;  %v5082_v20 = vld [vmem:[%s11585_s1 + $0x168] sm:$0xf]  ;;  %v7268_v21 = vld [vmem:[%s11585_s1 + $0x174] sm:$0xf0]  ;;  %v872_v27 = vunpack.c.l.b16 %v8706_v17  ;;  %v4939_v28 = vor.u32 %v7232_v19, %v4938_v15  ;;  %v7250_v12 = vld [vmem:[%s11585_s1 + $0xec] sm:$0xf] }
  0x75   :  { %v5338_v22 = vld [vmem:[%s11585_s1 + $0x368] sm:$0xf]  ;;  %v7332_v23 = vld [vmem:[%s11585_s1 + $0x374] sm:$0xf0]  ;;  %v5083_v29 = vor.u32 %v7268_v21, %v5082_v20  ;;  %v7278_v21 = vld [vmem:[%s11585_s1 + $0x1cc] sm:$0xf] }
  0x76   :  { %1499 = vmatpush.bf16.msrb.mxu0 %v5211_v10  ;;  %v5178_v25 = vld [vmem:[%s11585_s1 + $0x228] sm:$0xf]  ;;  %v7292_v26 = vld [vmem:[%s11585_s1 + $0x234] sm:$0xf0]  ;;  %v5339_v31 = vor.u32 %v7332_v23, %v5338_v22  ;;  %v1072_v42 = vpack.c.b16 %v872_v27, %v872_v27  ;;  %v5132_v22 = vld [vmem:[%s11585_s1 + $0x1d8] sm:$0xf0] }
  0x77   :  { %1510 = vmatpush.bf16.msra.mxu2 %v5371_v4  ;;  %v4922_v30 = vld [vmem:[%s11585_s1 + $0x28] sm:$0xf]  ;;  %5681 = vmatmul.msk.bf16.vlgmr.msrb.gmra.mxu3 %vm1270_vm1, %v8313_v53  ;;  %v7228_v32 = vld [vmem:[%s11585_s1 + $0x34] sm:$0xf0]  ;;  %v5179_v37 = vor.u32 %v7292_v26, %v5178_v25 }
  0x78   :  { %1484 = vmatpush.bf16.msra.mxu3 %v5115_v2  ;;  %1473 = vmatpush.bf16.msrb.mxu1 %v4955_v13  ;;  %v5066_v33 = vld [vmem:[%s11585_s1 + $0x148] sm:$0xf]  ;;  %v7264_v34 = vld [vmem:[%s11585_s1 + $0x154] sm:$0xf0]  ;;  %v4923_v43 = vor.u32 %v7228_v32, %v4922_v30  ;;  %v1282_v55 = vsel %vm1274_vm0, %v1072_v42, 0 }
  0x79   :  { %v5322_v35 = vld [vmem:[%s11585_s1 + $0x348] sm:$0xf]  ;;  %v7328_v36 = vld [vmem:[%s11585_s1 + $0x354] sm:$0xf0]  ;;  %v5067_v44 = vor.u32 %v7264_v34, %v5066_v33  ;;  %v5020_v13 = vld [vmem:[%s11585_s1 + $0xf8] sm:$0xf0] }
  0x7a   :  { %1500 = vmatpush.bf16.msrb.mxu0 %v5195_v24  ;;  %v5162_v38 = vld [vmem:[%s11585_s1 + $0x208] sm:$0xf]  ;;  %v7288_v39 = vld [vmem:[%s11585_s1 + $0x214] sm:$0xf0]  ;;  %v5323_v47 = vor.u32 %v7328_v36, %v5322_v35  ;;  %v5023_v24 = vor.u32 %v7250_v12, %v5020_v13  ;;  %v5004_v30 = vld [vmem:[%s11585_s1 + $0xd8] sm:$0xf0] }
  0x7b   :  { %1511 = vmatpush.bf16.msra.mxu2 %v5355_v18  ;;  %v4906_v45 = vld [vmem:[%s11585_s1 + $0x8] sm:$0xf]  ;;  %v7224_v46 = vld [vmem:[%s11585_s1 + $0x14] sm:$0xf0]  ;;  %v5163_v54 = vor.u32 %v7288_v39, %v5162_v38  ;;  %v5151_v18 = vor.u32 %v7282_v6, %v5148_v7  ;;  %v7274_v33 = vld [vmem:[%s11585_s1 + $0x1ac] sm:$0xf] }
  0x7c   :  { %1485 = vmatpush.bf16.msra.mxu3 %v5099_v14  ;;  %1474 = vmatpush.bf16.msrb.mxu1 %v4939_v28  ;;  %v5050_v48 = vld [vmem:[%s11585_s1 + $0x128] sm:$0xf]  ;;  %v7260_v49 = vld [vmem:[%s11585_s1 + $0x134] sm:$0xf0]  ;;  %v4907_v59 = vor.u32 %v7224_v46, %v4906_v45  ;;  %v5116_v34 = vld [vmem:[%s11585_s1 + $0x1b8] sm:$0xf0] }
  0x7d   :  { %v5306_v16 = vld [vmem:[%s11585_s1 + $0x328] sm:$0xf]  ;;  %v7324_v50 = vld [vmem:[%s11585_s1 + $0x334] sm:$0xf0]  ;;  %v5051_v60 = vor.u32 %v7260_v49, %v5050_v48  ;;  %v5119_v45 = vor.u32 %v7274_v33, %v5116_v34  ;;  %v5100_v48 = vld [vmem:[%s11585_s1 + $0x198] sm:$0xf0] }
  0x7e   :  { %1501 = vmatpush.bf16.msrb.mxu0 %v5179_v37  ;;  %v5530_v51 = vld [vmem:[%s11585_s1 + $0x4e8] sm:$0xf]  ;;  %v7380_v52 = vld [vmem:[%s11585_s1 + $0x4f4] sm:$0xf0]  ;;  %v5307_v3 = vor.u32 %v7324_v50, %v5306_v16  ;;  %v7234_v7 = vld [vmem:[%s11585_s1 + $0x6c] sm:$0xf] }
  0x7f   :  { %1512 = vmatpush.bf16.msra.mxu2 %v5339_v31  ;;  %v5034_v57 = vld [vmem:[%s11585_s1 + $0x108] sm:$0xf]  ;;  %v7256_v58 = vld [vmem:[%s11585_s1 + $0x114] sm:$0xf0]  ;;  %v5531_v4 = vor.u32 %v7380_v52, %v5530_v51  ;;  %v5135_v31 = vor.u32 %v7278_v21, %v5132_v22  ;;  %v5068_v12 = vld [vmem:[%s11585_s1 + $0x158] sm:$0xf0] }
  0x80   :  { %1486 = vmatpush.bf16.msra.mxu3 %v5083_v29  ;;  %1475 = vmatpush.bf16.msrb.mxu1 %v4923_v43  ;;  %v5290_v61 = vld [vmem:[%s11585_s1 + $0x308] sm:$0xf]  ;;  %v7416_v2 = vld [vmem:[%s11585_s1 + $0x614] sm:$0xf0]  ;;  %v5035_v15 = vor.u32 %v7256_v58, %v5034_v57  ;;  %v7246_v29 = vld [vmem:[%s11585_s1 + $0xcc] sm:$0xf] }
  0x81   :  { %v5674_v0 = vld [vmem:[%s11585_s1 + $0x608] sm:$0xf]  ;;  %v7320_v5 = vld [vmem:[%s11585_s1 + $0x314] sm:$0xf0]  ;;  %v5007_v36 = vor.u32 %v7246_v29, %v5004_v30  ;;  %v7242_v43 = vld [vmem:[%s11585_s1 + $0xac] sm:$0xf] }
  0x82   :  { %1502 = vmatpush.bf16.msrb.mxu0 %v5163_v54  ;;  %v5514_v8 = vld [vmem:[%s11585_s1 + $0x4c8] sm:$0xf]  ;;  %v7376_v9 = vld [vmem:[%s11585_s1 + $0x4d4] sm:$0xf0]  ;;  %v5675_v14 = vor.u32 %v7416_v2, %v5674_v0  ;;  %v5291_v19 = vor.u32 %v7320_v5, %v5290_v61  ;;  %v4972_v57 = vld [vmem:[%s11585_s1 + $0x98] sm:$0xf0] }
  0x83   :  { %1513 = vmatpush.bf16.msra.mxu2 %v5323_v47  ;;  %v5658_v10 = vld [vmem:[%s11585_s1 + $0x5e8] sm:$0xf]  ;;  %v7412_v11 = vld [vmem:[%s11585_s1 + $0x5f4] sm:$0xf0]  ;;  %v5515_v20 = vor.u32 %v7376_v9, %v5514_v8  ;;  %v7270_v47 = vld [vmem:[%s11585_s1 + $0x18c] sm:$0xf] }
  0x84   :  { %1487 = vmatpush.bf16.msra.mxu3 %v5067_v44  ;;  %1476 = vmatpush.bf16.msrb.mxu1 %v4907_v59  ;;  %v5659_v23 = vor.u32 %v7412_v11, %v5658_v10  ;;  %v5498_v25 = vld [vmem:[%s11585_s1 + $0x4a8] sm:$0xf]  ;;  %v7372_v26 = vld [vmem:[%s11585_s1 + $0x4b4] sm:$0xf0]  ;;  %v4988_v44 = vld [vmem:[%s11585_s1 + $0xb8] sm:$0xf0]  ;;  %v5103_v58 = vor.u32 %v7270_v47, %v5100_v48 }
  0x85   :  { %1503 = vmatmul.bf16.vlgmr.msrb.gmra.mxu0 %v8187_v56  ;;  %v5642_v27 = vld [vmem:[%s11585_s1 + $0x5c8] sm:$0xf]  ;;  %v7408_v28 = vld [vmem:[%s11585_s1 + $0x5d4] sm:$0xf0]  ;;  %v5499_v32 = vor.u32 %v7372_v26, %v5498_v25  ;;  %v4991_v16 = vor.u32 %v7242_v43, %v4988_v44  ;;  %v5084_v61 = vld [vmem:[%s11585_s1 + $0x178] sm:$0xf0] }
  0x86   :  { %1553 = vmatpush.bf16.msra.mxu0 %v1282_v55  ;;  %v5643_v35 = vor.u32 %v7408_v28, %v5642_v27  ;;  %v5482_v37 = vld [vmem:[%s11585_s1 + $0x488] sm:$0xf]  ;;  %v7368_v38 = vld [vmem:[%s11585_s1 + $0x494] sm:$0xf0]  ;;  %v7238_v55 = vld [vmem:[%s11585_s1 + $0x8c] sm:$0xf] }
  0x87   :  { %1514 = vmatpush.bf16.msra.mxu2 %v5307_v3  ;;  %1477 = vmatmul.bf16.vlgmr.msrb.gmra.mxu1 %v8204_v62  ;;  %v5626_v39 = vld [vmem:[%s11585_s1 + $0x5a8] sm:$0xf]  ;;  %v7404_v42 = vld [vmem:[%s11585_s1 + $0x5b4] sm:$0xf0]  ;;  %v5483_v46 = vor.u32 %v7368_v38, %v5482_v37  ;;  %v4975_v2 = vor.u32 %v7238_v55, %v4972_v57  ;;  %v4956_v8 = vld [vmem:[%s11585_s1 + $0x78] sm:$0xf0] }
  0x88   :  { %1488 = vmatpush.bf16.msra.mxu3 %v5051_v60  ;;  %1521 = vmatpush.bf16.msra.mxu1 %v5531_v4  ;;  %v5627_v49 = vor.u32 %v7404_v42, %v5626_v39  ;;  %v5466_v50 = vld [vmem:[%s11585_s1 + $0x468] sm:$0xf]  ;;  %v7364_v51 = vld [vmem:[%s11585_s1 + $0x474] sm:$0xf0]  ;;  %v7266_v60 = vld [vmem:[%s11585_s1 + $0x16c] sm:$0xf] }
  0x89   :  { %v5610_v52 = vld [vmem:[%s11585_s1 + $0x588] sm:$0xf]  ;;  %v7400_v54 = vld [vmem:[%s11585_s1 + $0x594] sm:$0xf0]  ;;  %v5467_v59 = vor.u32 %v7364_v51, %v5466_v50  ;;  %v5087_v9 = vor.u32 %v7266_v60, %v5084_v61  ;;  %v7262_v11 = vld [vmem:[%s11585_s1 + $0x14c] sm:$0xf] }
  0x8a   :  { %1554 = vmatpush.bf16.msra.mxu0 %v5675_v14  ;;  %v5611_v0 = vor.u32 %v7400_v54, %v5610_v52  ;;  %v5450_v3 = vld [vmem:[%s11585_s1 + $0x448] sm:$0xf]  ;;  %v7360_v4 = vld [vmem:[%s11585_s1 + $0x454] sm:$0xf0]  ;;  %v4959_v14 = vor.u32 %v7234_v7, %v4956_v8  ;;  %v7230_v21 = vld [vmem:[%s11585_s1 + $0x4c] sm:$0xf] }
  0x8b   :  { %1515 = vmatpush.bf16.msra.mxu2 %v5291_v19  ;;  %v5594_v5 = vld [vmem:[%s11585_s1 + $0x568] sm:$0xf]  ;;  %v7396_v6 = vld [vmem:[%s11585_s1 + $0x574] sm:$0xf0]  ;;  %v5451_v10 = vor.u32 %v7360_v4, %v5450_v3  ;;  %v4940_v22 = vld [vmem:[%s11585_s1 + $0x58] sm:$0xf0] }
  0x8c   :  { %1489 = vmatpush.bf16.msra.mxu3 %v5035_v15  ;;  %1522 = vmatpush.bf16.msra.mxu1 %v5515_v20  ;;  %v5595_v13 = vor.u32 %v7396_v6, %v5594_v5  ;;  %v5434_v15 = vld [vmem:[%s11585_s1 + $0x428] sm:$0xf]  ;;  %v7392_v20 = vld [vmem:[%s11585_s1 + $0x554] sm:$0xf0]  ;;  %v7258_v25 = vld [vmem:[%s11585_s1 + $0x12c] sm:$0xf]  ;;  %v4943_v28 = vor.u32 %v7230_v21, %v4940_v22 }
  0x8d   :  { %v5578_v19 = vld [vmem:[%s11585_s1 + $0x548] sm:$0xf]  ;;  %v5052_v26 = vld [vmem:[%s11585_s1 + $0x138] sm:$0xf0]  ;;  %v7352_v30 = vld [vmem:[%s11585_s1 + $0x414] sm:$0xf0] }
  0x8e   :  { %1573 = vmatpush.bf16.msrb.mxu0 %v5151_v18  ;;  %1516 = vmatmul.bf16.vlgmr.msra.gmra.mxu2 %v8206_v63  ;;  %v7356_v18 = vld [vmem:[%s11585_s1 + $0x434] sm:$0xf0]  ;;  %v5579_v27 = vor.u32 %v7392_v20, %v5578_v19  ;;  %v5418_v29 = vld [vmem:[%s11585_s1 + $0x408] sm:$0xf]  ;;  %v7226_v33 = vld [vmem:[%s11585_s1 + $0x2c] sm:$0xf]  ;;  %v5055_v37 = vor.u32 %v7258_v25, %v5052_v26 }
  0x8f   :  { %1560 = vmatpush.bf16.msrb.mxu2 %v5023_v24  ;;  %1490 = vmatmul.bf16.vlgmr.msra.gmra.mxu3 %v8208_v1  ;;  %v5435_v24 = vor.u32 %v7356_v18, %v5434_v15  ;;  %v4924_v34 = vld [vmem:[%s11585_s1 + $0x38] sm:$0xf0]  ;;  %v5419_v38 = vor.u32 %v7352_v30, %v5418_v29  ;;  %v5546_v39 = vld [vmem:[%s11585_s1 + $0x508] sm:$0xf]  ;;  %v7254_v42 = vld [vmem:[%s11585_s1 + $0x10c] sm:$0xf] }
  0x90   :  { %1534 = vmatpush.bf16.msrb.mxu3 %v5659_v23  ;;  %1523 = vmatpush.bf16.msra.mxu1 %v5499_v32  ;;  %v5071_v23 = vor.u32 %v7262_v11, %v5068_v12  ;;  %v7388_v32 = vld [vmem:[%s11585_s1 + $0x534] sm:$0xf0]  ;;  %v5036_v43 = vld [vmem:[%s11585_s1 + $0x118] sm:$0xf0]  ;;  %v7410_v47 = vld [vmem:[%s11585_s1 + $0x5ec] sm:$0xf] }
  0x91   :  { %v5660_v48 = vld [vmem:[%s11585_s1 + $0x5f8] sm:$0xf0]  ;;  %v7310_v51 = vld [vmem:[%s11585_s1 + $0x2cc] sm:$0xf]  ;;  %v5039_v57 = vor.u32 %v7254_v42, %v5036_v43 }
  0x92   :  { %1574 = vmatpush.bf16.msrb.mxu0 %v5135_v31  ;;  %v5562_v31 = vld [vmem:[%s11585_s1 + $0x528] sm:$0xf]  ;;  %v4908_v50 = vld [vmem:[%s11585_s1 + $0x18] sm:$0xf0]  ;;  %v7346_v54 = vld [vmem:[%s11585_s1 + $0x3ec] sm:$0xf]  ;;  %v5663_v60 = vor.u32 %v7410_v47, %v5660_v48 }
  0x93   :  { %1561 = vmatpush.bf16.msrb.mxu2 %v5007_v36  ;;  %v5276_v36 = vld [vmem:[%s11585_s1 + $0x2f8] sm:$0xf0]  ;;  %v5563_v44 = vor.u32 %v7388_v32, %v5562_v31  ;;  %v7306_v6 = vld [vmem:[%s11585_s1 + $0x2ac] sm:$0xf] }
  0x94   :  { %1535 = vmatpush.bf16.msrb.mxu3 %v5643_v35  ;;  %1524 = vmatpush.bf16.msra.mxu1 %v5483_v46  ;;  %v7314_v35 = vld [vmem:[%s11585_s1 + $0x2ec] sm:$0xf]  ;;  %v7384_v46 = vld [vmem:[%s11585_s1 + $0x514] sm:$0xf0]  ;;  %v5260_v52 = vld [vmem:[%s11585_s1 + $0x2d8] sm:$0xf0] }
  0x95   :  { %5682 = vmatmul.msk.bf16.vlgmr.msra.gmra.mxu0 %vm1270_vm1, %v8313_v53  ;;  %v5404_v55 = vld [vmem:[%s11585_s1 + $0x3f8] sm:$0xf0]  ;;  %v5547_v61 = vor.u32 %v7384_v46, %v5546_v39  ;;  %v5263_v4 = vor.u32 %v7310_v51, %v5260_v52  ;;  %v7374_v11 = vld [vmem:[%s11585_s1 + $0x4cc] sm:$0xf] }
  0x96   :  { %1575 = vmatpush.bf16.msrb.mxu0 %v5119_v45  ;;  %v4927_v45 = vor.u32 %v7226_v33, %v4924_v34  ;;  %v5644_v3 = vld [vmem:[%s11585_s1 + $0x5d8] sm:$0xf0]  ;;  %v5407_v5 = vor.u32 %v7346_v54, %v5404_v55  ;;  %v7302_v20 = vld [vmem:[%s11585_s1 + $0x28c] sm:$0xf] }
  0x97   :  { %1562 = vmatpush.bf16.msrb.mxu2 %v4991_v16  ;;  %v7222_v16 = vld [vmem:[%s11585_s1 + $0xc] sm:$0xf]  ;;  %v5244_v8 = vld [vmem:[%s11585_s1 + $0x2b8] sm:$0xf0] }
  0x98   :  { %1536 = vmatpush.bf16.msrb.mxu3 %v5627_v49  ;;  %1525 = vmatpush.bf16.msra.mxu1 %v5467_v59  ;;  %v5279_v49 = vor.u32 %v7314_v35, %v5276_v36  ;;  %v5532_v59 = vld [vmem:[%s11585_s1 + $0x4f8] sm:$0xf0]  ;;  %v5247_v18 = vor.u32 %v7306_v6, %v5244_v8  ;;  %v7370_v25 = vld [vmem:[%s11585_s1 + $0x4ac] sm:$0xf] }
  0x99   :  { %v5516_v12 = vld [vmem:[%s11585_s1 + $0x4d8] sm:$0xf0]  ;;  %v7298_v31 = vld [vmem:[%s11585_s1 + $0x26c] sm:$0xf] }
  0x9a   :  { %1576 = vmatpush.bf16.msrb.mxu0 %v5103_v58  ;;  %v7378_v58 = vld [vmem:[%s11585_s1 + $0x4ec] sm:$0xf]  ;;  %v5628_v15 = vld [vmem:[%s11585_s1 + $0x5b8] sm:$0xf0]  ;;  %v5519_v21 = vor.u32 %v7374_v11, %v5516_v12 }
  0x9b   :  { %1563 = vmatpush.bf16.msrb.mxu2 %v4975_v2  ;;  %v7406_v2 = vld [vmem:[%s11585_s1 + $0x5cc] sm:$0xf]  ;;  %v5535_v7 = vor.u32 %v7378_v58, %v5532_v59  ;;  %v5228_v22 = vld [vmem:[%s11585_s1 + $0x298] sm:$0xf0] }
  0x9c   :  { %1537 = vmatpush.bf16.msrb.mxu3 %v5611_v0  ;;  %1526 = vmatpush.bf16.msra.mxu1 %v5451_v10  ;;  %v4911_v0 = vor.u32 %v7222_v16, %v4908_v50  ;;  %v5388_v10 = vld [vmem:[%s11585_s1 + $0x3d8] sm:$0xf0]  ;;  %v5231_v29 = vor.u32 %v7302_v20, %v5228_v22  ;;  %v7334_v34 = vld [vmem:[%s11585_s1 + $0x38c] sm:$0xf] }
  0x9d   :  { %v5500_v26 = vld [vmem:[%s11585_s1 + $0x4b8] sm:$0xf0]  ;;  %v7394_v42 = vld [vmem:[%s11585_s1 + $0x56c] sm:$0xf] }
  0x9e   :  { %1577 = vmatpush.bf16.msrb.mxu0 %v5087_v9  ;;  %v7342_v9 = vld [vmem:[%s11585_s1 + $0x3cc] sm:$0xf]  ;;  %v5212_v33 = vld [vmem:[%s11585_s1 + $0x278] sm:$0xf0] }
  0x9f   :  { %1564 = vmatpush.bf16.msrb.mxu2 %v4959_v14  ;;  %v7402_v14 = vld [vmem:[%s11585_s1 + $0x5ac] sm:$0xf]  ;;  %v5391_v19 = vor.u32 %v7342_v9, %v5388_v10  ;;  %v5356_v35 = vld [vmem:[%s11585_s1 + $0x398] sm:$0xf0]  ;;  %v873_v10 = vunpack.c.h.b16 %v8706_v17 }
  0xa0   :  { %1538 = vmatpush.bf16.msrb.mxu3 %v5595_v13  ;;  %1527 = vmatpush.bf16.msra.mxu1 %v5435_v24  ;;  %v5647_v13 = vor.u32 %v7406_v2, %v5644_v3  ;;  %v5372_v24 = vld [vmem:[%s11585_s1 + $0x3b8] sm:$0xf0]  ;;  %v7294_v46 = vld [vmem:[%s11585_s1 + $0x24c] sm:$0xf] }
  0xa1   :  { %v5596_v43 = vld [vmem:[%s11585_s1 + $0x578] sm:$0xf0]  ;;  %v7330_v16 = vld [vmem:[%s11585_s1 + $0x36c] sm:$0xf] }
  0xa2   :  { %1578 = vmatpush.bf16.msrb.mxu0 %v5071_v23  ;;  %v7338_v23 = vld [vmem:[%s11585_s1 + $0x3ac] sm:$0xf]  ;;  %v5340_v50 = vld [vmem:[%s11585_s1 + $0x378] sm:$0xf0]  ;;  %v5599_v54 = vor.u32 %v7394_v42, %v5596_v43 }
  0xa3   :  { %1565 = vmatpush.bf16.msrb.mxu2 %v4943_v28  ;;  %v7398_v28 = vld [vmem:[%s11585_s1 + $0x58c] sm:$0xf]  ;;  %v5375_v30 = vor.u32 %v7338_v23, %v5372_v24  ;;  %v5468_v52 = vld [vmem:[%s11585_s1 + $0x478] sm:$0xf0] }
  0xa4   :  { %1539 = vmatpush.bf16.msrb.mxu3 %v5579_v27  ;;  %1528 = vmatpush.bf16.msra.mxu1 %v5419_v38  ;;  %v5631_v27 = vor.u32 %v7402_v14, %v5628_v15  ;;  %v5484_v38 = vld [vmem:[%s11585_s1 + $0x498] sm:$0xf0]  ;;  %v7362_v51 = vld [vmem:[%s11585_s1 + $0x46c] sm:$0xf] }
  0xa5   :  { %v5580_v58 = vld [vmem:[%s11585_s1 + $0x558] sm:$0xf0]  ;;  %v5471_v2 = vor.u32 %v7362_v51, %v5468_v52  ;;  %v7386_v11 = vld [vmem:[%s11585_s1 + $0x52c] sm:$0xf]  ;;  %v5782_v51 = vld [vmem:[%s11587_s3 + $0xc0] sm:$0xf] }
  0xa6   :  { %1579 = vmatpush.bf16.msrb.mxu0 %v5055_v37  ;;  %v9082_v32 = vpop.f32.mrf.mxu0  ;;  %v9093_v36 = vpop.f32.mrf.mxu1  ;;  %v7366_v37 = vld [vmem:[%s11585_s1 + $0x48c] sm:$0xf]  ;;  %v5180_v3 = vld [vmem:[%s11585_s1 + $0x238] sm:$0xf0]  ;;  %v7443_v52 = vld [vmem:[%s11587_s3 + $0xcc] sm:$0xf0] }
  0xa7   :  { %1566 = vmatpush.bf16.msrb.mxu2 %v4927_v45  ;;  %1529 = vmatmul.bf16.vlgmr.msra.gmra.mxu1 %v8401_v40  ;;  %v5359_v45 = vor.u32 %v7334_v34, %v5356_v35  ;;  %v5487_v48 = vor.u32 %v7366_v37, %v5484_v38  ;;  %v5452_v8 = vld [vmem:[%s11585_s1 + $0x458] sm:$0xf0]  ;;  %v7286_v15 = vld [vmem:[%s11585_s1 + $0x20c] sm:$0xf]  ;;  %v5798_v37 = vld [vmem:[%s11587_s3 + $0xe0] sm:$0xf] }
  0xa8   :  { %1540 = vmatpush.bf16.msrb.mxu3 %v5563_v44  ;;  %1586 = vmatpush.bf16.msrb.mxu1 %v5279_v49  ;;  %v5215_v44 = vor.u32 %v7298_v31, %v5212_v33  ;;  %v5196_v49 = vld [vmem:[%s11585_s1 + $0x258] sm:$0xf0]  ;;  %v7322_v20 = vld [vmem:[%s11585_s1 + $0x32c] sm:$0xf]  ;;  %v7447_v38 = vld [vmem:[%s11587_s3 + $0xec] sm:$0xf0] }
  0xa9   :  { %v9110_v47 = vpop.f32.mrf.mxu2  ;;  %v5199_v59 = vor.u32 %v7294_v46, %v5196_v49  ;;  %v5564_v12 = vld [vmem:[%s11585_s1 + $0x538] sm:$0xf0]  ;;  %v7354_v22 = vld [vmem:[%s11585_s1 + $0x42c] sm:$0xf]  ;;  %v7479_v49 = vld [vmem:[%s11587_s3 + $0x1ec] sm:$0xf0] }
  0xaa   :  { %1580 = vmatpush.bf16.msrb.mxu0 %v5039_v57  ;;  %v9127_v55 = vpop.f32.mrf.mxu3  ;;  %v7390_v57 = vld [vmem:[%s11585_s1 + $0x54c] sm:$0xf]  ;;  %v5164_v17 = vld [vmem:[%s11585_s1 + $0x218] sm:$0xf0]  ;;  %v5567_v24 = vor.u32 %v7386_v11, %v5564_v12  ;;  %v5878_v11 = vld [vmem:[%s11587_s3 + $0x180] sm:$0xf] }
  0xab   :  { %1567 = vmatpush.bf16.msrb.mxu2 %v4911_v0  ;;  %v5583_v9 = vor.u32 %v7390_v57, %v5580_v58  ;;  %v5436_v23 = vld [vmem:[%s11585_s1 + $0x438] sm:$0xf0]  ;;  %v7318_v31 = vld [vmem:[%s11585_s1 + $0x30c] sm:$0xf]  ;;  %v7467_v12 = vld [vmem:[%s11587_s3 + $0x18c] sm:$0xf0] }
  0xac   :  { %1541 = vmatpush.bf16.msrb.mxu3 %v5547_v61  ;;  %1587 = vmatpush.bf16.msrb.mxu1 %v5263_v4  ;;  %v7290_v61 = vld [vmem:[%s11585_s1 + $0x22c] sm:$0xf]  ;;  %v5292_v33 = vld [vmem:[%s11585_s1 + $0x318] sm:$0xf0] }
  0xad   :  { %1581 = vmatmul.bf16.vlgmr.msrb.gmra.mxu0 %v8208_v1  ;;  %v5612_v1 = vld [vmem:[%s11585_s1 + $0x598] sm:$0xf0]  ;;  %v7326_v4 = vld [vmem:[%s11585_s1 + $0x34c] sm:$0xf]  ;;  %v5295_v46 = vor.u32 %v7318_v31, %v5292_v33  ;;  %v5702_v31 = vld [vmem:[%s11587_s3 + $0x20] sm:$0xf] }
  0xae   :  { %1625 = vmatpush.bf16.msra.mxu0 %v5663_v60  ;;  %1568 = vmatmul.bf16.vlgmr.msrb.gmra.mxu2 %v8204_v62  ;;  %v5503_v62 = vor.u32 %v7370_v25, %v5500_v26  ;;  %v5615_v39 = vor.u32 %v7398_v28, %v5612_v1  ;;  %v5343_v60 = vor.u32 %v7330_v16, %v5340_v50  ;;  %v1298_v0 = vpop.f32.mrf.mxu0  ;;  %v1311_v6 = vpop.f32.mrf.mxu1  ;;  %v5548_v28 = vld [vmem:[%s11585_s1 + $0x518] sm:$0xf0]  ;;  %v9187_v1 = vld [vmem:[%s11586_s2] sm:$0xf]  ;;  %v7350_v34 = vld [vmem:[%s11585_s1 + $0x40c] sm:$0xf] }
  0xaf   :  { %1612 = vmatpush.bf16.msra.mxu2 %v5535_v7  ;;  %1542 = vmatmul.bf16.vlgmr.msrb.gmra.mxu3 %v8403_v41  ;;  %v7358_v7 = vld [vmem:[%s11585_s1 + $0x44c] sm:$0xf]  ;;  %v1073_v25 = vpack.c.b16 %v873_v10, %v873_v10  ;;  %v5420_v35 = vld [vmem:[%s11585_s1 + $0x418] sm:$0xf0]  ;;  %v5799_v50 = vor.u32 %v7447_v38, %v5798_v37  ;;  %v5783_v0 = vor.u32 %v7443_v52, %v5782_v51  ;;  %v5830_v37 = vld [vmem:[%s11587_s3 + $0x120] sm:$0xf] }
  0xb0   :  { %1599 = vmatpush.bf16.msra.mxu3 %v5407_v5  ;;  %1588 = vmatpush.bf16.msrb.mxu1 %v5247_v18  ;;  %v5324_v5 = vld [vmem:[%s11585_s1 + $0x358] sm:$0xf0]  ;;  %v7414_v43 = vld [vmem:[%s11585_s1 + $0x60c] sm:$0xf]  ;;  %v5423_v16 = vor.u32 %v7350_v34, %v5420_v35  ;;  %v5686_v35 = vld [vmem:[%s11587_s3] sm:$0xf] }
  0xb1   :  { %v5327_v14 = vor.u32 %v7326_v4, %v5324_v5  ;;  %v1324_v18 = vpop.f32.mrf.mxu2  ;;  %v1285_v42 = vsel %vm1274_vm0, %v1073_v25, 0  ;;  %v7471_v4 = vld [vmem:[%s11587_s3 + $0x1ac] sm:$0xf0] }
  0xb2   :  { %1626 = vmatpush.bf16.msra.mxu0 %v5647_v13  ;;  %v5183_v13 = vor.u32 %v7290_v61, %v5180_v3  ;;  %v1337_v26 = vpop.f32.mrf.mxu3  ;;  %v7475_v61 = vld [vmem:[%s11587_s3 + $0x1cc] sm:$0xf0] }
  0xb3   :  { %1613 = vmatpush.bf16.msra.mxu2 %v5519_v21  ;;  %v5308_v21 = vld [vmem:[%s11585_s1 + $0x338] sm:$0xf0]  ;;  %v7455_v38 = vld [vmem:[%s11587_s3 + $0x12c] sm:$0xf0] }
  0xb4   :  { %1600 = vmatpush.bf16.msra.mxu3 %v5391_v19  ;;  %1589 = vmatpush.bf16.msrb.mxu1 %v5231_v29  ;;  %v5455_v19 = vor.u32 %v7358_v7, %v5452_v8  ;;  %v5167_v29 = vor.u32 %v7286_v15, %v5164_v17  ;;  %v5879_v15 = vor.u32 %v7467_v12, %v5878_v11  ;;  %v5862_v17 = vld [vmem:[%s11587_s3 + $0x160] sm:$0xf]  ;;  %v7451_v52 = vld [vmem:[%s11587_s3 + $0x10c] sm:$0xf0] }
  0xb6   :  { %1627 = vmatpush.bf16.msra.mxu0 %v5631_v27  ;;  %v7382_v27 = vld [vmem:[%s11585_s1 + $0x50c] sm:$0xf] }
  0xb7   :  { %1614 = vmatpush.bf16.msra.mxu2 %v5503_v62  ;;  %v5439_v62 = vor.u32 %v7354_v22, %v5436_v23 }
  0xb8   :  { %1601 = vmatpush.bf16.msra.mxu3 %v5375_v30  ;;  %1590 = vmatpush.bf16.msrb.mxu1 %v5215_v44  ;;  %v5311_v30 = vor.u32 %v7322_v20, %v5308_v21  ;;  %v5676_v44 = vld [vmem:[%s11585_s1 + $0x618] sm:$0xf0]  ;;  %v7463_v20 = vld [vmem:[%s11587_s3 + $0x16c] sm:$0xf0] }
  0xb9   :  { %v5863_v25 = vor.u32 %v7463_v20, %v5862_v17  ;;  %v5752_v17 = vld [vmem:[%s11587_s3 + $0x90] sm:$0xf0] }
  0xba   :  { %1628 = vmatpush.bf16.msra.mxu0 %v5615_v39  ;;  %v5551_v39 = vor.u32 %v7382_v27, %v5548_v28  ;;  %v5846_v28 = vld [vmem:[%s11587_s3 + $0x140] sm:$0xf] }
  0xbb   :  { %1615 = vmatpush.bf16.msra.mxu2 %v5487_v48  ;;  %v5926_v48 = vld [vmem:[%s11587_s3 + $0x1e0] sm:$0xf]  ;;  %v9227_v57 = vpop.f32.mrf.mxu2 }
  0xbc   :  { %1602 = vmatpush.bf16.msra.mxu3 %v5359_v45  ;;  %1591 = vmatpush.bf16.msrb.mxu1 %v5199_v59  ;;  %v248_v45 = vperm.slane %v9187_v1, 0  ;;  %v5927_v58 = vor.u32 %v7479_v49, %v5926_v48  ;;  %v5831_v49 = vor.u32 %v7455_v38, %v5830_v37  ;;  %v5974_v38 = vld [vmem:[%s11587_s3 + $0x240] sm:$0xf] }
  0xbe   :  { %1629 = vmatpush.bf16.msra.mxu0 %v5599_v54  ;;  %v5679_v54 = vor.u32 %v7414_v43, %v5676_v44  ;;  %v1297_v59 = vadd.f32 %v9082_v32, %v248_v45  ;;  %v7439_v32 = vld [vmem:[%s11587_s3 + $0xac] sm:$0xf0]  ;;  %v6054_v43 = vld [vmem:[%s11587_s3 + $0x2e0] sm:$0xf]  ;;  %v7445_v45 = vld [vmem:[%s11587_s3 + $0xe4] sm:$0xf] }
  0xbf   :  { %1616 = vmatpush.bf16.msra.mxu2 %v5471_v2  ;;  %v7511_v44 = vld [vmem:[%s11587_s3 + $0x2ec] sm:$0xf0] }
  0xc0   :  { %1603 = vmatpush.bf16.msra.mxu3 %v5343_v60  ;;  %1592 = vmatpush.bf16.msrb.mxu1 %v5183_v13  ;;  %v5910_v60 = vld [vmem:[%s11587_s3 + $0x1c0] sm:$0xf]  ;;  %v1310_v3 = vadd.f32 %v9093_v36, %v1297_v59  ;;  %v6055_v48 = vor.u32 %v7511_v44, %v6054_v43 }
  0xc1   :  { %v5911_v2 = vor.u32 %v7475_v61, %v5910_v60  ;;  %v5734_v13 = vld [vmem:[%s11587_s3 + $0x60] sm:$0xf]  ;;  %v7507_v61 = vld [vmem:[%s11587_s3 + $0x2cc] sm:$0xf0] }
  0xc2   :  { %1630 = vmatpush.bf16.msra.mxu0 %v5583_v9  ;;  %v1348_v5 = vpop.f32.mrf.mxu0  ;;  %v1361_v6 = vpop.f32.mrf.mxu1  ;;  %v1323_v9 = vadd.f32 %v9110_v47, %v1310_v3  ;;  %v6038_v60 = vld [vmem:[%s11587_s3 + $0x2c0] sm:$0xf] }
  0xc3   :  { %1617 = vmatpush.bf16.msra.mxu2 %v5455_v19  ;;  %v1376_v36 = vpop.f32.mrf.mxu2 }
  0xc4   :  { %1604 = vmatpush.bf16.msra.mxu3 %v5327_v14  ;;  %1593 = vmatpush.bf16.msrb.mxu1 %v5167_v29  ;;  %v7431_v14 = vld [vmem:[%s11587_s3 + $0x6c] sm:$0xf0]  ;;  %v1336_v47 = vadd.f32 %v9127_v55, %v1323_v9  ;;  %v5718_v55 = vld [vmem:[%s11587_s3 + $0x40] sm:$0xf]  ;;  %v5768_v36 = vld [vmem:[%s11587_s3 + $0xb0] sm:$0xf0] }
  0xc5   :  { %v5735_v19 = vor.u32 %v7431_v14, %v5734_v13  ;;  %v7459_v29 = vld [vmem:[%s11587_s3 + $0x14c] sm:$0xf0]  ;;  %v5896_v13 = vld [vmem:[%s11587_s3 + $0x1b0] sm:$0xf0]  ;;  %v6006_v14 = vld [vmem:[%s11587_s3 + $0x280] sm:$0xf] }
  0xc6   :  { %1631 = vmatpush.bf16.msra.mxu0 %v5567_v24  ;;  %v1349_v23 = vadd.f32 %v1348_v5, %v1336_v47  ;;  %v7427_v24 = vld [vmem:[%s11587_s3 + $0x4c] sm:$0xf0] }
  0xc7   :  { %1618 = vmatpush.bf16.msra.mxu2 %v5439_v62  ;;  %1594 = vmatmul.bf16.vlgmr.msrb.gmra.mxu1 %v8187_v56  ;;  %v5766_v56 = vld [vmem:[%s11587_s3 + $0xa0] sm:$0xf]  ;;  %v5719_v27 = vor.u32 %v7427_v24, %v5718_v55  ;;  %v5847_v62 = vor.u32 %v7459_v29, %v5846_v28  ;;  %v7499_v47 = vld [vmem:[%s11587_s3 + $0x28c] sm:$0xf0]  ;;  %v5880_v24 = vld [vmem:[%s11587_s3 + $0x190] sm:$0xf0] }
  0xc8   :  { %1605 = vmatpush.bf16.msra.mxu3 %v5311_v30  ;;  %1644 = vmatpush.bf16.msra.mxu1 %v1285_v42  ;;  %v5767_v7 = vor.u32 %v7439_v32, %v5766_v56  ;;  %v1362_v30 = vadd.f32 %v1361_v6, %v1349_v23  ;;  %v7419_v42 = vld [vmem:[%s11587_s3 + $0xc] sm:$0xf0]  ;;  %v5784_v56 = vld [vmem:[%s11587_s3 + $0xd0] sm:$0xf0]  ;;  %v6039_v32 = vor.u32 %v7507_v61, %v6038_v60  ;;  %v7465_v23 = vld [vmem:[%s11587_s3 + $0x184] sm:$0xf] }
  0xc9   :  { %v5687_v51 = vor.u32 %v7419_v42, %v5686_v35  ;;  %v5912_v6 = vld [vmem:[%s11587_s3 + $0x1d0] sm:$0xf0]  ;;  %v6007_v20 = vor.u32 %v7499_v47, %v6006_v14  ;;  %v7429_v28 = vld [vmem:[%s11587_s3 + $0x64] sm:$0xf] }
  0xca   :  { %1632 = vmatpush.bf16.msra.mxu0 %v5551_v39  ;;  %v9273_v18 = vpop.f32.mrf.mxu3  ;;  %v1350_v21 = vpop.f32.mrf.mxu0  ;;  %v1375_v39 = vadd.f32 %v9227_v57, %v1362_v30  ;;  %v5928_v57 = vld [vmem:[%s11587_s3 + $0x1f0] sm:$0xf0]  ;;  %v7425_v42 = vld [vmem:[%s11587_s3 + $0x44] sm:$0xf] }
  0xcb   :  { %1619 = vmatpush.bf16.msra.mxu2 %v5423_v16  ;;  %v1363_v22 = vpop.f32.mrf.mxu1  ;;  %v5814_v16 = vld [vmem:[%s11587_s3 + $0x100] sm:$0xf]  ;;  %v249_v21 = vperm.slane %v9187_v1, 1  ;;  %v5736_v29 = vld [vmem:[%s11587_s3 + $0x70] sm:$0xf0] }
  0xcc   :  { %1606 = vmatpush.bf16.msra.mxu3 %v5295_v46  ;;  %1645 = vmatpush.bf16.msra.mxu1 %v5679_v54  ;;  %v5800_v46 = vld [vmem:[%s11587_s3 + $0xf0] sm:$0xf0]  ;;  %v7477_v54 = vld [vmem:[%s11587_s3 + $0x1e4] sm:$0xf] }
  0xcd   :  { %1633 = vmatmul.bf16.vlgmr.msra.gmra.mxu0 %v8403_v41  ;;  %v5894_v41 = vld [vmem:[%s11587_s3 + $0x1a0] sm:$0xf]  ;;  %v5803_v59 = vor.u32 %v7445_v45, %v5800_v46  ;;  %v5931_v3 = vor.u32 %v7477_v54, %v5928_v57  ;;  %v5864_v35 = vld [vmem:[%s11587_s3 + $0x170] sm:$0xf0]  ;;  %v7457_v46 = vld [vmem:[%s11587_s3 + $0x144] sm:$0xf] }
  0xce   :  { %1620 = vmatmul.bf16.vlgmr.msra.gmra.mxu2 %v8401_v40  ;;  %v7435_v40 = vld [vmem:[%s11587_s3 + $0x8c] sm:$0xf0]  ;;  %v5895_v8 = vor.u32 %v7471_v4, %v5894_v41  ;;  %v7473_v41 = vld [vmem:[%s11587_s3 + $0x1c4] sm:$0xf] }
  0xcf   :  { %1607 = vmatmul.bf16.vlgmr.msra.gmra.mxu3 %v8206_v63  ;;  %v5750_v63 = vld [vmem:[%s11587_s3 + $0x80] sm:$0xf]  ;;  %2463 = vmatpush.bf16.msrb.mxu2 %v6055_v48  ;;  %v5915_v9 = vor.u32 %v7473_v41, %v5912_v6  ;;  %v7421_v54 = vld [vmem:[%s11587_s3 + $0x24] sm:$0xf]  ;;  %v5688_v41 = vld [vmem:[%s11587_s3 + $0x10] sm:$0xf0] }
  0xd0   :  { %2437 = vmatpush.bf16.msrb.mxu3 %v5799_v50  ;;  %2450 = vmatpush.bf16.msrb.mxu1 %v5927_v58  ;;  %v5751_v10 = vor.u32 %v7435_v40, %v5750_v63  ;;  %v1651_v58 = vmax.f32 %v1375_v39, 0.0  ;;  %v7503_v63 = vld [vmem:[%s11587_s3 + $0x2ac] sm:$0xf0]  ;;  %v7437_v40 = vld [vmem:[%s11587_s3 + $0xa4] sm:$0xf] }
  0xd1   :  { %v9289_v26 = vpop.f32.mrf.mxu2  ;;  %v5771_v12 = vor.u32 %v7437_v40, %v5768_v36  ;;  %v7491_v39 = vld [vmem:[%s11587_s3 + $0x24c] sm:$0xf0]  ;;  %v7417_v61 = vld [vmem:[%s11587_s3 + $0x4] sm:$0xf]  ;;  %v5806_v40 = vld [vmem:[%s11587_s3 + $0xe8] sm:$0xf] }
  0xd2   :  { %v1389_v33 = vpop.f32.mrf.mxu3  ;;  %v9355_v4 = vpack.c.bf16 %v1651_v58, %v1651_v58  ;;  %v5975_v44 = vor.u32 %v7491_v39, %v5974_v38  ;;  %v7509_v6 = vld [vmem:[%s11587_s3 + $0x2e4] sm:$0xf]  ;;  %v7448_v36 = vld [vmem:[%s11587_s3 + $0xf4] sm:$0xf0]  ;;  %v6024_v39 = vld [vmem:[%s11587_s3 + $0x2b0] sm:$0xf0] }
  0xd3   :  { %2464 = vmatpush.bf16.msrb.mxu2 %v6039_v32  ;;  %v1388_v33 = vadd.f32 %v9273_v18, %v249_v21  ;;  %v5720_v18 = vld [vmem:[%s11587_s3 + $0x50] sm:$0xf0]  ;;  %v5807_v47 = vor.u32 %v7448_v36, %v5806_v40  ;;  %v5790_v21 = vld [vmem:[%s11587_s3 + $0xc8] sm:$0xf] }
  0xd4   :  { %2438 = vmatpush.bf16.msrb.mxu3 %v5783_v0  ;;  %2451 = vmatpush.bf16.msrb.mxu1 %v5911_v2  ;;  %v7441_v0 = vld [vmem:[%s11587_s3 + $0xc4] sm:$0xf]  ;;  %v5815_v2 = vor.u32 %v7451_v52, %v5814_v16  ;;  %v5723_v16 = vor.u32 %v7425_v42, %v5720_v18  ;;  %v7487_v52 = vld [vmem:[%s11587_s3 + $0x22c] sm:$0xf0]  ;;  %v5832_v32 = vld [vmem:[%s11587_s3 + $0x130] sm:$0xf0] }
  0xd5   :  { %v5787_v5 = vor.u32 %v7441_v0, %v5784_v56  ;;  %v1401_v48 = vadd.f32 %v9289_v26, %v1388_v33  ;;  %v5704_v26 = vld [vmem:[%s11587_s3 + $0x30] sm:$0xf0]  ;;  %v7453_v0 = vld [vmem:[%s11587_s3 + $0x124] sm:$0xf]  ;;  %v7539_v33 = vld [vmem:[%s11587_s3 + $0x3cc] sm:$0xf0] }
  0xd6   :  { %v5707_v56 = vor.u32 %v7421_v54, %v5704_v26  ;;  %v6008_v26 = vld [vmem:[%s11587_s3 + $0x290] sm:$0xf0]  ;;  %v5886_v36 = vld [vmem:[%s11587_s3 + $0x188] sm:$0xf] }
  0xd7   :  { %5683 = vmatmul.msk.bf16.vlgmr.msra.gmra.mxu1 %vm1270_vm1, %v8313_v53  ;;  %v7423_v53 = vld [vmem:[%s11587_s3 + $0x2c] sm:$0xf0] }
  0xd8   :  { %2439 = vmatpush.bf16.msrb.mxu3 %v5767_v7  ;;  %2452 = vmatpush.bf16.msrb.mxu1 %v5895_v8  ;;  %v5703_v34 = vor.u32 %v7423_v53, %v5702_v31  ;;  %v6022_v7 = vld [vmem:[%s11587_s3 + $0x2a0] sm:$0xf]  ;;  %v5883_v53 = vor.u32 %v7465_v23, %v5880_v24 }
  0xd9   :  { %v1402_v50 = vpop.f32.mrf.mxu2  ;;  %v6023_v8 = vor.u32 %v7503_v63, %v6022_v7  ;;  %v6056_v7 = vld [vmem:[%s11587_s3 + $0x2f0] sm:$0xf0] }
  0xda   :  { %v5848_v50 = vld [vmem:[%s11587_s3 + $0x150] sm:$0xf0] }
  0xdb   :  { %2465 = vmatpush.bf16.msrb.mxu2 %v6023_v8  ;;  %v5851_v60 = vor.u32 %v7457_v46, %v5848_v50  ;;  %v6059_v8 = vor.u32 %v7509_v6, %v6056_v7  ;;  %v5992_v7 = vld [vmem:[%s11587_s3 + $0x270] sm:$0xf0] }
  0xdc   :  { %2440 = vmatpush.bf16.msrb.mxu3 %v5751_v10  ;;  %2453 = vmatpush.bf16.msrb.mxu1 %v5879_v15  ;;  %v7469_v10 = vld [vmem:[%s11587_s3 + $0x1a4] sm:$0xf] }
  0xdd   :  { %v5899_v22 = vor.u32 %v7469_v10, %v5896_v13  ;;  %v5816_v13 = vld [vmem:[%s11587_s3 + $0x110] sm:$0xf0] }
  0xdf   :  { %2466 = vmatpush.bf16.msrb.mxu2 %v6007_v20 }
  0xe0   :  { %2441 = vmatpush.bf16.msrb.mxu3 %v5735_v19  ;;  %2454 = vmatpush.bf16.msrb.mxu1 %v5863_v25  ;;  %v7433_v19 = vld [vmem:[%s11587_s3 + $0x84] sm:$0xf]  ;;  %v5990_v25 = vld [vmem:[%s11587_s3 + $0x260] sm:$0xf] }
  0xe1   :  { %v5755_v55 = vor.u32 %v7433_v19, %v5752_v17  ;;  %v7543_v19 = vld [vmem:[%s11587_s3 + $0x3ec] sm:$0xf0]  ;;  %v7505_v17 = vld [vmem:[%s11587_s3 + $0x2c4] sm:$0xf] }
  0xe2   :  { %v1413_v11 = vpop.f32.mrf.mxu0 }
  0xe3   :  { %v1414_v58 = vadd.f32 %v1413_v11, %v1401_v48  ;;  %v5691_v11 = vor.u32 %v7417_v61, %v5688_v41  ;;  %v6150_v48 = vld [vmem:[%s11587_s3 + $0x3a0] sm:$0xf]  ;;  %v5902_v61 = vld [vmem:[%s11587_s3 + $0x1a8] sm:$0xf] }
  0xe4   :  { %2442 = vmatpush.bf16.msrb.mxu3 %v5719_v27  ;;  %2455 = vmatpush.bf16.msrb.mxu1 %v5847_v62  ;;  %v7495_v27 = vld [vmem:[%s11587_s3 + $0x26c] sm:$0xf0]  ;;  %v7461_v62 = vld [vmem:[%s11587_s3 + $0x164] sm:$0xf]  ;;  %v5742_v41 = vld [vmem:[%s11587_s3 + $0x68] sm:$0xf] }
  0xe5   :  { %v5991_v30 = vor.u32 %v7495_v27, %v5990_v25  ;;  %v5867_v45 = vor.u32 %v7461_v62, %v5864_v35  ;;  %v6166_v62 = vld [vmem:[%s11587_s3 + $0x3c0] sm:$0xf] }
  0xe6   :  { %v9385_v15 = vpop.f32.mrf.mxu1  ;;  %v6167_v38 = vor.u32 %v7539_v33, %v6166_v62  ;;  %v5960_v62 = vld [vmem:[%s11587_s3 + $0x230] sm:$0xf0] }
  0xe7   :  { %2467 = vmatpush.bf16.msrb.mxu2 %v5991_v30  ;;  %v1427_v63 = vadd.f32 %v9385_v15, %v1414_v58  ;;  %v6182_v15 = vld [vmem:[%s11587_s3 + $0x3e0] sm:$0xf]  ;;  %v7480_v30 = vld [vmem:[%s11587_s3 + $0x1f4] sm:$0xf0] }
  0xe8   :  { %2443 = vmatpush.bf16.msrb.mxu3 %v5703_v34  ;;  %2456 = vmatpush.bf16.msrb.mxu1 %v5831_v49  ;;  %v5739_v34 = vor.u32 %v7429_v28, %v5736_v29  ;;  %v6183_v23 = vor.u32 %v7543_v19, %v6182_v15  ;;  %v5934_v29 = vld [vmem:[%s11587_s3 + $0x1e8] sm:$0xf]  ;;  %v5976_v19 = vld [vmem:[%s11587_s3 + $0x250] sm:$0xf0] }
  0xe9   :  { %v5935_v42 = vor.u32 %v7480_v30, %v5934_v29  ;;  %v5710_v30 = vld [vmem:[%s11587_s3 + $0x28] sm:$0xf] }
  0xea   :  { %v1439_v31 = vpop.f32.mrf.mxu3  ;;  %v1415_v37 = vpop.f32.mrf.mxu0  ;;  %2476 = vmatpush.bf16.msrb.mxu0 %v6183_v23  ;;  %v7464_v23 = vld [vmem:[%s11587_s3 + $0x174] sm:$0xf0] }
  0xeb   :  { %2468 = vmatpush.bf16.msrb.mxu2 %v5975_v44  ;;  %v1440_v10 = vadd.f32 %v1439_v31, %v1427_v63  ;;  %v5774_v31 = vld [vmem:[%s11587_s3 + $0xa8] sm:$0xf]  ;;  %v7440_v37 = vld [vmem:[%s11587_s3 + $0xb4] sm:$0xf0] }
  0xec   :  { %2444 = vmatpush.bf16.msrb.mxu3 %v5687_v51  ;;  %2457 = vmatpush.bf16.msrb.mxu1 %v5815_v2  ;;  %v5958_v51 = vld [vmem:[%s11587_s3 + $0x220] sm:$0xf]  ;;  %v5918_v44 = vld [vmem:[%s11587_s3 + $0x1c8] sm:$0xf]  ;;  %v5775_v46 = vor.u32 %v7440_v37, %v5774_v31  ;;  %v7424_v31 = vld [vmem:[%s11587_s3 + $0x34] sm:$0xf0] }
  0xed   :  { %v5959_v57 = vor.u32 %v7487_v52, %v5958_v51  ;;  %v5942_v2 = vld [vmem:[%s11587_s3 + $0x200] sm:$0xf]  ;;  %v5758_v51 = vld [vmem:[%s11587_s3 + $0x88] sm:$0xf]  ;;  %v7436_v52 = vld [vmem:[%s11587_s3 + $0x94] sm:$0xf0] }
  0xee   :  { %v1428_v43 = vpop.f32.mrf.mxu1  ;;  %2477 = vmatpush.bf16.msrb.mxu0 %v6167_v38  ;;  %v7460_v37 = vld [vmem:[%s11587_s3 + $0x154] sm:$0xf0]  ;;  %v5711_v38 = vor.u32 %v7424_v31, %v5710_v30 }
  0xef   :  { %2445 = vmatmul.bf16.vlgmr.msrb.gmra.mxu3 %v9355_v4  ;;  %2469 = vmatpush.bf16.msrb.mxu2 %v5959_v57 }
  0xf0   :  { %2489 = vmatpush.bf16.msra.mxu3 %v5803_v59  ;;  %2502 = vmatpush.bf16.msra.mxu1 %v5931_v3  ;;  %v7483_v3 = vld [vmem:[%s11587_s3 + $0x20c] sm:$0xf0] }
  0xf1   :  { %v1452_v49 = vpop.f32.mrf.mxu2 }
  0xf2   :  { %v1441_v59 = vpop.f32.mrf.mxu3  ;;  %v1453_v20 = vadd.f32 %v1452_v49, %v1440_v10  ;;  %v7535_v49 = vld [vmem:[%s11587_s3 + $0x3ac] sm:$0xf0]  ;;  %v6118_v10 = vld [vmem:[%s11587_s3 + $0x360] sm:$0xf] }
  0xf3   :  { %v6151_v54 = vor.u32 %v7535_v49, %v6150_v48  ;;  %v5944_v48 = vld [vmem:[%s11587_s3 + $0x210] sm:$0xf0] }
  0xf4   :  { %2490 = vmatpush.bf16.msra.mxu3 %v5787_v5  ;;  %2503 = vmatpush.bf16.msra.mxu1 %v5915_v9  ;;  %v5943_v5 = vor.u32 %v7483_v3, %v5942_v2  ;;  %v5835_v9 = vor.u32 %v7453_v0, %v5832_v32  ;;  %v7472_v0 = vld [vmem:[%s11587_s3 + $0x1b4] sm:$0xf0]  ;;  %v6134_v32 = vld [vmem:[%s11587_s3 + $0x380] sm:$0xf]  ;;  %v7531_v2 = vld [vmem:[%s11587_s3 + $0x38c] sm:$0xf0] }
  0xf5   :  { %2478 = vmatpush.bf16.msrb.mxu0 %v6151_v54  ;;  %v7493_v3 = vld [vmem:[%s11587_s3 + $0x264] sm:$0xf]  ;;  %v6135_v6 = vor.u32 %v7531_v2, %v6134_v32  ;;  %v5903_v63 = vor.u32 %v7472_v0, %v5902_v61  ;;  %v6070_v61 = vld [vmem:[%s11587_s3 + $0x300] sm:$0xf]  ;;  %v7515_v0 = vld [vmem:[%s11587_s3 + $0x30c] sm:$0xf0] }
  0xf6   :  { %2470 = vmatpush.bf16.msrb.mxu2 %v5943_v5  ;;  %v7432_v5 = vld [vmem:[%s11587_s3 + $0x74] sm:$0xf0]  ;;  %v5995_v40 = vor.u32 %v7493_v3, %v5992_v7  ;;  %v6071_v2 = vor.u32 %v7515_v0, %v6070_v61  ;;  %v7541_v3 = vld [vmem:[%s11587_s3 + $0x3e4] sm:$0xf]  ;;  %v7442_v7 = vld [vmem:[%s11587_s3 + $0xcc] sm:$0xf] }
  0xf7   :  { %v7462_v61 = vld [vmem:[%s11587_s3 + $0x16c] sm:$0xf]  ;;  %v5872_v0 = vld [vmem:[%s11587_s3 + $0x178] sm:$0xf0] }
  0xf8   :  { %2491 = vmatpush.bf16.msra.mxu3 %v5771_v12  ;;  %2504 = vmatpush.bf16.msra.mxu1 %v5899_v22  ;;  %v7449_v12 = vld [vmem:[%s11587_s3 + $0x104] sm:$0xf]  ;;  %v7444_v22 = vld [vmem:[%s11587_s3 + $0xd4] sm:$0xf0] }
  0xf9   :  { %v1454_v14 = vpop.f32.mrf.mxu2  ;;  %v5819_v25 = vor.u32 %v7449_v12, %v5816_v13  ;;  %2479 = vmatpush.bf16.msrb.mxu0 %v6135_v6  ;;  %v7489_v12 = vld [vmem:[%s11587_s3 + $0x244] sm:$0xf] }
  0xfa   :  { %2515 = vmatpush.bf16.msra.mxu2 %v6059_v8  ;;  %v1465_v24 = vpop.f32.mrf.mxu3  ;;  %v7468_v8 = vld [vmem:[%s11587_s3 + $0x194] sm:$0xf0]  ;;  %v5726_v14 = vld [vmem:[%s11587_s3 + $0x48] sm:$0xf] }
  0xfb   :  { %v1466_v28 = vadd.f32 %v1465_v24, %v1453_v20 }
  0xfc   :  { %2492 = vmatpush.bf16.msra.mxu3 %v5755_v55  ;;  %2505 = vmatpush.bf16.msra.mxu1 %v5883_v53  ;;  %v6040_v55 = vld [vmem:[%s11587_s3 + $0x2d0] sm:$0xf0]  ;;  %v5791_v53 = vor.u32 %v7444_v22, %v5790_v21  ;;  %v5979_v21 = vor.u32 %v7489_v12, %v5976_v19  ;;  %v5870_v22 = vld [vmem:[%s11587_s3 + $0x168] sm:$0xf]  ;;  %v5776_v19 = vld [vmem:[%s11587_s3 + $0xb8] sm:$0xf0] }
  0xfd   :  { %v6043_v27 = vor.u32 %v7505_v17, %v6040_v55  ;;  %v1652_v35 = vmax.f32 %v1466_v28, 0.0  ;;  %v5887_v17 = vor.u32 %v7468_v8, %v5886_v36  ;;  %v7485_v28 = vld [vmem:[%s11587_s3 + $0x224] sm:$0xf]  ;;  %v5871_v33 = vor.u32 %v7464_v23, %v5870_v22  ;;  %v5822_v36 = vld [vmem:[%s11587_s3 + $0x108] sm:$0xf] }
  0xfe   :  { %v7452_v8 = vld [vmem:[%s11587_s3 + $0x114] sm:$0xf0]  ;;  %v6168_v12 = vld [vmem:[%s11587_s3 + $0x3d0] sm:$0xf0]  ;;  %v7474_v22 = vld [vmem:[%s11587_s3 + $0x1cc] sm:$0xf] }
  0xff   :  { %2516 = vmatpush.bf16.msra.mxu2 %v6043_v27  ;;  %v9530_v43 = vpack.c.bf16 %v1652_v35, %v1652_v35  ;;  %v7523_v27 = vld [vmem:[%s11587_s3 + $0x34c] sm:$0xf0]  ;;  %v5854_v35 = vld [vmem:[%s11587_s3 + $0x148] sm:$0xf]  ;;  %v5920_v23 = vld [vmem:[%s11587_s3 + $0x1d8] sm:$0xf0] }
 0x100   :  { %2493 = vmatpush.bf16.msra.mxu3 %v5739_v34  ;;  %2506 = vmatpush.bf16.msra.mxu1 %v5867_v45  ;;  %v7501_v34 = vld [vmem:[%s11587_s3 + $0x2a4] sm:$0xf]  ;;  %v7476_v45 = vld [vmem:[%s11587_s3 + $0x1d4] sm:$0xf0]  ;;  %v5855_v49 = vor.u32 %v7460_v37, %v5854_v35  ;;  %v6136_v37 = vld [vmem:[%s11587_s3 + $0x390] sm:$0xf0] }
 0x101   :  { %v6027_v18 = vor.u32 %v7501_v34, %v6024_v39  ;;  %2458 = vmatmul.bf16.vlgmr.msrb.gmra.mxu1 %v9530_v43  ;;  %v5919_v58 = vor.u32 %v7476_v45, %v5918_v44  ;;  %v5963_v34 = vor.u32 %v7485_v28, %v5960_v62  ;;  %v6086_v39 = vld [vmem:[%s11587_s3 + $0x320] sm:$0xf]  ;;  %v5694_v44 = vld [vmem:[%s11587_s3 + $0x8] sm:$0xf]  ;;  %v7420_v45 = vld [vmem:[%s11587_s3 + $0x14] sm:$0xf0]  ;;  %v5923_v62 = vor.u32 %v7474_v22, %v5920_v23 }
 0x102   :  { %v9548_v50 = vpop.f32.mrf.mxu0  ;;  %v1467_v57 = vpop.f32.mrf.mxu3  ;;  %v5760_v28 = vld [vmem:[%s11587_s3 + $0x98] sm:$0xf0]  ;;  %v6046_v22 = vld [vmem:[%s11587_s3 + $0x2c8] sm:$0xf]  ;;  %v7454_v23 = vld [vmem:[%s11587_s3 + $0x12c] sm:$0xf] }
 0x103   :  { %2517 = vmatpush.bf16.msra.mxu2 %v6027_v18  ;;  %v7481_v18 = vld [vmem:[%s11587_s3 + $0x204] sm:$0xf]  ;;  %v7456_v57 = vld [vmem:[%s11587_s3 + $0x134] sm:$0xf0] }
 0x104   :  { %2494 = vmatpush.bf16.msra.mxu3 %v5723_v16  ;;  %2507 = vmatpush.bf16.msra.mxu1 %v5851_v60  ;;  %v7497_v16 = vld [vmem:[%s11587_s3 + $0x284] sm:$0xf]  ;;  %v9559_v59 = vpop.f32.mrf.mxu1  ;;  %v5947_v54 = vor.u32 %v7481_v18, %v5944_v48  ;;  %v5888_v48 = vld [vmem:[%s11587_s3 + $0x198] sm:$0xf0] }
 0x105   :  { %v6011_v60 = vor.u32 %v7497_v16, %v6008_v26  ;;  %v7446_v16 = vld [vmem:[%s11587_s3 + $0xec] sm:$0xf]  ;;  %v5838_v26 = vld [vmem:[%s11587_s3 + $0x128] sm:$0xf] }
 0x106   :  { %v5839_v6 = vor.u32 %v7456_v57, %v5838_v26 }
 0x107   :  { %2518 = vmatpush.bf16.msra.mxu2 %v6011_v60 }
 0x108   :  { %2495 = vmatpush.bf16.msra.mxu3 %v5707_v56  ;;  %2508 = vmatpush.bf16.msra.mxu1 %v5835_v9  ;;  %v5759_v56 = vor.u32 %v7436_v52, %v5758_v51  ;;  %v5743_v9 = vor.u32 %v7432_v5, %v5742_v41  ;;  %v5808_v51 = vld [vmem:[%s11587_s3 + $0xf8] sm:$0xf0]  ;;  %v6184_v41 = vld [vmem:[%s11587_s3 + $0x3f0] sm:$0xf0]  ;;  %v250_v5 = vperm.slane %v9187_v1, 2 }
 0x10a   :  { %v1506_v13 = vpop.f32.mrf.mxu0 }
 0x10b   :  { %2519 = vmatpush.bf16.msra.mxu2 %v5995_v40  ;;  %v6187_v40 = vor.u32 %v7541_v3, %v6184_v41  ;;  %v7422_v41 = vld [vmem:[%s11587_s3 + $0x2c] sm:$0xf] }
 0x10c   :  { %2496 = vmatpush.bf16.msra.mxu3 %v5691_v11  ;;  %2509 = vmatpush.bf16.msra.mxu1 %v5819_v25  ;;  %v7527_v11 = vld [vmem:[%s11587_s3 + $0x36c] sm:$0xf0]  ;;  %v1480_v20 = vpop.f32.mrf.mxu1  ;;  %v6102_v25 = vld [vmem:[%s11587_s3 + $0x340] sm:$0xf] }
 0x10d   :  { %v6119_v15 = vor.u32 %v7527_v11, %v6118_v10  ;;  %v5936_v10 = vld [vmem:[%s11587_s3 + $0x1f8] sm:$0xf0]  ;;  %v7537_v11 = vld [vmem:[%s11587_s3 + $0x3c4] sm:$0xf]  ;;  %v1479_v20 = vadd.f32 %v9559_v59, %v250_v5  ;;  %v6152_v59 = vld [vmem:[%s11587_s3 + $0x3b0] sm:$0xf0] }
 0x10e   :  { %v5712_v5 = vld [vmem:[%s11587_s3 + $0x38] sm:$0xf0] }
 0x10f   :  { %2497 = vmatmul.bf16.vlgmr.msra.gmra.mxu3 %v9355_v4  ;;  %2480 = vmatpush.bf16.msrb.mxu0 %v6119_v15  ;;  %v7438_v15 = vld [vmem:[%s11587_s3 + $0xac] sm:$0xf] }
 0x110   :  { %2541 = vmatpush.bf16.msrb.mxu3 %v5807_v47  ;;  %2554 = vmatpush.bf16.msrb.mxu1 %v5935_v42  ;;  %v7428_v47 = vld [vmem:[%s11587_s3 + $0x54] sm:$0xf0]  ;;  %v7519_v42 = vld [vmem:[%s11587_s3 + $0x32c] sm:$0xf0] }
 0x111   :  { %v5727_v24 = vor.u32 %v7428_v47, %v5726_v14  ;;  %2520 = vmatpush.bf16.msra.mxu2 %v5979_v21  ;;  %v9626_v29 = vpop.f32.mrf.mxu2  ;;  %2510 = vmatmul.bf16.vlgmr.msra.gmra.mxu1 %v9530_v43  ;;  %v6171_v14 = vor.u32 %v7537_v11, %v6168_v12  ;;  %v5823_v47 = vor.u32 %v7452_v8, %v5822_v36  ;;  %v6062_v8 = vld [vmem:[%s11587_s3 + $0x2e8] sm:$0xf] }
 0x112   :  { %v9615_v55 = vpop.f32.mrf.mxu3  ;;  %v9668_v52 = vpop.f32.mrf.mxu0  ;;  %v5715_v12 = vor.u32 %v7422_v41, %v5712_v5  ;;  %v7484_v41 = vld [vmem:[%s11587_s3 + $0x214] sm:$0xf0] }
 0x113   :  { %v1492_v31 = vadd.f32 %v9615_v55, %v1479_v20  ;;  %v7529_v55 = vld [vmem:[%s11587_s3 + $0x384] sm:$0xf] }
 0x114   :  { %2542 = vmatpush.bf16.msrb.mxu3 %v5791_v53  ;;  %2555 = vmatpush.bf16.msrb.mxu1 %v5919_v58  ;;  %v6103_v53 = vor.u32 %v7523_v27, %v6102_v25  ;;  %v5695_v58 = vor.u32 %v7420_v45, %v5694_v44  ;;  %v7533_v25 = vld [vmem:[%s11587_s3 + $0x3a4] sm:$0xf]  ;;  %v7434_v27 = vld [vmem:[%s11587_s3 + $0x8c] sm:$0xf] }
 0x115   :  { %2521 = vmatpush.bf16.msra.mxu2 %v5963_v34  ;;  %v6155_v30 = vor.u32 %v7533_v25, %v6152_v59  ;;  %v5904_v34 = vld [vmem:[%s11587_s3 + $0x1b8] sm:$0xf0]  ;;  %v5763_v35 = vor.u32 %v7434_v27, %v5760_v28  ;;  %v1505_v18 = vadd.f32 %v9548_v50, %v1492_v31  ;;  %v6120_v50 = vld [vmem:[%s11587_s3 + $0x370] sm:$0xf0]  ;;  %v7508_v27 = vld [vmem:[%s11587_s3 + $0x2d4] sm:$0xf0] }
 0x116   :  { %2481 = vmatpush.bf16.msrb.mxu0 %v6103_v53  ;;  %v7513_v28 = vld [vmem:[%s11587_s3 + $0x304] sm:$0xf] }
 0x117   :  { %v1518_v57 = vadd.f32 %v9626_v29, %v1505_v18  ;;  %v6104_v29 = vld [vmem:[%s11587_s3 + $0x350] sm:$0xf0]  ;;  %v6014_v18 = vld [vmem:[%s11587_s3 + $0x288] sm:$0xf] }
 0x118   :  { %2543 = vmatpush.bf16.msrb.mxu3 %v5775_v46  ;;  %2556 = vmatpush.bf16.msrb.mxu1 %v5903_v63  ;;  %v6087_v46 = vor.u32 %v7519_v42, %v6086_v39  ;;  %v5792_v63 = vld [vmem:[%s11587_s3 + $0xd8] sm:$0xf0]  ;;  %v6139_v42 = vor.u32 %v7529_v55, %v6136_v37  ;;  %v6030_v37 = vld [vmem:[%s11587_s3 + $0x2a8] sm:$0xf] }
 0x119   :  { %2522 = vmatpush.bf16.msra.mxu2 %v5947_v54  ;;  %v1519_v32 = vpop.f32.mrf.mxu2  ;;  %v5795_v13 = vor.u32 %v7442_v7, %v5792_v63  ;;  %v5744_v39 = vld [vmem:[%s11587_s3 + $0x78] sm:$0xf0]  ;;  %v5875_v63 = vor.u32 %v7462_v61, %v5872_v0  ;;  %v7488_v61 = vld [vmem:[%s11587_s3 + $0x234] sm:$0xf0] }
 0x11a   :  { %2482 = vmatpush.bf16.msrb.mxu0 %v6087_v46  ;;  %v1493_v60 = vpop.f32.mrf.mxu3  ;;  %v7466_v46 = vld [vmem:[%s11587_s3 + $0x18c] sm:$0xf]  ;;  %v5728_v54 = vld [vmem:[%s11587_s3 + $0x58] sm:$0xf0] }
 0x11b   :  { %v5824_v55 = vld [vmem:[%s11587_s3 + $0x118] sm:$0xf0] }
 0x11c   :  { %2544 = vmatpush.bf16.msrb.mxu3 %v5759_v56  ;;  %2557 = vmatpush.bf16.msrb.mxu1 %v5887_v17  ;;  %v5811_v56 = vor.u32 %v7446_v16, %v5808_v51  ;;  %v1558_v17 = vpop.f32.mrf.mxu0  ;;  %v7525_v16 = vld [vmem:[%s11587_s3 + $0x364] sm:$0xf]  ;;  %v7426_v51 = vld [vmem:[%s11587_s3 + $0x4c] sm:$0xf] }
 0x11d   :  { %v6123_v26 = vor.u32 %v7525_v16, %v6120_v50  ;;  %v5731_v32 = vor.u32 %v7426_v51, %v5728_v54  ;;  %v5998_v16 = vld [vmem:[%s11587_s3 + $0x268] sm:$0xf] }
 0x11e   :  { %2483 = vmatpush.bf16.msrb.mxu0 %v6071_v2  ;;  %v7521_v2 = vld [vmem:[%s11587_s3 + $0x344] sm:$0xf] }
 0x120   :  { %2545 = vmatpush.bf16.msrb.mxu3 %v5743_v9  ;;  %2558 = vmatpush.bf16.msrb.mxu1 %v5871_v33  ;;  %v7478_v9 = vld [vmem:[%s11587_s3 + $0x1ec] sm:$0xf] }
 0x121   :  { %v5939_v21 = vor.u32 %v7478_v9, %v5936_v10  ;;  %v7470_v33 = vld [vmem:[%s11587_s3 + $0x1ac] sm:$0xf]  ;;  %v5856_v10 = vld [vmem:[%s11587_s3 + $0x158] sm:$0xf0] }
 0x122   :  { %2528 = vmatpush.bf16.msra.mxu0 %v6187_v40  ;;  %v5907_v44 = vor.u32 %v7470_v33, %v5904_v34  ;;  %v7458_v9 = vld [vmem:[%s11587_s3 + $0x14c] sm:$0xf]  ;;  %v6047_v34 = vor.u32 %v7508_v27, %v6046_v22 }
 0x123   :  { %v5859_v20 = vor.u32 %v7458_v9, %v5856_v10  ;;  %v6190_v9 = vld [vmem:[%s11587_s3 + $0x3e8] sm:$0xf]  ;;  %v7502_v22 = vld [vmem:[%s11587_s3 + $0x2ac] sm:$0xf] }
 0x124   :  { %2546 = vmatpush.bf16.msrb.mxu3 %v5727_v24  ;;  %2559 = vmatpush.bf16.msrb.mxu1 %v5855_v49  ;;  %v5779_v24 = vor.u32 %v7438_v15, %v5776_v19  ;;  %v1530_v53 = vpop.f32.mrf.mxu1  ;;  %v7418_v15 = vld [vmem:[%s11587_s3 + $0xc] sm:$0xf] }
 0x126   :  { %2529 = vmatpush.bf16.msra.mxu0 %v6171_v14  ;;  %v7517_v14 = vld [vmem:[%s11587_s3 + $0x324] sm:$0xf] }
 0x128   :  { %2547 = vmatpush.bf16.msrb.mxu3 %v5711_v38  ;;  %2560 = vmatpush.bf16.msrb.mxu1 %v5839_v6  ;;  %v7430_v38 = vld [vmem:[%s11587_s3 + $0x6c] sm:$0xf]  ;;  %v6107_v6 = vor.u32 %v7521_v2, %v6104_v29 }
 0x129   :  { %v5747_v49 = vor.u32 %v7430_v38, %v5744_v39  ;;  %v7504_v38 = vld [vmem:[%s11587_s3 + $0x2b4] sm:$0xf0] }
 0x12a   :  { %2530 = vmatpush.bf16.msra.mxu0 %v6155_v30  ;;  %v9760_v45 = vpop.f32.mrf.mxu0  ;;  %v6072_v30 = vld [vmem:[%s11587_s3 + $0x310] sm:$0xf0] }
 0x12c   :  { %2548 = vmatpush.bf16.msrb.mxu3 %v5695_v58  ;;  %2561 = vmatpush.bf16.msrb.mxu1 %v5823_v47  ;;  %v5891_v58 = vor.u32 %v7466_v46, %v5888_v48  ;;  %v1532_v60 = vpop.f32.mrf.mxu1  ;;  %v6088_v47 = vld [vmem:[%s11587_s3 + $0x330] sm:$0xf0]  ;;  %v251_v46 = vperm.slane %v9187_v1, 3  ;;  %v5982_v1 = vld [vmem:[%s11587_s3 + $0x248] sm:$0xf] }
 0x12d   :  { %v6091_v19 = vor.u32 %v7517_v14, %v6088_v47 }
 0x12e   :  { %2531 = vmatpush.bf16.msra.mxu0 %v6139_v42  ;;  %v6031_v42 = vor.u32 %v7504_v38, %v6030_v37  ;;  %v6000_v37 = vld [vmem:[%s11587_s3 + $0x278] sm:$0xf0] }
 0x12f   :  { %2549 = vmatmul.bf16.vlgmr.msrb.gmra.mxu3 %v9355_v4  ;;  %2562 = vmatmul.bf16.vlgmr.msrb.gmra.mxu1 %v9530_v43 }
 0x130   :  { %2593 = vmatpush.bf16.msra.mxu3 %v5811_v56  ;;  %2606 = vmatpush.bf16.msra.mxu1 %v5939_v21  ;;  %v1531_v56 = vadd.f32 %v1530_v53, %v1518_v57  ;;  %v6075_v53 = vor.u32 %v7513_v28, %v6072_v30  ;;  %v6158_v28 = vld [vmem:[%s11587_s3 + $0x3a8] sm:$0xf]  ;;  %v7536_v30 = vld [vmem:[%s11587_s3 + $0x3b4] sm:$0xf0] }
 0x131   :  { %v1569_v40 = vpop.f32.mrf.mxu2 }
 0x132   :  { %2532 = vmatpush.bf16.msra.mxu0 %v6123_v26  ;;  %v1543_v3 = vpop.f32.mrf.mxu3  ;;  %v1584_v36 = vpop.f32.mrf.mxu0  ;;  %v1570_v50 = vadd.f32 %v1569_v40, %v251_v46  ;;  %v7492_v26 = vld [vmem:[%s11587_s3 + $0x254] sm:$0xf0]  ;;  %v5984_v46 = vld [vmem:[%s11587_s3 + $0x258] sm:$0xf0] }
 0x133   :  { %v1544_v7 = vadd.f32 %v1543_v3, %v1531_v56  ;;  %v5950_v3 = vld [vmem:[%s11587_s3 + $0x208] sm:$0xf] }
 0x134   :  { %2594 = vmatpush.bf16.msra.mxu3 %v5795_v13  ;;  %2607 = vmatpush.bf16.msra.mxu1 %v5923_v62  ;;  %v7512_v13 = vld [vmem:[%s11587_s3 + $0x2f4] sm:$0xf0]  ;;  %v1583_v57 = vadd.f32 %v9760_v45, %v1570_v50  ;;  %v5951_v40 = vor.u32 %v7484_v41, %v5950_v3  ;;  %v7486_v50 = vld [vmem:[%s11587_s3 + $0x22c] sm:$0xf] }
 0x135   :  { %v1557_v11 = vadd.f32 %v9668_v52, %v1544_v7  ;;  %v5696_v52 = vld [vmem:[%s11587_s3 + $0x18] sm:$0xf0]  ;;  %v6063_v21 = vor.u32 %v7512_v13, %v6062_v8 }
 0x136   :  { %2533 = vmatpush.bf16.msra.mxu0 %v6107_v6  ;;  %v5699_v59 = vor.u32 %v7418_v15, %v5696_v52  ;;  %v7510_v6 = vld [vmem:[%s11587_s3 + $0x2ec] sm:$0xf]  ;;  %v6064_v7 = vld [vmem:[%s11587_s3 + $0x2f8] sm:$0xf0] }
 0x137   :  { %v1653_v17 = vmax.f32 %v1557_v11, 0.0  ;;  %v6067_v8 = vor.u32 %v7510_v6, %v6064_v7  ;;  %v7544_v11 = vld [vmem:[%s11587_s3 + $0x3f4] sm:$0xf0]  ;;  %v6048_v13 = vld [vmem:[%s11587_s3 + $0x2d8] sm:$0xf0] }
 0x138   :  { %2595 = vmatpush.bf16.msra.mxu3 %v5779_v24  ;;  %2608 = vmatpush.bf16.msra.mxu1 %v5907_v44  ;;  %v5840_v24 = vld [vmem:[%s11587_s3 + $0x138] sm:$0xf0]  ;;  %v7500_v44 = vld [vmem:[%s11587_s3 + $0x294] sm:$0xf0]  ;;  %v6191_v52 = vor.u32 %v7544_v11, %v6190_v9 }
 0x139   :  { %v9833_v25 = vpack.c.bf16 %v1653_v17, %v1653_v17  ;;  %v5843_v62 = vor.u32 %v7454_v23, %v5840_v24  ;;  %v1571_v33 = vpop.f32.mrf.mxu2  ;;  %v6015_v48 = vor.u32 %v7500_v44, %v6014_v18  ;;  %v6174_v17 = vld [vmem:[%s11587_s3 + $0x3c8] sm:$0xf]  ;;  %v6032_v23 = vld [vmem:[%s11587_s3 + $0x2b8] sm:$0xf0]  ;;  %v7528_v18 = vld [vmem:[%s11587_s3 + $0x374] sm:$0xf0] }
 0x13a   :  { %2534 = vmatpush.bf16.msra.mxu0 %v6091_v19  ;;  %v1545_v31 = vpop.f32.mrf.mxu3  ;;  %v6035_v27 = vor.u32 %v7502_v22, %v6032_v23  ;;  %v7490_v44 = vld [vmem:[%s11587_s3 + $0x24c] sm:$0xf]  ;;  %v6176_v6 = vld [vmem:[%s11587_s3 + $0x3d8] sm:$0xf0] }
 0x13b   :  { %2471 = vmatmul.bf16.vlgmr.msrb.gmra.mxu2 %v9833_v25  ;;  %v7498_v31 = vld [vmem:[%s11587_s3 + $0x28c] sm:$0xf]  ;;  %v6144_v9 = vld [vmem:[%s11587_s3 + $0x398] sm:$0xf0] }
 0x13c   :  { %2596 = vmatpush.bf16.msra.mxu3 %v5763_v35  ;;  %2609 = vmatpush.bf16.msra.mxu1 %v5891_v58  ;;  %v7450_v35 = vld [vmem:[%s11587_s3 + $0x10c] sm:$0xf]  ;;  %v5983_v58 = vor.u32 %v7492_v26, %v5982_v1 }
 0x13d   :  { %2567 = vmatpush.bf16.msrb.mxu2 %v6063_v21  ;;  %v5827_v39 = vor.u32 %v7450_v35, %v5824_v55  ;;  %v7540_v21 = vld [vmem:[%s11587_s3 + $0x3d4] sm:$0xf0]  ;;  %v7494_v55 = vld [vmem:[%s11587_s3 + $0x26c] sm:$0xf] }
 0x13e   :  { %2535 = vmatpush.bf16.msra.mxu0 %v6075_v53  ;;  %v6016_v53 = vld [vmem:[%s11587_s3 + $0x298] sm:$0xf0]  ;;  %v7532_v35 = vld [vmem:[%s11587_s3 + $0x394] sm:$0xf0]  ;;  %v7518_v23 = vld [vmem:[%s11587_s3 + $0x32c] sm:$0xf] }
 0x13f   :  { %v6019_v33 = vor.u32 %v7498_v31, %v6016_v53 }
 0x140   :  { %2597 = vmatpush.bf16.msra.mxu3 %v5747_v49  ;;  %2610 = vmatpush.bf16.msra.mxu1 %v5875_v63 }
 0x141   :  { %2568 = vmatpush.bf16.msrb.mxu2 %v6047_v34  ;;  %v6142_v34 = vld [vmem:[%s11587_s3 + $0x388] sm:$0xf] }
 0x142   :  { %v6143_v38 = vor.u32 %v7532_v35, %v6142_v34 }
 0x144   :  { %2598 = vmatpush.bf16.msra.mxu3 %v5731_v32  ;;  %2611 = vmatpush.bf16.msra.mxu1 %v5859_v20  ;;  %v1595_v49 = vpop.f32.mrf.mxu1 }
 0x145   :  { %2569 = vmatpush.bf16.msrb.mxu2 %v6031_v42  ;;  %v1596_v0 = vadd.f32 %v1595_v49, %v1583_v57  ;;  %v6126_v42 = vld [vmem:[%s11587_s3 + $0x368] sm:$0xf]  ;;  %v5987_v49 = vor.u32 %v7490_v44, %v5984_v46 }
 0x146   :  { %v6094_v57 = vld [vmem:[%s11587_s3 + $0x328] sm:$0xf] }
 0x147   :  { %v7550_v44 = vld [vmem:[%s11589_s5 + $0x28] sm:$0xff] }
 0x148   :  { %2599 = vmatpush.bf16.msra.mxu3 %v5715_v12  ;;  %2612 = vmatpush.bf16.msra.mxu1 %v5843_v62  ;;  %v7506_v12 = vld [vmem:[%s11587_s3 + $0x2cc] sm:$0xf]  ;;  %v6159_v62 = vor.u32 %v7536_v30, %v6158_v28  ;;  %v6080_v30 = vld [vmem:[%s11587_s3 + $0x318] sm:$0xf0] }
 0x149   :  { %2570 = vmatpush.bf16.msrb.mxu2 %v6015_v48  ;;  %v6051_v19 = vor.u32 %v7506_v12, %v6048_v13  ;;  %v6127_v48 = vor.u32 %v7528_v18, %v6126_v42  ;;  %v7526_v12 = vld [vmem:[%s11587_s3 + $0x36c] sm:$0xf]  ;;  %v6128_v13 = vld [vmem:[%s11587_s3 + $0x378] sm:$0xf0] }
 0x14a   :  { %v1634_v51 = vpop.f32.mrf.mxu0  ;;  %v7514_v28 = vld [vmem:[%s11587_s3 + $0x30c] sm:$0xf] }
 0x14b   :  { %2523 = vmatmul.bf16.vlgmr.msra.gmra.mxu2 %v9833_v25 }
 0x14c   :  { %2600 = vmatpush.bf16.msra.mxu3 %v5699_v59  ;;  %2613 = vmatpush.bf16.msra.mxu1 %v5827_v39  ;;  %v1597_v60 = vpop.f32.mrf.mxu1  ;;  %v6175_v59 = vor.u32 %v7540_v21, %v6174_v17  ;;  %v6003_v39 = vor.u32 %v7494_v55, %v6000_v37  ;;  %v6112_v17 = vld [vmem:[%s11587_s3 + $0x358] sm:$0xf0] }
 0x14d   :  { %v7482_v60 = vld [vmem:[%s11587_s3 + $0x20c] sm:$0xf]  ;;  %v7552_v37 = vld [vmem:[%s11589_s5 + $0x38] sm:$0xff] }
 0x14f   :  { %2601 = vmatmul.bf16.vlgmr.msra.gmra.mxu3 %v9355_v4  ;;  %v7496_v4 = vld [vmem:[%s11587_s3 + $0x274] sm:$0xf0]  ;;  %2614 = vmatmul.bf16.vlgmr.msra.gmra.mxu1 %v9530_v43  ;;  %v5966_v43 = vld [vmem:[%s11587_s3 + $0x228] sm:$0xf] }
 0x150   :  { %v5999_v54 = vor.u32 %v7496_v4, %v5998_v16  ;;  %v5967_v45 = vor.u32 %v7488_v61, %v5966_v43  ;;  %v6110_v16 = vld [vmem:[%s11587_s3 + $0x348] sm:$0xf]  ;;  %v7524_v4 = vld [vmem:[%s11587_s3 + $0x354] sm:$0xf0]  ;;  %v5952_v43 = vld [vmem:[%s11587_s3 + $0x218] sm:$0xf0]  ;;  %2913 = vmatpush.bf16.msrb.mxu3 %v7552_v37 }
 0x151   :  { %v1621_v2 = vpop.f32.mrf.mxu2  ;;  %v6111_v1 = vor.u32 %v7524_v4, %v6110_v16  ;;  %v7548_v4 = vld [vmem:[%s11589_s5 + $0x18] sm:$0xff]  ;;  %v7569_v37 = vld [vmem:[%s11589_s5 + $0xc0] sm:$0xff] }
 0x152   :  { %2571 = vmatpush.bf16.msrb.mxu2 %v5999_v54  ;;  %v1608_v56 = vpop.f32.mrf.mxu3  ;;  %v1636_v29 = vpop.f32.mrf.mxu0 }
 0x153   :  { %v1609_v32 = vadd.f32 %v1608_v56, %v1596_v0  ;;  %v5955_v0 = vor.u32 %v7482_v60, %v5952_v43  ;;  %v6078_v56 = vld [vmem:[%s11587_s3 + $0x308] sm:$0xf]  ;;  %v6192_v29 = vld [vmem:[%s11587_s3 + $0x3f8] sm:$0xf0] }
 0x154   :  { %v1647_v36 = vpop.f32.mrf.mxu1 }
 0x155   :  { %v1622_v5 = vadd.f32 %v1621_v2, %v1609_v32  ;;  %v7516_v32 = vld [vmem:[%s11587_s3 + $0x314] sm:$0xf0]  ;;  %v7542_v2 = vld [vmem:[%s11587_s3 + $0x3ec] sm:$0xf] }
 0x156   :  { %2572 = vmatpush.bf16.msrb.mxu2 %v5983_v58  ;;  %v7520_v58 = vld [vmem:[%s11587_s3 + $0x334] sm:$0xf0]  ;;  %v6079_v3 = vor.u32 %v7516_v32, %v6078_v56  ;;  %v6195_v41 = vor.u32 %v7542_v2, %v6192_v29  ;;  %v7555_v56 = vld [vmem:[%s11589_s5 + $0x50] sm:$0xff] }
 0x157   :  { %v1635_v63 = vadd.f32 %v1634_v51, %v1622_v5  ;;  %v5968_v51 = vld [vmem:[%s11587_s3 + $0x238] sm:$0xf0]  ;;  %v6095_v61 = vor.u32 %v7520_v58, %v6094_v57  ;;  %v7538_v5 = vld [vmem:[%s11587_s3 + $0x3cc] sm:$0xf]  ;;  %v7545_v57 = vld [vmem:[%s11589_s5] sm:$0xff] }
 0x158   :  { %v5971_v26 = vor.u32 %v7486_v50, %v5968_v51  ;;  %v6179_v7 = vor.u32 %v7538_v5, %v6176_v6  ;;  %v7560_v50 = vld [vmem:[%s11589_s5 + $0x78] sm:$0xff]  ;;  %v7559_v51 = vld [vmem:[%s11589_s5 + $0x70] sm:$0xff]  ;;  %v7557_v58 = vld [vmem:[%s11589_s5 + $0x60] sm:$0xff] }
 0x159   :  { %v1648_v10 = vadd.f32 %v1647_v36, %v1635_v63  ;;  %v1623_v15 = vpop.f32.mrf.mxu2  ;;  %v7534_v63 = vld [vmem:[%s11587_s3 + $0x3ac] sm:$0xf]  ;;  %v10016_v36 = vld [vmem:[%s11588_s4] sm:$0xf]  ;;  %2926 = vmatpush.bf16.msrb.mxu1 %v7560_v50  ;;  %v7567_v32 = vld [vmem:[%s11589_s5 + $0xb0] sm:$0xff] }
 0x15a   :  { %2573 = vmatpush.bf16.msrb.mxu2 %v5967_v45  ;;  %v1610_v14 = vpop.f32.mrf.mxu3  ;;  %v6131_v15 = vor.u32 %v7526_v12, %v6128_v13  ;;  %v1790_v31 = vperm.slane %v10016_v36, 1  ;;  %v1792_v43 = vperm.slane %v10016_v36, 3  ;;  %v7554_v5 = vld [vmem:[%s11589_s5 + $0x48] sm:$0xff] }
 0x15b   :  { %v1654_v47 = vmax.f32 %v1648_v10, 0.0  ;;  %v1789_v10 = vperm.slane %v10016_v36, 0  ;;  %v7566_v6 = vld [vmem:[%s11589_s5 + $0xa8] sm:$0xff] }
 0x15c   :  { %v1649_v24 = vpop.f32.mrf.mxu1  ;;  %v7562_v12 = vld [vmem:[%s11589_s5 + $0x88] sm:$0xff] }
 0x15d   :  { %v9913_v20 = vpack.c.bf16 %v1654_v47, %v1654_v47  ;;  %v6096_v24 = vld [vmem:[%s11587_s3 + $0x338] sm:$0xf0]  ;;  %2927 = vmatpush.bf16.msrb.mxu1 %v7559_v51 }
 0x15e   :  { %2574 = vmatpush.bf16.msrb.mxu2 %v5951_v40  ;;  %v6160_v40 = vld [vmem:[%s11587_s3 + $0x3b8] sm:$0xf0] }
 0x15f   :  { %2484 = vmatmul.bf16.vlgmr.msrb.gmra.mxu0 %v9913_v20 }
 0x160   :  { %2580 = vmatpush.bf16.msrb.mxu0 %v6191_v52 }
 0x161   :  { %2575 = vmatmul.bf16.vlgmr.msrb.gmra.mxu2 %v9833_v25 }
 0x162   :  { %2619 = vmatpush.bf16.msra.mxu2 %v6067_v8  ;;  %v7530_v8 = vld [vmem:[%s11587_s3 + $0x38c] sm:$0xf] }
 0x163   :  { %v6147_v11 = vor.u32 %v7530_v8, %v6144_v9  ;;  %v7564_v8 = vld [vmem:[%s11589_s5 + $0x98] sm:$0xff]  ;;  %v7563_v9 = vld [vmem:[%s11589_s5 + $0x90] sm:$0xff] }
 0x164   :  { %2581 = vmatpush.bf16.msrb.mxu0 %v6175_v59 }
 0x166   :  { %2620 = vmatpush.bf16.msra.mxu2 %v6051_v19  ;;  %v7522_v19 = vld [vmem:[%s11587_s3 + $0x34c] sm:$0xf] }
 0x167   :  { %v6115_v22 = vor.u32 %v7522_v19, %v6112_v17  ;;  %v7576_v19 = vld [vmem:[%s11589_s5 + $0xf8] sm:$0xff] }
 0x168   :  { %2582 = vmatpush.bf16.msrb.mxu0 %v6159_v62  ;;  %v6083_v62 = vor.u32 %v7514_v28, %v6080_v30 }
 0x16a   :  { %2621 = vmatpush.bf16.msra.mxu2 %v6035_v27  ;;  %v6099_v27 = vor.u32 %v7518_v23, %v6096_v24  ;;  %v7574_v23 = vld [vmem:[%s11589_s5 + $0xe8] sm:$0xff] }
 0x16c   :  { %2583 = vmatpush.bf16.msrb.mxu0 %v6143_v38  ;;  %v1791_v38 = vperm.slane %v10016_v36, 2  ;;  %v7565_v36 = vld [vmem:[%s11589_s5 + $0xa0] sm:$0xff] }
 0x16e   :  { %2622 = vmatpush.bf16.msra.mxu2 %v6019_v33 }
 0x16f   :  { %2536 = vmatmul.bf16.vlgmr.msra.gmra.mxu0 %v9913_v20 }
 0x170   :  { %2584 = vmatpush.bf16.msrb.mxu0 %v6127_v48  ;;  %v7549_v48 = vld [vmem:[%s11589_s5 + $0x20] sm:$0xff] }
 0x172   :  { %2623 = vmatpush.bf16.msra.mxu2 %v6003_v39  ;;  %v2446_v54 = vpop.f32.mrf.mxu3  ;;  %v7551_v39 = vld [vmem:[%s11589_s5 + $0x30] sm:$0xff] }
 0x173   :  { %v2447_v14 = vadd.f32 %v2446_v54, %v1789_v10  ;;  %2914 = vmatpush.bf16.msrb.mxu3 %v7551_v39  ;;  %v7547_v54 = vld [vmem:[%s11589_s5 + $0x10] sm:$0xff] }
 0x174   :  { %2585 = vmatpush.bf16.msrb.mxu0 %v6111_v1  ;;  %v7546_v1 = vld [vmem:[%s11589_s5 + $0x8] sm:$0xff] }
 0x176   :  { %2624 = vmatpush.bf16.msra.mxu2 %v5987_v49 }
 0x177   :  { %2915 = vmatpush.bf16.msrb.mxu3 %v7550_v44 }
 0x178   :  { %2586 = vmatpush.bf16.msrb.mxu0 %v6095_v61  ;;  %v7556_v61 = vld [vmem:[%s11589_s5 + $0x58] sm:$0xff] }
 0x17a   :  { %2625 = vmatpush.bf16.msra.mxu2 %v5971_v26  ;;  %v2448_v45 = vpop.f32.mrf.mxu3  ;;  %v7558_v26 = vld [vmem:[%s11589_s5 + $0x68] sm:$0xff] }
 0x17b   :  { %2916 = vmatpush.bf16.msrb.mxu3 %v7549_v48  ;;  %2928 = vmatpush.bf16.msrb.mxu1 %v7558_v26 }
 0x17c   :  { %2587 = vmatpush.bf16.msrb.mxu0 %v6079_v3 }
 0x17e   :  { %2626 = vmatpush.bf16.msra.mxu2 %v5955_v0  ;;  %v2459_v47 = vpop.f32.mrf.mxu1  ;;  %v7568_v0 = vld [vmem:[%s11589_s5 + $0xb8] sm:$0xff] }
 0x17f   :  { %2588 = vmatmul.bf16.vlgmr.msrb.gmra.mxu0 %v9913_v20  ;;  %v10031_v52 = vadd.f32 %v2459_v47, %v2447_v14  ;;  %2917 = vmatpush.bf16.msrb.mxu3 %v7548_v4 }
 0x180   :  { %2632 = vmatpush.bf16.msra.mxu0 %v6195_v41  ;;  %2929 = vmatpush.bf16.msrb.mxu1 %v7557_v58 }
 0x181   :  { %2627 = vmatmul.bf16.vlgmr.msra.gmra.mxu2 %v9833_v25  ;;  %v6163_v25 = vor.u32 %v7534_v63, %v6160_v40  ;;  %v7553_v40 = vld [vmem:[%s11589_s5 + $0x40] sm:$0xff] }
 0x182   :  { %2939 = vmatpush.bf16.msrb.mxu2 %v7568_v0 }
 0x183   :  { %2918 = vmatpush.bf16.msrb.mxu3 %v7547_v54 }
 0x184   :  { %2633 = vmatpush.bf16.msra.mxu0 %v6179_v7  ;;  %2930 = vmatpush.bf16.msrb.mxu1 %v7556_v61 }
 0x186   :  { %v2461_v59 = vpop.f32.mrf.mxu1  ;;  %2940 = vmatpush.bf16.msrb.mxu2 %v7567_v32 }
 0x187   :  { %2919 = vmatpush.bf16.msrb.mxu3 %v7546_v1  ;;  %v7573_v59 = vld [vmem:[%s11589_s5 + $0xe0] sm:$0xff] }
 0x188   :  { %2634 = vmatpush.bf16.msra.mxu0 %v6163_v25  ;;  %2931 = vmatpush.bf16.msrb.mxu1 %v7555_v56 }
 0x18a   :  { %2941 = vmatpush.bf16.msrb.mxu2 %v7566_v6  ;;  %v7881_v6 = vmov 0  }
 0x18b   :  { %2920 = vmatpush.bf16.msrb.mxu3 %v7545_v57  ;;  %7806 = vset.pattern.permute.xlu0 %v7881_v6  ;;  %v6607_v6 = vld [vmem:[%s11593_s9 + $0x230] sm:$0xf] }
 0x18c   :  { %2635 = vmatpush.bf16.msra.mxu0 %v6147_v11  ;;  %2932 = vmatpush.bf16.msrb.mxu1 %v7554_v5  ;;  %v7880_v5 = vmov 1  }
 0x18d   :  { %7807 = vset.pattern.permute.xlu1 %v7880_v5 }
 0x18e   :  { %v2511_v34 = vpop.f32.mrf.mxu1  ;;  %2942 = vmatpush.bf16.msrb.mxu2 %v7565_v36 }
 0x190   :  { %2636 = vmatpush.bf16.msra.mxu0 %v6131_v15  ;;  %2933 = vmatpush.bf16.msrb.mxu1 %v7553_v40  ;;  %v7561_v15 = vld [vmem:[%s11589_s5 + $0x80] sm:$0xff]  ;;  %v6747_v40 = vld [vmem:[%s11593_s9 + $0x348] sm:$0xf] }
 0x192   :  { %v2498_v21 = vpop.f32.mrf.mxu3  ;;  %2943 = vmatpush.bf16.msrb.mxu2 %v7564_v8  ;;  %v6971_v8 = vld [vmem:[%s11593_s9 + $0x508] sm:$0xf] }
 0x193   :  { %v2499_v33 = vadd.f32 %v2498_v21, %v1790_v31  ;;  %v7572_v31 = vld [vmem:[%s11589_s5 + $0xd8] sm:$0xff] }
 0x194   :  { %2637 = vmatpush.bf16.msra.mxu0 %v6115_v22 }
 0x195   :  { %v10052_v35 = vadd.f32 %v2511_v34, %v2499_v33  ;;  %v7571_v33 = vld [vmem:[%s11589_s5 + $0xd0] sm:$0xff] }
 0x196   :  { %v2513_v55 = vpop.f32.mrf.mxu1  ;;  %2944 = vmatpush.bf16.msrb.mxu2 %v7563_v9  ;;  %v7741_v9 = vld [vmem:[%s11593_s9 + $0x520] sm:$0xf0] }
 0x198   :  { %2638 = vmatpush.bf16.msra.mxu0 %v6099_v27 }
 0x19a   :  { %v2500_v53 = vpop.f32.mrf.mxu3  ;;  %2945 = vmatpush.bf16.msrb.mxu2 %v7562_v12  ;;  %v7195_v12 = vld [vmem:[%s11593_s9 + $0x6c8] sm:$0xf] }
 0x19c   :  { %2639 = vmatpush.bf16.msra.mxu0 %v6083_v62 }
 0x19e   :  { %2946 = vmatpush.bf16.msrb.mxu2 %v7561_v15  ;;  %v7622_v15 = vld [vmem:[%s11593_s9 + $0x168] sm:$0xf0] }
 0x19f   :  { %2640 = vmatmul.bf16.vlgmr.msra.gmra.mxu0 %v9913_v20 }
 0x1a0   :  { %2952 = vmatpush.bf16.msrb.mxu0 %v7576_v19  ;;  %v6719_v19 = vld [vmem:[%s11593_s9 + $0x310] sm:$0xf] }
 0x1ac   :  { %v2563_v18 = vpop.f32.mrf.mxu1 }
 0x1b2   :  { %v2550_v42 = vpop.f32.mrf.mxu3 }
 0x1b3   :  { %v2551_v20 = vadd.f32 %v2550_v42, %v1791_v38 }
 0x1b4   :  { %v2565_v16 = vpop.f32.mrf.mxu1 }
 0x1b5   :  { %v10065_v46 = vadd.f32 %v2563_v18, %v2551_v20 }
 0x1ba   :  { %v2552_v49 = vpop.f32.mrf.mxu3 }
 0x1be   :  { %v2472_v60 = vpop.f32.mrf.mxu2 }
 0x1bf   :  { %v2473_v11 = vadd.f32 %v2472_v60, %v10031_v52  ;;  %v7575_v52 = vld [vmem:[%s11589_s5 + $0xf0] sm:$0xff] }
 0x1c0   :  { %2953 = vmatpush.bf16.msrb.mxu0 %v7575_v52 }
 0x1c4   :  { %2954 = vmatpush.bf16.msrb.mxu0 %v7574_v23  ;;  %v7734_v23 = vld [vmem:[%s11593_s9 + $0x4e8] sm:$0xf0] }
 0x1c6   :  { %v2474_v41 = vpop.f32.mrf.mxu2 }
 0x1c8   :  { %2955 = vmatpush.bf16.msrb.mxu0 %v7573_v59 }
 0x1cc   :  { %v2615_v29 = vpop.f32.mrf.mxu1  ;;  %2956 = vmatpush.bf16.msrb.mxu0 %v7572_v31 }
 0x1ce   :  { %v2524_v25 = vpop.f32.mrf.mxu2 }
 0x1cf   :  { %v2525_v27 = vadd.f32 %v2524_v25, %v10052_v35  ;;  %v7570_v35 = vld [vmem:[%s11589_s5 + $0xc8] sm:$0xff]  ;;  %v7685_v25 = vld [vmem:[%s11593_s9 + $0x360] sm:$0xf0] }
 0x1d0   :  { %2957 = vmatpush.bf16.msrb.mxu0 %v7571_v33  ;;  %v6915_v33 = vld [vmem:[%s11593_s9 + $0x498] sm:$0xf] }
 0x1d2   :  { %v2602_v2 = vpop.f32.mrf.mxu3 }
 0x1d3   :  { %v2603_v45 = vadd.f32 %v2602_v2, %v1792_v43  ;;  %v7809_v43 = vld [vmem:[%s11590_s6] ss:$0 sm:$0xff] }
 0x1d4   :  { %v2617_v63 = vpop.f32.mrf.mxu1  ;;  %2958 = vmatpush.bf16.msrb.mxu0 %v7570_v35  ;;  %v7727_v35 = vld [vmem:[%s11593_s9 + $0x4b0] sm:$0xf0] }
 0x1d5   :  { %v10107_v3 = vadd.f32 %v2615_v29, %v2603_v45  ;;  %v7629_v63 = vld [vmem:[%s11593_s9 + $0x1a0] sm:$0xf0] }
 0x1d6   :  { %v2526_v10 = vpop.f32.mrf.mxu2 }
 0x1d7   :  { %v6748_v10 = vor.u32 %v7685_v25, %v6747_v40  ;;  %v6831_v40 = vld [vmem:[%s11593_s9 + $0x3f0] sm:$0xf] }
 0x1d8   :  { %2959 = vmatpush.bf16.msrb.mxu0 %v7569_v37  ;;  %v7783_v37 = vld [vmem:[%s11593_s9 + $0x670] sm:$0xf0]  ;;  %v7055_v25 = vld [vmem:[%s11593_s9 + $0x5b0] sm:$0xf] }
 0x1d9   :  { %4476 = vmatpush.bf16.msra.mxu1 %v6748_v10 }
 0x1da   :  { %v2604_v7 = vpop.f32.mrf.mxu3 }
 0x1db   :  { %v6523_v7 = vld [vmem:[%s11593_s9 + $0x188] sm:$0xf] }
 0x1dc   :  { %v2485_v13 = vpop.f32.mrf.mxu0  ;;  %v6524_v36 = vor.u32 %v7629_v63, %v6523_v7  ;;  %v7650_v63 = vld [vmem:[%s11593_s9 + $0x248] sm:$0xf0] }
 0x1dd   :  { %v2486_v14 = vadd.f32 %v2485_v13, %v2473_v11  ;;  %v6972_v11 = vor.u32 %v7741_v9, %v6971_v8  ;;  %v7797_v13 = vld [vmem:[%s11593_s9 + $0x6e0] sm:$0xf0]  ;;  %v7762_v8 = vld [vmem:[%s11593_s9 + $0x5c8] sm:$0xf0]  ;;  %v6608_v10 = vor.u32 %v7650_v63, %v6607_v6  ;;  %v7612_v6 = vld [vmem:[%s11593_s9 + $0x11c] sm:$0xf] }
 0x1de   :  { %4463 = vmatpush.bf16.msra.mxu3 %v6524_v36  ;;  %v7706_v36 = vld [vmem:[%s11593_s9 + $0x408] sm:$0xf0]  ;;  %v7668_v63 = vld [vmem:[%s11593_s9 + $0x2dc] sm:$0xf] }
 0x1df   :  { %v2645_v47 = vmax.f32 %v2486_v14, 0.0  ;;  %v6495_v14 = vld [vmem:[%s11593_s9 + $0x150] sm:$0xf]  ;;  %4489 = vmatpush.bf16.msra.mxu2 %v6972_v11  ;;  %v6832_v11 = vor.u32 %v7706_v36, %v6831_v40  ;;  %v6693_v36 = vld [vmem:[%s11593_s9 + $0x2f4] sm:$0xf0] }
 0x1e1   :  { %v2649_v17 = vpack.c.bf16 %v2645_v47, %v2645_v47  ;;  %v7196_v47 = vor.u32 %v7797_v13, %v7195_v12  ;;  %v6355_v12 = vld [vmem:[%s11593_s9 + $0x38] sm:$0xf]  ;;  %v7587_v13 = vld [vmem:[%s11593_s9 + $0x50] sm:$0xf0] }
 0x1e3   :  { %2921 = vmatmul.bf16.vlgmr.msrb.gmra.mxu3 %v2649_v17  ;;  %v7678_v17 = vld [vmem:[%s11593_s9 + $0x328] sm:$0xf0]  ;;  %4502 = vmatpush.bf16.msra.mxu0 %v7196_v47  ;;  %v7056_v47 = vor.u32 %v7762_v8, %v7055_v25  ;;  %v7724_v25 = vld [vmem:[%s11593_s9 + $0x49c] sm:$0xf]  ;;  %v6917_v8 = vld [vmem:[%s11593_s9 + $0x4b4] sm:$0xf0] }
 0x1e4   :  { %v2576_v21 = vpop.f32.mrf.mxu2  ;;  %v2487_v22 = vpop.f32.mrf.mxu0  ;;  %v6720_v52 = vor.u32 %v7678_v17, %v6719_v19  ;;  %v6803_v19 = vld [vmem:[%s11593_s9 + $0x3b8] sm:$0xf]  ;;  %v7699_v17 = vld [vmem:[%s11593_s9 + $0x3d0] sm:$0xf0] }
 0x1e5   :  { %v2577_v55 = vadd.f32 %v2576_v21, %v10065_v46  ;;  %v6496_v21 = vor.u32 %v7622_v15, %v6495_v14  ;;  %v6943_v22 = vld [vmem:[%s11593_s9 + $0x4d0] sm:$0xf]  ;;  %v6579_v14 = vld [vmem:[%s11593_s9 + $0x1f8] sm:$0xf]  ;;  %v7643_v15 = vld [vmem:[%s11593_s9 + $0x210] sm:$0xf0] }
 0x1e6   :  { %v6944_v59 = vor.u32 %v7734_v23, %v6943_v22  ;;  %4477 = vmatpush.bf16.msra.mxu1 %v6720_v52  ;;  %v7755_v52 = vld [vmem:[%s11593_s9 + $0x590] sm:$0xf0]  ;;  %v6356_v22 = vor.u32 %v7587_v13, %v6355_v12  ;;  %v7826_v23 = vld [vmem:[%s11584_s0] sm:$0xff]  ;;  %v6696_v12 = vor.u32 %v7668_v63, %v6693_v36  ;;  %v6920_v13 = vor.u32 %v7724_v25, %v6917_v8 }
 0x1e7   :  { %4464 = vmatpush.bf16.msra.mxu3 %v6496_v21  ;;  %v7027_v21 = vld [vmem:[%s11593_s9 + $0x578] sm:$0xf]  ;;  %v7689_v63 = vld [vmem:[%s11593_s9 + $0x384] sm:$0xf] }
 0x1e8   :  { %4490 = vmatpush.bf16.msra.mxu2 %v6944_v59  ;;  %v6580_v59 = vor.u32 %v7643_v15, %v6579_v14  ;;  %v7605_v14 = vld [vmem:[%s11593_s9 + $0xe4] sm:$0xf] }
 0x1e9   :  { %v7661_v15 = vld [vmem:[%s11593_s9 + $0x2a4] sm:$0xf] }
 0x1ea   :  { %v7745_v8 = vld [vmem:[%s11593_s9 + $0x544] sm:$0xf] }
 0x1ec   :  { %v2578_v24 = vpop.f32.mrf.mxu2  ;;  %v2537_v28 = vpop.f32.mrf.mxu0 }
 0x1ed   :  { %v2538_v30 = vadd.f32 %v2537_v28, %v2525_v27  ;;  %v7167_v24 = vld [vmem:[%s11593_s9 + $0x690] sm:$0xf]  ;;  %v7790_v27 = vld [vmem:[%s11593_s9 + $0x6a8] sm:$0xf0]  ;;  %v6467_v28 = vld [vmem:[%s11593_s9 + $0x118] sm:$0xf] }
 0x1ee   :  { %v7168_v31 = vor.u32 %v7790_v27, %v7167_v24  ;;  %v47_v24 = vunpack.c.l.bf16 %v7826_v23  ;;  %v6804_v27 = vor.u32 %v7699_v17, %v6803_v19  ;;  %v6665_v17 = vld [vmem:[%s11593_s9 + $0x2bc] sm:$0xf0] }
 0x1ef   :  { %v2646_v53 = vmax.f32 %v2538_v30, 0.0  ;;  %v7615_v30 = vld [vmem:[%s11593_s9 + $0x130] sm:$0xf0]  ;;  %v7113_v23 = vld [vmem:[%s11593_s9 + $0x63c] sm:$0xf0] }
 0x1f0   :  { %4503 = vmatpush.bf16.msra.mxu0 %v7168_v31  ;;  %v7028_v31 = vor.u32 %v7755_v52, %v7027_v21  ;;  %v7717_v21 = vld [vmem:[%s11593_s9 + $0x464] sm:$0xf]  ;;  %v6889_v52 = vld [vmem:[%s11593_s9 + $0x47c] sm:$0xf0] }
 0x1f1   :  { %v2650_v62 = vpack.c.bf16 %v2646_v53, %v2646_v53  ;;  %v6691_v53 = vld [vmem:[%s11593_s9 + $0x2d8] sm:$0xf] }
 0x1f3   :  { %2934 = vmatmul.bf16.vlgmr.msrb.gmra.mxu1 %v2650_v62  ;;  %v7671_v62 = vld [vmem:[%s11593_s9 + $0x2f0] sm:$0xf0] }
 0x1f4   :  { %v2539_v34 = vpop.f32.mrf.mxu0 }
 0x1f5   :  { %v6468_v34 = vor.u32 %v7615_v30, %v6467_v28  ;;  %v6327_v28 = vld [vmem:[%s11593_s9] sm:$0xf]  ;;  %v7580_v30 = vld [vmem:[%s11593_s9 + $0x18] sm:$0xf0] }
 0x1f7   :  { %4465 = vmatpush.bf16.msra.mxu3 %v6468_v34  ;;  %v7692_v34 = vld [vmem:[%s11593_s9 + $0x398] sm:$0xf0] }
 0x1fc   :  { %v2589_v38 = vpop.f32.mrf.mxu0 }
 0x1fd   :  { %v2590_v39 = vadd.f32 %v2589_v38, %v2577_v55  ;;  %v7139_v55 = vld [vmem:[%s11593_s9 + $0x658] sm:$0xf]  ;;  %v6692_v38 = vor.u32 %v7671_v62, %v6691_v53  ;;  %v6551_v53 = vld [vmem:[%s11593_s9 + $0x1c0] sm:$0xf]  ;;  %v7636_v62 = vld [vmem:[%s11593_s9 + $0x1d8] sm:$0xf0] }
 0x1ff   :  { %v2647_v18 = vmax.f32 %v2590_v39, 0.0  ;;  %v6916_v39 = vor.u32 %v7727_v35, %v6915_v33  ;;  %4478 = vmatpush.bf16.msra.mxu1 %v6692_v38  ;;  %v6775_v33 = vld [vmem:[%s11593_s9 + $0x380] sm:$0xf]  ;;  %v6328_v38 = vor.u32 %v7580_v30, %v6327_v28  ;;  %v7598_v28 = vld [vmem:[%s11593_s9 + $0xac] sm:$0xf] }
 0x200   :  { %v6999_v35 = vld [vmem:[%s11593_s9 + $0x540] sm:$0xf]  ;;  %v7654_v30 = vld [vmem:[%s11593_s9 + $0x26c] sm:$0xf] }
 0x201   :  { %v2651_v44 = vpack.c.bf16 %v2647_v18, %v2647_v18  ;;  %v7608_v18 = vld [vmem:[%s11593_s9 + $0xf8] sm:$0xf0]  ;;  %4491 = vmatpush.bf16.msra.mxu2 %v6916_v39  ;;  %v7626_v39 = vld [vmem:[%s11593_s9 + $0x18c] sm:$0xf] }
 0x203   :  { %2947 = vmatmul.bf16.vlgmr.msrb.gmra.mxu2 %v2651_v44  ;;  %v6663_v44 = vld [vmem:[%s11593_s9 + $0x2a0] sm:$0xf] }
 0x204   :  { %v2628_v42 = vpop.f32.mrf.mxu2  ;;  %v2591_v20 = vpop.f32.mrf.mxu0 }
 0x205   :  { %v2629_v49 = vadd.f32 %v2628_v42, %v10107_v3  ;;  %v6439_v42 = vld [vmem:[%s11593_s9 + $0xe0] sm:$0xf]  ;;  %v7140_v20 = vor.u32 %v7783_v37, %v7139_v55  ;;  %v7748_v55 = vld [vmem:[%s11593_s9 + $0x558] sm:$0xf0] }
 0x207   :  { %4504 = vmatpush.bf16.msra.mxu0 %v7140_v20  ;;  %v6749_v20 = vld [vmem:[%s11593_s9 + $0x364] sm:$0xf0] }
 0x20c   :  { %v2630_v48 = vpop.f32.mrf.mxu2 }
 0x20d   :  { %v7664_v48 = vld [vmem:[%s11593_s9 + $0x2b8] sm:$0xf0] }
 0x21c   :  { %v2641_v16 = vpop.f32.mrf.mxu0 }
 0x21d   :  { %v2642_v4 = vadd.f32 %v2641_v16, %v2629_v49  ;;  %v6887_v49 = vld [vmem:[%s11593_s9 + $0x460] sm:$0xf]  ;;  %v7720_v16 = vld [vmem:[%s11593_s9 + $0x478] sm:$0xf0] }
 0x21f   :  { %v2648_v50 = vmax.f32 %v2642_v4, 0.0  ;;  %v7111_v4 = vld [vmem:[%s11593_s9 + $0x620] sm:$0xf] }
 0x221   :  { %v2652_v51 = vpack.c.bf16 %v2648_v50, %v2648_v50  ;;  %v7776_v50 = vld [vmem:[%s11593_s9 + $0x638] sm:$0xf0] }
 0x223   :  { %2960 = vmatmul.bf16.vlgmr.msrb.gmra.mxu0 %v2652_v51  ;;  %v6440_v51 = vor.u32 %v7608_v18, %v6439_v42  ;;  %v6525_v42 = vld [vmem:[%s11593_s9 + $0x1a4] sm:$0xf0]  ;;  %v7682_v18 = vld [vmem:[%s11593_s9 + $0x34c] sm:$0xf] }
 0x224   :  { %v2643_v46 = vpop.f32.mrf.mxu0 }
 0x225   :  { %v6664_v46 = vor.u32 %v7664_v48, %v6663_v44  ;;  %4466 = vmatpush.bf16.msra.mxu3 %v6440_v51  ;;  %v7738_v48 = vld [vmem:[%s11593_s9 + $0x50c] sm:$0xf]  ;;  %v7197_v51 = vld [vmem:[%s11593_s9 + $0x6e4] sm:$0xf0] }
 0x227   :  { %4479 = vmatpush.bf16.msra.mxu1 %v6664_v46 }
 0x266   :  { %v2922_v54 = vpop.f32.mrf.mxu3 }
 0x267   :  { %v2923_v61 = vadd.f32 %v7809_v43, %v2922_v54  ;;  %v6888_v54 = vor.u32 %v7720_v16, %v6887_v49  ;;  %v6859_v43 = vld [vmem:[%s11593_s9 + $0x428] sm:$0xf]  ;;  %v6552_v16 = vor.u32 %v7636_v62, %v6551_v53  ;;  %v7710_v62 = vld [vmem:[%s11593_s9 + $0x42c] sm:$0xf] }
 0x268   :  { %v6973_v49 = vld [vmem:[%s11593_s9 + $0x524] sm:$0xf0] }
 0x269   :  { %4492 = vmatpush.bf16.msra.mxu2 %v6888_v54  ;;  %v7000_v54 = vor.u32 %v7748_v55, %v6999_v35  ;;  %v6637_v53 = vld [vmem:[%s11593_s9 + $0x284] sm:$0xf0] }
 0x26a   :  { %v7085_v35 = vld [vmem:[%s11593_s9 + $0x604] sm:$0xf0] }
 0x26e   :  { %v2924_v1 = vpop.f32.mrf.mxu3 }
 0x26f   :  { %v6411_v1 = vld [vmem:[%s11593_s9 + $0xa8] sm:$0xf] }
 0x270   :  { %v2935_v26 = vpop.f32.mrf.mxu1 }
 0x271   :  { %v2936_v0 = vadd.f32 %v2935_v26, %v2923_v61  ;;  %v7601_v26 = vld [vmem:[%s11593_s9 + $0xc0] sm:$0xf0] }
 0x272   :  { %v7713_v61 = vld [vmem:[%s11593_s9 + $0x440] sm:$0xf0] }
 0x278   :  { %v2937_v57 = vpop.f32.mrf.mxu1 }
 0x279   :  { %v6635_v57 = vld [vmem:[%s11593_s9 + $0x268] sm:$0xf] }
 0x286   :  { %v2948_v58 = vpop.f32.mrf.mxu2 }
 0x287   :  { %v2949_v56 = vadd.f32 %v2948_v58, %v2936_v0  ;;  %v7112_v58 = vor.u32 %v7776_v50, %v7111_v4  ;;  %v7083_v0 = vld [vmem:[%s11593_s9 + $0x5e8] sm:$0xf]  ;;  %v6776_v4 = vor.u32 %v7692_v34, %v6775_v33  ;;  %v7794_v50 = vld [vmem:[%s11593_s9 + $0x6cc] sm:$0xf] }
 0x288   :  { %v6861_v33 = vld [vmem:[%s11593_s9 + $0x444] sm:$0xf0]  ;;  %v7766_v34 = vld [vmem:[%s11593_s9 + $0x5ec] sm:$0xf] }
 0x289   :  { %4505 = vmatpush.bf16.msra.mxu0 %v7112_v58  ;;  %v7619_v58 = vld [vmem:[%s11593_s9 + $0x154] sm:$0xf] }
 0x28e   :  { %v2950_v60 = vpop.f32.mrf.mxu2 }
 0x28f   :  { %v7657_v60 = vld [vmem:[%s11593_s9 + $0x280] sm:$0xf0] }
 0x2a0   :  { %v2961_v32 = vpop.f32.mrf.mxu0 }
 0x2a1   :  { %v10164_v2 = vadd.f32 %v2961_v32, %v2949_v56  ;;  %v7769_v56 = vld [vmem:[%s11593_s9 + $0x600] sm:$0xf0]  ;;  %v6412_v32 = vor.u32 %v7601_v26, %v6411_v1  ;;  %v6528_v1 = vor.u32 %v7626_v39, %v6525_v42  ;;  %v6752_v26 = vor.u32 %v7682_v18, %v6749_v20  ;;  %v7591_v42 = vld [vmem:[%s11593_s9 + $0x74] sm:$0xf]  ;;  %v6385_v18 = vld [vmem:[%s11593_s9 + $0x8c] sm:$0xf0] }
 0x2a2   :  { %v7084_v7 = vor.u32 %v7769_v56, %v7083_v0  ;;  %v7731_v0 = vld [vmem:[%s11593_s9 + $0x4d4] sm:$0xf]  ;;  %v6945_v56 = vld [vmem:[%s11593_s9 + $0x4ec] sm:$0xf0]  ;;  %v7088_v39 = vor.u32 %v7766_v34, %v7085_v35  ;;  %v6388_v20 = vor.u32 %v7591_v42, %v6385_v18 }
 0x2a3   :  { %v2966_v29 = vmul.f32 0.5, %v10164_v2  ;;  %2965 = vst [vmem:[#allocation4] sm:$0xff] %v10164_v2  ;;  %4467 = vmatpush.bf16.msra.mxu3 %v6412_v32  ;;  %v7787_v32 = vld [vmem:[%s11593_s9 + $0x694] sm:$0xf]  ;;  %v6531_v18 = vld [vmem:[%s11593_s9 + $0x190] sm:$0xf] }
 0x2a4   :  { %4506 = vmatpush.bf16.msra.mxu0 %v7084_v7  ;;  %v6469_v7 = vld [vmem:[%s11593_s9 + $0x134] sm:$0xf0] }
 0x2a5   :  { %v2967_v45 = vmul.f32 1.442695, %v2966_v29  ;;  %v6636_v29 = vor.u32 %v7657_v60, %v6635_v57  ;;  %v6976_v57 = vor.u32 %v7738_v48, %v6973_v49  ;;  %v6497_v60 = vld [vmem:[%s11593_s9 + $0x16c] sm:$0xf0]  ;;  %v7703_v49 = vld [vmem:[%s11593_s9 + $0x3f4] sm:$0xf] }
 0x2a6   :  { %v6609_v48 = vld [vmem:[%s11593_s9 + $0x24c] sm:$0xf0] }
 0x2a7   :  { %7810 = vpow2.f32 %v2967_v45  ;;  %v6860_v45 = vor.u32 %v7713_v61, %v6859_v43  ;;  %4480 = vmatpush.bf16.msra.mxu1 %v6636_v29  ;;  %v7675_v43 = vld [vmem:[%s11593_s9 + $0x314] sm:$0xf]  ;;  %v6721_v61 = vld [vmem:[%s11593_s9 + $0x32c] sm:$0xf0] }
 0x2a8   :  { %v2963_v3 = vpop.f32.mrf.mxu0  ;;  %4507 = vmatpush.bf16.msra.mxu0 %v7056_v47  ;;  %v7169_v29 = vld [vmem:[%s11593_s9 + $0x6ac] sm:$0xf0]  ;;  %v6441_v47 = vld [vmem:[%s11593_s9 + $0xfc] sm:$0xf0] }
 0x2a9   :  { %v6383_v3 = vld [vmem:[%s11593_s9 + $0x70] sm:$0xf]  ;;  %4493 = vmatpush.bf16.msra.mxu2 %v6860_v45  ;;  %v6500_v45 = vor.u32 %v7619_v58, %v6497_v60  ;;  %v7172_v40 = vor.u32 %v7787_v32, %v7169_v29  ;;  %v6581_v60 = vld [vmem:[%s11593_s9 + $0x214] sm:$0xf0] }
 0x2aa   :  { %v7029_v32 = vld [vmem:[%s11593_s9 + $0x594] sm:$0xf0] }
 0x2ab   :  { %4481 = vmatpush.bf16.msra.mxu1 %v6608_v10  ;;  %v7141_v10 = vld [vmem:[%s11593_s9 + $0x674] sm:$0xf0] }
 0x2ac   :  { %4508 = vmatpush.bf16.msra.mxu0 %v7028_v31 }
 0x2ad   :  { %v7811_v41 = vpop.eup %7810  ;;  %4494 = vmatpush.bf16.msra.mxu2 %v6832_v11  ;;  %v6472_v11 = vor.u32 %v7612_v6, %v6469_v7  ;;  %v6553_v7 = vld [vmem:[%s11593_s9 + $0x1dc] sm:$0xf0] }
 0x2ae   :  { %2970 = vrot.lane.b32.xlu0 %v7811_v41, %s7879_s19  ;;  %v7594_v41 = vld [vmem:[%s11593_s9 + $0x88] sm:$0xf0] }
 0x2af   :  { %v6384_v9 = vor.u32 %v7594_v41, %v6383_v3  ;;  %4482 = vmatpush.bf16.msra.mxu1 %v6580_v59  ;;  %v6724_v3 = vor.u32 %v7675_v43, %v6721_v61  ;;  %v6948_v41 = vor.u32 %v7731_v0, %v6945_v56  ;;  %v6668_v59 = vor.u32 %v7661_v15, %v6665_v17  ;;  %v7696_v43 = vld [vmem:[%s11593_s9 + $0x3bc] sm:$0xf] }
 0x2b0   :  { %4509 = vmatpush.bf16.msra.mxu0 %v7000_v54  ;;  %v7752_v56 = vld [vmem:[%s11593_s9 + $0x57c] sm:$0xf] }
 0x2b1   :  { %4468 = vmatpush.bf16.msra.mxu3 %v6384_v9  ;;  %4495 = vmatpush.bf16.msra.mxu2 %v6804_v27  ;;  %v7780_v9 = vld [vmem:[%s11593_s9 + $0x65c] sm:$0xf]  ;;  %v6892_v27 = vor.u32 %v7717_v21, %v6889_v52  ;;  %v7032_v29 = vor.u32 %v7752_v56, %v7029_v32 }
 0x2b2   :  { %v7144_v19 = vor.u32 %v7780_v9, %v7141_v10  ;;  %v7001_v9 = vld [vmem:[%s11593_s9 + $0x55c] sm:$0xf0] }
 0x2b3   :  { %4483 = vmatpush.bf16.msra.mxu1 %v6552_v16  ;;  %v6833_v16 = vld [vmem:[%s11593_s9 + $0x40c] sm:$0xf0]  ;;  %v7004_v10 = vor.u32 %v7745_v8, %v7001_v9 }
 0x2b5   :  { %4469 = vmatpush.bf16.msra.mxu3 %v6356_v22  ;;  %4496 = vmatpush.bf16.msra.mxu2 %v6776_v4  ;;  %v7773_v22 = vld [vmem:[%s11593_s9 + $0x624] sm:$0xf] }
 0x2b6   :  { %v7116_v31 = vor.u32 %v7773_v22, %v7113_v23 }
 0x2b7   :  { %4528 = vmatpush.bf16.msrb.mxu1 %v6752_v26  ;;  %v6357_v26 = vld [vmem:[%s11593_s9 + $0x54] sm:$0xf0] }
 0x2b9   :  { %4470 = vmatpush.bf16.msra.mxu3 %v6328_v38  ;;  %4541 = vmatpush.bf16.msrb.mxu2 %v6976_v57  ;;  %v6864_v38 = vor.u32 %v7710_v62, %v6861_v33  ;;  %v7640_v57 = vld [vmem:[%s11593_s9 + $0x1fc] sm:$0xf] }
 0x2ba   :  { %v6584_v61 = vor.u32 %v7640_v57, %v6581_v60  ;;  %v7798_v60 = vld [vmem:[%s11593_s9 + $0x6e8] sm:$0xf0] }
 0x2bb   :  { %4529 = vmatpush.bf16.msrb.mxu1 %v6724_v3  ;;  %v6329_v3 = vld [vmem:[%s11593_s9 + $0x1c] sm:$0xf0] }
 0x2bd   :  { %4515 = vmatpush.bf16.msrb.mxu3 %v6528_v1  ;;  %4542 = vmatpush.bf16.msrb.mxu2 %v6948_v41  ;;  %v7584_v1 = vld [vmem:[%s11593_s9 + $0x3c] sm:$0xf]  ;;  %v7633_v41 = vld [vmem:[%s11593_s9 + $0x1c4] sm:$0xf] }
 0x2be   :  { %v6360_v58 = vor.u32 %v7584_v1, %v6357_v26  ;;  %v6556_v36 = vor.u32 %v7633_v41, %v6553_v7  ;;  %v7679_v7 = vld [vmem:[%s11593_s9 + $0x330] sm:$0xf0] }
 0x2bf   :  { %4530 = vmatpush.bf16.msrb.mxu1 %v6696_v12  ;;  %v2975_v12 = vld [vmem:[%s11591_s7] ss:$8 sm:$0xf] }
 0x2c0   :  { %v2982_v17 = vperm.slane %v2975_v12, 0  ;;  %v2983_v21 = vperm.slane %v2975_v12, 1  ;;  %v2984_v52 = vperm.slane %v2975_v12, 2  ;;  %v2985_v22 = vperm.slane %v2975_v12, 3 }
 0x2c1   :  { %4516 = vmatpush.bf16.msrb.mxu3 %v6500_v45  ;;  %4543 = vmatpush.bf16.msrb.mxu2 %v6920_v13  ;;  %v7577_v45 = vld [vmem:[%s11593_s9 + $0x4] sm:$0xf] }
 0x2c2   :  { %v6332_v6 = vor.u32 %v7577_v45, %v6329_v3  ;;  %v7623_v45 = vld [vmem:[%s11593_s9 + $0x170] sm:$0xf0] }
 0x2c3   :  { %4531 = vmatpush.bf16.msrb.mxu1 %v6668_v59 }
 0x2c5   :  { %4517 = vmatpush.bf16.msrb.mxu3 %v6472_v11  ;;  %4544 = vmatpush.bf16.msrb.mxu2 %v6892_v27  ;;  %v6324_v11 = vld [vmem:[%s11591_s7 + $0x1] ss:$8 sm:$0xf] }
 0x2c6   :  { %v3001_v13 = vperm.slane %v6324_v11, 0  ;;  %v3004_v15 = vperm.slane %v6324_v11, 3 }
 0x2c9   :  { %4545 = vmatpush.bf16.msrb.mxu2 %v6864_v38 }
 0x320   :  { %v2971_v37 = vpop.permute.xlu0 %2970 }
 0x321   :  { %v2973_v44 = vmul.f32 %v2971_v37, %v47_v24  ;;  %v6444_v24 = vor.u32 %v7605_v14, %v6441_v47  ;;  %v6640_v37 = vor.u32 %v7654_v30, %v6637_v53  ;;  %v3002_v14 = vperm.slane %v6324_v11, 1 }
 0x322   :  { %v3003_v47 = vperm.slane %v6324_v11, 2  ;;  %v7616_v11 = vld [vmem:[%s11593_s9 + $0x138] sm:$0xf0] }
 0x323   :  { %v2974_v46 = vadd.f32 %v2973_v44, %v10164_v2  ;;  %v7200_v2 = vor.u32 %v7794_v50, %v7197_v51  ;;  %4518 = vmatpush.bf16.msrb.mxu3 %v6444_v24  ;;  %4532 = vmatpush.bf16.msrb.mxu1 %v6640_v37  ;;  %v7647_v44 = vld [vmem:[%s11593_s9 + $0x234] sm:$0xf]  ;;  %v6836_v50 = vor.u32 %v7703_v49, %v6833_v16  ;;  %v7630_v16 = vld [vmem:[%s11593_s9 + $0x1a8] sm:$0xf0] }
 0x324   :  { %v6612_v4 = vor.u32 %v7647_v44, %v6609_v48  ;;  %v7759_v51 = vld [vmem:[%s11593_s9 + $0x5b4] sm:$0xf] }
 0x325   :  { %2997 = vperm.xlu1 %7807, %v2974_v46   ;;  %2978 = vperm.xlu0 %7806, %v2974_v46   ;;  %v7057_v46 = vld [vmem:[%s11593_s9 + $0x5cc] sm:$0xf0] }
 0x326   :  { %4554 = vmatpush.bf16.msrb.mxu0 %v7200_v2  ;;  %v7060_v54 = vor.u32 %v7759_v51, %v7057_v46  ;;  %4546 = vmatpush.bf16.msrb.mxu2 %v6836_v50  ;;  %v6805_v2 = vld [vmem:[%s11593_s9 + $0x3d4] sm:$0xf0]  ;;  %v7686_v50 = vld [vmem:[%s11593_s9 + $0x368] sm:$0xf0]  ;;  %v6979_v51 = vld [vmem:[%s11593_s9 + $0x510] sm:$0xf] }
 0x327   :  { %4533 = vmatpush.bf16.msrb.mxu1 %v6612_v4  ;;  %v6808_v0 = vor.u32 %v7696_v43, %v6805_v2  ;;  %v6755_v4 = vld [vmem:[%s11593_s9 + $0x350] sm:$0xf]  ;;  %v7742_v46 = vld [vmem:[%s11593_s9 + $0x528] sm:$0xf0]  ;;  %v6532_v43 = vor.u32 %v7630_v16, %v6531_v18 }
 0x328   :  { %v6756_v2 = vor.u32 %v7686_v50, %v6755_v4  ;;  %v6980_v3 = vor.u32 %v7742_v46, %v6979_v51  ;;  %v6867_v18 = vld [vmem:[%s11593_s9 + $0x430] sm:$0xf]  ;;  %v6391_v4 = vld [vmem:[%s11593_s9 + $0x78] sm:$0xf]  ;;  %v7595_v50 = vld [vmem:[%s11593_s9 + $0x90] sm:$0xf0] }
 0x32a   :  { %4555 = vmatpush.bf16.msrb.mxu0 %v7172_v40  ;;  %4547 = vmatpush.bf16.msrb.mxu2 %v6808_v0  ;;  %v6777_v40 = vld [vmem:[%s11593_s9 + $0x39c] sm:$0xf0] }
 0x32b   :  { %4534 = vmatpush.bf16.msrb.mxu1 %v6584_v61  ;;  %v6780_v25 = vor.u32 %v7689_v63, %v6777_v40  ;;  %v6951_v63 = vld [vmem:[%s11593_s9 + $0x4d8] sm:$0xf]  ;;  %v7735_v40 = vld [vmem:[%s11593_s9 + $0x4f0] sm:$0xf0] }
 0x32c   :  { %v6952_v12 = vor.u32 %v7735_v40, %v6951_v63  ;;  %v6811_v63 = vld [vmem:[%s11593_s9 + $0x3c0] sm:$0xf]  ;;  %v7700_v40 = vld [vmem:[%s11593_s9 + $0x3d8] sm:$0xf0] }
 0x32d   :  { %7808 = vset.pattern.permute.xlu0 %v7880_v5  ;;  %v6413_v5 = vld [vmem:[%s11593_s9 + $0xc4] sm:$0xf0] }
 0x32e   :  { %4556 = vmatpush.bf16.msrb.mxu0 %v7144_v19  ;;  %v6416_v55 = vor.u32 %v7598_v28, %v6413_v5  ;;  %4548 = vmatpush.bf16.msrb.mxu2 %v6780_v25  ;;  %v3017_v19 = vld [vmem:[%s11592_s8] sm:$0xf]  ;;  %v7791_v25 = vld [vmem:[%s11593_s9 + $0x6b0] sm:$0xf0] }
 0x32f   :  { %4535 = vmatpush.bf16.msrb.mxu1 %v6556_v36  ;;  %v3019_v24 = vperm.slane %v3017_v19, 0  ;;  %v3020_v59 = vperm.slane %v3017_v19, 1  ;;  %v3021_v27 = vperm.slane %v3017_v19, 2  ;;  %v3022_v28 = vperm.slane %v3017_v19, 3  ;;  %v7175_v36 = vld [vmem:[%s11593_s9 + $0x698] sm:$0xf] }
 0x330   :  { %4519 = vmatpush.bf16.msrb.mxu3 %v6416_v55  ;;  %v7728_v19 = vld [vmem:[%s11593_s9 + $0x4b8] sm:$0xf0] }
 0x332   :  { %4557 = vmatpush.bf16.msrb.mxu0 %v7116_v31 }
 0x334   :  { %4520 = vmatpush.bf16.msrb.mxu3 %v6388_v20 }
 0x336   :  { %4558 = vmatpush.bf16.msrb.mxu0 %v7088_v39 }
 0x338   :  { %4521 = vmatpush.bf16.msrb.mxu3 %v6360_v58 }
 0x33a   :  { %4559 = vmatpush.bf16.msrb.mxu0 %v7060_v54  ;;  %v7203_v54 = vld [vmem:[%s11593_s9 + $0x6d0] sm:$0xf] }
 0x33b   :  { %v7204_v41 = vor.u32 %v7798_v60, %v7203_v54  ;;  %v6615_v54 = vld [vmem:[%s11593_s9 + $0x238] sm:$0xf]  ;;  %v7763_v60 = vld [vmem:[%s11593_s9 + $0x5d0] sm:$0xf0] }
 0x33c   :  { %4522 = vmatpush.bf16.msrb.mxu3 %v6332_v6  ;;  %v6727_v6 = vld [vmem:[%s11593_s9 + $0x318] sm:$0xf] }
 0x33d   :  { %v6728_v9 = vor.u32 %v7679_v7, %v6727_v6  ;;  %v6587_v6 = vld [vmem:[%s11593_s9 + $0x200] sm:$0xf]  ;;  %v7644_v7 = vld [vmem:[%s11593_s9 + $0x218] sm:$0xf0] }
 0x33e   :  { %4560 = vmatpush.bf16.msrb.mxu0 %v7032_v29  ;;  %v6503_v29 = vld [vmem:[%s11593_s9 + $0x158] sm:$0xf] }
 0x33f   :  { %v6504_v8 = vor.u32 %v7623_v45, %v6503_v29  ;;  %v6363_v29 = vld [vmem:[%s11593_s9 + $0x40] sm:$0xf]  ;;  %v7588_v45 = vld [vmem:[%s11593_s9 + $0x58] sm:$0xf0] }
 0x342   :  { %4561 = vmatpush.bf16.msrb.mxu0 %v7004_v10  ;;  %v6475_v10 = vld [vmem:[%s11593_s9 + $0x120] sm:$0xf] }
 0x397   :  { %v2998_v23 = vpop.permute.xlu1 %2997  ;;  %v2979_v5 = vpop.permute.xlu0 %2978 }
 0x398   :  { %v3009_v30 = vmul.f32 %v3001_v13, %v2998_v23  ;;  %v3010_v31 = vmul.f32 %v3002_v14, %v2998_v23  ;;  %v3011_v53 = vmul.f32 %v3003_v47, %v2998_v23  ;;  %v3012_v62 = vmul.f32 %v3004_v15, %v2998_v23  ;;  %v6699_v14 = vld [vmem:[%s11593_s9 + $0x2e0] sm:$0xf]  ;;  %v7672_v47 = vld [vmem:[%s11593_s9 + $0x2f8] sm:$0xf0]  ;;  %v6447_v23 = vld [vmem:[%s11593_s9 + $0xe8] sm:$0xf] }
 0x399   :  { %v2990_v33 = vmul.f32 %v2982_v17, %v2979_v5  ;;  %v2991_v34 = vmul.f32 %v2983_v21, %v2979_v5  ;;  %v2992_v35 = vmul.f32 %v2984_v52, %v2979_v5  ;;  %v2993_v55 = vmul.f32 %v2985_v22, %v2979_v5  ;;  %v6923_v15 = vld [vmem:[%s11593_s9 + $0x4a0] sm:$0xf]  ;;  %v7784_v21 = vld [vmem:[%s11593_s9 + $0x678] sm:$0xf0]  ;;  %v7665_v5 = vld [vmem:[%s11593_s9 + $0x2c0] sm:$0xf0] }
 0x39a   :  { %v7176_v13 = vor.u32 %v7791_v25, %v7175_v36  ;;  %v7147_v17 = vld [vmem:[%s11593_s9 + $0x660] sm:$0xf]  ;;  %v6476_v52 = vor.u32 %v7616_v11, %v6475_v10  ;;  %v6700_v22 = vor.u32 %v7672_v47, %v6699_v14  ;;  %v7756_v25 = vld [vmem:[%s11593_s9 + $0x598] sm:$0xf0]  ;;  %v6588_v10 = vor.u32 %v7644_v7, %v6587_v6  ;;  %v7581_v11 = vld [vmem:[%s11593_s9 + $0x20] sm:$0xf0] }
 0x39b   :  { %v3013_v37 = vadd.f32 %v3009_v30, %v2990_v33  ;;  %v3014_v38 = vadd.f32 %v3010_v31, %v2991_v34  ;;  %v3015_v39 = vadd.f32 %v3011_v53, %v2992_v35  ;;  %v3016_v42 = vadd.f32 %v3012_v62, %v2993_v55  ;;  %v6895_v30 = vld [vmem:[%s11593_s9 + $0x468] sm:$0xf]  ;;  %v7721_v31 = vld [vmem:[%s11593_s9 + $0x480] sm:$0xf0]  ;;  %v6419_v35 = vld [vmem:[%s11593_s9 + $0xb0] sm:$0xf] }
 0x39c   :  { %v7119_v53 = vld [vmem:[%s11593_s9 + $0x628] sm:$0xf]  ;;  %v7777_v62 = vld [vmem:[%s11593_s9 + $0x640] sm:$0xf0]  ;;  %v7602_v55 = vld [vmem:[%s11593_s9 + $0xc8] sm:$0xf0]  ;;  %v6812_v14 = vor.u32 %v7700_v40, %v6811_v63 }
 0x39d   :  { %v3027_v44 = vadd.f32 %v3019_v24, %v3013_v37  ;;  %v3028_v20 = vadd.f32 %v3020_v59, %v3014_v38  ;;  %v3029_v48 = vadd.f32 %v3021_v27, %v3015_v39  ;;  %v3030_v49 = vadd.f32 %v3022_v28, %v3016_v42  ;;  %v7609_v24 = vld [vmem:[%s11593_s9 + $0x100] sm:$0xf0]  ;;  %v6671_v28 = vld [vmem:[%s11593_s9 + $0x2a8] sm:$0xf]  ;;  %v6643_v39 = vld [vmem:[%s11593_s9 + $0x270] sm:$0xf] }
 0x39e   :  { %v6924_v59 = vor.u32 %v7728_v19, %v6923_v15  ;;  %v7148_v27 = vor.u32 %v7784_v21, %v7147_v17  ;;  %v6448_v33 = vor.u32 %v7609_v24, %v6447_v23  ;;  %v6672_v34 = vor.u32 %v7665_v5, %v6671_v28  ;;  %v7658_v42 = vld [vmem:[%s11593_s9 + $0x288] sm:$0xf0]  ;;  %v7035_v36 = vld [vmem:[%s11593_s9 + $0x580] sm:$0xf]  ;;  %v6783_v15 = vld [vmem:[%s11593_s9 + $0x388] sm:$0xf] }
 0x39f   :  { %v3031_v1 = vmax.f32 %v3027_v44, 0.0  ;;  %v3032_v26 = vmax.f32 %v3028_v20, 0.0  ;;  %v3033_v57 = vmax.f32 %v3029_v48, 0.0  ;;  %v3034_v58 = vmax.f32 %v3030_v49, 0.0  ;;  %v7714_v44 = vld [vmem:[%s11593_s9 + $0x448] sm:$0xf0] }
 0x3a0   :  { %v6896_v37 = vor.u32 %v7721_v31, %v6895_v30  ;;  %v7120_v38 = vor.u32 %v7777_v62, %v7119_v53  ;;  %v7091_v20 = vld [vmem:[%s11593_s9 + $0x5f0] sm:$0xf]  ;;  %v7770_v48 = vld [vmem:[%s11593_s9 + $0x608] sm:$0xf0]  ;;  %v6420_v49 = vor.u32 %v7602_v55, %v6419_v35  ;;  %v6644_v16 = vor.u32 %v7658_v42, %v6643_v39  ;;  %v7693_v19 = vld [vmem:[%s11593_s9 + $0x3a0] sm:$0xf0] }
 0x3a1   :  { %v10591_v61 = vpack.c.bf16 %v3031_v1, %v3031_v1  ;;  %v10593_v0 = vpack.c.bf16 %v3032_v26, %v3032_v26  ;;  %v10595_v56 = vpack.c.bf16 %v3033_v57, %v3033_v57  ;;  %v10597_v32 = vpack.c.bf16 %v3034_v58, %v3034_v58  ;;  %v7651_v1 = vld [vmem:[%s11593_s9 + $0x250] sm:$0xf0]  ;;  %v6839_v26 = vld [vmem:[%s11593_s9 + $0x3f8] sm:$0xf]  ;;  %v7007_v17 = vld [vmem:[%s11593_s9 + $0x548] sm:$0xf] }
 0x3a2   :  { %v6868_v51 = vor.u32 %v7714_v44, %v6867_v18  ;;  %v7092_v46 = vor.u32 %v7770_v48, %v7091_v20  ;;  %v7707_v57 = vld [vmem:[%s11593_s9 + $0x410] sm:$0xf0]  ;;  %v7063_v58 = vld [vmem:[%s11593_s9 + $0x5b8] sm:$0xf]  ;;  %v7036_v47 = vor.u32 %v7756_v25, %v7035_v36  ;;  %v7749_v21 = vld [vmem:[%s11593_s9 + $0x560] sm:$0xf0]  ;;  %v6784_v53 = vor.u32 %v7693_v19, %v6783_v15 }
 0x3a3   :  { %4471 = vmatmul.bf16.vlgmr.msra.gmra.mxu3 %v10591_v61  ;;  %4484 = vmatmul.bf16.vlgmr.msra.gmra.mxu1 %v10593_v0  ;;  %v7683_v23 = vld [vmem:[%s11593_s9 + $0x354] sm:$0xf]  ;;  %v6757_v24 = vld [vmem:[%s11593_s9 + $0x36c] sm:$0xf0]  ;;  %v7008_v62 = vor.u32 %v7749_v21, %v7007_v17  ;;  %v7620_v35 = vld [vmem:[%s11593_s9 + $0x15c] sm:$0xf] }
 0x3a4   :  { %4497 = vmatmul.bf16.vlgmr.msra.gmra.mxu2 %v10595_v56  ;;  %4510 = vmatmul.bf16.vlgmr.msra.gmra.mxu0 %v10597_v32  ;;  %v6981_v5 = vld [vmem:[%s11593_s9 + $0x52c] sm:$0xf0]  ;;  %v7795_v30 = vld [vmem:[%s11593_s9 + $0x6d4] sm:$0xf]  ;;  %v6505_v55 = vld [vmem:[%s11593_s9 + $0x174] sm:$0xf0] }
 0x3a5   :  { %4567 = vmatpush.bf16.msra.mxu3 %v6532_v43  ;;  %4580 = vmatpush.bf16.msra.mxu1 %v6756_v2  ;;  %v6392_v43 = vor.u32 %v7595_v50, %v6391_v4  ;;  %v6616_v2 = vor.u32 %v7651_v1, %v6615_v54  ;;  %v7205_v31 = vld [vmem:[%s11593_s9 + $0x6ec] sm:$0xf0]  ;;  %v7676_v39 = vld [vmem:[%s11593_s9 + $0x31c] sm:$0xf]  ;;  %v6729_v42 = vld [vmem:[%s11593_s9 + $0x334] sm:$0xf0] }
 0x3a6   :  { %4593 = vmatpush.bf16.msra.mxu2 %v6980_v3  ;;  %4606 = vmatpush.bf16.msra.mxu0 %v7204_v41  ;;  %v6840_v3 = vor.u32 %v7707_v57, %v6839_v26  ;;  %v7064_v41 = vor.u32 %v7763_v60, %v7063_v58  ;;  %v7732_v18 = vld [vmem:[%s11593_s9 + $0x4dc] sm:$0xf]  ;;  %v6953_v44 = vld [vmem:[%s11593_s9 + $0x4f4] sm:$0xf0]  ;;  %v7613_v4 = vld [vmem:[%s11593_s9 + $0x124] sm:$0xf] }
 0x3a7   :  { %v7788_v20 = vld [vmem:[%s11593_s9 + $0x69c] sm:$0xf]  ;;  %v7177_v48 = vld [vmem:[%s11593_s9 + $0x6b4] sm:$0xf0]  ;;  %v6477_v50 = vld [vmem:[%s11593_s9 + $0x13c] sm:$0xf0] }
 0x3a8   :  { %v7669_v54 = vld [vmem:[%s11593_s9 + $0x2e4] sm:$0xf]  ;;  %v6701_v1 = vld [vmem:[%s11593_s9 + $0x2fc] sm:$0xf0]  ;;  %v7662_v6 = vld [vmem:[%s11593_s9 + $0x2ac] sm:$0xf] }
 0x3a9   :  { %4568 = vmatpush.bf16.msra.mxu3 %v6504_v8  ;;  %4581 = vmatpush.bf16.msra.mxu1 %v6728_v9  ;;  %v6335_v8 = vld [vmem:[%s11593_s9 + $0x8] sm:$0xf]  ;;  %v6364_v9 = vor.u32 %v7588_v45, %v6363_v29  ;;  %v7725_v26 = vld [vmem:[%s11593_s9 + $0x4a4] sm:$0xf]  ;;  %v6925_v57 = vld [vmem:[%s11593_s9 + $0x4bc] sm:$0xf0] }
 0x3aa   :  { %4594 = vmatpush.bf16.msra.mxu2 %v6952_v12  ;;  %4607 = vmatpush.bf16.msra.mxu0 %v7176_v13  ;;  %v6559_v12 = vld [vmem:[%s11593_s9 + $0x1c8] sm:$0xf]  ;;  %v7637_v13 = vld [vmem:[%s11593_s9 + $0x1e0] sm:$0xf0]  ;;  %v7149_v60 = vld [vmem:[%s11593_s9 + $0x67c] sm:$0xf0] }
 0x3ab   :  { %v6560_v28 = vor.u32 %v7637_v13, %v6559_v12  ;;  %v7781_v58 = vld [vmem:[%s11593_s9 + $0x664] sm:$0xf]  ;;  %v7606_v29 = vld [vmem:[%s11593_s9 + $0xec] sm:$0xf]  ;;  %v6449_v45 = vld [vmem:[%s11593_s9 + $0x104] sm:$0xf0] }
 0x3ac   :  { %v6673_v7 = vld [vmem:[%s11593_s9 + $0x2c4] sm:$0xf0]  ;;  %v7718_v63 = vld [vmem:[%s11593_s9 + $0x46c] sm:$0xf]  ;;  %v7711_v15 = vld [vmem:[%s11593_s9 + $0x434] sm:$0xf] }
 0x3ad   :  { %4569 = vmatpush.bf16.msra.mxu3 %v6476_v52  ;;  %4582 = vmatpush.bf16.msra.mxu1 %v6700_v22  ;;  %v7627_v52 = vld [vmem:[%s11593_s9 + $0x194] sm:$0xf]  ;;  %v6533_v22 = vld [vmem:[%s11593_s9 + $0x1ac] sm:$0xf0]  ;;  %v6897_v40 = vld [vmem:[%s11593_s9 + $0x484] sm:$0xf0] }
 0x3ae   :  { %4595 = vmatpush.bf16.msra.mxu2 %v6924_v59  ;;  %4608 = vmatpush.bf16.msra.mxu0 %v7148_v27  ;;  %v7739_v59 = vld [vmem:[%s11593_s9 + $0x514] sm:$0xf]  ;;  %v6336_v27 = vor.u32 %v7581_v11, %v6335_v8  ;;  %v7774_v36 = vld [vmem:[%s11593_s9 + $0x62c] sm:$0xf]  ;;  %v7121_v25 = vld [vmem:[%s11593_s9 + $0x644] sm:$0xf0]  ;;  %v6452_v8 = vor.u32 %v7606_v29, %v6449_v45  ;;  %v6900_v12 = vor.u32 %v7718_v63, %v6897_v40 }
 0x3af   :  { %v6421_v11 = vld [vmem:[%s11593_s9 + $0xcc] sm:$0xf0]  ;;  %v7124_v13 = vor.u32 %v7774_v36, %v7121_v25  ;;  %v7767_v17 = vld [vmem:[%s11593_s9 + $0x5f4] sm:$0xf]  ;;  %v6763_v29 = vld [vmem:[%s11593_s9 + $0x358] sm:$0xf] }
 0x3b0   :  { %v6869_v19 = vld [vmem:[%s11593_s9 + $0x44c] sm:$0xf0]  ;;  %v7687_v45 = vld [vmem:[%s11593_s9 + $0x370] sm:$0xf0]  ;;  %v7211_v63 = vld [vmem:[%s11593_s9 + $0x6d8] sm:$0xf] }
 0x3b1   :  { %4570 = vmatpush.bf16.msra.mxu3 %v6448_v33  ;;  %4583 = vmatpush.bf16.msra.mxu1 %v6672_v34  ;;  %v6536_v33 = vor.u32 %v7627_v52, %v6533_v22  ;;  %v6760_v34 = vor.u32 %v7683_v23, %v6757_v24  ;;  %v7093_v21 = vld [vmem:[%s11593_s9 + $0x60c] sm:$0xf0]  ;;  %v7592_v23 = vld [vmem:[%s11593_s9 + $0x7c] sm:$0xf]  ;;  %v6393_v24 = vld [vmem:[%s11593_s9 + $0x94] sm:$0xf0] }
 0x3b2   :  { %4596 = vmatpush.bf16.msra.mxu2 %v6896_v37  ;;  %4609 = vmatpush.bf16.msra.mxu0 %v7120_v38  ;;  %v6984_v37 = vor.u32 %v7739_v59, %v6981_v5  ;;  %v7208_v38 = vor.u32 %v7795_v30, %v7205_v31  ;;  %v6872_v59 = vor.u32 %v7711_v15, %v6869_v19  ;;  %v6617_v5 = vld [vmem:[%s11593_s9 + $0x254] sm:$0xf0]  ;;  %v7704_v30 = vld [vmem:[%s11593_s9 + $0x3fc] sm:$0xf]  ;;  %v7799_v40 = vld [vmem:[%s11593_s9 + $0x6f0] sm:$0xf0] }
 0x3b3   :  { %4523 = vmatmul.bf16.vlgmr.msrb.gmra.mxu3 %v10591_v61  ;;  %4536 = vmatmul.bf16.vlgmr.msrb.gmra.mxu1 %v10593_v0  ;;  %v6841_v31 = vld [vmem:[%s11593_s9 + $0x414] sm:$0xf0]  ;;  %v6959_v15 = vld [vmem:[%s11593_s9 + $0x4e0] sm:$0xf]  ;;  %v7736_v19 = vld [vmem:[%s11593_s9 + $0x4f8] sm:$0xf0] }
 0x3b4   :  { %4549 = vmatmul.bf16.vlgmr.msrb.gmra.mxu2 %v10595_v56  ;;  %4562 = vmatmul.bf16.vlgmr.msrb.gmra.mxu0 %v10597_v32 }
 0x3b5   :  { %4571 = vmatpush.bf16.msra.mxu3 %v6420_v49  ;;  %4584 = vmatpush.bf16.msra.mxu1 %v6644_v16  ;;  %v6508_v49 = vor.u32 %v7620_v35, %v6505_v55  ;;  %v6732_v16 = vor.u32 %v7676_v39, %v6729_v42  ;;  %v7585_v35 = vld [vmem:[%s11593_s9 + $0x44] sm:$0xf]  ;;  %v6365_v55 = vld [vmem:[%s11593_s9 + $0x5c] sm:$0xf0] }
 0x3b6   :  { %4597 = vmatpush.bf16.msra.mxu2 %v6868_v51  ;;  %4610 = vmatpush.bf16.msra.mxu0 %v7092_v46  ;;  %v6956_v51 = vor.u32 %v7732_v18, %v6953_v44  ;;  %v7180_v46 = vor.u32 %v7788_v20, %v7177_v48  ;;  %v7641_v39 = vld [vmem:[%s11593_s9 + $0x204] sm:$0xf]  ;;  %v6589_v42 = vld [vmem:[%s11593_s9 + $0x21c] sm:$0xf0] }
 0x3b7   :  { %v7697_v18 = vld [vmem:[%s11593_s9 + $0x3c4] sm:$0xf]  ;;  %v6813_v44 = vld [vmem:[%s11593_s9 + $0x3dc] sm:$0xf0] }
 0x3b8   :  { %v7753_v20 = vld [vmem:[%s11593_s9 + $0x584] sm:$0xf]  ;;  %v7037_v48 = vld [vmem:[%s11593_s9 + $0x59c] sm:$0xf0] }
 0x3b9   :  { %4572 = vmatpush.bf16.msra.mxu3 %v6392_v43  ;;  %4585 = vmatpush.bf16.msra.mxu1 %v6616_v2  ;;  %v6480_v43 = vor.u32 %v7613_v4, %v6477_v50  ;;  %v6704_v2 = vor.u32 %v7669_v54, %v6701_v1  ;;  %v6592_v4 = vor.u32 %v7641_v39, %v6589_v42  ;;  %v6337_v50 = vld [vmem:[%s11593_s9 + $0x24] sm:$0xf0]  ;;  %v6679_v39 = vld [vmem:[%s11593_s9 + $0x2b0] sm:$0xf]  ;;  %v7666_v42 = vld [vmem:[%s11593_s9 + $0x2c8] sm:$0xf0] }
 0x3ba   :  { %4598 = vmatpush.bf16.msra.mxu2 %v6840_v3  ;;  %4611 = vmatpush.bf16.msra.mxu0 %v7064_v41  ;;  %v6928_v3 = vor.u32 %v7725_v26, %v6925_v57  ;;  %v7152_v41 = vor.u32 %v7781_v58, %v7149_v60  ;;  %v6816_v54 = vor.u32 %v7697_v18, %v6813_v44  ;;  %v7690_v26 = vld [vmem:[%s11593_s9 + $0x38c] sm:$0xf]  ;;  %v6785_v57 = vld [vmem:[%s11593_s9 + $0x3a4] sm:$0xf0]  ;;  %v6903_v18 = vld [vmem:[%s11593_s9 + $0x470] sm:$0xf] }
 0x3bb   :  { %v7040_v1 = vor.u32 %v7753_v20, %v7037_v48  ;;  %v7746_v58 = vld [vmem:[%s11593_s9 + $0x54c] sm:$0xf]  ;;  %v7009_v60 = vld [vmem:[%s11593_s9 + $0x564] sm:$0xf0]  ;;  %v6788_v36 = vor.u32 %v7690_v26, %v6785_v57  ;;  %v7127_v20 = vld [vmem:[%s11593_s9 + $0x630] sm:$0xf] }
 0x3bc   :  { %v7012_v25 = vor.u32 %v7746_v58, %v7009_v60  ;;  %v7722_v44 = vld [vmem:[%s11593_s9 + $0x488] sm:$0xf0]  ;;  %v6875_v26 = vld [vmem:[%s11593_s9 + $0x438] sm:$0xf]  ;;  %v7715_v57 = vld [vmem:[%s11593_s9 + $0x450] sm:$0xf0] }
 0x3bd   :  { %4573 = vmatpush.bf16.msra.mxu3 %v6364_v9  ;;  %4586 = vmatpush.bf16.msra.mxu1 %v6588_v10  ;;  %v6676_v9 = vor.u32 %v7662_v6, %v6673_v7  ;;  %v7599_v10 = vld [vmem:[%s11593_s9 + $0xb4] sm:$0xf]  ;;  %v7778_v48 = vld [vmem:[%s11593_s9 + $0x648] sm:$0xf0]  ;;  %v7099_v58 = vld [vmem:[%s11593_s9 + $0x5f8] sm:$0xf] }
 0x3be   :  { %4599 = vmatpush.bf16.msra.mxu2 %v6812_v14  ;;  %4612 = vmatpush.bf16.msra.mxu0 %v7036_v47  ;;  %v7655_v14 = vld [vmem:[%s11593_s9 + $0x274] sm:$0xf]  ;;  %v6645_v47 = vld [vmem:[%s11593_s9 + $0x28c] sm:$0xf0]  ;;  %v6424_v52 = vor.u32 %v7599_v10, %v6421_v11  ;;  %v6511_v10 = vld [vmem:[%s11593_s9 + $0x160] sm:$0xf] }
 0x3bf   :  { %v6648_v22 = vor.u32 %v7655_v14, %v6645_v47  ;;  %v7743_v7 = vld [vmem:[%s11593_s9 + $0x530] sm:$0xf0]  ;;  %v7624_v11 = vld [vmem:[%s11593_s9 + $0x178] sm:$0xf0]  ;;  %v6735_v14 = vld [vmem:[%s11593_s9 + $0x320] sm:$0xf] }
 0x3c0   :  { %v7680_v47 = vld [vmem:[%s11593_s9 + $0x338] sm:$0xf0]  ;;  %v7771_v60 = vld [vmem:[%s11593_s9 + $0x610] sm:$0xf0] }
 0x3c1   :  { %4574 = vmatpush.bf16.msra.mxu3 %v6336_v27  ;;  %4587 = vmatpush.bf16.msra.mxu1 %v6560_v28  ;;  %v7096_v27 = vor.u32 %v7767_v17, %v7093_v21  ;;  %v7648_v28 = vld [vmem:[%s11593_s9 + $0x23c] sm:$0xf]  ;;  %v7183_v17 = vld [vmem:[%s11593_s9 + $0x6a0] sm:$0xf] }
 0x3c2   :  { %4600 = vmatpush.bf16.msra.mxu2 %v6784_v53  ;;  %4613 = vmatpush.bf16.msra.mxu0 %v7008_v62  ;;  %v7760_v53 = vld [vmem:[%s11593_s9 + $0x5bc] sm:$0xf]  ;;  %v7065_v62 = vld [vmem:[%s11593_s9 + $0x5d4] sm:$0xf0] }
 0x3c3   :  { %v7792_v21 = vld [vmem:[%s11593_s9 + $0x6b8] sm:$0xf0] }
 0x3c4   :  { %4575 = vmatmul.bf16.vlgmr.msra.gmra.mxu3 %v10591_v61  ;;  %4588 = vmatmul.bf16.vlgmr.msra.gmra.mxu1 %v10593_v0 }
 0x3c5   :  { %4619 = vmatpush.bf16.msrb.mxu3 %v6536_v33  ;;  %4632 = vmatpush.bf16.msrb.mxu1 %v6760_v34  ;;  %v6396_v33 = vor.u32 %v7592_v23, %v6393_v24  ;;  %v6620_v34 = vor.u32 %v7648_v28, %v6617_v5  ;;  %v6483_v23 = vld [vmem:[%s11593_s9 + $0x128] sm:$0xf]  ;;  %v7617_v24 = vld [vmem:[%s11593_s9 + $0x140] sm:$0xf0] }
 0x3c6   :  { %4645 = vmatpush.bf16.msrb.mxu2 %v6984_v37  ;;  %4658 = vmatpush.bf16.msrb.mxu0 %v7208_v38  ;;  %v6844_v37 = vor.u32 %v7704_v30, %v6841_v31  ;;  %v7068_v38 = vor.u32 %v7760_v53, %v7065_v62  ;;  %v6707_v28 = vld [vmem:[%s11593_s9 + $0x2e8] sm:$0xf]  ;;  %v7673_v5 = vld [vmem:[%s11593_s9 + $0x300] sm:$0xf0] }
 0x3c7   :  { %4601 = vmatmul.bf16.vlgmr.msra.gmra.mxu2 %v10595_v56  ;;  %4614 = vmatmul.bf16.vlgmr.msra.gmra.mxu0 %v10597_v32  ;;  %v6931_v30 = vld [vmem:[%s11593_s9 + $0x4a8] sm:$0xf]  ;;  %v7729_v31 = vld [vmem:[%s11593_s9 + $0x4c0] sm:$0xf0] }
 0x3c8   :  { %v7155_v53 = vld [vmem:[%s11593_s9 + $0x668] sm:$0xf]  ;;  %v7785_v62 = vld [vmem:[%s11593_s9 + $0x680] sm:$0xf0] }
 0x3c9   :  { %4620 = vmatpush.bf16.msrb.mxu3 %v6508_v49  ;;  %4633 = vmatpush.bf16.msrb.mxu1 %v6732_v16  ;;  %v7578_v49 = vld [vmem:[%s11593_s9 + $0xc] sm:$0xf]  ;;  %v6368_v16 = vor.u32 %v7585_v35, %v6365_v55  ;;  %v6455_v35 = vld [vmem:[%s11593_s9 + $0xf0] sm:$0xf] }
 0x3ca   :  { %4646 = vmatpush.bf16.msrb.mxu2 %v6956_v51  ;;  %4659 = vmatpush.bf16.msrb.mxu0 %v7180_v46  ;;  %v7634_v51 = vld [vmem:[%s11593_s9 + $0x1cc] sm:$0xf]  ;;  %v6561_v46 = vld [vmem:[%s11593_s9 + $0x1e4] sm:$0xf0] }
 0x3cb   :  { %v6564_v6 = vor.u32 %v7634_v51, %v6561_v46  ;;  %v7610_v55 = vld [vmem:[%s11593_s9 + $0x108] sm:$0xf0]  ;;  %v6904_v51 = vor.u32 %v7722_v44, %v6903_v18  ;;  %v7128_v46 = vor.u32 %v7778_v48, %v7127_v20  ;;  %v7796_v18 = vld [vmem:[%s11593_s9 + $0x6dc] sm:$0xf]  ;;  %v7213_v44 = vld [vmem:[%s11593_s9 + $0x6f4] sm:$0xf0] }
 0x3cd   :  { %4621 = vmatpush.bf16.msrb.mxu3 %v6480_v43  ;;  %4634 = vmatpush.bf16.msrb.mxu1 %v6704_v2  ;;  %v6539_v43 = vld [vmem:[%s11593_s9 + $0x198] sm:$0xf]  ;;  %v7631_v2 = vld [vmem:[%s11593_s9 + $0x1b0] sm:$0xf0] }
 0x3ce   :  { %4647 = vmatpush.bf16.msrb.mxu2 %v6928_v3  ;;  %4660 = vmatpush.bf16.msrb.mxu0 %v7152_v41  ;;  %v6987_v3 = vld [vmem:[%s11593_s9 + $0x518] sm:$0xf]  ;;  %v6340_v41 = vor.u32 %v7578_v49, %v6337_v50  ;;  %v6456_v49 = vor.u32 %v7610_v55, %v6455_v35  ;;  %v7603_v50 = vld [vmem:[%s11593_s9 + $0xd0] sm:$0xf0]  ;;  %v7684_v35 = vld [vmem:[%s11593_s9 + $0x35c] sm:$0xf] }
 0x3cf   :  { %v6765_v55 = vld [vmem:[%s11593_s9 + $0x374] sm:$0xf0] }
 0x3d1   :  { %4622 = vmatpush.bf16.msrb.mxu3 %v6452_v8  ;;  %4635 = vmatpush.bf16.msrb.mxu1 %v6676_v9  ;;  %v6540_v8 = vor.u32 %v7631_v2, %v6539_v43  ;;  %v6764_v9 = vor.u32 %v7687_v45, %v6763_v29  ;;  %v6399_v29 = vld [vmem:[%s11593_s9 + $0x80] sm:$0xf]  ;;  %v7596_v45 = vld [vmem:[%s11593_s9 + $0x98] sm:$0xf0] }
 0x3d2   :  { %4648 = vmatpush.bf16.msrb.mxu2 %v6900_v12  ;;  %4661 = vmatpush.bf16.msrb.mxu0 %v7124_v13  ;;  %v6988_v12 = vor.u32 %v7743_v7, %v6987_v3  ;;  %v7212_v13 = vor.u32 %v7799_v40, %v7211_v63  ;;  %v6876_v3 = vor.u32 %v7715_v57, %v6875_v26  ;;  %v7652_v7 = vld [vmem:[%s11593_s9 + $0x258] sm:$0xf0]  ;;  %v6847_v63 = vld [vmem:[%s11593_s9 + $0x400] sm:$0xf]  ;;  %v7733_v26 = vld [vmem:[%s11593_s9 + $0x4e4] sm:$0xf] }
 0x3d3   :  { %v7708_v40 = vld [vmem:[%s11593_s9 + $0x418] sm:$0xf0]  ;;  %v6961_v57 = vld [vmem:[%s11593_s9 + $0x4fc] sm:$0xf0] }
 0x3d5   :  { %4623 = vmatpush.bf16.msrb.mxu3 %v6424_v52  ;;  %4636 = vmatpush.bf16.msrb.mxu1 %v6648_v22  ;;  %v6512_v52 = vor.u32 %v7624_v11, %v6511_v10  ;;  %v6736_v22 = vor.u32 %v7680_v47, %v6735_v14  ;;  %v6371_v10 = vld [vmem:[%s11593_s9 + $0x48] sm:$0xf]  ;;  %v7589_v11 = vld [vmem:[%s11593_s9 + $0x60] sm:$0xf0] }
 0x3d6   :  { %4649 = vmatpush.bf16.msrb.mxu2 %v6872_v59  ;;  %4662 = vmatpush.bf16.msrb.mxu0 %v7096_v27  ;;  %v6960_v59 = vor.u32 %v7736_v19, %v6959_v15  ;;  %v7184_v27 = vor.u32 %v7792_v21, %v7183_v17  ;;  %v6595_v14 = vld [vmem:[%s11593_s9 + $0x208] sm:$0xf]  ;;  %v7645_v47 = vld [vmem:[%s11593_s9 + $0x220] sm:$0xf0] }
 0x3d7   :  { %v6819_v15 = vld [vmem:[%s11593_s9 + $0x3c8] sm:$0xf]  ;;  %v7701_v19 = vld [vmem:[%s11593_s9 + $0x3e0] sm:$0xf0] }
 0x3d8   :  { %v7043_v17 = vld [vmem:[%s11593_s9 + $0x588] sm:$0xf]  ;;  %v7757_v21 = vld [vmem:[%s11593_s9 + $0x5a0] sm:$0xf0] }
 0x3d9   :  { %4624 = vmatpush.bf16.msrb.mxu3 %v6396_v33  ;;  %4637 = vmatpush.bf16.msrb.mxu1 %v6620_v34  ;;  %v6484_v33 = vor.u32 %v7617_v24, %v6483_v23  ;;  %v6708_v34 = vor.u32 %v7673_v5, %v6707_v28  ;;  %v6596_v23 = vor.u32 %v7645_v47, %v6595_v14  ;;  %v7582_v24 = vld [vmem:[%s11593_s9 + $0x28] sm:$0xf0]  ;;  %v7663_v14 = vld [vmem:[%s11593_s9 + $0x2b4] sm:$0xf]  ;;  %v6681_v47 = vld [vmem:[%s11593_s9 + $0x2cc] sm:$0xf0] }
 0x3da   :  { %4650 = vmatpush.bf16.msrb.mxu2 %v6844_v37  ;;  %4663 = vmatpush.bf16.msrb.mxu0 %v7068_v38  ;;  %v6932_v37 = vor.u32 %v7729_v31, %v6931_v30  ;;  %v7156_v38 = vor.u32 %v7785_v62, %v7155_v53  ;;  %v6820_v28 = vor.u32 %v7701_v19, %v6819_v15  ;;  %v6791_v30 = vld [vmem:[%s11593_s9 + $0x390] sm:$0xf]  ;;  %v7694_v31 = vld [vmem:[%s11593_s9 + $0x3a8] sm:$0xf0]  ;;  %v7719_v15 = vld [vmem:[%s11593_s9 + $0x474] sm:$0xf] }
 0x3db   :  { %v7044_v5 = vor.u32 %v7757_v21, %v7043_v17  ;;  %v7015_v53 = vld [vmem:[%s11593_s9 + $0x550] sm:$0xf]  ;;  %v7750_v62 = vld [vmem:[%s11593_s9 + $0x568] sm:$0xf0]  ;;  %v6792_v20 = vor.u32 %v7694_v31, %v6791_v30  ;;  %v7775_v17 = vld [vmem:[%s11593_s9 + $0x634] sm:$0xf] }
 0x3dc   :  { %v7016_v48 = vor.u32 %v7750_v62, %v7015_v53  ;;  %v6905_v19 = vld [vmem:[%s11593_s9 + $0x48c] sm:$0xf0]  ;;  %v7712_v30 = vld [vmem:[%s11593_s9 + $0x43c] sm:$0xf]  ;;  %v6877_v31 = vld [vmem:[%s11593_s9 + $0x454] sm:$0xf0] }
 0x3dd   :  { %4625 = vmatpush.bf16.msrb.mxu3 %v6368_v16  ;;  %4638 = vmatpush.bf16.msrb.mxu1 %v6592_v4  ;;  %v6680_v16 = vor.u32 %v7666_v42, %v6679_v39  ;;  %v6427_v4 = vld [vmem:[%s11593_s9 + $0xb8] sm:$0xf]  ;;  %v7129_v21 = vld [vmem:[%s11593_s9 + $0x64c] sm:$0xf0]  ;;  %v7768_v53 = vld [vmem:[%s11593_s9 + $0x5fc] sm:$0xf] }
 0x3de   :  { %4651 = vmatpush.bf16.msrb.mxu2 %v6816_v54  ;;  %4664 = vmatpush.bf16.msrb.mxu0 %v7040_v1  ;;  %v6651_v54 = vld [vmem:[%s11593_s9 + $0x278] sm:$0xf]  ;;  %v7659_v1 = vld [vmem:[%s11593_s9 + $0x290] sm:$0xf0]  ;;  %v6428_v43 = vor.u32 %v7603_v50, %v6427_v4  ;;  %v7621_v4 = vld [vmem:[%s11593_s9 + $0x164] sm:$0xf] }
 0x3df   :  { %v6652_v2 = vor.u32 %v7659_v1, %v6651_v54  ;;  %v6989_v42 = vld [vmem:[%s11593_s9 + $0x534] sm:$0xf0]  ;;  %v6513_v50 = vld [vmem:[%s11593_s9 + $0x17c] sm:$0xf0]  ;;  %v7677_v54 = vld [vmem:[%s11593_s9 + $0x324] sm:$0xf] }
 0x3e0   :  { %v6737_v1 = vld [vmem:[%s11593_s9 + $0x33c] sm:$0xf0]  ;;  %v7101_v62 = vld [vmem:[%s11593_s9 + $0x614] sm:$0xf0] }
 0x3e1   :  { %4626 = vmatpush.bf16.msrb.mxu3 %v6340_v41  ;;  %4639 = vmatpush.bf16.msrb.mxu1 %v6564_v6  ;;  %v7100_v41 = vor.u32 %v7771_v60, %v7099_v58  ;;  %v6623_v6 = vld [vmem:[%s11593_s9 + $0x240] sm:$0xf]  ;;  %v7789_v58 = vld [vmem:[%s11593_s9 + $0x6a4] sm:$0xf] }
 0x3e2   :  { %4652 = vmatpush.bf16.msrb.mxu2 %v6788_v36  ;;  %4665 = vmatpush.bf16.msrb.mxu0 %v7012_v25  ;;  %v7071_v36 = vld [vmem:[%s11593_s9 + $0x5c0] sm:$0xf]  ;;  %v7764_v25 = vld [vmem:[%s11593_s9 + $0x5d8] sm:$0xf0] }
 0x3e3   :  { %v7185_v60 = vld [vmem:[%s11593_s9 + $0x6bc] sm:$0xf0] }
 0x3e4   :  { %4627 = vmatmul.bf16.vlgmr.msrb.gmra.mxu3 %v10591_v61  ;;  %4640 = vmatmul.bf16.vlgmr.msrb.gmra.mxu1 %v10593_v0 }
 0x3e5   :  { %4671 = vmatpush.bf16.msra.mxu3 %v6540_v8  ;;  %4684 = vmatpush.bf16.msra.mxu1 %v6764_v9  ;;  %v6400_v8 = vor.u32 %v7596_v45, %v6399_v29  ;;  %v6624_v9 = vor.u32 %v7652_v7, %v6623_v6  ;;  %v7614_v29 = vld [vmem:[%s11593_s9 + $0x12c] sm:$0xf]  ;;  %v6485_v45 = vld [vmem:[%s11593_s9 + $0x144] sm:$0xf0] }
 0x3e6   :  { %4697 = vmatpush.bf16.msra.mxu2 %v6988_v12  ;;  %4710 = vmatpush.bf16.msra.mxu0 %v7212_v13  ;;  %v6848_v12 = vor.u32 %v7708_v40, %v6847_v63  ;;  %v7072_v13 = vor.u32 %v7764_v25, %v7071_v36  ;;  %v7670_v6 = vld [vmem:[%s11593_s9 + $0x2ec] sm:$0xf]  ;;  %v6709_v7 = vld [vmem:[%s11593_s9 + $0x304] sm:$0xf0] }
 0x3e7   :  { %4653 = vmatmul.bf16.vlgmr.msrb.gmra.mxu2 %v10595_v56  ;;  %4666 = vmatmul.bf16.vlgmr.msrb.gmra.mxu0 %v10597_v32  ;;  %v7726_v63 = vld [vmem:[%s11593_s9 + $0x4ac] sm:$0xf]  ;;  %v6933_v40 = vld [vmem:[%s11593_s9 + $0x4c4] sm:$0xf0] }
 0x3e8   :  { %v7782_v36 = vld [vmem:[%s11593_s9 + $0x66c] sm:$0xf]  ;;  %v7157_v25 = vld [vmem:[%s11593_s9 + $0x684] sm:$0xf0] }
 0x3e9   :  { %4672 = vmatpush.bf16.msra.mxu3 %v6512_v52  ;;  %4685 = vmatpush.bf16.msra.mxu1 %v6736_v22  ;;  %v6343_v52 = vld [vmem:[%s11593_s9 + $0x10] sm:$0xf]  ;;  %v6372_v22 = vor.u32 %v7589_v11, %v6371_v10  ;;  %v7607_v10 = vld [vmem:[%s11593_s9 + $0xf4] sm:$0xf] }
 0x3ea   :  { %4698 = vmatpush.bf16.msra.mxu2 %v6960_v59  ;;  %4711 = vmatpush.bf16.msra.mxu0 %v7184_v27  ;;  %v6567_v59 = vld [vmem:[%s11593_s9 + $0x1d0] sm:$0xf]  ;;  %v7638_v27 = vld [vmem:[%s11593_s9 + $0x1e8] sm:$0xf0] }
 0x3eb   :  { %v6568_v39 = vor.u32 %v7638_v27, %v6567_v59  ;;  %v6457_v11 = vld [vmem:[%s11593_s9 + $0x10c] sm:$0xf0]  ;;  %v6908_v59 = vor.u32 %v7719_v15, %v6905_v19  ;;  %v7132_v27 = vor.u32 %v7775_v17, %v7129_v21  ;;  %v7219_v15 = vld [vmem:[%s11593_s9 + $0x6e0] sm:$0xf]  ;;  %v7800_v19 = vld [vmem:[%s11593_s9 + $0x6f8] sm:$0xf0] }
 0x3ed   :  { %4673 = vmatpush.bf16.msra.mxu3 %v6484_v33  ;;  %4686 = vmatpush.bf16.msra.mxu1 %v6708_v34  ;;  %v7628_v33 = vld [vmem:[%s11593_s9 + $0x19c] sm:$0xf]  ;;  %v6541_v34 = vld [vmem:[%s11593_s9 + $0x1b4] sm:$0xf0] }
 0x3ee   :  { %4699 = vmatpush.bf16.msra.mxu2 %v6932_v37  ;;  %4712 = vmatpush.bf16.msra.mxu0 %v7156_v38  ;;  %v7740_v37 = vld [vmem:[%s11593_s9 + $0x51c] sm:$0xf]  ;;  %v6344_v38 = vor.u32 %v7582_v24, %v6343_v52  ;;  %v6460_v52 = vor.u32 %v7607_v10, %v6457_v11  ;;  %v6429_v24 = vld [vmem:[%s11593_s9 + $0xd4] sm:$0xf0]  ;;  %v6771_v10 = vld [vmem:[%s11593_s9 + $0x360] sm:$0xf] }
 0x3ef   :  { %v7688_v11 = vld [vmem:[%s11593_s9 + $0x378] sm:$0xf0] }
 0x3f1   :  { %4674 = vmatpush.bf16.msra.mxu3 %v6456_v49  ;;  %4687 = vmatpush.bf16.msra.mxu1 %v6680_v16  ;;  %v6544_v49 = vor.u32 %v7628_v33, %v6541_v34  ;;  %v6768_v16 = vor.u32 %v7684_v35, %v6765_v55  ;;  %v7593_v35 = vld [vmem:[%s11593_s9 + $0x84] sm:$0xf]  ;;  %v6401_v55 = vld [vmem:[%s11593_s9 + $0x9c] sm:$0xf0] }
 0x3f2   :  { %4700 = vmatpush.bf16.msra.mxu2 %v6904_v51  ;;  %4713 = vmatpush.bf16.msra.mxu0 %v7128_v46  ;;  %v6992_v51 = vor.u32 %v7740_v37, %v6989_v42  ;;  %v7216_v46 = vor.u32 %v7796_v18, %v7213_v44  ;;  %v6880_v37 = vor.u32 %v7712_v30, %v6877_v31  ;;  %v6625_v42 = vld [vmem:[%s11593_s9 + $0x25c] sm:$0xf0]  ;;  %v7705_v18 = vld [vmem:[%s11593_s9 + $0x404] sm:$0xf]  ;;  %v6967_v30 = vld [vmem:[%s11593_s9 + $0x4e8] sm:$0xf] }
 0x3f3   :  { %v6849_v44 = vld [vmem:[%s11593_s9 + $0x41c] sm:$0xf0]  ;;  %v7737_v31 = vld [vmem:[%s11593_s9 + $0x500] sm:$0xf0] }
 0x3f5   :  { %4675 = vmatpush.bf16.msra.mxu3 %v6428_v43  ;;  %4688 = vmatpush.bf16.msra.mxu1 %v6652_v2  ;;  %v6516_v43 = vor.u32 %v7621_v4, %v6513_v50  ;;  %v6740_v2 = vor.u32 %v7677_v54, %v6737_v1  ;;  %v7586_v4 = vld [vmem:[%s11593_s9 + $0x4c] sm:$0xf]  ;;  %v6373_v50 = vld [vmem:[%s11593_s9 + $0x64] sm:$0xf0] }
 0x3f6   :  { %4701 = vmatpush.bf16.msra.mxu2 %v6876_v3  ;;  %4714 = vmatpush.bf16.msra.mxu0 %v7100_v41  ;;  %v6964_v3 = vor.u32 %v7733_v26, %v6961_v57  ;;  %v7188_v41 = vor.u32 %v7789_v58, %v7185_v60  ;;  %v7642_v54 = vld [vmem:[%s11593_s9 + $0x20c] sm:$0xf]  ;;  %v6597_v1 = vld [vmem:[%s11593_s9 + $0x224] sm:$0xf0] }
 0x3f7   :  { %v7698_v26 = vld [vmem:[%s11593_s9 + $0x3cc] sm:$0xf]  ;;  %v6821_v57 = vld [vmem:[%s11593_s9 + $0x3e4] sm:$0xf0] }
 0x3f8   :  { %v7754_v58 = vld [vmem:[%s11593_s9 + $0x58c] sm:$0xf]  ;;  %v7045_v60 = vld [vmem:[%s11593_s9 + $0x5a4] sm:$0xf0] }
 0x3f9   :  { %4676 = vmatpush.bf16.msra.mxu3 %v6400_v8  ;;  %4689 = vmatpush.bf16.msra.mxu1 %v6624_v9  ;;  %v6488_v8 = vor.u32 %v7614_v29, %v6485_v45  ;;  %v6712_v9 = vor.u32 %v7670_v6, %v6709_v7  ;;  %v6600_v29 = vor.u32 %v7642_v54, %v6597_v1  ;;  %v6345_v45 = vld [vmem:[%s11593_s9 + $0x2c] sm:$0xf0]  ;;  %v6687_v54 = vld [vmem:[%s11593_s9 + $0x2b8] sm:$0xf] }
 0x3fa   :  { %4702 = vmatpush.bf16.msra.mxu2 %v6848_v12  ;;  %4715 = vmatpush.bf16.msra.mxu0 %v7072_v13  ;;  %v6936_v12 = vor.u32 %v7726_v63, %v6933_v40  ;;  %v7160_v13 = vor.u32 %v7782_v36, %v7157_v25  ;;  %v6824_v6 = vor.u32 %v7698_v26, %v6821_v57  ;;  %v7691_v63 = vld [vmem:[%s11593_s9 + $0x394] sm:$0xf]  ;;  %v6793_v40 = vld [vmem:[%s11593_s9 + $0x3ac] sm:$0xf0] }
 0x3fb   :  { %v7048_v7 = vor.u32 %v7754_v58, %v7045_v60  ;;  %v7747_v36 = vld [vmem:[%s11593_s9 + $0x554] sm:$0xf]  ;;  %v7017_v25 = vld [vmem:[%s11593_s9 + $0x56c] sm:$0xf0]  ;;  %v6796_v17 = vor.u32 %v7691_v63, %v6793_v40  ;;  %v6911_v58 = vld [vmem:[%s11593_s9 + $0x478] sm:$0xf] }
 0x3fc   :  { %v7020_v21 = vor.u32 %v7747_v36, %v7017_v25  ;;  %v7667_v57 = vld [vmem:[%s11593_s9 + $0x2d0] sm:$0xf0]  ;;  %v11459_v60 = vld [vmem:[%s11594_s10] sm:$0x7f] }
 0x3fd   :  { %4677 = vmatpush.bf16.msra.mxu3 %v6372_v22  ;;  %4690 = vmatpush.bf16.msra.mxu1 %v6596_v23  ;;  %v6684_v22 = vor.u32 %v7663_v14, %v6681_v47  ;;  %v7600_v23 = vld [vmem:[%s11593_s9 + $0xbc] sm:$0xf]  ;;  %v6659_v25 = vld [vmem:[%s11593_s9 + $0x280] sm:$0xf] }
 0x3fe   :  { %4703 = vmatpush.bf16.msra.mxu2 %v6820_v28  ;;  %4716 = vmatpush.bf16.msra.mxu0 %v7044_v5  ;;  %v7656_v28 = vld [vmem:[%s11593_s9 + $0x27c] sm:$0xf]  ;;  %v6653_v5 = vld [vmem:[%s11593_s9 + $0x294] sm:$0xf0]  ;;  %v6432_v33 = vor.u32 %v7600_v23, %v6429_v24  ;;  %v6519_v23 = vld [vmem:[%s11593_s9 + $0x168] sm:$0xf] }
 0x3ff   :  { %v6656_v34 = vor.u32 %v7656_v28, %v6653_v5  ;;  %v7744_v47 = vld [vmem:[%s11593_s9 + $0x538] sm:$0xf0]  ;;  %v7625_v24 = vld [vmem:[%s11593_s9 + $0x180] sm:$0xf0]  ;;  %v6743_v28 = vld [vmem:[%s11593_s9 + $0x328] sm:$0xf] }
 0x400   :  { %v7681_v5 = vld [vmem:[%s11593_s9 + $0x340] sm:$0xf0] }
 0x401   :  { %4678 = vmatpush.bf16.msra.mxu3 %v6344_v38  ;;  %4691 = vmatpush.bf16.msra.mxu1 %v6568_v39  ;;  %v7104_v38 = vor.u32 %v7768_v53, %v7101_v62  ;;  %v7649_v39 = vld [vmem:[%s11593_s9 + $0x244] sm:$0xf]  ;;  %v7191_v53 = vld [vmem:[%s11593_s9 + $0x6a8] sm:$0xf] }
 0x402   :  { %4704 = vmatpush.bf16.msra.mxu2 %v6792_v20  ;;  %4717 = vmatpush.bf16.msra.mxu0 %v7016_v48  ;;  %v7761_v20 = vld [vmem:[%s11593_s9 + $0x5c4] sm:$0xf]  ;;  %v7073_v48 = vld [vmem:[%s11593_s9 + $0x5dc] sm:$0xf0] }
 0x403   :  { %v7793_v62 = vld [vmem:[%s11593_s9 + $0x6c0] sm:$0xf0] }
 0x404   :  { %4679 = vmatmul.bf16.vlgmr.msra.gmra.mxu3 %v10591_v61  ;;  %4692 = vmatmul.bf16.vlgmr.msra.gmra.mxu1 %v10593_v0 }
 0x405   :  { %4723 = vmatpush.bf16.msrb.mxu3 %v6544_v49  ;;  %4736 = vmatpush.bf16.msrb.mxu1 %v6768_v16  ;;  %v6404_v49 = vor.u32 %v7593_v35, %v6401_v55  ;;  %v6628_v16 = vor.u32 %v7649_v39, %v6625_v42  ;;  %v6491_v35 = vld [vmem:[%s11593_s9 + $0x130] sm:$0xf]  ;;  %v7618_v55 = vld [vmem:[%s11593_s9 + $0x148] sm:$0xf0] }
 0x406   :  { %4749 = vmatpush.bf16.msrb.mxu2 %v6992_v51  ;;  %4762 = vmatpush.bf16.msrb.mxu0 %v7216_v46  ;;  %v6852_v51 = vor.u32 %v7705_v18, %v6849_v44  ;;  %v7076_v46 = vor.u32 %v7761_v20, %v7073_v48  ;;  %v6715_v39 = vld [vmem:[%s11593_s9 + $0x2f0] sm:$0xf]  ;;  %v7674_v42 = vld [vmem:[%s11593_s9 + $0x308] sm:$0xf0] }
 0x407   :  { %4705 = vmatmul.bf16.vlgmr.msra.gmra.mxu2 %v10595_v56  ;;  %4718 = vmatmul.bf16.vlgmr.msra.gmra.mxu0 %v10597_v32  ;;  %v6939_v18 = vld [vmem:[%s11593_s9 + $0x4b0] sm:$0xf]  ;;  %v7730_v44 = vld [vmem:[%s11593_s9 + $0x4c8] sm:$0xf0] }
 0x408   :  { %v7163_v20 = vld [vmem:[%s11593_s9 + $0x670] sm:$0xf]  ;;  %v7786_v48 = vld [vmem:[%s11593_s9 + $0x688] sm:$0xf0]  ;;  %v6940_v1 = vor.u32 %v7730_v44, %v6939_v18 }
 0x409   :  { %4724 = vmatpush.bf16.msrb.mxu3 %v6516_v43  ;;  %4737 = vmatpush.bf16.msrb.mxu1 %v6740_v2  ;;  %v7579_v43 = vld [vmem:[%s11593_s9 + $0x14] sm:$0xf]  ;;  %v6376_v2 = vor.u32 %v7586_v4, %v6373_v50  ;;  %v6716_v4 = vor.u32 %v7674_v42, %v6715_v39  ;;  %v7164_v26 = vor.u32 %v7786_v48, %v7163_v20  ;;  %v7646_v39 = vld [vmem:[%s11593_s9 + $0x228] sm:$0xf0]  ;;  %v6827_v42 = vld [vmem:[%s11593_s9 + $0x3d0] sm:$0xf] }
 0x40a   :  { %4750 = vmatpush.bf16.msrb.mxu2 %v6964_v3  ;;  %4763 = vmatpush.bf16.msrb.mxu0 %v7188_v41  ;;  %v7635_v3 = vld [vmem:[%s11593_s9 + $0x1d4] sm:$0xf]  ;;  %v6569_v41 = vld [vmem:[%s11593_s9 + $0x1ec] sm:$0xf0]  ;;  %v7702_v44 = vld [vmem:[%s11593_s9 + $0x3e8] sm:$0xf0] }
 0x40b   :  { %v6572_v14 = vor.u32 %v7635_v3, %v6569_v41  ;;  %v6688_v3 = vor.u32 %v7667_v57, %v6687_v54  ;;  %v3297_v41 = vperm.slane %v11459_v60, 0  ;;  %v7051_v20 = vld [vmem:[%s11593_s9 + $0x590] sm:$0xf]  ;;  %v7758_v48 = vld [vmem:[%s11593_s9 + $0x5a8] sm:$0xf0]  ;;  %v6828_v57 = vor.u32 %v7702_v44, %v6827_v42 }
 0x40c   :  { %v6351_v54 = vld [vmem:[%s11593_s9 + $0x18] sm:$0xf] }
 0x40d   :  { %4725 = vmatpush.bf16.msrb.mxu3 %v6488_v8  ;;  %4738 = vmatpush.bf16.msrb.mxu1 %v6712_v9  ;;  %v6547_v8 = vld [vmem:[%s11593_s9 + $0x1a0] sm:$0xf]  ;;  %v7632_v9 = vld [vmem:[%s11593_s9 + $0x1b8] sm:$0xf0] }
 0x40e   :  { %4751 = vmatpush.bf16.msrb.mxu2 %v6936_v12  ;;  %4764 = vmatpush.bf16.msrb.mxu0 %v7160_v13  ;;  %v6995_v12 = vld [vmem:[%s11593_s9 + $0x520] sm:$0xf]  ;;  %v6348_v13 = vor.u32 %v7579_v43, %v6345_v45  ;;  %v7723_v43 = vld [vmem:[%s11593_s9 + $0x490] sm:$0xf0] }
 0x40f   :  { %v6912_v63 = vor.u32 %v7723_v43, %v6911_v58  ;;  %v7052_v58 = vor.u32 %v7758_v48, %v7051_v20  ;;  %v7639_v43 = vld [vmem:[%s11593_s9 + $0x1f0] sm:$0xf0] }
 0x411   :  { %4726 = vmatpush.bf16.msrb.mxu3 %v6460_v52  ;;  %4739 = vmatpush.bf16.msrb.mxu1 %v6684_v22  ;;  %v6548_v52 = vor.u32 %v7632_v9, %v6547_v8  ;;  %v6772_v22 = vor.u32 %v7688_v11, %v6771_v10  ;;  %v7660_v8 = vld [vmem:[%s11593_s9 + $0x298] sm:$0xf0]  ;;  %v6883_v9 = vld [vmem:[%s11593_s9 + $0x440] sm:$0xf] }
 0x412   :  { %4752 = vmatpush.bf16.msrb.mxu2 %v6908_v59  ;;  %4765 = vmatpush.bf16.msrb.mxu0 %v7132_v27  ;;  %v6996_v59 = vor.u32 %v7744_v47, %v6995_v12  ;;  %v7220_v27 = vor.u32 %v7800_v19, %v7219_v15  ;;  %v7716_v11 = vld [vmem:[%s11593_s9 + $0x458] sm:$0xf0]  ;;  %v7107_v12 = vld [vmem:[%s11593_s9 + $0x600] sm:$0xf]  ;;  %v6660_v19 = vor.u32 %v7660_v8, %v6659_v25 }
 0x415   :  { %4727 = vmatpush.bf16.msrb.mxu3 %v6432_v33  ;;  %4740 = vmatpush.bf16.msrb.mxu1 %v6656_v34  ;;  %v6520_v33 = vor.u32 %v7625_v24, %v6519_v23  ;;  %v6744_v34 = vor.u32 %v7681_v5, %v6743_v28  ;;  %v6631_v24 = vld [vmem:[%s11593_s9 + $0x248] sm:$0xf]  ;;  %v7709_v28 = vld [vmem:[%s11593_s9 + $0x420] sm:$0xf0] }
 0x416   :  { %4753 = vmatpush.bf16.msrb.mxu2 %v6880_v37  ;;  %4766 = vmatpush.bf16.msrb.mxu0 %v7104_v38  ;;  %v6968_v37 = vor.u32 %v7737_v31, %v6967_v30  ;;  %v7192_v38 = vor.u32 %v7793_v62, %v7191_v53  ;;  %v7079_v5 = vld [vmem:[%s11593_s9 + $0x5c8] sm:$0xf]  ;;  %v7765_v30 = vld [vmem:[%s11593_s9 + $0x5e0] sm:$0xf0] }
 0x419   :  { %4728 = vmatpush.bf16.msrb.mxu3 %v6404_v49  ;;  %4741 = vmatpush.bf16.msrb.mxu1 %v6628_v16  ;;  %v6492_v16 = vor.u32 %v7618_v55, %v6491_v35  ;;  %v7080_v55 = vor.u32 %v7765_v30, %v7079_v5 }
 0x41a   :  { %4754 = vmatpush.bf16.msrb.mxu2 %v6852_v51  ;;  %4767 = vmatpush.bf16.msrb.mxu0 %v7076_v46  ;;  %v6463_v51 = vld [vmem:[%s11593_s9 + $0xf8] sm:$0xf]  ;;  %v7611_v46 = vld [vmem:[%s11593_s9 + $0x110] sm:$0xf0] }
 0x41b   :  { %v6464_v45 = vor.u32 %v7611_v46, %v6463_v51 }
 0x41d   :  { %4729 = vmatpush.bf16.msrb.mxu3 %v6376_v2  ;;  %4742 = vmatpush.bf16.msrb.mxu1 %v6600_v29  ;;  %v7135_v2 = vld [vmem:[%s11593_s9 + $0x638] sm:$0xf]  ;;  %v7779_v29 = vld [vmem:[%s11593_s9 + $0x650] sm:$0xf0] }
 0x41e   :  { %4755 = vmatpush.bf16.msrb.mxu2 %v6824_v6  ;;  %4768 = vmatpush.bf16.msrb.mxu0 %v7048_v7  ;;  %v6435_v6 = vld [vmem:[%s11593_s9 + $0xc0] sm:$0xf]  ;;  %v7604_v7 = vld [vmem:[%s11593_s9 + $0xd8] sm:$0xf0]  ;;  %v7136_v40 = vor.u32 %v7779_v29, %v7135_v2  ;;  %v6799_v2 = vld [vmem:[%s11593_s9 + $0x398] sm:$0xf] }
 0x41f   :  { %v6436_v15 = vor.u32 %v7604_v7, %v6435_v6  ;;  %v7695_v29 = vld [vmem:[%s11593_s9 + $0x3b0] sm:$0xf0] }
 0x420   :  { %v4485_v49 = vpop.f32.mrf.mxu1 }
 0x421   :  { %4730 = vmatpush.bf16.msrb.mxu3 %v6348_v13  ;;  %4743 = vmatpush.bf16.msrb.mxu1 %v6572_v14  ;;  %v11439_v50 = vpop.f32.mrf.mxu0  ;;  %v7772_v13 = vld [vmem:[%s11593_s9 + $0x618] sm:$0xf0] }
 0x422   :  { %4756 = vmatpush.bf16.msrb.mxu2 %v6796_v17  ;;  %4769 = vmatpush.bf16.msrb.mxu0 %v7020_v21  ;;  %v6407_v21 = vld [vmem:[%s11593_s9 + $0x88] sm:$0xf]  ;;  %v7108_v23 = vor.u32 %v7772_v13, %v7107_v12 }
 0x424   :  { %4731 = vmatmul.bf16.vlgmr.msrb.gmra.mxu3 %v10591_v61  ;;  %4744 = vmatmul.bf16.vlgmr.msrb.gmra.mxu1 %v10593_v0 }
 0x425   :  { %4775 = vmatpush.bf16.msra.mxu3 %v6548_v52  ;;  %4788 = vmatpush.bf16.msra.mxu1 %v6772_v22  ;;  %v7597_v52 = vld [vmem:[%s11593_s9 + $0xa0] sm:$0xf0]  ;;  %v6884_v22 = vor.u32 %v7716_v11, %v6883_v9 }
 0x426   :  { %4801 = vmatpush.bf16.msra.mxu2 %v6996_v59  ;;  %4814 = vmatpush.bf16.msra.mxu0 %v7220_v27  ;;  %v4472_v36 = vpop.f32.mrf.mxu3  ;;  %v7653_v59 = vld [vmem:[%s11593_s9 + $0x260] sm:$0xf0]  ;;  %v6855_v27 = vld [vmem:[%s11593_s9 + $0x408] sm:$0xf]  ;;  %v6408_v53 = vor.u32 %v7597_v52, %v6407_v21 }
 0x427   :  { %4757 = vmatmul.bf16.vlgmr.msrb.gmra.mxu2 %v10595_v56  ;;  %4770 = vmatmul.bf16.vlgmr.msrb.gmra.mxu0 %v10597_v32  ;;  %v4498_v10 = vpop.f32.mrf.mxu2  ;;  %v4473_v47 = vadd.f32 %v4472_v36, %v3297_v41  ;;  %v6632_v62 = vor.u32 %v7653_v59, %v6631_v24  ;;  %v6856_v35 = vor.u32 %v7709_v28, %v6855_v27  ;;  %v3298_v41 = vperm.slane %v11459_v60, 1 }
 0x428   :  { %v4487_v14 = vpop.f32.mrf.mxu1 }
 0x429   :  { %4776 = vmatpush.bf16.msra.mxu3 %v6520_v33  ;;  %4789 = vmatpush.bf16.msra.mxu1 %v6744_v34  ;;  %v4513_v17 = vpop.f32.mrf.mxu0  ;;  %v4486_v31 = vadd.f32 %v4485_v49, %v4473_v47  ;;  %v6379_v33 = vld [vmem:[%s11593_s9 + $0x50] sm:$0xf]  ;;  %v7590_v34 = vld [vmem:[%s11593_s9 + $0x68] sm:$0xf0] }
 0x42a   :  { %4802 = vmatpush.bf16.msra.mxu2 %v6968_v37  ;;  %4815 = vmatpush.bf16.msra.mxu0 %v7192_v38  ;;  %v6603_v38 = vld [vmem:[%s11593_s9 + $0x210] sm:$0xf] }
 0x42b   :  { %v6604_v51 = vor.u32 %v7646_v39, %v6603_v38 }
 0x42d   :  { %4777 = vmatpush.bf16.msra.mxu3 %v6492_v16  ;;  %4790 = vmatpush.bf16.msra.mxu1 %v6716_v4  ;;  %v4499_v16 = vadd.f32 %v4498_v10, %v4486_v31  ;;  %v6380_v4 = vor.u32 %v7590_v34, %v6379_v33  ;;  %v3299_v31 = vperm.slane %v11459_v60, 2 }
 0x42e   :  { %4803 = vmatpush.bf16.msra.mxu2 %v6940_v1  ;;  %4816 = vmatpush.bf16.msra.mxu0 %v7164_v26  ;;  %v4474_v37 = vpop.f32.mrf.mxu3  ;;  %v7583_v1 = vld [vmem:[%s11593_s9 + $0x30] sm:$0xf0]  ;;  %v6575_v26 = vld [vmem:[%s11593_s9 + $0x1d8] sm:$0xf] }
 0x42f   :  { %v4500_v18 = vpop.f32.mrf.mxu2  ;;  %v4512_v6 = vadd.f32 %v11439_v50, %v4499_v16  ;;  %v6352_v7 = vor.u32 %v7583_v1, %v6351_v54 }
 0x430   :  { %v4537_v49 = vpop.f32.mrf.mxu1 }
 0x431   :  { %4778 = vmatpush.bf16.msra.mxu3 %v6464_v45  ;;  %4791 = vmatpush.bf16.msra.mxu1 %v6688_v3  ;;  %v4563_v46 = vpop.f32.mrf.mxu0  ;;  %v7023_v45 = vld [vmem:[%s11593_s9 + $0x558] sm:$0xf]  ;;  %v7751_v3 = vld [vmem:[%s11593_s9 + $0x570] sm:$0xf0]  ;;  %v4827_v11 = vmul.f32 0.5, %v4512_v6  ;;  %s7882_s9 = smov [#allocation4]  }
 0x432   :  { %4804 = vmatpush.bf16.msra.mxu2 %v6912_v63  ;;  %4817 = vmatpush.bf16.msra.mxu0 %v7136_v40  ;;  %v6576_v63 = vor.u32 %v7639_v43, %v6575_v26  ;;  %v6800_v40 = vor.u32 %v7695_v29, %v6799_v2  ;;  %v7024_v36 = vor.u32 %v7751_v3, %v7023_v45  ;;  %s4880_s4 = sshll.u32 %s7882_s9, 4  ;;  %s4881_s4 = int_to_ptr.vmem [resolvable:$true] %s4880_s4 }
 0x433   :  { %7812 = vtanh.f32 %v4827_v11  ;;  %4885 = dma.vmem_to_hbm [thread:$0]  %s4881_s4, 128, %s4883_s28, [#allocation5]  }
 0x435   :  { %4779 = vmatpush.bf16.msra.mxu3 %v6436_v15  ;;  %4792 = vmatpush.bf16.msra.mxu1 %v6660_v19 }
 0x436   :  { %4805 = vmatpush.bf16.msra.mxu2 %v6884_v22  ;;  %4818 = vmatpush.bf16.msra.mxu0 %v7108_v23  ;;  %v4524_v25 = vpop.f32.mrf.mxu3 }
 0x437   :  { %v4525_v8 = vadd.f32 %v4524_v25, %v3298_v41  ;;  %v4550_v9 = vpop.f32.mrf.mxu2 }
 0x438   :  { %v4539_v10 = vpop.f32.mrf.mxu1 }
 0x439   :  { %4780 = vmatpush.bf16.msra.mxu3 %v6408_v53  ;;  %4793 = vmatpush.bf16.msra.mxu1 %v6632_v62  ;;  %v4538_v12 = vadd.f32 %v4537_v49, %v4525_v8  ;;  %v4565_v13 = vpop.f32.mrf.mxu0  ;;  %v7813_v21 = vpop.eup %7812 }
 0x43a   :  { %4806 = vmatpush.bf16.msra.mxu2 %v6856_v35  ;;  %4819 = vmatpush.bf16.msra.mxu0 %v7080_v55  ;;  %v4841_v22 = vadd.f32 1.0, %v7813_v21  ;;  %v3300_v55 = vperm.slane %v11459_v60, 3 }
 0x43b   :  { %v4551_v50 = vadd.f32 %v4550_v9, %v4538_v12  ;;  %v3302_v12 = vperm.slane %v11459_v60, 5 }
 0x43c   :  { %v4848_v27 = vmul.f32 0.5, %v4841_v22 }
 0x43d   :  { %4781 = vmatpush.bf16.msra.mxu3 %v6380_v4  ;;  %4794 = vmatpush.bf16.msra.mxu1 %v6604_v51  ;;  %v4564_v14 = vadd.f32 %v4563_v46, %v4551_v50 }
 0x43e   :  { %4807 = vmatpush.bf16.msra.mxu2 %v6828_v57  ;;  %4820 = vmatpush.bf16.msra.mxu0 %v7052_v58  ;;  %v4526_v47 = vpop.f32.mrf.mxu3 }
 0x43f   :  { %v4828_v15 = vmul.f32 0.5, %v4564_v14  ;;  %v4552_v19 = vpop.f32.mrf.mxu2 }
 0x441   :  { %4782 = vmatpush.bf16.msra.mxu3 %v6352_v7  ;;  %4795 = vmatpush.bf16.msra.mxu1 %v6576_v63  ;;  %7814 = vtanh.f32 %v4828_v15  ;;  %v4589_v17 = vpop.f32.mrf.mxu1 }
 0x442   :  { %4808 = vmatpush.bf16.msra.mxu2 %v6800_v40  ;;  %4821 = vmatpush.bf16.msra.mxu0 %v7024_v36  ;;  %v3301_v36 = vperm.slane %v11459_v60, 4 }
 0x444   :  { %4783 = vmatmul.bf16.vlgmr.msra.gmra.mxu3 %v10591_v61  ;;  %4796 = vmatmul.bf16.vlgmr.msra.gmra.mxu1 %v10593_v0  ;;  %v4615_v52 = vpop.f32.mrf.mxu0 }
 0x445   :  { %4809 = vmatmul.bf16.vlgmr.msra.gmra.mxu2 %v10595_v56  ;;  %4822 = vmatmul.bf16.vlgmr.msra.gmra.mxu0 %v10597_v32 }
 0x447   :  { %v7815_v23 = vpop.eup %7814  ;;  %v4576_v59 = vpop.f32.mrf.mxu3 }
 0x448   :  { %v4842_v24 = vadd.f32 1.0, %v7815_v23  ;;  %v4577_v53 = vadd.f32 %v4576_v59, %v3299_v31 }
 0x449   :  { %v4591_v28 = vpop.f32.mrf.mxu1 }
 0x44a   :  { %v4602_v61 = vpop.f32.mrf.mxu2  ;;  %v4849_v0 = vmul.f32 0.5, %v4842_v24  ;;  %v4590_v62 = vadd.f32 %v4589_v17, %v4577_v53  ;;  %v3303_v53 = vperm.slane %v11459_v60, 6 }
 0x44c   :  { %v4617_v5 = vpop.f32.mrf.mxu0  ;;  %v4855_v30 = vpack.c.bf16 %v4849_v0, %v4848_v27  ;;  %v4603_v34 = vadd.f32 %v4602_v61, %v4590_v62 }
 0x44e   :  { %4859 = vst [vmem:[#allocation2] sm:$0xff] %v4855_v30  ;;  %v4616_v37 = vadd.f32 %v4615_v52, %v4603_v34 }
 0x44f   :  { %v4578_v56 = vpop.f32.mrf.mxu3 }
 0x450   :  { %v4829_v44 = vmul.f32 0.5, %v4616_v37 }
 0x452   :  { %v4604_v32 = vpop.f32.mrf.mxu2  ;;  %7816 = vtanh.f32 %v4829_v44 }
 0x458   :  { %v7817_v54 = vpop.eup %7816 }
 0x459   :  { %v4843_v1 = vadd.f32 1.0, %v7817_v54 }
 0x45b   :  { %v4850_v58 = vmul.f32 0.5, %v4843_v1 }
 0x461   :  { %v4641_v33 = vpop.f32.mrf.mxu1 }
 0x464   :  { %v4667_v35 = vpop.f32.mrf.mxu0 }
 0x467   :  { %v4628_v38 = vpop.f32.mrf.mxu3 }
 0x468   :  { %v4629_v39 = vadd.f32 %v4628_v38, %v3300_v55 }
 0x469   :  { %v4643_v18 = vpop.f32.mrf.mxu1 }
 0x46a   :  { %v4654_v42 = vpop.f32.mrf.mxu2  ;;  %v4642_v20 = vadd.f32 %v4641_v33, %v4629_v39 }
 0x46c   :  { %v4669_v48 = vpop.f32.mrf.mxu0  ;;  %v4655_v49 = vadd.f32 %v4654_v42, %v4642_v20 }
 0x46e   :  { %v4668_v16 = vadd.f32 %v4667_v35, %v4655_v49 }
 0x46f   :  { %v4630_v4 = vpop.f32.mrf.mxu3 }
 0x470   :  { %v4830_v51 = vmul.f32 0.5, %v4668_v16 }
 0x472   :  { %v4656_v46 = vpop.f32.mrf.mxu2  ;;  %7818 = vtanh.f32 %v4830_v51 }
 0x478   :  { %v7819_v26 = vpop.eup %7818 }
 0x479   :  { %v4844_v57 = vadd.f32 1.0, %v7819_v26 }
 0x47b   :  { %v4851_v43 = vmul.f32 0.5, %v4844_v57 }
 0x47d   :  { %v4856_v2 = vpack.c.bf16 %v4851_v43, %v4850_v58 }
 0x47f   :  { %4860 = vst [vmem:[#allocation2 + $0x8] sm:$0xff] %v4856_v2 }
 0x481   :  { %v4693_v29 = vpop.f32.mrf.mxu1 }
 0x484   :  { %v4719_v45 = vpop.f32.mrf.mxu0 }
 0x487   :  { %v4680_v3 = vpop.f32.mrf.mxu3 }
 0x488   :  { %v4681_v25 = vadd.f32 %v4680_v3, %v3301_v36 }
 0x489   :  { %v4695_v6 = vpop.f32.mrf.mxu1 }
 0x48a   :  { %v4706_v41 = vpop.f32.mrf.mxu2  ;;  %v4694_v8 = vadd.f32 %v4693_v29, %v4681_v25 }
 0x48c   :  { %v4721_v7 = vpop.f32.mrf.mxu0  ;;  %v4707_v10 = vadd.f32 %v4706_v41, %v4694_v8 }
 0x48e   :  { %v4720_v13 = vadd.f32 %v4719_v45, %v4707_v10 }
 0x48f   :  { %v4682_v63 = vpop.f32.mrf.mxu3 }
 0x490   :  { %v4831_v19 = vmul.f32 0.5, %v4720_v13 }
 0x492   :  { %v4708_v40 = vpop.f32.mrf.mxu2  ;;  %7820 = vtanh.f32 %v4831_v19 }
 0x498   :  { %v7821_v61 = vpop.eup %7820 }
 0x499   :  { %v4845_v27 = vadd.f32 1.0, %v7821_v61 }
 0x49b   :  { %v4852_v5 = vmul.f32 0.5, %v4845_v27 }
 0x4a1   :  { %v4745_v9 = vpop.f32.mrf.mxu1 }
 0x4a4   :  { %v4771_v11 = vpop.f32.mrf.mxu0 }
 0x4a7   :  { %v4732_v50 = vpop.f32.mrf.mxu3 }
 0x4a8   :  { %v4733_v14 = vadd.f32 %v4732_v50, %v3302_v12 }
 0x4a9   :  { %v4747_v15 = vpop.f32.mrf.mxu1 }
 0x4aa   :  { %v4758_v47 = vpop.f32.mrf.mxu2  ;;  %v4746_v17 = vadd.f32 %v4745_v9, %v4733_v14 }
 0x4ac   :  { %v4773_v21 = vpop.f32.mrf.mxu0  ;;  %v4759_v52 = vadd.f32 %v4758_v47, %v4746_v17 }
 0x4ae   :  { %v4772_v22 = vadd.f32 %v4771_v11, %v4759_v52 }
 0x4af   :  { %v4734_v23 = vpop.f32.mrf.mxu3 }
 0x4b0   :  { %v4832_v24 = vmul.f32 0.5, %v4772_v22 }
 0x4b2   :  { %v4760_v59 = vpop.f32.mrf.mxu2  ;;  %7822 = vtanh.f32 %v4832_v24 }
 0x4b8   :  { %v7823_v0 = vpop.eup %7822 }
 0x4b9   :  { %v4846_v28 = vadd.f32 1.0, %v7823_v0 }
 0x4bb   :  { %v4853_v30 = vmul.f32 0.5, %v4846_v28 }
 0x4bd   :  { %v4857_v56 = vpack.c.bf16 %v4853_v30, %v4852_v5 }
 0x4bf   :  { %4861 = vst [vmem:[#allocation2 + $0x10] sm:$0xff] %v4857_v56 }
 0x4c1   :  { %v4797_v32 = vpop.f32.mrf.mxu1 }
 0x4c2   :  { %v4823_v31 = vpop.f32.mrf.mxu0 }
 0x4c7   :  { %v4784_v62 = vpop.f32.mrf.mxu3 }
 0x4c8   :  { %v4785_v33 = vadd.f32 %v4784_v62, %v3303_v53  ;;  %v4810_v34 = vpop.f32.mrf.mxu2 }
 0x4c9   :  { %v4799_v35 = vpop.f32.mrf.mxu1 }
 0x4ca   :  { %v4798_v55 = vadd.f32 %v4797_v32, %v4785_v33  ;;  %v4825_v37 = vpop.f32.mrf.mxu0 }
 0x4cc   :  { %v4811_v38 = vadd.f32 %v4810_v34, %v4798_v55 }
 0x4ce   :  { %v4824_v39 = vadd.f32 %v4823_v31, %v4811_v38 }
 0x4cf   :  { %v4786_v42 = vpop.f32.mrf.mxu3 }
 0x4d0   :  { %v4833_v18 = vmul.f32 0.5, %v4824_v39  ;;  %v4812_v44 = vpop.f32.mrf.mxu2 }
 0x4d2   :  { %7824 = vtanh.f32 %v4833_v18 }
 0x4d8   :  { %v7825_v20 = vpop.eup %7824 }
 0x4d9   :  { %v4847_v48 = vadd.f32 1.0, %v7825_v20 }
 0x4db   :  { %v4854_v60 = vmul.f32 0.5, %v4847_v48 }
 0x4dd   :  { %v4858_v49 = vpack.c.bf16 %v4854_v60, %v4854_v60 }
 0x4df   :  { %4863 = vst.msk [vmem:[#allocation2 + $0x18] sm:$0xf] %vm4862_vm2, %v4858_v49 }
 0x4e0   :  { %4874 = dma.vmem_to_hbm [thread:$0]  %s4870_s29, 448, %s4872_s14, [#allocation3]  }
 0x4e1   :  { %7875 = dma.done.wait [#allocation3], 448  }
 0x4e2   :  { %7876 = vsyncadd [#allocation3], 4294966848 }
 0x4e3   :  { %7877 = dma.done.wait [#allocation5], 128  }
 0x4e4   :  { %7878 = vsyncadd [#allocation5], 4294967168 }
 0x4e5   :  { %4894 = vsyncpa [#allocation3], 1 }
 0x4e6   :  { %4895 = vsyncpa [#allocation5], 1 }

</bundles_post_ra>
